<compile_context>
chip_gen: v7x
topology: tpu7x:2x2x1
jax: 0.10.0
libtpu: 0.0.40
codegen_flags: <defaults>
</compile_context>

<pallas_src>
import math
import functools

import jax
import jax.numpy as jnp
from jax import lax
from jax.experimental import pallas as pl
from jax.experimental.pallas import tpu as pltpu


def _round_up(x, m):
    return -(-x // m) * m


def _vmem_limit_bytes():
    """Per-generation scoped-VMEM limit (leave headroom for the compiler)."""
    cap = 64 * 1024 * 1024
    try:
        info = pltpu.get_tpu_info()
        cap = int(getattr(info, "vmem_capacity_bytes", cap))
    except Exception:
        pass
    return int(min(cap * 3 // 4, 100 * 1024 * 1024))


# ----------------------------------------------------------------------------
# Pointwise (1x1) convolution:  y[b, co, n] = sum_ci w[co, ci] * x[b, ci, n] + bias[co]
# ----------------------------------------------------------------------------

def _pointwise_conv_kernel(x_ref, w_ref, b_ref, o_ref):
    x = x_ref[...].astype(jnp.bfloat16)
    acc = jnp.dot(w_ref[...], x, preferred_element_type=jnp.float32)
    o_ref[...] = (acc + b_ref[...]).astype(o_ref.dtype)


def pointwise_conv(x, w, b, out_dtype):
    """1x1 Conv2d.  x: (B, Cin, F, T); w: (Cout, Cin); b: (Cout,) -> (B, Cout, F, T).

    No host pads / slices: pixel tiles are either the full F*T row (always legal) or
    2048 lanes with a ragged edge block (OOB input garbage only reaches OOB output
    pixels, whose writes are dropped)."""
    B, Cin, F, T = x.shape
    Cout = w.shape[0]
    Np = F * T
    x2 = x.reshape(B, Cin, Np)                       # free reshape
    n_tile = Np if Np <= 2048 else 2048
    grid = (B, -(-Np // n_tile))
    out = pl.pallas_call(
        _pointwise_conv_kernel,
        out_shape=jax.ShapeDtypeStruct((B, Cout, Np), out_dtype),
        grid=grid,
        in_specs=[
            pl.BlockSpec((None, Cin, n_tile), lambda bi, ni: (bi, 0, ni)),
            pl.BlockSpec((Cout, Cin), lambda bi, ni: (0, 0)),
            pl.BlockSpec((Cout, 1), lambda bi, ni: (0, 0)),
        ],
        out_specs=pl.BlockSpec((None, Cout, n_tile), lambda bi, ni: (bi, 0, ni)),
        compiler_params=pltpu.CompilerParams(
            dimension_semantics=("parallel", "parallel"),
            vmem_limit_bytes=_vmem_limit_bytes()),
    )(x2, w.astype(jnp.bfloat16), b.reshape(Cout, 1).astype(jnp.float32))
    return out.reshape(B, Cout, F, T)


# ----------------------------------------------------------------------------
# Banded multi-head attention over time (single fused pallas_call, KV carried in VMEM)
# ----------------------------------------------------------------------------

def _banded_attn_kernel(q_ref, k_ref, v_ref, o_ref,
                        kcur_ref, vcur_ref, ktail_ref, vtail_ref,
                        *, n_heads, k_ch, f_rows, q_tile, lp, rp, t_real, nq):
    # Input blocks: (H, Dk, Fr, Tq) bf16 (T on lanes).  Scratch: (H*Fr, Dk, Tq) bf16.
    H, Dk, Fr, Tq = n_heads, k_ch, f_rows, q_tile
    g = H * Fr
    j = pl.program_id(2)

    def to_g(a):
        # (H, Dk, Fr, T) -> (H*Fr, Dk, T): the lane (time) axis is untouched, so this is
        # a cheap VMEM-local sublane relayout (no HBM traffic).
        return jnp.transpose(a, (0, 2, 1, 3)).reshape(g, Dk, Tq)

    # --- arrival processing of the freshly fetched KV block (every step) ----------
    k_new = to_g(k_ref[...])
    v_new = to_g(v_ref[...])
    # Zero key columns beyond the real sequence so `0 * garbage` from a ragged edge
    # block can never poison the PV matmul (K garbage only reaches masked scores).
    fetch_base = jnp.minimum(j, nq - 1) * q_tile
    col3 = lax.broadcasted_iota(jnp.int32, (1, 1, Tq), 2)
    v_new = jnp.where(fetch_base + col3 < t_real, v_new, 0.0).astype(jnp.bfloat16)

    k_cur = kcur_ref[...]
    v_cur = vcur_ref[...]

    # --- compute the previous query chunk (jq = j - 1) -----------------------------
    @pl.when(j > 0)
    def _():
        jq = j - 1
        cur_base = jq * q_tile
        q_g = to_g(q_ref[...])

        # Halo window = last lp keys of block jq-1 (explicit zero keys at the start,
        # matching the PyTorch zero left-padding) followed by the head of block jq+1.
        if lp > 0:
            left_k = jnp.where(j >= 2, ktail_ref[...], 0.0).astype(jnp.bfloat16)
            left_v = jnp.where(j >= 2, vtail_ref[...], 0.0).astype(jnp.bfloat16)
            k_halo = jnp.concatenate([left_k[..., Tq - lp:], k_new[..., :Tq - lp]], axis=-1)
            v_halo = jnp.concatenate([left_v[..., Tq - lp:], v_new[..., :Tq - lp]], axis=-1)
        else:
            k_halo, v_halo = k_new, v_new

        # Scores (1/sqrt(Dk) is folded into the Q projection weights).  The contraction
        # runs over the sublane (Dk) axis of both bf16 operands (trans-A on the MXU), so
        # there is no per-step minor-dim transpose / dtype-cast pass over Q.
        dn_qk = (((1,), (1,)), ((0,), (0,)))
        s_c = lax.dot_general(q_g, k_cur, dn_qk, preferred_element_type=jnp.float32)
        s_h = lax.dot_general(q_g, k_halo, dn_qk, preferred_element_type=jnp.float32)

        # Band mask generated in-kernel from iotas (no mask DMA), in real coordinates.
        qq = lax.broadcasted_iota(jnp.int32, (Tq, Tq), 0)
        kk = lax.broadcasted_iota(jnp.int32, (Tq, Tq), 1)
        qa = cur_base + qq                                            # query position
        r_c = cur_base + kk                                           # current-window key
        r_h = cur_base - lp + kk + jnp.where(kk >= lp, q_tile, 0)     # halo key (may be <0)
        valid_c = (r_c >= qa - lp) & (r_c <= qa + rp) & (r_c < t_real)
        valid_h = (r_h >= qa - lp) & (r_h <= qa + rp) & (r_h < t_real)
        s_c = jnp.where(valid_c[None], s_c, -10000.0)
        s_h = jnp.where(valid_h[None], s_h, -10000.0)

        m = jnp.maximum(jnp.max(s_c, axis=-1, keepdims=True),
                        jnp.max(s_h, axis=-1, keepdims=True))
        e_c = jnp.exp(s_c - m)
        e_h = jnp.exp(s_h - m)
        denom = (jnp.sum(e_c, axis=-1, keepdims=True)
                 + jnp.sum(e_h, axis=-1, keepdims=True))
        inv = pl.reciprocal(denom, approx=True)          # EUP slot instead of VALU divide
        p_c = (e_c * inv).astype(jnp.bfloat16)
        p_h = (e_h * inv).astype(jnp.bfloat16)

        # PV product written directly in (Dk, Tq) order -> lane-dense output stores.
        dn_pv = (((2,), (2,)), ((0,), (0,)))
        o = (lax.dot_general(v_cur, p_c, dn_pv, preferred_element_type=jnp.float32)
             + lax.dot_general(v_halo, p_h, dn_pv, preferred_element_type=jnp.float32))
        o = jnp.transpose(o.reshape(H, Fr, Dk, Tq), (0, 2, 1, 3))
        o_ref[...] = o.astype(o_ref.dtype)

    # --- rotate the KV carry: every KV block is DMA'd from HBM exactly once --------
    ktail_ref[...] = k_cur
    vtail_ref[...] = v_cur
    kcur_ref[...] = k_new
    vcur_ref[...] = v_new


def banded_attention(qkv, *, n_heads, k_ch, lp, rp, f_rows, q_tile):
    """qkv: (B, 3, H, Dk, F, T) bf16 (free-reshaped 1x1-conv output, unpadded).

    Returns (B, H, Dk, F, T) bf16 (channel-first, directly consumable by conv_o)."""
    B, three, H, Dk, F, T = qkv.shape
    assert three == 3 and H == n_heads and Dk == k_ch
    nq = -(-T // q_tile)
    n_ftiles = -(-F // f_rows)
    grid = (B, n_ftiles, nq + 1)          # one extra priming step per (b, f-tile) row
    g = H * f_rows
    blk_in = (None, None, H, Dk, f_rows, q_tile)
    kernel = functools.partial(
        _banded_attn_kernel, n_heads=H, k_ch=Dk, f_rows=f_rows, q_tile=q_tile,
        lp=lp, rp=rp, t_real=T, nq=nq)
    return pl.pallas_call(
        kernel,
        out_shape=jax.ShapeDtypeStruct((B, H, Dk, F, T), jnp.bfloat16),
        grid=grid,
        in_specs=[
            # q: block jq = j-1 (chunk computed one step behind the KV fetch)
            pl.BlockSpec(blk_in, lambda b, fi, j: (b, 0, 0, 0, fi, jnp.maximum(j - 1, 0))),
            # k / v: fetch block j (clamped at the last block; the clamp is masked out)
            pl.BlockSpec(blk_in, lambda b, fi, j: (b, 1, 0, 0, fi, jnp.minimum(j, nq - 1))),
            pl.BlockSpec(blk_in, lambda b, fi, j: (b, 2, 0, 0, fi, jnp.minimum(j, nq - 1))),
        ],
        out_specs=pl.BlockSpec((None, H, Dk, f_rows, q_tile),
                               lambda b, fi, j: (b, 0, 0, fi, jnp.maximum(j - 1, 0))),
        scratch_shapes=[pltpu.VMEM((g, Dk, q_tile), jnp.bfloat16) for _ in range(4)],
        compiler_params=pltpu.CompilerParams(
            dimension_semantics=("parallel", "parallel", "arbitrary"),
            vmem_limit_bytes=_vmem_limit_bytes()),
    )(qkv, qkv, qkv)


def _choose_f_rows(B, F, H, Dk, q_tile, budget_bytes):
    """Largest legal (divisor-of-F, multiple-of-8 or == F) row batch fitting the budget,
    counting the live f32 score/exp/probability temporaries, with a megacore nudge."""
    def est(fr):
        g = H * fr
        blk = g * Dk * q_tile * 2                       # one bf16 block
        io = 8 * blk + 4 * blk                          # double-buffered q/k/v/out + carries
        tmp = (4 * g * q_tile * q_tile * 4              # s_c, s_h, e_c, e_h (f32)
               + 2 * g * q_tile * q_tile * 2            # p_c, p_h (bf16)
               + g * Dk * q_tile * 4                    # f32 accumulator
               + 4 * blk)                               # transposed q / halo copies
        return io + tmp

    cands = sorted({d for d in range(1, F + 1) if F % d == 0 and (d == F or d % 8 == 0)})
    fr = cands[0]
    for c in cands:
        if est(c) <= budget_bytes:
            fr = c
    # keep both v7x TensorCores busy if the parallel grid would otherwise collapse to 1
    if B * (-(-F // fr)) < 2:
        smaller = [c for c in cands if c < fr]
        if smaller:
            fr = smaller[-1]
    return fr


# ----------------------------------------------------------------------------
# MHA forward (matches the PyTorch module with state_old=None)
# ----------------------------------------------------------------------------

def mha_forward(x, params, attn_range, n_heads, attn_unroll=128):
    B, C, F, T = x.shape
    assert C % n_heads == 0
    Dk = C // n_heads
    lp, rp = int(attn_range[0]), int(attn_range[1])
    span = lp + rp
    del attn_unroll  # chunking is result-invariant; we pick a lane-aligned chunk below

    # Fold the 1/sqrt(Dk) score scale into the Q rows of the QKV projection.
    scale = 1.0 / math.sqrt(Dk)
    qkv_w = params['qkv_w'].at[:C].multiply(scale)
    qkv_b = params['qkv_b'].at[:C].multiply(scale)

    qkv = pointwise_conv(x, qkv_w, qkv_b, out_dtype=jnp.bfloat16)      # (B, 3C, F, T)
    qkv = qkv.reshape(B, 3, n_heads, Dk, F, T)                         # free reshape

    # Query-chunk width: full T when it fits one lane tile, else 128-aligned chunks.
    if T <= 128:
        q_tile = T
    else:
        q_tile = max(128, _round_up(span, 128))
    nq = -(-T // q_tile)
    if nq > 1:
        assert span <= q_tile, "attention span must fit in one chunk-sized window"
    assert lp <= q_tile, "left context must fit in one chunk-sized window"

    budget = _vmem_limit_bytes() // 2
    f_rows = _choose_f_rows(B, F, n_heads, Dk, q_tile, budget)

    o = banded_attention(qkv, n_heads=n_heads, k_ch=Dk, lp=lp, rp=rp,
                         f_rows=f_rows, q_tile=q_tile)                 # (B, H, Dk, F, T)
    o = o.reshape(B, C, F, T)                                          # free reshape

    out = pointwise_conv(o, params['o_w'], params['o_b'], out_dtype=jnp.float32)
    # TODO(synk): States / state_old streaming carry (second return value) not implemented.
    return out


# ----------------------------------------------------------------------------
# Deterministic synthetic parameters
# ----------------------------------------------------------------------------

def init_params(key, channels, out_channels):
    k1, k2, k3, k4 = jax.random.split(key, 4)

    def nrm(kk, shape, s=0.1):
        return s * jax.random.normal(kk, shape, dtype=jnp.float32)

    return dict(
        qkv_w=nrm(k1, (3 * channels, channels)),
        qkv_b=nrm(k2, (3 * channels,)),
        o_w=nrm(k3, (out_channels, channels)),
        o_b=nrm(k4, (out_channels,)),
    )


# ----------------------------------------------------------------------------
if __name__ == "__main__":
    B, C, F, T = 2, 32, 8, 16
    n_heads = 4
    out_channels = 32
    attn_range = (2, 2)        # (left, right) time context

    key = jax.random.PRNGKey(0)
    kx, kp = jax.random.split(key)
    x = jax.random.normal(kx, (B, C, F, T), dtype=jnp.float32)
    params = init_params(kp, C, out_channels)

    fwd = jax.jit(functools.partial(mha_forward, attn_range=attn_range,
                                    n_heads=n_heads, attn_unroll=128))
    y = jax.block_until_ready(fwd(x, params))

    assert y.shape == (B, out_channels, F, T), y.shape
    assert bool(jnp.all(jnp.isfinite(y)))
    print("KERNEL_OK")
</pallas_src>

<mosaic_0001>
module attributes {stable_mosaic.version = 11 : i64} {
  func.func @_pointwise_conv_kernel(%arg0: i32, %arg1: i32, %arg2: memref<1x32x128xf32, #tpu.memory_space<vmem>>, %arg3: memref<96x32xbf16, #tpu.memory_space<vmem>>, %arg4: memref<96x1xf32, #tpu.memory_space<vmem>>, %arg5: memref<1x96x128xbf16, #tpu.memory_space<vmem>>) attributes {dimension_semantics = [#tpu.dimension_semantics<parallel>, #tpu.dimension_semantics<parallel>], iteration_bounds = array<i64: 2, 1>, scalar_prefetch = 0 : i64, scratch_operands = 0 : i64, tpu.core_type = #tpu.core_type<tc>, window_params = [{transform_indices = @transform_0, window_bounds = array<i64: 1, 32, 128>}, {pipeline_mode = #tpu.pipeline_mode<synchronous>, transform_indices = @transform_1, window_bounds = array<i64: 96, 32>}, {pipeline_mode = #tpu.pipeline_mode<synchronous>, transform_indices = @transform_2, window_bounds = array<i64: 96, 1>}, {transform_indices = @transform_3, window_bounds = array<i64: 1, 96, 128>}]} {
    %c0 = arith.constant 0 : index
    %c0_0 = arith.constant 0 : index
    %c0_1 = arith.constant 0 : index
    %0 = vector.load %arg2[%c0, %c0_0, %c0_1] : memref<1x32x128xf32, #tpu.memory_space<vmem>>, vector<1x32x128xf32>
    %1 = vector.shape_cast %0 : vector<1x32x128xf32> to vector<32x128xf32>
    %2 = arith.truncf %1 : vector<32x128xf32> to vector<32x128xbf16>
    %c0_2 = arith.constant 0 : index
    %c0_3 = arith.constant 0 : index
    %3 = vector.load %arg3[%c0_2, %c0_3] : memref<96x32xbf16, #tpu.memory_space<vmem>>, vector<96x32xbf16>
    %cst = arith.constant dense<0.000000e+00> : vector<96x128xf32>
    %4 = tpu.matmul %3, %2, %cst {dimension_numbers = #tpu.dot_dimension_numbers<[1], [0], [0], [1], [0, 0, 1, 1], [], []>} : vector<96x32xbf16>, vector<32x128xbf16>, vector<96x128xf32> -> vector<96x128xf32>
    %c0_4 = arith.constant 0 : index
    %c0_5 = arith.constant 0 : index
    %5 = vector.load %arg4[%c0_4, %c0_5] : memref<96x1xf32, #tpu.memory_space<vmem>>, vector<96x1xf32>
    %6 = vector.broadcast %5 : vector<96x1xf32> to vector<96x128xf32>
    %7 = arith.addf %4, %6 : vector<96x128xf32>
    %8 = arith.truncf %7 : vector<96x128xf32> to vector<96x128xbf16>
    %c0_6 = arith.constant 0 : index
    %c0_7 = arith.constant 0 : index
    %c0_8 = arith.constant 0 : index
    %9 = vector.load %arg5[%c0_6, %c0_7, %c0_8] : memref<1x96x128xbf16, #tpu.memory_space<vmem>>, vector<1x96x128xbf16>
    %10 = vector.shape_cast %9 : vector<1x96x128xbf16> to vector<96x128xbf16>
    %11 = vector.shape_cast %8 : vector<96x128xbf16> to vector<1x96x128xbf16>
    tpu.vector_store %arg5[%c0_6, %c0_7, %c0_8], %11 {strides = array<i32>} : memref<1x96x128xbf16, #tpu.memory_space<vmem>>, vector<1x96x128xbf16>,
    return
  }
  func.func @transform_0(%arg0: i32, %arg1: i32) -> (i32, i32, i32) {
    %c0_i32 = arith.constant 0 : i32
    %c0_i32_0 = arith.constant 0 : i32
    return %arg0, %c0_i32, %arg1 : i32, i32, i32
  }
  func.func @transform_1(%arg0: i32, %arg1: i32) -> (i32, i32) {
    %c0_i32 = arith.constant 0 : i32
    %c0_i32_0 = arith.constant 0 : i32
    %c0_i32_1 = arith.constant 0 : i32
    return %c0_i32, %c0_i32_0 : i32, i32
  }
  func.func @transform_2(%arg0: i32, %arg1: i32) -> (i32, i32) {
    %c0_i32 = arith.constant 0 : i32
    %c0_i32_0 = arith.constant 0 : i32
    %c0_i32_1 = arith.constant 0 : i32
    return %c0_i32, %c0_i32_0 : i32, i32
  }
  func.func @transform_3(%arg0: i32, %arg1: i32) -> (i32, i32, i32) {
    %c0_i32 = arith.constant 0 : i32
    %c0_i32_0 = arith.constant 0 : i32
    return %arg0, %c0_i32, %arg1 : i32, i32, i32
  }
}

module attributes {stable_mosaic.version = 11 : i64} {
  func.func @_banded_attn_kernel(%arg0: i32, %arg1: i32, %arg2: i32, %arg3: memref<1x1x4x8x8x16xbf16, #tpu.memory_space<vmem>>, %arg4: memref<1x1x4x8x8x16xbf16, #tpu.memory_space<vmem>>, %arg5: memref<1x1x4x8x8x16xbf16, #tpu.memory_space<vmem>>, %arg6: memref<1x4x8x8x16xbf16, #tpu.memory_space<vmem>>, %arg7: memref<32x8x16xbf16, #tpu.memory_space<vmem>>, %arg8: memref<32x8x16xbf16, #tpu.memory_space<vmem>>, %arg9: memref<32x8x16xbf16, #tpu.memory_space<vmem>>, %arg10: memref<32x8x16xbf16, #tpu.memory_space<vmem>>) attributes {dimension_semantics = [#tpu.dimension_semantics<parallel>, #tpu.dimension_semantics<parallel>, #tpu.dimension_semantics<arbitrary>], iteration_bounds = array<i64: 2, 1, 2>, scalar_prefetch = 0 : i64, scratch_operands = 4 : i64, tpu.core_type = #tpu.core_type<tc>, window_params = [{transform_indices = @transform_0, window_bounds = array<i64: 1, 1, 4, 8, 8, 16>}, {transform_indices = @transform_1, window_bounds = array<i64: 1, 1, 4, 8, 8, 16>}, {transform_indices = @transform_2, window_bounds = array<i64: 1, 1, 4, 8, 8, 16>}, {transform_indices = @transform_3, window_bounds = array<i64: 1, 4, 8, 8, 16>}]} {
    %c0 = arith.constant 0 : index
    %c0_0 = arith.constant 0 : index
    %c0_1 = arith.constant 0 : index
    %c0_2 = arith.constant 0 : index
    %c0_3 = arith.constant 0 : index
    %c0_4 = arith.constant 0 : index
    %0 = vector.load %arg4[%c0, %c0_0, %c0_1, %c0_2, %c0_3, %c0_4] : memref<1x1x4x8x8x16xbf16, #tpu.memory_space<vmem>>, vector<1x1x4x8x8x16xbf16>
    %1 = vector.shape_cast %0 : vector<1x1x4x8x8x16xbf16> to vector<4x8x8x16xbf16>
    %2 = tpu.transpose %1, [0, 2, 1, 3] : vector<4x8x8x16xbf16> -> vector<4x8x8x16xbf16>
    %3 = vector.shape_cast %2 : vector<4x8x8x16xbf16> to vector<32x8x16xbf16>
    %c0_5 = arith.constant 0 : index
    %c0_6 = arith.constant 0 : index
    %c0_7 = arith.constant 0 : index
    %c0_8 = arith.constant 0 : index
    %c0_9 = arith.constant 0 : index
    %c0_10 = arith.constant 0 : index
    %4 = vector.load %arg5[%c0_5, %c0_6, %c0_7, %c0_8, %c0_9, %c0_10] : memref<1x1x4x8x8x16xbf16, #tpu.memory_space<vmem>>, vector<1x1x4x8x8x16xbf16>
    %5 = vector.shape_cast %4 : vector<1x1x4x8x8x16xbf16> to vector<4x8x8x16xbf16>
    %6 = tpu.transpose %5, [0, 2, 1, 3] : vector<4x8x8x16xbf16> -> vector<4x8x8x16xbf16>
    %7 = vector.shape_cast %6 : vector<4x8x8x16xbf16> to vector<32x8x16xbf16>
    %c0_i32 = arith.constant 0 : i32
    %8 = arith.minsi %arg2, %c0_i32 : i32
    %c16_i32 = arith.constant 16 : i32
    %9 = arith.muli %8, %c16_i32 : i32
    %10 = tpu.iota {dimensions = array<i32: 2>} : vector<1x1x16xi32>
    %11 = vector.broadcast %9 : i32 to vector<1x1x16xi32>
    %12 = arith.addi %11, %10 : vector<1x1x16xi32>
    %c16_i32_11 = arith.constant 16 : i32
    %13 = vector.broadcast %c16_i32_11 : i32 to vector<1x1x16xi32>
    %14 = arith.cmpi slt, %12, %13 : vector<1x1x16xi32>
    %cst = arith.constant 0.000000e+00 : f32
    %15 = arith.truncf %cst : f32 to bf16
    %16 = vector.shape_cast %14 : vector<1x1x16xi1> to vector<1x1x16xi1>
    %17 = vector.broadcast %16 : vector<1x1x16xi1> to vector<32x8x16xi1>
    %18 = vector.broadcast %15 : bf16 to vector<32x8x16xbf16>
    %19 = arith.select %17, %7, %18 : vector<32x8x16xi1>, vector<32x8x16xbf16>
    %c0_12 = arith.constant 0 : index
    %c0_13 = arith.constant 0 : index
    %c0_14 = arith.constant 0 : index
    %20 = vector.load %arg7[%c0_12, %c0_13, %c0_14] : memref<32x8x16xbf16, #tpu.memory_space<vmem>>, vector<32x8x16xbf16>
    %c0_15 = arith.constant 0 : index
    %c0_16 = arith.constant 0 : index
    %c0_17 = arith.constant 0 : index
    %21 = vector.load %arg8[%c0_15, %c0_16, %c0_17] : memref<32x8x16xbf16, #tpu.memory_space<vmem>>, vector<32x8x16xbf16>
    %c0_i32_18 = arith.constant 0 : i32
    %22 = arith.cmpi sgt, %arg2, %c0_i32_18 : i32
    %23 = arith.extui %22 : i1 to i32
    %c0_i32_19 = arith.constant 0 : i32
    %24 = arith.cmpi ne, %23, %c0_i32_19 : i32
    scf.if %24 {
      %c1_i32 = arith.constant 1 : i32
      %29 = arith.subi %arg2, %c1_i32 : i32
      %c16_i32_32 = arith.constant 16 : i32
      %30 = arith.muli %29, %c16_i32_32 : i32
      %c0_33 = arith.constant 0 : index
      %c0_34 = arith.constant 0 : index
      %c0_35 = arith.constant 0 : index
      %c0_36 = arith.constant 0 : index
      %c0_37 = arith.constant 0 : index
      %c0_38 = arith.constant 0 : index
      %31 = vector.load %arg3[%c0_33, %c0_34, %c0_35, %c0_36, %c0_37, %c0_38] : memref<1x1x4x8x8x16xbf16, #tpu.memory_space<vmem>>, vector<1x1x4x8x8x16xbf16>
      %32 = vector.shape_cast %31 : vector<1x1x4x8x8x16xbf16> to vector<4x8x8x16xbf16>
      %33 = tpu.transpose %32, [0, 2, 1, 3] : vector<4x8x8x16xbf16> -> vector<4x8x8x16xbf16>
      %34 = vector.shape_cast %33 : vector<4x8x8x16xbf16> to vector<32x8x16xbf16>
      %c2_i32 = arith.constant 2 : i32
      %35 = arith.cmpi sge, %arg2, %c2_i32 : i32
      %c0_39 = arith.constant 0 : index
      %c0_40 = arith.constant 0 : index
      %c0_41 = arith.constant 0 : index
      %36 = vector.load %arg9[%c0_39, %c0_40, %c0_41] : memref<32x8x16xbf16, #tpu.memory_space<vmem>>, vector<32x8x16xbf16>
      %cst_42 = arith.constant 0.000000e+00 : f32
      %37 = arith.truncf %cst_42 : f32 to bf16
      %38 = vector.broadcast %37 : bf16 to vector<32x8x16xbf16>
      %39 = arith.select %35, %36, %38 : vector<32x8x16xbf16>
      %c2_i32_43 = arith.constant 2 : i32
      %40 = arith.cmpi sge, %arg2, %c2_i32_43 : i32
      %c0_44 = arith.constant 0 : index
      %c0_45 = arith.constant 0 : index
      %c0_46 = arith.constant 0 : index
      %41 = vector.load %arg10[%c0_44, %c0_45, %c0_46] : memref<32x8x16xbf16, #tpu.memory_space<vmem>>, vector<32x8x16xbf16>
      %cst_47 = arith.constant 0.000000e+00 : f32
      %42 = arith.truncf %cst_47 : f32 to bf16
      %43 = vector.broadcast %42 : bf16 to vector<32x8x16xbf16>
      %44 = arith.select %40, %41, %43 : vector<32x8x16xbf16>
      %45 = vector.extract_strided_slice %39 {offsets = [0, 0, 14], sizes = [32, 8, 2], strides = [1, 1, 1]} : vector<32x8x16xbf16> to vector<32x8x2xbf16>
      %46 = vector.extract_strided_slice %3 {offsets = [0, 0, 0], sizes = [32, 8, 14], strides = [1, 1, 1]} : vector<32x8x16xbf16> to vector<32x8x14xbf16>
      %47 = tpu.concatenate %45, %46 in 2 : vector<32x8x2xbf16>, vector<32x8x14xbf16> -> vector<32x8x16xbf16>
      %48 = vector.extract_strided_slice %44 {offsets = [0, 0, 14], sizes = [32, 8, 2], strides = [1, 1, 1]} : vector<32x8x16xbf16> to vector<32x8x2xbf16>
      %49 = vector.extract_strided_slice %19 {offsets = [0, 0, 0], sizes = [32, 8, 14], strides = [1, 1, 1]} : vector<32x8x16xbf16> to vector<32x8x14xbf16>
      %50 = tpu.concatenate %48, %49 in 2 : vector<32x8x2xbf16>, vector<32x8x14xbf16> -> vector<32x8x16xbf16>
      %cst_48 = arith.constant dense<0.000000e+00> : vector<32x16x16xf32>
      %51 = tpu.matmul %34, %20, %cst_48 {dimension_numbers = #tpu.dot_dimension_numbers<[1], [1], [2], [2], [0, 0, 0, 2, 1, 2], [0], [0]>} : vector<32x8x16xbf16>, vector<32x8x16xbf16>, vector<32x16x16xf32> -> vector<32x16x16xf32>
      %cst_49 = arith.constant dense<0.000000e+00> : vector<32x16x16xf32>
      %52 = tpu.matmul %34, %47, %cst_49 {dimension_numbers = #tpu.dot_dimension_numbers<[1], [1], [2], [2], [0, 0, 0, 2, 1, 2], [0], [0]>} : vector<32x8x16xbf16>, vector<32x8x16xbf16>, vector<32x16x16xf32> -> vector<32x16x16xf32>
      %53 = tpu.iota {dimensions = array<i32: 0>} : vector<16x16xi32>
      %54 = tpu.iota {dimensions = array<i32: 1>} : vector<16x16xi32>
      %55 = vector.broadcast %30 : i32 to vector<16x16xi32>
      %56 = arith.addi %55, %53 : vector<16x16xi32>
      %57 = vector.broadcast %30 : i32 to vector<16x16xi32>
      %58 = arith.addi %57, %54 : vector<16x16xi32>
      %c2_i32_50 = arith.constant 2 : i32
      %59 = arith.subi %30, %c2_i32_50 : i32
      %60 = vector.broadcast %59 : i32 to vector<16x16xi32>
      %61 = arith.addi %60, %54 : vector<16x16xi32>
      %c2_i32_51 = arith.constant 2 : i32
      %62 = vector.broadcast %c2_i32_51 : i32 to vector<16x16xi32>
      %63 = arith.cmpi sge, %54, %62 : vector<16x16xi32>
      %c16_i32_52 = arith.constant 16 : i32
      %c0_i32_53 = arith.constant 0 : i32
      %64 = vector.broadcast %c16_i32_52 : i32 to vector<16x16xi32>
      %65 = vector.broadcast %c0_i32_53 : i32 to vector<16x16xi32>
      %66 = arith.select %63, %64, %65 : vector<16x16xi1>, vector<16x16xi32>
      %67 = arith.addi %61, %66 : vector<16x16xi32>
      %c2_i32_54 = arith.constant 2 : i32
      %68 = vector.broadcast %c2_i32_54 : i32 to vector<16x16xi32>
      %69 = arith.subi %56, %68 : vector<16x16xi32>
      %70 = arith.cmpi sge, %58, %69 : vector<16x16xi32>
      %c2_i32_55 = arith.constant 2 : i32
      %71 = vector.broadcast %c2_i32_55 : i32 to vector<16x16xi32>
      %72 = arith.addi %56, %71 : vector<16x16xi32>
      %73 = arith.cmpi sle, %58, %72 : vector<16x16xi32>
      %74 = arith.andi %70, %73 : vector<16x16xi1>
      %c16_i32_56 = arith.constant 16 : i32
      %75 = vector.broadcast %c16_i32_56 : i32 to vector<16x16xi32>
      %76 = arith.cmpi slt, %58, %75 : vector<16x16xi32>
      %77 = arith.andi %74, %76 : vector<16x16xi1>
      %c2_i32_57 = arith.constant 2 : i32
      %78 = vector.broadcast %c2_i32_57 : i32 to vector<16x16xi32>
      %79 = arith.subi %56, %78 : vector<16x16xi32>
      %80 = arith.cmpi sge, %67, %79 : vector<16x16xi32>
      %c2_i32_58 = arith.constant 2 : i32
      %81 = vector.broadcast %c2_i32_58 : i32 to vector<16x16xi32>
      %82 = arith.addi %56, %81 : vector<16x16xi32>
      %83 = arith.cmpi sle, %67, %82 : vector<16x16xi32>
      %84 = arith.andi %80, %83 : vector<16x16xi1>
      %c16_i32_59 = arith.constant 16 : i32
      %85 = vector.broadcast %c16_i32_59 : i32 to vector<16x16xi32>
      %86 = arith.cmpi slt, %67, %85 : vector<16x16xi32>
      %87 = arith.andi %84, %86 : vector<16x16xi1>
      %88 = vector.shape_cast %77 : vector<16x16xi1> to vector<1x16x16xi1>
      %cst_60 = arith.constant -1.000000e+04 : f32
      %89 = vector.shape_cast %88 : vector<1x16x16xi1> to vector<1x16x16xi1>
      %90 = vector.broadcast %89 : vector<1x16x16xi1> to vector<32x16x16xi1>
      %91 = vector.broadcast %cst_60 : f32 to vector<32x16x16xf32>
      %92 = arith.select %90, %51, %91 : vector<32x16x16xi1>, vector<32x16x16xf32>
      %93 = vector.shape_cast %87 : vector<16x16xi1> to vector<1x16x16xi1>
      %cst_61 = arith.constant -1.000000e+04 : f32
      %94 = vector.shape_cast %93 : vector<1x16x16xi1> to vector<1x16x16xi1>
      %95 = vector.broadcast %94 : vector<1x16x16xi1> to vector<32x16x16xi1>
      %96 = vector.broadcast %cst_61 : f32 to vector<32x16x16xf32>
      %97 = arith.select %95, %52, %96 : vector<32x16x16xi1>, vector<32x16x16xf32>
      %cst_62 = arith.constant dense<0xFF800000> : vector<32x16xf32>
      %98 = vector.multi_reduction <maximumf>, %92, %cst_62 [2] : vector<32x16x16xf32> to vector<32x16xf32>
      %99 = vector.shape_cast %98 : vector<32x16xf32> to vector<32x16x1xf32>
      %cst_63 = arith.constant dense<0xFF800000> : vector<32x16xf32>
      %100 = vector.multi_reduction <maximumf>, %97, %cst_63 [2] : vector<32x16x16xf32> to vector<32x16xf32>
      %101 = vector.shape_cast %100 : vector<32x16xf32> to vector<32x16x1xf32>
      %102 = arith.maximumf %99, %101 : vector<32x16x1xf32>
      %103 = vector.broadcast %102 : vector<32x16x1xf32> to vector<32x16x16xf32>
      %104 = arith.subf %92, %103 : vector<32x16x16xf32>
      %105 = math.exp %104 : vector<32x16x16xf32>
      %106 = vector.broadcast %102 : vector<32x16x1xf32> to vector<32x16x16xf32>
      %107 = arith.subf %97, %106 : vector<32x16x16xf32>
      %108 = math.exp %107 : vector<32x16x16xf32>
      %cst_64 = arith.constant dense<0.000000e+00> : vector<32x16xf32>
      %109 = vector.multi_reduction <add>, %105, %cst_64 [2] : vector<32x16x16xf32> to vector<32x16xf32>
      %110 = vector.shape_cast %109 : vector<32x16xf32> to vector<32x16x1xf32>
      %cst_65 = arith.constant dense<0.000000e+00> : vector<32x16xf32>
      %111 = vector.multi_reduction <add>, %108, %cst_65 [2] : vector<32x16x16xf32> to vector<32x16xf32>
      %112 = vector.shape_cast %111 : vector<32x16xf32> to vector<32x16x1xf32>
      %113 = arith.addf %110, %112 : vector<32x16x1xf32>
      %114 = tpu.reciprocal %113 {approx = true} : vector<32x16x1xf32> -> vector<32x16x1xf32>
      %115 = vector.broadcast %114 : vector<32x16x1xf32> to vector<32x16x16xf32>
      %116 = arith.mulf %105, %115 : vector<32x16x16xf32>
      %117 = arith.truncf %116 : vector<32x16x16xf32> to vector<32x16x16xbf16>
      %118 = vector.broadcast %114 : vector<32x16x1xf32> to vector<32x16x16xf32>
      %119 = arith.mulf %108, %118 : vector<32x16x16xf32>
      %120 = arith.truncf %119 : vector<32x16x16xf32> to vector<32x16x16xbf16>
      %cst_66 = arith.constant dense<0.000000e+00> : vector<32x8x16xf32>
      %121 = tpu.matmul %21, %117, %cst_66 {dimension_numbers = #tpu.dot_dimension_numbers<[2], [2], [1], [1], [0, 0, 0, 1, 1, 1], [0], [0]>} : vector<32x8x16xbf16>, vector<32x16x16xbf16>, vector<32x8x16xf32> -> vector<32x8x16xf32>
      %cst_67 = arith.constant dense<0.000000e+00> : vector<32x8x16xf32>
      %122 = tpu.matmul %50, %120, %cst_67 {dimension_numbers = #tpu.dot_dimension_numbers<[2], [2], [1], [1], [0, 0, 0, 1, 1, 1], [0], [0]>} : vector<32x8x16xbf16>, vector<32x16x16xbf16>, vector<32x8x16xf32> -> vector<32x8x16xf32>
      %123 = arith.addf %121, %122 : vector<32x8x16xf32>
      %124 = vector.shape_cast %123 : vector<32x8x16xf32> to vector<4x8x8x16xf32>
      %125 = tpu.transpose %124, [0, 2, 1, 3] : vector<4x8x8x16xf32> -> vector<4x8x8x16xf32>
      %126 = arith.truncf %125 : vector<4x8x8x16xf32> to vector<4x8x8x16xbf16>
      %c0_68 = arith.constant 0 : index
      %c0_69 = arith.constant 0 : index
      %c0_70 = arith.constant 0 : index
      %c0_71 = arith.constant 0 : index
      %c0_72 = arith.constant 0 : index
      %127 = vector.load %arg6[%c0_68, %c0_69, %c0_70, %c0_71, %c0_72] : memref<1x4x8x8x16xbf16, #tpu.memory_space<vmem>>, vector<1x4x8x8x16xbf16>
      %128 = vector.shape_cast %127 : vector<1x4x8x8x16xbf16> to vector<4x8x8x16xbf16>
      %129 = vector.shape_cast %126 : vector<4x8x8x16xbf16> to vector<1x4x8x8x16xbf16>
      tpu.vector_store %arg6[%c0_68, %c0_69, %c0_70, %c0_71, %c0_72], %129 {strides = array<i32>} : memref<1x4x8x8x16xbf16, #tpu.memory_space<vmem>>, vector<1x4x8x8x16xbf16>,
    } else {
    }
    %c0_20 = arith.constant 0 : index
    %c0_21 = arith.constant 0 : index
    %c0_22 = arith.constant 0 : index
    %25 = vector.load %arg9[%c0_20, %c0_21, %c0_22] : memref<32x8x16xbf16, #tpu.memory_space<vmem>>, vector<32x8x16xbf16>
    tpu.vector_store %arg9[%c0_20, %c0_21, %c0_22], %20 {strides = array<i32>} : memref<32x8x16xbf16, #tpu.memory_space<vmem>>, vector<32x8x16xbf16>,
    %c0_23 = arith.constant 0 : index
    %c0_24 = arith.constant 0 : index
    %c0_25 = arith.constant 0 : index
    %26 = vector.load %arg10[%c0_23, %c0_24, %c0_25] : memref<32x8x16xbf16, #tpu.memory_space<vmem>>, vector<32x8x16xbf16>
    tpu.vector_store %arg10[%c0_23, %c0_24, %c0_25], %21 {strides = array<i32>} : memref<32x8x16xbf16, #tpu.memory_space<vmem>>, vector<32x8x16xbf16>,
    %c0_26 = arith.constant 0 : index
    %c0_27 = arith.constant 0 : index
    %c0_28 = arith.constant 0 : index
    %27 = vector.load %arg7[%c0_26, %c0_27, %c0_28] : memref<32x8x16xbf16, #tpu.memory_space<vmem>>, vector<32x8x16xbf16>
    tpu.vector_store %arg7[%c0_26, %c0_27, %c0_28], %3 {strides = array<i32>} : memref<32x8x16xbf16, #tpu.memory_space<vmem>>, vector<32x8x16xbf16>,
    %c0_29 = arith.constant 0 : index
    %c0_30 = arith.constant 0 : index
    %c0_31 = arith.constant 0 : index
    %28 = vector.load %arg8[%c0_29, %c0_30, %c0_31] : memref<32x8x16xbf16, #tpu.memory_space<vmem>>, vector<32x8x16xbf16>
    tpu.vector_store %arg8[%c0_29, %c0_30, %c0_31], %19 {strides = array<i32>} : memref<32x8x16xbf16, #tpu.memory_space<vmem>>, vector<32x8x16xbf16>,
    return
  }
  func.func @transform_0(%arg0: i32, %arg1: i32, %arg2: i32) -> (i32, i32, i32, i32, i32, i32) {
    %c1_i32 = arith.constant 1 : i32
    %0 = arith.subi %arg2, %c1_i32 : i32
    %c0_i32 = arith.constant 0 : i32
    %1 = arith.maxsi %0, %c0_i32 : i32
    %c0_i32_0 = arith.constant 0 : i32
    %c0_i32_1 = arith.constant 0 : i32
    %c0_i32_2 = arith.constant 0 : i32
    %c0_i32_3 = arith.constant 0 : i32
    return %arg0, %c0_i32_0, %c0_i32_1, %c0_i32_2, %arg1, %1 : i32, i32, i32, i32, i32, i32
  }
  func.func @transform_1(%arg0: i32, %arg1: i32, %arg2: i32) -> (i32, i32, i32, i32, i32, i32) {
    %c0_i32 = arith.constant 0 : i32
    %0 = arith.minsi %arg2, %c0_i32 : i32
    %c1_i32 = arith.constant 1 : i32
    %c0_i32_0 = arith.constant 0 : i32
    %c0_i32_1 = arith.constant 0 : i32
    %c0_i32_2 = arith.constant 0 : i32
    return %arg0, %c1_i32, %c0_i32_0, %c0_i32_1, %arg1, %0 : i32, i32, i32, i32, i32, i32
  }
  func.func @transform_2(%arg0: i32, %arg1: i32, %arg2: i32) -> (i32, i32, i32, i32, i32, i32) {
    %c0_i32 = arith.constant 0 : i32
    %0 = arith.minsi %arg2, %c0_i32 : i32
    %c2_i32 = arith.constant 2 : i32
    %c0_i32_0 = arith.constant 0 : i32
    %c0_i32_1 = arith.constant 0 : i32
    %c0_i32_2 = arith.constant 0 : i32
    return %arg0, %c2_i32, %c0_i32_0, %c0_i32_1, %arg1, %0 : i32, i32, i32, i32, i32, i32
  }
  func.func @transform_3(%arg0: i32, %arg1: i32, %arg2: i32) -> (i32, i32, i32, i32, i32) {
    %c1_i32 = arith.constant 1 : i32
    %0 = arith.subi %arg2, %c1_i32 : i32
    %c0_i32 = arith.constant 0 : i32
    %1 = arith.maxsi %0, %c0_i32 : i32
    %c0_i32_0 = arith.constant 0 : i32
    %c0_i32_1 = arith.constant 0 : i32
    %c0_i32_2 = arith.constant 0 : i32
    return %arg0, %c0_i32_0, %c0_i32_1, %arg1, %1 : i32, i32, i32, i32, i32
  }
}

module attributes {stable_mosaic.version = 11 : i64} {
  func.func @_pointwise_conv_kernel(%arg0: i32, %arg1: i32, %arg2: memref<1x32x128xbf16, #tpu.memory_space<vmem>>, %arg3: memref<32x32xbf16, #tpu.memory_space<vmem>>, %arg4: memref<32x1xf32, #tpu.memory_space<vmem>>, %arg5: memref<1x32x128xf32, #tpu.memory_space<vmem>>) attributes {dimension_semantics = [#tpu.dimension_semantics<parallel>, #tpu.dimension_semantics<parallel>], iteration_bounds = array<i64: 2, 1>, scalar_prefetch = 0 : i64, scratch_operands = 0 : i64, tpu.core_type = #tpu.core_type<tc>, window_params = [{transform_indices = @transform_0, window_bounds = array<i64: 1, 32, 128>}, {pipeline_mode = #tpu.pipeline_mode<synchronous>, transform_indices = @transform_1, window_bounds = array<i64: 32, 32>}, {pipeline_mode = #tpu.pipeline_mode<synchronous>, transform_indices = @transform_2, window_bounds = array<i64: 32, 1>}, {transform_indices = @transform_3, window_bounds = array<i64: 1, 32, 128>}]} {
    %c0 = arith.constant 0 : index
    %c0_0 = arith.constant 0 : index
    %c0_1 = arith.constant 0 : index
    %0 = vector.load %arg2[%c0, %c0_0, %c0_1] : memref<1x32x128xbf16, #tpu.memory_space<vmem>>, vector<1x32x128xbf16>
    %1 = vector.shape_cast %0 : vector<1x32x128xbf16> to vector<32x128xbf16>
    %c0_2 = arith.constant 0 : index
    %c0_3 = arith.constant 0 : index
    %2 = vector.load %arg3[%c0_2, %c0_3] : memref<32x32xbf16, #tpu.memory_space<vmem>>, vector<32x32xbf16>
    %cst = arith.constant dense<0.000000e+00> : vector<32x128xf32>
    %3 = tpu.matmul %2, %1, %cst {dimension_numbers = #tpu.dot_dimension_numbers<[1], [0], [0], [1], [0, 0, 1, 1], [], []>} : vector<32x32xbf16>, vector<32x128xbf16>, vector<32x128xf32> -> vector<32x128xf32>
    %c0_4 = arith.constant 0 : index
    %c0_5 = arith.constant 0 : index
    %4 = vector.load %arg4[%c0_4, %c0_5] : memref<32x1xf32, #tpu.memory_space<vmem>>, vector<32x1xf32>
    %5 = vector.broadcast %4 : vector<32x1xf32> to vector<32x128xf32>
    %6 = arith.addf %3, %5 : vector<32x128xf32>
    %c0_6 = arith.constant 0 : index
    %c0_7 = arith.constant 0 : index
    %c0_8 = arith.constant 0 : index
    %7 = vector.load %arg5[%c0_6, %c0_7, %c0_8] : memref<1x32x128xf32, #tpu.memory_space<vmem>>, vector<1x32x128xf32>
    %8 = vector.shape_cast %7 : vector<1x32x128xf32> to vector<32x128xf32>
    %9 = vector.shape_cast %6 : vector<32x128xf32> to vector<1x32x128xf32>
    tpu.vector_store %arg5[%c0_6, %c0_7, %c0_8], %9 {strides = array<i32>} : memref<1x32x128xf32, #tpu.memory_space<vmem>>, vector<1x32x128xf32>,
    return
  }
  func.func @transform_0(%arg0: i32, %arg1: i32) -> (i32, i32, i32) {
    %c0_i32 = arith.constant 0 : i32
    %c0_i32_0 = arith.constant 0 : i32
    return %arg0, %c0_i32, %arg1 : i32, i32, i32
  }
  func.func @transform_1(%arg0: i32, %arg1: i32) -> (i32, i32) {
    %c0_i32 = arith.constant 0 : i32
    %c0_i32_0 = arith.constant 0 : i32
    %c0_i32_1 = arith.constant 0 : i32
    return %c0_i32, %c0_i32_0 : i32, i32
  }
  func.func @transform_2(%arg0: i32, %arg1: i32) -> (i32, i32) {
    %c0_i32 = arith.constant 0 : i32
    %c0_i32_0 = arith.constant 0 : i32
    %c0_i32_1 = arith.constant 0 : i32
    return %c0_i32, %c0_i32_0 : i32, i32
  }
  func.func @transform_3(%arg0: i32, %arg1: i32) -> (i32, i32, i32) {
    %c0_i32 = arith.constant 0 : i32
    %c0_i32_0 = arith.constant 0 : i32
    return %arg0, %c0_i32, %arg1 : i32, i32, i32
  }
}

</mosaic_0001>

<bundles_post_ra>
// kernel: mha_forward.3
= control target key start
LH: loop header
LB: loop body
LE: loop exit
PB: predicated region body
PF: predicated region fallthrough
CT: control target
= control target key end

     0   :  { %s755_s12 = smov 0   ;;  %s757_s13 = smov 0   ;;  %s852_s0 = inlined_call_operand.vmem [shape: f32[2,32,128], index: 0, kind: input, shape index: {}]   ;;  %s853_s1 = inlined_call_operand.vmem [shape: bf16[96,32], index: 1, kind: input, shape index: {}]   ;;  %s854_s2 = inlined_call_operand.vmem [shape: f32[96,1], index: 2, kind: input, shape index: {}]   ;;  %s855_s3 = inlined_call_operand.vmem [shape: bf16[2,96,128], index: 3, kind: output, shape index: {}]  }
   0x1   :  { %s759_s14 = smov 0  }
   0x2 LB: > { %s25_s15 = sadd.s32 1, %s728_s13  ;;  %p570_p0 = scmp.ge.s32.totalorder %s732_s14, 1  ;;  %s732_s14 = sphi %s759_s14, %s13_s14   ;;  %s728_s13 = sphi %s757_s13, %s857_s13   ;;  %s724_s12 = sphi %s755_s12, %s856_s12  }
   0x3   : > { %p27_p1 = scmp.ge.s32.totalorder %s25_s15, 2  ;;  %p156_p2 = scmp.lt.s32.totalorder %s732_s14, 3 }
   0x5   : > { %s859_s15 = smov (%p27_p1, %s25_s15), 0  ;;  %p157_p3 = pnand %p570_p0, %p156_p2 }
   0x6   : > { %p186_p4 = scmp.lt.s32.totalorder (!%p157_p3), %s724_s12, 1  ;;  %v704_v0 = vld [vmem:[%s853_s1] sm:$0xff] (!%p157_p3)   ;;  %vm323_vm0 = vcmask (!%p157_p3), 261120   ;;  %v705_v1 = vld [vmem:[%s853_s1 + $0x10] sm:$0xff] (!%p157_p3)   ;;  %v734_v2 = vmov (!%p157_p3), 0   ;;  %v224_v11 = vld [vmem:[%s854_s2 + $0x18] sm:$0xff] (!%p157_p3) }
   0x7   : > { %160 = sbr.rel (%p157_p3) target bundleno = 256 (0x100), region = 32  ;;  %660 = vmatprep.mubr.msk.bf16.mxu0 (!%p157_p3), %vm323_vm0, %v704_v0  ;;  %664 = vmatprep.mubr.msk.bf16.mxu1 (!%p157_p3), %vm323_vm0, %v705_v1  ;;  %v223_v8 = vld [vmem:[%s854_s2 + $0x10] sm:$0xff] (!%p157_p3)  ;;  %v221_v9 = vld [vmem:[%s854_s2] sm:$0xff] (!%p157_p3)  ;;  %v222_v12 = vld [vmem:[%s854_s2 + $0x8] sm:$0xff] (!%p157_p3) }
   0x8   : > { %703 = vset.pattern.permute.xlu1 (!%p157_p3), %v734_v2  ;;  %702 = vset.pattern.permute.xlu0 (!%p157_p3), %v734_v2  ;;  %v706_v13 = vld [vmem:[%s853_s1 + $0x8] sm:$0xff] (!%p157_p3)   ;;  %v707_v14 = vld [vmem:[%s853_s1 + $0x18] sm:$0xff] (!%p157_p3)   ;;  %v225_v16 = vld [vmem:[%s854_s2 + $0x20] sm:$0xff] (!%p157_p3) }
   0x9   : > { %245 = vperm.xlu1 (!%p157_p3), %703, %v223_v8   ;;  %235 = vperm.xlu0 (!%p157_p3), %702, %v221_v9   ;;  %v226_v15 = vld [vmem:[%s854_s2 + $0x28] sm:$0xff] (!%p157_p3)  ;;  %v708_v17 = vld [vmem:[%s853_s1 + $0x20] sm:$0xff] (!%p157_p3)   ;;  %v228_v18 = vld [vmem:[%s854_s2 + $0x38] sm:$0xff] (!%p157_p3) }
   0xa   : > { %v227_v19 = vld [vmem:[%s854_s2 + $0x30] sm:$0xff] (!%p157_p3)  ;;  %v709_v20 = vld [vmem:[%s853_s1 + $0x28] sm:$0xff] (!%p157_p3)   ;;  %v229_v22 = vld [vmem:[%s854_s2 + $0x40] sm:$0xff] (!%p157_p3) }
   0xb   : > { %v230_v21 = vld [vmem:[%s854_s2 + $0x48] sm:$0xff] (!%p157_p3)  ;;  %v232_v23 = vld [vmem:[%s854_s2 + $0x58] sm:$0xff] (!%p157_p3)  ;;  %v231_v24 = vld [vmem:[%s854_s2 + $0x50] sm:$0xff] (!%p157_p3) }
   0xd   : > { %250 = vperm.xlu1 (!%p157_p3), %703, %v224_v11   ;;  %240 = vperm.xlu0 (!%p157_p3), %702, %v222_v12  }
   0xe   : > { %s861_s12 = smov (!%p186_p4, %s724_s12), 1 }
   0xf   : > { %s600_s20 = sshll.u32 %s861_s12, 5  ;;  %s676_s6 = smul.u32 48, %s861_s12 }
  0x10   : > { %s193_s23 = scalar_lea.vmem %s852_s0, %s600_s20 }
  0x11   : > { %v203_v3 = vld [vmem:[%s193_s23] sm:$0xff]  ;;  %v204_v4 = vld [vmem:[%s193_s23 + $0x8] sm:$0xff]  ;;  %v205_v5 = vld [vmem:[%s193_s23 + $0x10] sm:$0xff]  ;;  %260 = vperm.xlu1 %703, %v226_v15   ;;  %255 = vperm.xlu0 %702, %v225_v16   ;;  %s201_s9 = scalar_lea.vmem %s855_s3, %s676_s6 }
  0x12   : > { %v207_v6 = vpack.c.bf16 %v204_v4, %v203_v3  ;;  %v206_v7 = vld [vmem:[%s193_s23 + $0x18] sm:$0xff] }
  0x13   : > { %v208_v10 = vpack.c.bf16 %v206_v7, %v205_v5 }
  0x14   : > { %656 = vmatprep.subr.bf16.mxu0 %v207_v6  ;;  %672 = vmatprep.subr.bf16.mxu1 %v207_v6 }
  0x15   : > { %657 = vmatpush3.bf16.msra.mxu0 %v207_v6  ;;  %674 = vmatpush3.bf16.msra.mxu1 %v207_v6 }
  0x16   : > { %658 = vmatprep.subr.bf16.mxu0 %v208_v10  ;;  %673 = vmatprep.subr.bf16.mxu1 %v208_v10 }
  0x17   : > { %270 = vperm.xlu1 %703, %v228_v18   ;;  %265 = vperm.xlu0 %702, %v227_v19  }
  0x19   : > { %659 = vmatpush3.bf16.msra.mxu0 %v208_v10  ;;  %675 = vmatpush3.bf16.msra.mxu1 %v208_v10 }
  0x1b   : > { %280 = vperm.xlu1 %703, %v230_v21   ;;  %275 = vperm.xlu0 %702, %v229_v22  }
  0x1c   : > { %661 = vmatmul.mubr.msk.bf16.vlgmr.msra.gmra.mrb[0].mxu0 %vm323_vm0, %v706_v13  ;;  %665 = vmatmul.mubr.msk.bf16.vlgmr.msra.gmra.mrb[0].mxu1 %vm323_vm0, %v707_v14 }
  0x1d   : > { %668 = vmatprep.mubr.msk.bf16.mxu1 %vm323_vm0, %v708_v17 }
  0x1f   : > { %290 = vperm.xlu1 %703, %v232_v23   ;;  %285 = vperm.xlu0 %702, %v231_v24  }
  0x24   : > { %669 = vmatmul.mubr.msk.bf16.gmra.mrb[4].mxu1 %vm323_vm0, %v709_v20 }
  0x88   : > { %v246_v25 = vpop.permute.xlu1 %245  ;;  %v236_v26 = vpop.permute.xlu0 %235 }
  0x8c   : > { %v251_v27 = vpop.permute.xlu1 %250  ;;  %v241_v28 = vpop.permute.xlu0 %240 }
  0x90   : > { %v261_v29 = vpop.permute.xlu1 %260  ;;  %v256_v30 = vpop.permute.xlu0 %255 }
  0x96   : > { %v271_v31 = vpop.permute.xlu1 %270  ;;  %v266_v32 = vpop.permute.xlu0 %265 }
  0x9a   : > { %v281_v33 = vpop.permute.xlu1 %280  ;;  %v276_v46 = vpop.permute.xlu0 %275 }
  0x9e   : > { %v291_v56 = vpop.permute.xlu1 %290  ;;  %v286_v58 = vpop.permute.xlu0 %285 }
  0xef   : > { %v662_v34 = vpop.f32.mrb[0].mxu0  ;;  %v666_v35 = vpop.f32.mrb[0].mxu1 }
  0xf0   : > { %v376_v36 = vpop.f32.mrb[1].mxu0  ;;  %v392_v37 = vpop.f32.mrb[1].mxu1  ;;  %v385_v40 = vadd.f32 %v662_v34, %v246_v25  ;;  %v401_v41 = vadd.f32 %v666_v35, %v266_v32 }
  0xf1   : > { %v663_v38 = vpop.f32.mrb[2].mxu0  ;;  %v667_v39 = vpop.f32.mrb[2].mxu1  ;;  %v377_v47 = vadd.f32 %v376_v36, %v236_v26  ;;  %v393_v48 = vadd.f32 %v392_v37, %v256_v30 }
  0xf2   : > { %v388_v42 = vadd.f32 %v663_v38, %v251_v27  ;;  %v404_v43 = vadd.f32 %v667_v39, %v271_v31  ;;  %v379_v44 = vpop.f32.mrb[3].mxu0  ;;  %v395_v45 = vpop.f32.mrb[3].mxu1 }
  0xf3   : > { %v380_v49 = vadd.f32 %v379_v44, %v241_v28  ;;  %v396_v50 = vadd.f32 %v395_v45, %v261_v29 }
  0xf4   : > { %v621_v51 = vpack.c.bf16 %v388_v42, %v385_v40  ;;  %v631_v52 = vpack.c.bf16 %v404_v43, %v401_v41 }
  0xf5   : > { %v616_v53 = vpack.c.bf16 %v380_v49, %v377_v47  ;;  %v626_v54 = vpack.c.bf16 %v396_v50, %v393_v48 }
  0xf6   : > { %643 = vst [vmem:[%s201_s9 + $0x8] sm:$0xff] %v621_v51   ;;  %645 = vst [vmem:[%s201_s9 + $0x18] sm:$0xff] %v631_v52  }
  0xf7   : > { %617 = vst [vmem:[%s201_s9] sm:$0xff] %v616_v53   ;;  %644 = vst [vmem:[%s201_s9 + $0x10] sm:$0xff] %v626_v54   ;;  %v670_v55 = vpop.f32.mrb[4].mxu1 }
  0xf8   : > { %v408_v57 = vpop.f32.mrb[5].mxu1  ;;  %v417_v60 = vadd.f32 %v670_v55, %v286_v58 }
  0xf9   : > { %v671_v59 = vpop.f32.mrb[6].mxu1  ;;  %v409_v63 = vadd.f32 %v408_v57, %v276_v46 }
  0xfa   : > { %v420_v61 = vadd.f32 %v671_v59, %v291_v56  ;;  %v411_v62 = vpop.f32.mrb[7].mxu1 }
  0xfb   : > { %v412_v0 = vadd.f32 %v411_v62, %v281_v33 }
  0xfc   : > { %v641_v1 = vpack.c.bf16 %v420_v61, %v417_v60 }
  0xfd   : > { %v636_v2 = vpack.c.bf16 %v412_v0, %v409_v63 }
  0xfe   : > { %647 = vst [vmem:[%s201_s9 + $0x28] sm:$0xff] %v641_v1  }
  0xff   : > { %646 = vst [vmem:[%s201_s9 + $0x20] sm:$0xff] %v636_v2  }
 0x100 PF: > { %s13_s14 = sadd.s32 1, %s732_s14   ;;  %s856_s12 = smov %s728_s13 }
 0x101   : > { %p10_p5 = scmp.ge.s32.totalorder %s13_s14, 4   ;;  %s857_s13 = smov %s859_s15 }
 0x103   :  { %12 = sbr.rel (!%p10_p5) target bundleno = 2 (0x2), region = 62 }

// kernel: mha_forward.5
= control target key start
LH: loop header
LB: loop body
LE: loop exit
PB: predicated region body
PF: predicated region fallthrough
CT: control target
= control target key end

     0   :  { %s507_s12 = smov 0   ;;  %s509_s13 = smov 0   ;;  %s560_s0 = inlined_call_operand.vmem [shape: bf16[2,32,128], index: 0, kind: input, shape index: {}]   ;;  %s561_s1 = inlined_call_operand.vmem [shape: bf16[32,32], index: 1, kind: input, shape index: {}]   ;;  %s562_s2 = inlined_call_operand.vmem [shape: f32[32,1], index: 2, kind: input, shape index: {}]   ;;  %s563_s3 = inlined_call_operand.vmem [shape: f32[2,32,128], index: 3, kind: output, shape index: {}]  }
   0x1   :  { %s511_s14 = smov 0  }
   0x2 LB: > { %s25_s15 = sadd.s32 1, %s480_s13  ;;  %p404_p0 = scmp.ge.s32.totalorder %s484_s14, 1  ;;  %s484_s14 = sphi %s511_s14, %s13_s14   ;;  %s480_s13 = sphi %s509_s13, %s565_s13   ;;  %s476_s12 = sphi %s507_s12, %s564_s12  }
   0x3   : > { %p27_p1 = scmp.ge.s32.totalorder %s25_s15, 2  ;;  %p156_p2 = scmp.lt.s32.totalorder %s484_s14, 3 }
   0x5   : > { %s567_s15 = smov (%p27_p1, %s25_s15), 0  ;;  %p157_p3 = pnand %p404_p0, %p156_p2 }
   0x6   : > { %p186_p4 = scmp.lt.s32.totalorder (!%p157_p3), %s476_s12, 1  ;;  %v460_v0 = vld [vmem:[%s561_s1] sm:$0xff] (!%p157_p3)   ;;  %vm257_vm0 = vcmask (!%p157_p3), 261120   ;;  %v213_v1 = vld [vmem:[%s562_s2 + $0x10] sm:$0xff] (!%p157_p3)  ;;  %v486_v3 = vmov (!%p157_p3), 0   ;;  %v214_v4 = vld [vmem:[%s562_s2 + $0x18] sm:$0xff] (!%p157_p3) }
   0x7   : > { %160 = sbr.rel (%p157_p3) target bundleno = 244 (0xf4), region = 32  ;;  %427 = vmatprep.mubr.msk.bf16.mxu0 (!%p157_p3), %vm257_vm0, %v460_v0  ;;  %v211_v2 = vld [vmem:[%s562_s2] sm:$0xff] (!%p157_p3)  ;;  %457 = vset.pattern.permute.xlu1 (!%p157_p3), %v486_v3  ;;  %v212_v5 = vld [vmem:[%s562_s2 + $0x8] sm:$0xff] (!%p157_p3) }
   0x8   : > { %456 = vset.pattern.permute.xlu0 (!%p157_p3), %v486_v3  ;;  %227 = vperm.xlu1 (!%p157_p3), %457, %v213_v1   ;;  %v461_v8 = vld [vmem:[%s561_s1 + $0x8] sm:$0xff] (!%p157_p3)  }
   0x9   : > { %217 = vperm.xlu0 (!%p157_p3), %456, %v211_v2  }
   0xc   : > { %232 = vperm.xlu1 (!%p157_p3), %457, %v214_v4  }
   0xd   : > { %222 = vperm.xlu0 (!%p157_p3), %456, %v212_v5  }
   0xe   : > { %s569_s12 = smov (!%p186_p4, %s476_s12), 1 }
   0xf   : > { %s417_s22 = sshll.u32 %s569_s12, 4  ;;  %s418_s5 = sshll.u32 %s569_s12, 5 }
  0x10   : > { %s193_s25 = scalar_lea.vmem %s560_s0, %s417_s22  ;;  %s201_s8 = scalar_lea.vmem %s563_s3, %s418_s5 }
  0x11   : > { %v458_v6 = vld [vmem:[%s193_s25] sm:$0xff]   ;;  %v459_v7 = vld [vmem:[%s193_s25 + $0x8] sm:$0xff]  }
  0x12   : > { %423 = vmatprep.subr.bf16.mxu0 %v458_v6 }
  0x13   : > { %424 = vmatpush3.bf16.msra.mxu0 %v458_v6 }
  0x14   : > { %425 = vmatprep.subr.bf16.mxu0 %v459_v7 }
  0x17   : > { %426 = vmatpush3.bf16.msra.mxu0 %v459_v7 }
  0x1a   : > { %428 = vmatmul.mubr.msk.bf16.vlgmr.msra.gmra.mrb[0].mxu0 %vm257_vm0, %v461_v8 }
  0x87   : > { %v228_v9 = vpop.permute.xlu1 %227 }
  0x88   : > { %v218_v10 = vpop.permute.xlu0 %217 }
  0x8b   : > { %v233_v14 = vpop.permute.xlu1 %232 }
  0x8c   : > { %v223_v17 = vpop.permute.xlu0 %222 }
  0xed   : > { %v429_v11 = vpop.f32.mrb[0].mxu0 }
  0xee   : > { %v307_v12 = vadd.f32 %v429_v11, %v228_v9  ;;  %v298_v13 = vpop.f32.mrb[1].mxu0 }
  0xef   : > { %v299_v15 = vadd.f32 %v298_v13, %v218_v10  ;;  %v430_v16 = vpop.f32.mrb[2].mxu0 }
  0xf0   : > { %315 = vst [vmem:[%s201_s8 + $0x10] sm:$0xff] %v307_v12  ;;  %v310_v18 = vadd.f32 %v430_v16, %v233_v14  ;;  %v301_v19 = vpop.f32.mrb[3].mxu0 }
  0xf1   : > { %313 = vst [vmem:[%s201_s8] sm:$0xff] %v299_v15  ;;  %v302_v20 = vadd.f32 %v301_v19, %v223_v17 }
  0xf2   : > { %316 = vst [vmem:[%s201_s8 + $0x18] sm:$0xff] %v310_v18 }
  0xf3   : > { %314 = vst [vmem:[%s201_s8 + $0x8] sm:$0xff] %v302_v20 }
  0xf4 PF: > { %s13_s14 = sadd.s32 1, %s484_s14   ;;  %s564_s12 = smov %s480_s13 }
  0xf5   : > { %p10_p5 = scmp.ge.s32.totalorder %s13_s14, 4   ;;  %s565_s13 = smov %s567_s15 }
  0xf7   :  { %12 = sbr.rel (!%p10_p5) target bundleno = 2 (0x2), region = 62 }

// kernel: mha_forward.4
= control target key start
LH: loop header
LB: loop body
LE: loop exit
PB: predicated region body
PF: predicated region fallthrough
CT: control target
= control target key end

     0   :  { %s13701_s12 = smov 0   ;;  %s13703_s13 = smov 0   ;;  %s18790_s0 = inlined_call_operand.vmem [shape: bf16[2,3,4,8,8,16], index: 0, kind: input, shape index: {}, may-alias: {0,1,2}]   ;;  %s18791_s1 = inlined_call_operand.vmem [shape: bf16[2,3,4,8,8,16], index: 1, kind: input, shape index: {}, may-alias: {0,1,2}]   ;;  %s18792_s2 = inlined_call_operand.vmem [shape: bf16[2,3,4,8,8,16], index: 2, kind: input, shape index: {}, may-alias: {0,1,2}]   ;;  %s18793_s3 = inlined_call_operand.vmem [shape: bf16[2,4,8,8,16], index: 3, kind: output, shape index: {}]  }
   0x1   :  { %s13705_s14 = smov 0   ;;  %s13707_s15 = smov 0  }
   0x2   :  { %s13709_s16 = smov 0  }
   0x3 LB: > { %s25_s17 = sadd.s32 1, %s13663_s14  ;;  %s32_s18 = sadd.s32 1, %s13667_s15  ;;  %s13671_s16 = sphi %s13709_s16, %s13_s16   ;;  %s13667_s15 = sphi %s13707_s15, %s19906_s15   ;;  %s13663_s14 = sphi %s13705_s14, %s19905_s14   ;;  %s13659_s13 = sphi %s13703_s13, %s19904_s13   ;;  %s13655_s12 = sphi %s13701_s12, %s19903_s12  }
   0x4   : > { %p26_p0 = scmp.ge.s32.totalorder %s25_s17, 2  ;;  %p11645_p1 = scmp.ge.s32.totalorder %s13671_s16, 1 }
   0x5   : > { %p246_p2 = scmp.lt.s32.totalorder %s13671_s16, 5 }
   0x6   : > { %s19908_s17 = smov (%p26_p0, %s25_s17), 0  ;;  %s19910_s18 = smov (!%p26_p0, %s32_s18), %s13667_s15 }
   0x7   : > { %p247_p3 = pnand %p11645_p1, %p246_p2  ;;  %p34_p4 = scmp.ge.s32.totalorder %s19910_s18, 2 }
   0x9   : > { %s19912_s18 = smov (%p34_p4, %s19910_s18), 0  ;;  %250 = sbr.rel (%p247_p3) target bundleno = 2206 (0x89e), region = 32 }
  0x10   : > { %p319_p5 = scmp.lt.s32.totalorder %s13659_s13, 1  ;;  %p333_p6 = scmp.lt.s32.totalorder %s13655_s12, 0  ;;  %v13734_v0 = vld [vmem:[#allocation2] sm:$0xf]  ;;  %v13736_v1 = vld [vmem:[#allocation2 + $0x4] sm:$0xf]  ;;  %v419_v7 = vlaneseq }
  0x11   : > { %18981 = vst [vmem:[#allocation6_spill] sm:$0xff] %v13734_v0  ;;  %18982 = vst [vmem:[#allocation7_spill] sm:$0xff] %v13736_v1  ;;  %v13738_v2 = vld [vmem:[#allocation2 + $0x8] sm:$0xf]  ;;  %v13745_v3 = vld [vmem:[#allocation2 + $0xc] sm:$0xf] }
  0x12   : > { %s19914_s13 = smov (!%p319_p5, %s13659_s13), 1  ;;  %18983 = vst [vmem:[#allocation8_spill] sm:$0xff] %v13738_v2  ;;  %18984 = vst [vmem:[#allocation9_spill] sm:$0xff] %v13745_v3  ;;  %v13747_v4 = vld [vmem:[#allocation2 + $0x10] sm:$0xf]  ;;  %v13787_v17 = vshrl.u32 %v419_v7, 7 }
  0x13   : > { %s13743_s19 = scalar_select %p333_p6, %s13655_s12, 0  ;;  %18985 = vst [vmem:[#allocation10_spill] sm:$0xff] %v13747_v4  ;;  %v13749_v5 = vld [vmem:[#allocation2 + $0x14] sm:$0xf]  ;;  %v13751_v6 = vld [vmem:[#allocation2 + $0x18] sm:$0xf] }
  0x14   : > { %s13151_s20 = smul.u32 96, %s19914_s13  ;;  %s11998_s21 = sshll.u32 %s19914_s13, 7  ;;  %18986 = vst [vmem:[#allocation11_spill] sm:$0xff] %v13749_v5  ;;  %18987 = vst [vmem:[#allocation12_spill] sm:$0xff] %v13751_v6  ;;  %v13758_v8 = vld [vmem:[#allocation2 + $0x1c] sm:$0xf] }
  0x15   : > { %s13152_s22 = smul.u32 384, %s19914_s13  ;;  %s13756_s25 = scalar_lea.vmem %s18793_s3, %s11998_s21  ;;  %18988 = vst [vmem:[#allocation13_spill] sm:$0xff] %v13758_v8  ;;  %v13760_v9 = vld [vmem:[#allocation2 + $0x20] sm:$0xf]  ;;  %v13765_v10 = vld [vmem:[#allocation2 + $0x24] sm:$0xf] }
  0x16   : > { %18989 = vst [vmem:[#allocation14_spill] sm:$0xff] %v13760_v9  ;;  %s340_s26 = scalar_select %p333_p6, %s13743_s19, 0  ;;  %18990 = vst [vmem:[#allocation15_spill] sm:$0xff] %v13765_v10  ;;  %v13767_v11 = vld [vmem:[#allocation2 + $0x28] sm:$0xf]  ;;  %v13822_v43 = vand.u32 127, %v419_v7 }
  0x17   : > { %18991 = vst [vmem:[#allocation16_spill] sm:$0xff] %v13767_v11  ;;  %s13772_s29 = scalar_lea.vmem %s18790_s0, %s13152_s22  ;;  %v13774_v12 = vld [vmem:[#allocation2 + $0x2c] sm:$0xf]  ;;  %v13776_v13 = vld [vmem:[#allocation2 + $0x30] sm:$0xf]  ;;  %s11733_s11 = sshll.u32 %s13743_s19, 4 }
  0x18   : > { %18992 = vst [vmem:[#allocation17_spill] sm:$0xff] %v13774_v12  ;;  %18993 = vst [vmem:[#allocation18_spill] sm:$0xff] %v13776_v13  ;;  %s13778_s30 = sadd.s32 %s13151_s20, %s340_s26  ;;  %v13780_v14 = vld [vmem:[#allocation2 + $0x34] sm:$0xf]  ;;  %v13782_v15 = vld [vmem:[#allocation2 + $0x38] sm:$0xf] }
  0x19   : > { %18994 = vst [vmem:[#allocation19_spill] sm:$0xff] %v13780_v14  ;;  %18995 = vst [vmem:[#allocation20_spill] sm:$0xff] %v13782_v15  ;;  %v13784_v16 = vld [vmem:[#allocation2 + $0x3c] sm:$0xf]  ;;  %s11656_s4 = sshll.u32 %s13778_s30, 2  ;;  %p11734_p7 = scmp.le.s32.totalorder %s13655_s12, 0 }
  0x1a   : > { %18996 = vst [vmem:[#allocation21_spill] sm:$0xff] %v13784_v16  ;;  %v13789_v18 = vld [vmem:[#allocation2 + $0x40] sm:$0xf]  ;;  %v13791_v19 = vld [vmem:[#allocation2 + $0x44] sm:$0xf]  ;;  %s13798_s7 = scalar_lea.vmem %s18791_s1, %s11656_s4  ;;  %s13835_s10 = scalar_lea.vmem %s18792_s2, %s11656_s4 }
  0x1b   : > { %18997 = vst [vmem:[#allocation22_spill] sm:$0xff] %v13789_v18  ;;  %18998 = vst [vmem:[#allocation23_spill] sm:$0xff] %v13791_v19  ;;  %v13800_v20 = vld [vmem:[#allocation2 + $0x48] sm:$0xf]  ;;  %v13802_v21 = vld [vmem:[#allocation2 + $0x4c] sm:$0xf] }
  0x1c   : > { %18999 = vst [vmem:[#allocation24_spill] sm:$0xff] %v13800_v20  ;;  %19000 = vst [vmem:[#allocation25_spill] sm:$0xff] %v13802_v21  ;;  %v13804_v22 = vld [vmem:[#allocation2 + $0x50] sm:$0xf]  ;;  %v13673_v23 = vmov 1983009808  }
  0x1d   : > { %19001 = vst [vmem:[#allocation26_spill] sm:$0xff] %v13804_v22  ;;  %v417_v24 = vunpack.c.l.s4 %v13673_v23  ;;  %v13674_v26 = vmov 1934713408   ;;  %v13201_v28 = vld [vmem:[%s13798_s7 + $0x80] ss:$16 sps:$4 sm:$0xff]  }
  0x1e   : > { %v434_v27 = vunpack.c.l.s4 %v13674_v26  ;;  %v13202_v31 = vld [vmem:[%s13798_s7 + $0x88] ss:$16 sps:$4 sm:$0xff]   ;;  %v13203_v32 = vld [vmem:[%s13798_s7 + $0x84] ss:$16 sps:$4 sm:$0xff]   ;;  %v13204_v33 = vld [vmem:[%s13798_s7 + $0x8c] ss:$16 sps:$4 sm:$0xff]  }
  0x1f   : > { %v418_v25 = vunpack.c.0.s8 %v417_v24  ;;  %v13205_v35 = vld [vmem:[%s13798_s7 + $0xa0] ss:$16 sps:$4 sm:$0xff]   ;;  %v13206_v36 = vld [vmem:[%s13798_s7 + $0xa8] ss:$16 sps:$4 sm:$0xff]   ;;  %v13207_v37 = vld [vmem:[%s13798_s7 + $0xa4] ss:$16 sps:$4 sm:$0xff]  }
  0x20   : > { %v435_v30 = vunpack.c.0.s8 %v434_v27  ;;  %v13208_v41 = vld [vmem:[%s13798_s7 + $0xac] ss:$16 sps:$4 sm:$0xff]   ;;  %v13209_v42 = vld [vmem:[%s13798_s7 + $0xc0] ss:$16 sps:$4 sm:$0xff]   ;;  %v13210_v52 = vld [vmem:[%s13798_s7 + $0xc8] ss:$16 sps:$4 sm:$0xff]  }
  0x21   : > { %v13808_v29 = vsub.s32 %v418_v25, %v13787_v17  ;;  %v13211_v53 = vld [vmem:[%s13798_s7 + $0xc4] ss:$16 sps:$4 sm:$0xff]   ;;  %v13212_v54 = vld [vmem:[%s13798_s7 + $0xcc] ss:$16 sps:$4 sm:$0xff]   ;;  %v13213_v55 = vld [vmem:[%s13798_s7 + $0xe0] ss:$16 sps:$4 sm:$0xff]  }
  0x22   : > { %v13825_v44 = vsub.s32 %v435_v30, %v13787_v17  ;;  %v13214_v60 = vld [vmem:[%s13798_s7 + $0xe8] ss:$16 sps:$4 sm:$0xff]   ;;  %v13215_v61 = vld [vmem:[%s13798_s7 + $0xe4] ss:$16 sps:$4 sm:$0xff]   ;;  %v18794_v30 = vmov 0  }
  0x23   : > { %19002 = vst [vmem:[#allocation27_spill] sm:$0xff] %v13808_v29  ;;  %v422_v34 = vrot.slane %v13201_v28, %v13808_v29  ;;  %v430_v38 = vrot.slane %v13202_v31, %v13808_v29  ;;  %v456_v39 = vrot.slane %v13203_v32, %v13808_v29  ;;  %v464_v40 = vrot.slane %v13204_v33, %v13808_v29  ;;  %v13216_v28 = vld [vmem:[%s13798_s7 + $0xec] ss:$16 sps:$4 sm:$0xff]  }
  0x24   : > { %19003 = vst [vmem:[#allocation28_spill] sm:$0xff] %v13825_v44  ;;  %v490_v45 = vrot.slane %v13205_v35, %v13808_v29  ;;  %v498_v46 = vrot.slane %v13206_v36, %v13808_v29  ;;  %v524_v47 = vrot.slane %v13207_v37, %v13808_v29  ;;  %v532_v58 = vrot.slane %v13208_v41, %v13808_v29 }
  0x25   : > { %v431_v48 = vcombine.low %v422_v34, %v430_v38  ;;  %v432_v49 = vcombine.high %v422_v34, %v430_v38  ;;  %v465_v50 = vcombine.low %v456_v39, %v464_v40  ;;  %v466_v51 = vcombine.high %v456_v39, %v464_v40 }
  0x26   : > { %v499_v56 = vcombine.low %v490_v45, %v498_v46  ;;  %v500_v57 = vcombine.high %v490_v45, %v498_v46  ;;  %v558_v59 = vrot.slane %v13209_v42, %v13808_v29  ;;  %v533_v26 = vcombine.low %v524_v47, %v532_v58 }
  0x27   : > { %v439_v62 = vrot.slane %v431_v48, %v13825_v44  ;;  %v13847_v63 = vrot.slane %v432_v49, %v13825_v44  ;;  %v473_v7 = vrot.slane %v465_v50, %v13825_v44  ;;  %v13851_v23 = vrot.slane %v466_v51, %v13825_v44 }
  0x28   : > { %v13854_v24 = vrot.slane %v499_v56, %v13825_v44  ;;  %v13857_v25 = vrot.slane %v500_v57, %v13825_v44  ;;  %v534_v27 = vcombine.high %v524_v47, %v532_v58  ;;  %v541_v37 = vrot.slane %v533_v26, %v13825_v44 }
  0x29   : > { %v447_v31 = vcombine.high %v439_v62, %v18794_v30  ;;  %v448_v32 = vcombine.high %v13847_v63, %v18794_v30  ;;  %v481_v33 = vcombine.high %v473_v7, %v18794_v30  ;;  %v482_v34 = vcombine.high %v13851_v23, %v18794_v30 }
  0x2a   : > { %v13868_v35 = vcombine.high %v13854_v24, %v18794_v30  ;;  %v13872_v36 = vcombine.high %v13857_v25, %v18794_v30  ;;  %v13876_v38 = vrot.slane %v534_v27, %v13825_v44  ;;  %v566_v39 = vrot.slane %v13210_v52, %v13808_v29 }
  0x2b   : > { %v592_v40 = vrot.slane %v13211_v53, %v13808_v29  ;;  %v600_v41 = vrot.slane %v13212_v54, %v13808_v29  ;;  %v626_v42 = vrot.slane %v13213_v55, %v13808_v29  ;;  %v549_v45 = vcombine.high %v541_v37, %v18794_v30 }
  0x2c   : > { %v13885_v46 = vcombine.high %v13876_v38, %v18794_v30  ;;  %v634_v47 = vrot.slane %v13214_v60, %v13808_v29  ;;  %v660_v48 = vrot.slane %v13215_v61, %v13808_v29  ;;  %v567_v49 = vcombine.low %v558_v59, %v566_v39 }
  0x2d   : > { %v568_v50 = vcombine.high %v558_v59, %v566_v39  ;;  %v601_v51 = vcombine.low %v592_v40, %v600_v41  ;;  %v602_v52 = vcombine.high %v592_v40, %v600_v41  ;;  %v668_v54 = vrot.slane %v13216_v28, %v13808_v29 }
  0x2e   : > { %v635_v56 = vcombine.low %v626_v42, %v634_v47  ;;  %v636_v53 = vcombine.high %v626_v42, %v634_v47  ;;  %v13890_v57 = vpack.i.b16 %v473_v7, %v439_v62  ;;  %v13893_v55 = vrot.slane %v567_v49, %v13825_v44 }
  0x2f   : > { %v13896_v58 = vrot.slane %v568_v50, %v13825_v44  ;;  %v13899_v60 = vrot.slane %v601_v51, %v13825_v44  ;;  %v13902_v61 = vrot.slane %v602_v52, %v13825_v44  ;;  %v669_v27 = vcombine.low %v660_v48, %v668_v54 }
  0x30   : > { %19004 = vst [vmem:[#allocation29_spill] sm:$0xff] %v13890_v57  ;;  %v13905_v59 = vrot.slane %v635_v56, %v13825_v44  ;;  %v13908_v26 = vrot.slane %v636_v53, %v13825_v44  ;;  %v670_v28 = vcombine.high %v660_v48, %v668_v54  ;;  %v13912_v39 = vcombine.high %v13893_v55, %v18794_v30 }
  0x31   : > { %v13916_v40 = vcombine.high %v13896_v58, %v18794_v30  ;;  %v13920_v41 = vcombine.high %v13899_v60, %v18794_v30  ;;  %v13924_v42 = vcombine.high %v13902_v61, %v18794_v30  ;;  %v13935_v49 = vrot.slane %v669_v27, %v13825_v44 }
  0x32   : > { %v13928_v47 = vcombine.high %v13905_v59, %v18794_v30  ;;  %v13932_v48 = vcombine.high %v13908_v26, %v18794_v30  ;;  %v13938_v50 = vrot.slane %v670_v28, %v13825_v44  ;;  %v691_v51 = vshrl.u32 %v439_v62, 16 }
  0x33   : > { %v692_v52 = vshrl.u32 %v473_v7, 16  ;;  %v13940_v56 = vpack.i.b16 %v481_v33, %v447_v31  ;;  %v699_v53 = vshrl.u32 %v447_v31, 16  ;;  %v13944_v54 = vcombine.high %v13935_v49, %v18794_v30 }
  0x34   : > { %v13948_v22 = vcombine.high %v13938_v50, %v18794_v30  ;;  %v700_v21 = vshrl.u32 %v481_v33, 16  ;;  %v13952_v27 = vpack.i.b16 %v13851_v23, %v13847_v63  ;;  %v707_v62 = vshrl.u32 %v13847_v63, 16 }
  0x35   : > { %19005 = vst [vmem:[#allocation30_spill] sm:$0xff] %v13940_v56  ;;  %v13954_v28 = vpack.i.b16 %v692_v52, %v691_v51  ;;  %v708_v7 = vshrl.u32 %v13851_v23, 16  ;;  %v13958_v31 = vpack.i.b16 %v482_v34, %v448_v32  ;;  %v715_v19 = vshrl.u32 %v448_v32, 16  ;;  %v13981_v52 = vld [vmem:[#allocation2 + $0x58] sm:$0xf] }
  0x36   : > { %19006 = vst [vmem:[#allocation31_spill] sm:$0xff] %v13952_v27  ;;  %v13960_v20 = vpack.i.b16 %v700_v21, %v699_v53  ;;  %v716_v18 = vshrl.u32 %v482_v34, 16  ;;  %v13963_v30 = vpack.i.b16 %v541_v37, %v13854_v24  ;;  %v723_v16 = vshrl.u32 %v13854_v24, 16  ;;  %v13979_v34 = vld [vmem:[#allocation2 + $0x54] sm:$0xf]  ;;  %19016 = vst [vmem:[#allocation41_spill] sm:$0xff] %v13981_v52 }
  0x37   : > { %19007 = vst [vmem:[#allocation32_spill] sm:$0xff] %v13954_v28  ;;  %19008 = vst [vmem:[#allocation33_spill] sm:$0xff] %v13958_v31  ;;  %v13965_v33 = vpack.i.b16 %v708_v7, %v707_v62  ;;  %v724_v15 = vshrl.u32 %v541_v37, 16  ;;  %v13969_v51 = vpack.i.b16 %v549_v45, %v13868_v35  ;;  %v731_v23 = vshrl.u32 %v13868_v35, 16  ;;  %v13993_v35 = vld [vmem:[#allocation2 + $0x60] sm:$0xf] }
  0x38   : > { %19009 = vst [vmem:[#allocation34_spill] sm:$0xff] %v13960_v20  ;;  %19010 = vst [vmem:[#allocation35_spill] sm:$0xff] %v13963_v30  ;;  %v13972_v63 = vpack.i.b16 %v716_v18, %v715_v19  ;;  %v732_v21 = vshrl.u32 %v549_v45, 16  ;;  %v13977_v32 = vpack.i.b16 %v13876_v38, %v13857_v25  ;;  %v739_v24 = vshrl.u32 %v13857_v25, 16  ;;  %v13991_v19 = vld [vmem:[#allocation2 + $0x5c] sm:$0xf] }
  0x39   : > { %19011 = vst [vmem:[#allocation36_spill] sm:$0xff] %v13965_v33  ;;  %19012 = vst [vmem:[#allocation37_spill] sm:$0xff] %v13969_v51  ;;  %v13983_v53 = vpack.i.b16 %v724_v15, %v723_v16  ;;  %v740_v37 = vshrl.u32 %v13876_v38, 16  ;;  %v13989_v18 = vpack.i.b16 %v13885_v46, %v13872_v36  ;;  %v747_v62 = vshrl.u32 %v13872_v36, 16  ;;  %v14003_v25 = vld [vmem:[#allocation2 + $0x64] sm:$0xf] }
  0x3a   : > { %19013 = vst [vmem:[#allocation38_spill] sm:$0xff] %v13972_v63  ;;  %19014 = vst [vmem:[#allocation39_spill] sm:$0xff] %v13977_v32  ;;  %v13995_v45 = vpack.i.b16 %v732_v21, %v731_v23  ;;  %v748_v15 = vshrl.u32 %v13885_v46, 16  ;;  %v14001_v16 = vpack.i.b16 %v13899_v60, %v13893_v55  ;;  %v14005_v38 = vld [vmem:[#allocation2 + $0x68] sm:$0xf]  ;;  %v756_v23 = vshrl.u32 %v13899_v60, 16 }
  0x3b   : > { %19015 = vst [vmem:[#allocation40_spill] sm:$0xff] %v13979_v34  ;;  %19017 = vst [vmem:[#allocation42_spill] sm:$0xff] %v13983_v53  ;;  %v14007_v7 = vpack.i.b16 %v740_v37, %v739_v24  ;;  %v14013_v36 = vpack.i.b16 %v13920_v41, %v13912_v39  ;;  %v14015_v46 = vld [vmem:[#allocation2 + $0x6c] sm:$0xf]  ;;  %v14017_v21 = vld [vmem:[#allocation2 + $0x70] sm:$0xf] }
  0x3c   : > { %19018 = vst [vmem:[#allocation43_spill] sm:$0xff] %v13989_v18  ;;  %19019 = vst [vmem:[#allocation44_spill] sm:$0xff] %v13991_v19  ;;  %v755_v19 = vshrl.u32 %v13893_v55, 16  ;;  %v763_v24 = vshrl.u32 %v13912_v39, 16  ;;  %v764_v37 = vshrl.u32 %v13920_v41, 16  ;;  %v14025_v55 = vpack.i.b16 %v13902_v61, %v13896_v58 }
  0x3d   : > { %19020 = vst [vmem:[#allocation45_spill] sm:$0xff] %v13993_v35  ;;  %19021 = vst [vmem:[#allocation46_spill] sm:$0xff] %v13995_v45  ;;  %v13217_v60 = vld [vmem:[%s13835_s10 + $0x100] ss:$16 sps:$4 sm:$0xff]   ;;  %v14030_v35 = vld [vmem:[#allocation2 + $0x78] sm:$0xf]  ;;  %v14038_v41 = vpack.i.b16 %v13924_v42, %v13916_v40 }
  0x3e   : > { %19022 = vst [vmem:[#allocation47_spill] sm:$0xff] %v14001_v16  ;;  %19023 = vst [vmem:[#allocation48_spill] sm:$0xff] %v14003_v25  ;;  %v14019_v25 = vpack.i.b16 %v748_v15, %v747_v62  ;;  %v771_v62 = vshrl.u32 %v13896_v58, 16  ;;  %v772_v39 = vshrl.u32 %v13902_v61, 16  ;;  %v13218_v15 = vld [vmem:[%s13835_s10 + $0x108] ss:$16 sps:$4 sm:$0xff]   ;;  %v14047_v34 = vpack.i.b16 %v764_v37, %v763_v24 }
  0x3f   : > { %19024 = vst [vmem:[#allocation49_spill] sm:$0xff] %v14005_v38  ;;  %19025 = vst [vmem:[#allocation50_spill] sm:$0xff] %v14007_v7  ;;  %v14028_v38 = vld [vmem:[#allocation2 + $0x74] sm:$0xf]  ;;  %v14043_v52 = vld [vmem:[#allocation2 + $0x7c] sm:$0xf]  ;;  %v14053_v58 = vpack.i.b16 %v13935_v49, %v13905_v59 }
  0x40   : > { %19026 = vst [vmem:[#allocation51_spill] sm:$0xff] %v14013_v36  ;;  %19027 = vst [vmem:[#allocation52_spill] sm:$0xff] %v14015_v46  ;;  %v14032_v46 = vpack.i.b16 %v756_v23, %v755_v19  ;;  %v779_v19 = vshrl.u32 %v13916_v40, 16  ;;  %v780_v23 = vshrl.u32 %v13924_v42, 16  ;;  %v13221_v61 = vld [vmem:[%s13835_s10 + $0x120] ss:$16 sps:$4 sm:$0xff]   ;;  %v14068_v42 = vpack.i.b16 %v13944_v54, %v13928_v47 }
  0x41   : > { %19028 = vst [vmem:[#allocation53_spill] sm:$0xff] %v14017_v21  ;;  %19029 = vst [vmem:[#allocation54_spill] sm:$0xff] %v14019_v25  ;;  %v13219_v21 = vld [vmem:[%s13835_s10 + $0x104] ss:$16 sps:$4 sm:$0xff]   ;;  %v14060_v36 = vld [vmem:[#allocation3 + $0x8] sm:$0xf] }
  0x42   : > { %19030 = vst [vmem:[#allocation55_spill] sm:$0xff] %v14025_v55  ;;  %19031 = vst [vmem:[#allocation56_spill] sm:$0xff] %v14028_v38  ;;  %v13220_v55 = vld [vmem:[%s13835_s10 + $0x10c] ss:$16 sps:$4 sm:$0xff]   ;;  %v14045_v38 = vld [vmem:[#allocation3] sm:$0xf] }
  0x43   : > { %19032 = vst [vmem:[#allocation57_spill] sm:$0xff] %v14030_v35  ;;  %19033 = vst [vmem:[#allocation58_spill] sm:$0xff] %v14032_v46  ;;  %v13222_v35 = vld [vmem:[%s13835_s10 + $0x128] ss:$16 sps:$4 sm:$0xff]   ;;  %v14058_v46 = vld [vmem:[#allocation3 + $0x4] sm:$0xf] }
  0x44   : > { %19034 = vst [vmem:[#allocation59_spill] sm:$0xff] %v14038_v41  ;;  %19035 = vst [vmem:[#allocation60_spill] sm:$0xff] %v14043_v52  ;;  %v13223_v41 = vld [vmem:[%s13835_s10 + $0x124] ss:$16 sps:$4 sm:$0xff]   ;;  %v14062_v52 = vpack.i.b16 %v772_v39, %v771_v62  ;;  %v787_v24 = vshrl.u32 %v13905_v59, 16  ;;  %v788_v40 = vshrl.u32 %v13935_v49, 16  ;;  %v14080_v62 = vpack.i.b16 %v13938_v50, %v13908_v26 }
  0x45   : > { %19036 = vst [vmem:[#allocation61_spill] sm:$0xff] %v14045_v38  ;;  %19037 = vst [vmem:[#allocation62_spill] sm:$0xff] %v14047_v34  ;;  %v14070_v37 = vld [vmem:[#allocation3 + $0xc] sm:$0xf]  ;;  %v14072_v38 = vld [vmem:[#allocation3 + $0x10] sm:$0xf] }
  0x46   : > { %19038 = vst [vmem:[#allocation63_spill] sm:$0xff] %v14053_v58  ;;  %19039 = vst [vmem:[#allocation64_spill] sm:$0xff] %v14058_v46  ;;  %v14074_v58 = vpack.i.b16 %v780_v23, %v779_v19  ;;  %v795_v46 = vshrl.u32 %v13928_v47, 16  ;;  %v13224_v59 = vld [vmem:[%s13835_s10 + $0x12c] ss:$16 sps:$4 sm:$0xff]   ;;  %v804_v19 = vshrl.u32 %v13938_v50, 16  ;;  %v14093_v47 = vpack.i.b16 %v13948_v22, %v13932_v48 }
  0x47   : > { %19040 = vst [vmem:[#allocation65_spill] sm:$0xff] %v14060_v36  ;;  %19041 = vst [vmem:[#allocation66_spill] sm:$0xff] %v14062_v52  ;;  %v796_v36 = vshrl.u32 %v13944_v54, 16  ;;  %v14083_v49 = vld [vmem:[#allocation3 + $0x14] sm:$0xf] }
  0x48   : > { %19042 = vst [vmem:[#allocation67_spill] sm:$0xff] %v14068_v42  ;;  %19043 = vst [vmem:[#allocation68_spill] sm:$0xff] %v14070_v37  ;;  %v14085_v39 = vld [vmem:[#allocation3 + $0x18] sm:$0xf]  ;;  %v14087_v42 = vpack.i.b16 %v788_v40, %v787_v24  ;;  %v14095_v54 = vld [vmem:[#allocation3 + $0x1c] sm:$0xf]  ;;  %v854_v40 = vrot.slane %v13217_v60, %v13808_v29 }
  0x49   : > { %19044 = vst [vmem:[#allocation69_spill] sm:$0xff] %v14072_v38  ;;  %19045 = vst [vmem:[#allocation70_spill] sm:$0xff] %v14074_v58  ;;  %v803_v38 = vshrl.u32 %v13908_v26, 16  ;;  %v14097_v23 = vld [vmem:[#allocation3 + $0x20] sm:$0xf]  ;;  %v14099_v37 = vpack.i.b16 %v796_v36, %v795_v46  ;;  %v812_v24 = vshrl.u32 %v13948_v22, 16 }
  0x4a   : > { %19046 = vst [vmem:[#allocation71_spill] sm:$0xff] %v14080_v62  ;;  %19047 = vst [vmem:[#allocation72_spill] sm:$0xff] %v14083_v49  ;;  %v811_v49 = vshrl.u32 %v13932_v48, 16  ;;  %v14106_v26 = vld [vmem:[#allocation3 + $0x28] sm:$0xf] }
  0x4b   : > { %19048 = vst [vmem:[#allocation73_spill] sm:$0xff] %v14085_v39  ;;  %19049 = vst [vmem:[#allocation74_spill] sm:$0xff] %v14087_v42  ;;  %v14104_v39 = vld [vmem:[#allocation3 + $0x24] sm:$0xf]  ;;  %v14108_v50 = vpack.i.b16 %v804_v19, %v803_v38  ;;  %v13225_v36 = vld [vmem:[%s13835_s10 + $0x140] ss:$16 sps:$4 sm:$0xff]   ;;  %v922_v38 = vrot.slane %v13221_v61, %v13808_v29 }
  0x4c   : > { %19050 = vst [vmem:[#allocation75_spill] sm:$0xff] %v14093_v47  ;;  %19051 = vst [vmem:[#allocation76_spill] sm:$0xff] %v14095_v54  ;;  %v862_v47 = vrot.slane %v13218_v15, %v13808_v29  ;;  %v888_v54 = vrot.slane %v13219_v21, %v13808_v29  ;;  %v14114_v48 = vld [vmem:[#allocation3 + $0x2c] sm:$0xf]  ;;  %v14116_v22 = vld [vmem:[#allocation3 + $0x30] sm:$0xf]  ;;  %v14120_v60 = vpack.i.b16 %v812_v24, %v811_v49 }
  0x4d   : > { %19052 = vst [vmem:[#allocation77_spill] sm:$0xff] %v14097_v23  ;;  %19053 = vst [vmem:[#allocation78_spill] sm:$0xff] %v14099_v37  ;;  %v896_v23 = vrot.slane %v13220_v55, %v13808_v29  ;;  %v14118_v46 = vld [vmem:[#allocation3 + $0x34] sm:$0xf]  ;;  %v930_v15 = vrot.slane %v13222_v35, %v13808_v29  ;;  %v956_v21 = vrot.slane %v13223_v41, %v13808_v29  ;;  %v14125_v55 = vld [vmem:[#allocation3 + $0x38] sm:$0xf] }
  0x4e   : > { %19054 = vst [vmem:[#allocation79_spill] sm:$0xff] %v14104_v39  ;;  %19055 = vst [vmem:[#allocation80_spill] sm:$0xff] %v14106_v26  ;;  %v14127_v19 = vld [vmem:[#allocation3 + $0x3c] sm:$0xf]  ;;  %v864_v26 = vcombine.high %v854_v40, %v862_v47  ;;  %v13226_v24 = vld [vmem:[%s13835_s10 + $0x148] ss:$16 sps:$4 sm:$0xff]  }
  0x4f   : > { %19056 = vst [vmem:[#allocation81_spill] sm:$0xff] %v14108_v50  ;;  %19057 = vst [vmem:[#allocation82_spill] sm:$0xff] %v14114_v48  ;;  %v14129_v48 = vld [vmem:[#allocation3 + $0x40] sm:$0xf]  ;;  %v898_v49 = vcombine.high %v888_v54, %v896_v23  ;;  %v13227_v39 = vld [vmem:[%s13835_s10 + $0x144] ss:$16 sps:$4 sm:$0xff]   ;;  %v932_v50 = vcombine.high %v922_v38, %v930_v15 }
  0x50   : > { %19058 = vst [vmem:[#allocation83_spill] sm:$0xff] %v14116_v22  ;;  %19059 = vst [vmem:[#allocation84_spill] sm:$0xff] %v14118_v46  ;;  %v863_v22 = vcombine.low %v854_v40, %v862_v47  ;;  %v897_v46 = vcombine.low %v888_v54, %v896_v23  ;;  %v13228_v61 = vld [vmem:[%s13835_s10 + $0x14c] ss:$16 sps:$4 sm:$0xff]   ;;  %v14135_v35 = vld [vmem:[#allocation3 + $0x44] sm:$0xf]  ;;  %v1252_v47 = vstv %s11733_s11 }
  0x51   : > { %19060 = vst [vmem:[#allocation85_spill] sm:$0xff] %v14120_v60  ;;  %19061 = vst [vmem:[#allocation86_spill] sm:$0xff] %v14125_v55  ;;  %v13229_v60 = vld [vmem:[%s13835_s10 + $0x160] ss:$16 sps:$4 sm:$0xff]   ;;  %v14137_v41 = vld [vmem:[#allocation3 + $0x48] sm:$0xf] }
  0x52   : > { %19062 = vst [vmem:[#allocation87_spill] sm:$0xff] %v14127_v19  ;;  %19063 = vst [vmem:[#allocation88_spill] sm:$0xff] %v14129_v48  ;;  %v14139_v55 = vld [vmem:[#allocation3 + $0x4c] sm:$0xf]  ;;  %v931_v19 = vcombine.low %v922_v38, %v930_v15  ;;  %v964_v48 = vrot.slane %v13224_v59, %v13808_v29  ;;  %v13230_v37 = vld [vmem:[%s13835_s10 + $0x168] ss:$16 sps:$4 sm:$0xff]   ;;  %v14159_v38 = vrot.slane %v897_v46, %v13825_v44 }
  0x53   : > { %19064 = vst [vmem:[#allocation89_spill] sm:$0xff] %v14135_v35  ;;  %19065 = vst [vmem:[#allocation90_spill] sm:$0xff] %v14137_v41  ;;  %v13231_v62 = vld [vmem:[%s13835_s10 + $0x164] ss:$16 sps:$4 sm:$0xff]   ;;  %v14146_v40 = vld [vmem:[#allocation3 + $0x50] sm:$0xf]  ;;  %v14153_v35 = vrot.slane %v863_v22, %v13825_v44  ;;  %v14156_v41 = vrot.slane %v864_v26, %v13825_v44  ;;  %v14162_v59 = vrot.slane %v898_v49, %v13825_v44 }
  0x54   : > { %19066 = vst [vmem:[#allocation91_spill] sm:$0xff] %v14139_v55  ;;  %19067 = vst [vmem:[#allocation92_spill] sm:$0xff] %v14146_v40  ;;  %v14148_v54 = vld [vmem:[#allocation3 + $0x54] sm:$0xf]  ;;  %v14150_v23 = vld [vmem:[#allocation3 + $0x58] sm:$0xf]  ;;  %v965_v22 = vcombine.low %v956_v21, %v964_v48  ;;  %v1066_v25 = vrot.slane %v13230_v37, %v13808_v29  ;;  %v1092_v16 = vrot.slane %v13231_v62, %v13808_v29 }
  0x55   : > { %19068 = vst [vmem:[#allocation93_spill] sm:$0xff] %v14148_v54  ;;  %19069 = vst [vmem:[#allocation94_spill] sm:$0xff] %v14150_v23  ;;  %v14164_v15 = vld [vmem:[#allocation3 + $0x5c] sm:$0xf]  ;;  %v14166_v55 = vld [vmem:[#allocation3 + $0x60] sm:$0xf]  ;;  %v14171_v23 = vrot.slane %v931_v19, %v13825_v44  ;;  %v966_v54 = vcombine.high %v956_v21, %v964_v48  ;;  %v14188_v19 = vadd.s32 %v1252_v47, %v13822_v43 }
  0x56   : > { %19070 = vst [vmem:[#allocation95_spill] sm:$0xff] %v14164_v15  ;;  %19071 = vst [vmem:[#allocation96_spill] sm:$0xff] %v14166_v55  ;;  %v14168_v40 = vld [vmem:[#allocation3 + $0x64] sm:$0xf]  ;;  %v14173_v26 = vld [vmem:[#allocation3 + $0x68] sm:$0xf]  ;;  %v14184_v55 = vrot.slane %v932_v50, %v13825_v44  ;;  %v14218_v52 = vrot.slane %v965_v22, %v13825_v44  ;;  %v1137_v6 = vpack.i.b16 %v14162_v59, %v14156_v41 }
  0x57   : > { %19072 = vst [vmem:[#allocation97_spill] sm:$0xff] %v14168_v40  ;;  %19073 = vst [vmem:[#allocation98_spill] sm:$0xff] %v14173_v26  ;;  %v14175_v42 = vld [vmem:[#allocation3 + $0x6c] sm:$0xf]  ;;  %v14177_v46 = vld [vmem:[#allocation3 + $0x70] sm:$0xf]  ;;  %v990_v40 = vrot.slane %v13225_v36, %v13808_v29  ;;  %v1058_v26 = vrot.slane %v13229_v60, %v13808_v29  ;;  %v14221_v34 = vrot.slane %v966_v54, %v13825_v44 }
  0x58   : > { %19074 = vst [vmem:[#allocation99_spill] sm:$0xff] %v14175_v42  ;;  %19075 = vst [vmem:[#allocation100_spill] sm:$0xff] %v14177_v46  ;;  %v19076_v49 = vmov 0   ;;  %v14190_v15 = vld [vmem:[#allocation3 + $0x74] sm:$0xf]  ;;  %v1139_v8 = vshrl.u32 %v14156_v41, 16  ;;  %v1153_v2 = vpack.i.b16 %v14218_v52, %v14171_v23 }
  0x59   : > { %v14181_v58 = vcombine.high %v14153_v35, %v19076_v49  ;;  %19077 = vst [vmem:[#allocation101_spill] sm:$0xff] %v14190_v15  ;;  %v14192_v48 = vld [vmem:[#allocation3 + $0x78] sm:$0xf]  ;;  %v14194_v21 = vld [vmem:[#allocation3 + $0x7c] sm:$0xf]  ;;  %v14198_v46 = vcombine.high %v14156_v41, %v19076_v49  ;;  %v14202_v42 = vcombine.high %v14159_v38, %v19076_v49  ;;  %v14206_v50 = vcombine.high %v14162_v59, %v19076_v49 }
  0x5a   : > { %19078 = vst [vmem:[#allocation102_spill] sm:$0xff] %v14192_v48  ;;  %19079 = vst [vmem:[#allocation103_spill] sm:$0xff] %v14194_v21  ;;  %v14210_v36 = vcombine.high %v14171_v23, %v19076_v49  ;;  %v13232_v47 = vld [vmem:[%s13835_s10 + $0x16c] ss:$16 sps:$4 sm:$0xff]   ;;  %v998_v48 = vrot.slane %v13226_v24, %v13808_v29  ;;  %v1024_v21 = vrot.slane %v13227_v39, %v13808_v29  ;;  %v1140_v45 = vshrl.u32 %v14162_v59, 16 }
  0x5b   : > { %v1032_v15 = vrot.slane %v13228_v61, %v13808_v29  ;;  %v14227_v39 = vcombine.high %v14184_v55, %v19076_v49  ;;  %v1067_v61 = vcombine.low %v1058_v26, %v1066_v25  ;;  %v1068_v60 = vcombine.high %v1058_v26, %v1066_v25 }
  0x5c   : > { %v999_v14 = vcombine.low %v990_v40, %v998_v48  ;;  %v1000_v13 = vcombine.high %v990_v40, %v998_v48  ;;  %v1100_v22 = vrot.slane %v13232_v47, %v13808_v29  ;;  %v1131_v48 = vshrl.u32 %v14181_v58, 16 }
  0x5d   : > { %v1033_v12 = vcombine.low %v1024_v21, %v1032_v15  ;;  %v1034_v24 = vcombine.high %v1024_v21, %v1032_v15  ;;  %v14243_v40 = vrot.slane %v1067_v61, %v13825_v44  ;;  %v14246_v15 = vrot.slane %v1068_v60, %v13825_v44 }
  0x5e   : > { %v14231_v7 = vrot.slane %v999_v14, %v13825_v44  ;;  %v14234_v54 = vrot.slane %v1000_v13, %v13825_v44  ;;  %v1101_v25 = vcombine.low %v1092_v16, %v1100_v22  ;;  %v1102_v26 = vcombine.high %v1092_v16, %v1100_v22 }
  0x5f   : > { %v14237_v37 = vrot.slane %v1033_v12, %v13825_v44  ;;  %v14240_v62 = vrot.slane %v1034_v24, %v13825_v44  ;;  %v14250_v14 = vcombine.high %v14218_v52, %v19076_v49  ;;  %v14254_v13 = vcombine.high %v14221_v34, %v19076_v49 }
  0x60   : > { %v14258_v12 = vcombine.high %v14231_v7, %v19076_v49  ;;  %v14264_v21 = vcombine.high %v14234_v54, %v19076_v49  ;;  %v14271_v47 = vrot.slane %v1101_v25, %v13825_v44  ;;  %v14274_v24 = vrot.slane %v1102_v26, %v13825_v44 }
  0x61   : > { %v14268_v16 = vcombine.high %v14237_v37, %v19076_v49  ;;  %v14278_v61 = vcombine.high %v14240_v62, %v19076_v49  ;;  %v1123_v60 = vshrl.u32 %v14153_v35, 16  ;;  %v1124_v22 = vshrl.u32 %v14159_v38, 16 }
  0x62   : > { %v14285_v18 = vcombine.high %v14243_v40, %v19076_v49  ;;  %v14289_v25 = vcombine.high %v14246_v15, %v19076_v49  ;;  %v1132_v11 = vshrl.u32 %v14202_v42, 16  ;;  %v14296_v10 = vcombine.high %v14271_v47, %v19076_v49 }
  0x63   : > { %v14300_v9 = vcombine.high %v14274_v24, %v19076_v49  ;;  %v1125_v32 = vpack.i.b16 %v1124_v22, %v1123_v60  ;;  %v1147_v26 = vshrl.u32 %v14198_v46, 16  ;;  %v1148_v5 = vshrl.u32 %v14206_v50, 16 }
  0x64   : > { %v1133_v4 = vpack.i.b16 %v1132_v11, %v1131_v48  ;;  %v1145_v3 = vpack.i.b16 %v14206_v50, %v14198_v46  ;;  %v1155_v51 = vshrl.u32 %v14171_v23, 16  ;;  %v1156_v49 = vshrl.u32 %v14218_v52, 16 }
  0x65   : > { %v1141_v53 = vpack.i.b16 %v1140_v45, %v1139_v8  ;;  %v1163_v60 = vshrl.u32 %v14210_v36, 16  ;;  %v1164_v41 = vshrl.u32 %v14250_v14, 16  ;;  %v1149_v59 = vpack.i.b16 %v1148_v5, %v1147_v26 }
  0x66   : > { %v1161_v22 = vpack.i.b16 %v14250_v14, %v14210_v36  ;;  %v1171_v11 = vshrl.u32 %v14184_v55, 16  ;;  %v1172_v46 = vshrl.u32 %v14221_v34, 16  ;;  %v1157_v50 = vpack.i.b16 %v1156_v49, %v1155_v51 }
  0x67   : > { %v1169_v48 = vpack.i.b16 %v14221_v34, %v14184_v55  ;;  %v1179_v8 = vshrl.u32 %v14227_v39, 16  ;;  %v1180_v52 = vshrl.u32 %v14254_v13, 16  ;;  %v1165_v45 = vpack.i.b16 %v1164_v41, %v1163_v60 }
  0x68   : > { %v1177_v23 = vpack.i.b16 %v14254_v13, %v14227_v39  ;;  %v1187_v5 = vshrl.u32 %v14231_v7, 16  ;;  %v1188_v36 = vshrl.u32 %v14237_v37, 16  ;;  %v1173_v14 = vpack.i.b16 %v1172_v46, %v1171_v11 }
  0x69   : > { %v1185_v26 = vpack.i.b16 %v14237_v37, %v14231_v7  ;;  %v1195_v51 = vshrl.u32 %v14258_v12, 16  ;;  %v1196_v34 = vshrl.u32 %v14268_v16, 16  ;;  %v1181_v55 = vpack.i.b16 %v1180_v52, %v1179_v8 }
  0x6a   : > { %v1193_v49 = vpack.i.b16 %v14268_v16, %v14258_v12  ;;  %v1203_v60 = vshrl.u32 %v14234_v54, 16  ;;  %v1204_v39 = vshrl.u32 %v14240_v62, 16  ;;  %v1189_v13 = vpack.i.b16 %v1188_v36, %v1187_v5 }
  0x6b   : > { %v1201_v41 = vpack.i.b16 %v14240_v62, %v14234_v54  ;;  %v1211_v11 = vshrl.u32 %v14264_v21, 16  ;;  %v1212_v7 = vshrl.u32 %v14278_v61, 16  ;;  %v1197_v37 = vpack.i.b16 %v1196_v34, %v1195_v51 }
  0x6c   : > { %v1209_v46 = vpack.i.b16 %v14278_v61, %v14264_v21  ;;  %v1219_v8 = vshrl.u32 %v14243_v40, 16  ;;  %v1220_v12 = vshrl.u32 %v14271_v47, 16  ;;  %v1205_v16 = vpack.i.b16 %v1204_v39, %v1203_v60 }
  0x6d   : > { %v1217_v52 = vpack.i.b16 %v14271_v47, %v14243_v40  ;;  %v1227_v5 = vshrl.u32 %v14285_v18, 16  ;;  %v1228_v54 = vshrl.u32 %v14296_v10, 16  ;;  %v1213_v62 = vpack.i.b16 %v1212_v7, %v1211_v11 }
  0x6e   : > { %v1225_v36 = vpack.i.b16 %v14296_v10, %v14285_v18  ;;  %v1235_v51 = vshrl.u32 %v14246_v15, 16  ;;  %v1236_v21 = vshrl.u32 %v14274_v24, 16  ;;  %v1233_v61 = vpack.i.b16 %v14274_v24, %v14246_v15 }
  0x6f   : > { %v1243_v34 = vshrl.u32 %v14289_v25, 16  ;;  %v1244_v60 = vshrl.u32 %v14300_v9, 16  ;;  %vm1254_vm0 = vcmp.lt.s32.totalorder %v14188_v19, 16  ;;  %v1221_v40 = vpack.i.b16 %v1220_v12, %v1219_v8 }
  0x70   : > { %v1229_v47 = vpack.i.b16 %v1228_v54, %v1227_v5  ;;  %v1237_v39 = vpack.i.b16 %v1236_v21, %v1235_v51  ;;  %v1241_v11 = vpack.i.b16 %v14300_v9, %v14289_v25  ;;  %vm14359_vm1 = vmpackc.low %vm1254_vm0, %vm1254_vm0  ;;  %v19082_v15 = vpack.i.b16 %v14159_v38, %v14153_v35 }
  0x71   : > { %v1245_v18 = vpack.i.b16 %v1244_v60, %v1243_v34  ;;  %v14372_v19 = vsel %vm14359_vm1, %v1125_v32, 0  ;;  %v19085_v7 = vpack.i.b16 %v14202_v42, %v14181_v58  ;;  %v14383_v25 = vsel %vm14359_vm1, %v1133_v4, 0 }
  0x72   : > { %v14368_v24 = vsel %vm14359_vm1, %v19082_v15, 0  ;;  %19084 = vst [vmem:[#allocation105_spill] sm:$0xff] %v14372_v19  ;;  %19087 = vst [vmem:[#allocation107_spill] sm:$0xff] %v14383_v25  ;;  %v14387_v35 = vsel %vm14359_vm1, %v1137_v6, 0  ;;  %v14391_v38 = vsel %vm14359_vm1, %v1141_v53, 0  ;;  %v14395_v32 = vsel %vm14359_vm1, %v1145_v3, 0 }
  0x73   : > { %19083 = vst [vmem:[#allocation104_spill] sm:$0xff] %v14368_v24  ;;  %v14379_v9 = vsel %vm14359_vm1, %v19085_v7, 0  ;;  %19088 = vst [vmem:[#allocation108_spill] sm:$0xff] %v14387_v35  ;;  %v14399_v58 = vsel %vm14359_vm1, %v1149_v59, 0  ;;  %v14403_v4 = vsel %vm14359_vm1, %v1153_v2, 0  ;;  %v14407_v6 = vsel %vm14359_vm1, %v1157_v50, 0 }
  0x74   : > { %19086 = vst [vmem:[#allocation106_spill] sm:$0xff] %v14379_v9  ;;  %19089 = vst [vmem:[#allocation109_spill] sm:$0xff] %v14391_v38  ;;  %v14411_v53 = vsel %vm14359_vm1, %v1161_v22, 0  ;;  %v14415_v3 = vsel %vm14359_vm1, %v1165_v45, 0  ;;  %v14419_v42 = vsel %vm14359_vm1, %v1169_v48, 0  ;;  %v14423_v2 = vsel %vm14359_vm1, %v1173_v14, 0 }
  0x75   : > { %19090 = vst [vmem:[#allocation110_spill] sm:$0xff] %v14395_v32  ;;  %19091 = vst [vmem:[#allocation111_spill] sm:$0xff] %v14399_v58  ;;  %v14427_v59 = vsel %vm14359_vm1, %v1177_v23, 0  ;;  %v14431_v22 = vsel %vm14359_vm1, %v1181_v55, 0  ;;  %v14435_v50 = vsel %vm14359_vm1, %v1185_v26, 0  ;;  %v14439_v48 = vsel %vm14359_vm1, %v1189_v13, 0 }
  0x76   : > { %19092 = vst [vmem:[#allocation112_spill] sm:$0xff] %v14403_v4  ;;  %19093 = vst [vmem:[#allocation113_spill] sm:$0xff] %v14407_v6  ;;  %v14443_v45 = vsel %vm14359_vm1, %v1193_v49, 0  ;;  %v14447_v23 = vsel %vm14359_vm1, %v1197_v37, 0  ;;  %v14451_v14 = vsel %vm14359_vm1, %v1201_v41, 0  ;;  %v14455_v26 = vsel %vm14359_vm1, %v1205_v16, 0 }
  0x77   : > { %19094 = vst [vmem:[#allocation114_spill] sm:$0xff] %v14411_v53  ;;  %19095 = vst [vmem:[#allocation115_spill] sm:$0xff] %v14415_v3  ;;  %v14459_v55 = vsel %vm14359_vm1, %v1209_v46, 0  ;;  %v14463_v49 = vsel %vm14359_vm1, %v1213_v62, 0  ;;  %v14467_v13 = vsel %vm14359_vm1, %v1217_v52, 0  ;;  %v14471_v41 = vsel %vm14359_vm1, %v1221_v40, 0 }
  0x78   : > { %19096 = vst [vmem:[#allocation116_spill] sm:$0xff] %v14419_v42  ;;  %19097 = vst [vmem:[#allocation117_spill] sm:$0xff] %v14423_v2  ;;  %v14475_v37 = vsel %vm14359_vm1, %v1225_v36, 0  ;;  %v14479_v46 = vsel %vm14359_vm1, %v1229_v47, 0  ;;  %v14483_v8 = vsel %vm14359_vm1, %v1233_v61, 0  ;;  %v14487_v12 = vsel %vm14359_vm1, %v1237_v39, 0 }
  0x79   : > { %19098 = vst [vmem:[#allocation118_spill] sm:$0xff] %v14427_v59  ;;  %19099 = vst [vmem:[#allocation119_spill] sm:$0xff] %v14431_v22  ;;  %v14491_v16 = vsel %vm14359_vm1, %v1241_v11, 0  ;;  %v14495_v52 = vsel %vm14359_vm1, %v1245_v18, 0 }
  0x7a   : > { %19100 = vst [vmem:[#allocation120_spill] sm:$0xff] %v14435_v50  ;;  %19101 = vst [vmem:[#allocation121_spill] sm:$0xff] %v14439_v48 }
  0x7b   : > { %19102 = vst [vmem:[#allocation122_spill] sm:$0xff] %v14443_v45  ;;  %19103 = vst [vmem:[#allocation123_spill] sm:$0xff] %v14447_v23  ;;  %1357 = sbr.rel (%p11734_p7) target bundleno = 2141 (0x85d), region = 36 }
  0x7c   : > { %19104 = vst [vmem:[#allocation124_spill] sm:$0xff] %v14451_v14  ;;  %19105 = vst [vmem:[#allocation125_spill] sm:$0xff] %v14455_v26 }
  0x7d   : > { %19106 = vst [vmem:[#allocation126_spill] sm:$0xff] %v14459_v55  ;;  %19107 = vst [vmem:[#allocation127_spill] sm:$0xff] %v14463_v49 }
  0x7e   : > { %19108 = vst [vmem:[#allocation128_spill] sm:$0xff] %v14467_v13  ;;  %19109 = vst [vmem:[#allocation129_spill] sm:$0xff] %v14471_v41 }
  0x7f   : > { %19110 = vst [vmem:[#allocation130_spill] sm:$0xff] %v14475_v37  ;;  %19111 = vst [vmem:[#allocation131_spill] sm:$0xff] %v14479_v46 }
  0x80   : > { %19112 = vst [vmem:[#allocation132_spill] sm:$0xff] %v14483_v8  ;;  %19113 = vst [vmem:[#allocation133_spill] sm:$0xff] %v14487_v12 }
  0x81   : > { %19114 = vst [vmem:[#allocation134_spill] sm:$0xff] %v14491_v16  ;;  %19115 = vst [vmem:[#allocation135_spill] sm:$0xff] %v14495_v52 }
  0x82   : > { %v13233_v5 = vld [vmem:[%s13772_s29] ss:$16 sps:$4 sm:$0xff]   ;;  %v13234_v54 = vld [vmem:[%s13772_s29 + $0x8] ss:$16 sps:$4 sm:$0xff]   ;;  %v13235_v62 = vld [vmem:[%s13772_s29 + $0x4] ss:$16 sps:$4 sm:$0xff]  }
  0x83   : > { %v13236_v36 = vld [vmem:[%s13772_s29 + $0xc] ss:$16 sps:$4 sm:$0xff]   ;;  %v1399_v51 = vrot.slane %v13233_v5, %v13808_v29  ;;  %v6121_v21 = vadd.s32 8, %v13787_v17  ;;  %s11735_s13 = sadd.s32 4294967295, %s13655_s12  ;;  %v1407_v61 = vrot.slane %v13234_v54, %v13808_v29  ;;  %v1433_v34 = vrot.slane %v13235_v62, %v13808_v29  ;;  %v13237_v16 = vld [vmem:[%s13772_s29 + $0x20] ss:$16 sps:$4 sm:$0xff]  }
  0x84   : > { %v1441_v60 = vrot.slane %v13236_v36, %v13808_v29  ;;  %vm6129_vm2 = vcmp.ge.s32.totalorder %v13822_v43, 2  ;;  %s11736_s19 = sshll.u32 %s11735_s13, 4  ;;  %v18796_v18 = vmov 0   ;;  %v13238_v46 = vld [vmem:[%s13772_s29 + $0x28] ss:$16 sps:$4 sm:$0xff]   ;;  %vm2745_vm12 = vcmask 1043456  }
  0x85   : > { %v14509_v40 = vstv %s11736_s19  ;;  %s11929_s20 = sadd.s32 4294967294, %s11736_s19  ;;  %v1408_v47 = vcombine.low %v1399_v51, %v1407_v61  ;;  %v1409_v11 = vcombine.high %v1399_v51, %v1407_v61  ;;  %v6130_v15 = vsel %vm6129_vm2, 16, %v18796_v18  ;;  %v13239_v41 = vld [vmem:[%s13772_s29 + $0x24] ss:$16 sps:$4 sm:$0xff]   ;;  %v13240_v13 = vld [vmem:[%s13772_s29 + $0x2c] ss:$16 sps:$4 sm:$0xff]  }
  0x86   : > { %v1442_v39 = vcombine.low %v1433_v34, %v1441_v60  ;;  %v1443_v10 = vcombine.high %v1433_v34, %v1441_v60  ;;  %v6123_v7 = vadd.s32 %v14509_v40, %v13787_v17  ;;  %v6124_v5 = vadd.s32 %v14509_v40, %v6121_v21  ;;  %v13242_v26 = vld [vmem:[%s13772_s29 + $0x48] ss:$16 sps:$4 sm:$0xff]   ;;  %v13243_v14 = vld [vmem:[%s13772_s29 + $0x44] ss:$16 sps:$4 sm:$0xff]   ;;  %v13244_v23 = vld [vmem:[%s13772_s29 + $0x4c] ss:$16 sps:$4 sm:$0xff]  }
  0x87   : > { %v6127_v54 = vstv %s11929_s20  ;;  %v1416_v62 = vrot.slane %v1408_v47, %v13825_v44  ;;  %v1423_v52 = vrot.slane %v1409_v11, %v13825_v44  ;;  %v19116_v47 = vmov 0   ;;  %p1792_p8 = scmp.ge.s32.totalorder %s13655_s12, 2  ;;  %s13679_s12 = smov 114   ;;  %v1815_v42 = vld [vmem:[#allocation4 + $0x58] sm:$0xf] }
  0x88   : > { %v1450_v36 = vrot.slane %v1442_v39, %v13825_v44  ;;  %v1457_v51 = vrot.slane %v1443_v10, %v13825_v44  ;;  %v6128_v61 = vadd.s32 %v6127_v54, %v13822_v43  ;;  %v14520_v34 = vadd.s32 4294967294, %v6123_v7  ;;  %s13680_s22 = smov 2   ;;  %v1814_v3 = vld [vmem:[#allocation4 + $0x54] sm:$0xf]  ;;  %v19162_v6 = vld [vmem:[#allocation45_spill] sm:$0xff] }
  0x89   : > { %v14522_v60 = vadd.s32 4294967294, %v6124_v5  ;;  %v1668_v21 = vshrl.u32 %v1416_v62, 16  ;;  %v1424_v12 = vcombine.high %v1416_v62, %v19116_v47  ;;  %v14527_v10 = vadd.s32 2, %v6123_v7  ;;  %s1825_s21 = scalar_select %p1792_p8, 1, 0 }
  0x8a   : > { %v1666_v17 = vpack.i.b16 %v1450_v36, %v1416_v62  ;;  %v1669_v18 = vshrl.u32 %v1450_v36, 16  ;;  %v1458_v39 = vcombine.high %v1450_v36, %v19116_v47  ;;  %v6131_v11 = vadd.s32 %v6130_v15, %v6128_v61  ;;  %v1821_v19 = vld [vmem:[#allocation4 + $0x70] sm:$0xf]  ;;  %v1820_v24 = vld [vmem:[#allocation4 + $0x6c] sm:$0xf] }
  0x8b   : > { %v1682_v8 = vpack.i.b16 %v1457_v51, %v1423_v52  ;;  %v14529_v54 = vadd.s32 2, %v6124_v5  ;;  %v1684_v15 = vshrl.u32 %v1423_v52, 16  ;;  %v1685_v7 = vshrl.u32 %v1457_v51, 16 }
  0x8c   : > { %2725 = vxpose.xlu0.c.b16.start.end [1/1] (short) (narrow) %v1666_v17, 16  ;;  %v1674_v37 = vpack.i.b16 %v1458_v39, %v1424_v12  ;;  %vm6145_vm3 = vcmp.ge.s32.totalorder %v6131_v11, %v14520_v34  ;;  %vm6146_vm4 = vcmp.ge.s32.totalorder %v6131_v11, %v14522_v60  ;;  %v1670_v49 = vpack.i.b16 %v1669_v18, %v1668_v21 }
  0x8d   : > { %vm6147_vm5 = vcmp.le.s32.totalorder %v6131_v11, %v14527_v10  ;;  %vm6148_vm6 = vcmp.le.s32.totalorder %v6131_v11, %v14529_v54  ;;  %vm6151_vm7 = vcmp.lt.s32.totalorder %v6131_v11, 16  ;;  %v1676_v62 = vshrl.u32 %v1424_v12, 16 }
  0x8e   : > { %2853 = vxpose.xlu1.c.b16.start.end [1/1] (short) (narrow) %v1674_v37, 16  ;;  %v1677_v5 = vshrl.u32 %v1458_v39, 16  ;;  %v1425_v36 = vcombine.high %v1423_v52, %v19116_v47  ;;  %v1459_v61 = vcombine.high %v1457_v51, %v19116_v47  ;;  %v1467_v17 = vrot.slane %v13237_v16, %v13808_v29  ;;  %vm6149_vm8 = vmand %vm6145_vm3, %vm6147_vm5 }
  0x8f   : > { %v1475_v55 = vrot.slane %v13238_v46, %v13808_v29  ;;  %v1686_v18 = vpack.i.b16 %v1685_v7, %v1684_v15  ;;  %v1501_v37 = vrot.slane %v13239_v41, %v13808_v29  ;;  %v1509_v12 = vrot.slane %v13240_v13, %v13808_v29  ;;  %vm6150_vm9 = vmand %vm6146_vm4, %vm6148_vm6  ;;  %v13241_v7 = vld [vmem:[%s13772_s29 + $0x40] ss:$16 sps:$4 sm:$0xff]  }
  0x90   : > { %2979 = vxpose.xlu0.c.b16.start.end [1/1] (short) (narrow) %v1682_v8, 16  ;;  %vm14551_vm10 = vmand %vm6149_vm8, %vm6151_vm7  ;;  %v19117_v46 = vmov 0  ;;  %v1678_v16 = vpack.i.b16 %v1677_v5, %v1676_v62  ;;  %v1692_v41 = vshrl.u32 %v1425_v36, 16  ;;  %v1693_v51 = vshrl.u32 %v1459_v61, 16 }
  0x91   : > { %v1476_v8 = vcombine.low %v1467_v17, %v1475_v55  ;;  %v19118_v46 = vsel %vm14551_vm10, 4294967295, %v19117_v46  ;;  %v1510_v52 = vcombine.low %v1501_v37, %v1509_v12  ;;  %vm14556_vm11 = vmand %vm6150_vm9, %vm6151_vm7  ;;  %v19120_v13 = vmov 0 }
  0x92   : > { %19119 = vst [vmem:[#allocation136_spill] sm:$0xff] %v19118_v46  ;;  %3042 = vxpose.xlu1.c.b16.start.end [1/1] (short) (narrow) %v1686_v18, 16  ;;  %v19121_v13 = vsel %vm14556_vm11, 4294967295, %v19120_v13  ;;  %v1690_v21 = vpack.i.b16 %v1459_v61, %v1425_v36  ;;  %v1694_v62 = vpack.i.b16 %v1693_v51, %v1692_v41  ;;  %v1477_v45 = vcombine.high %v1467_v17, %v1475_v55 }
  0x93   : > { %19122 = vst [vmem:[#allocation137_spill] sm:$0xff] %v19121_v13  ;;  %v1484_v39 = vrot.slane %v1476_v8, %v13825_v44  ;;  %v1518_v15 = vrot.slane %v1510_v52, %v13825_v44  ;;  %v1511_v36 = vcombine.high %v1501_v37, %v1509_v12  ;;  %v1535_v61 = vrot.slane %v13241_v7, %v13808_v29 }
  0x94   : > { %2790 = vxpose.xlu0.c.b16.start.end [1/1] (short) (narrow) %v1670_v49, 16  ;;  %v1543_v8 = vrot.slane %v13242_v26, %v13808_v29  ;;  %v1569_v52 = vrot.slane %v13243_v14, %v13808_v29  ;;  %v1577_v50 = vrot.slane %v13244_v23, %v13808_v29  ;;  %v1491_v17 = vrot.slane %v1477_v45, %v13825_v44 }
  0x95   : > { %v1700_v5 = vshrl.u32 %v1484_v39, 16  ;;  %v1701_v18 = vshrl.u32 %v1518_v15, 16  ;;  %v1698_v49 = vpack.i.b16 %v1518_v15, %v1484_v39  ;;  %v1492_v11 = vcombine.high %v1484_v39, %v19116_v47 }
  0x96   : > { %2916 = vxpose.xlu1.c.b16.start.end [1/1] (short) (narrow) %v1678_v16, 16  ;;  %v1526_v48 = vcombine.high %v1518_v15, %v19116_v47  ;;  %v1544_v39 = vcombine.low %v1535_v61, %v1543_v8  ;;  %v1578_v37 = vcombine.low %v1569_v52, %v1577_v50  ;;  %v1716_v15 = vshrl.u32 %v1491_v17, 16 }
  0x97   : > { %v1702_v16 = vpack.i.b16 %v1701_v18, %v1700_v5  ;;  %v1708_v41 = vshrl.u32 %v1492_v11, 16  ;;  %v1493_v23 = vcombine.high %v1491_v17, %v19116_v47  ;;  %vm13678_vm13 = vmmov 0  }
  0x98   : > { %3105 = vxpose.xlu0.c.b16.start.end [1/1] (short) (narrow) %v1690_v21, 16  ;;  %v1709_v51 = vshrl.u32 %v1526_v48, 16  ;;  %v1706_v55 = vpack.i.b16 %v1526_v48, %v1492_v11  ;;  %v1525_v21 = vrot.slane %v1511_v36, %v13825_v44  ;;  %v1552_v48 = vrot.slane %v1544_v39, %v13825_v44 }
  0x99   : > { %v1586_v45 = vrot.slane %v1578_v37, %v13825_v44  ;;  %v1724_v5 = vshrl.u32 %v1493_v23, 16  ;;  %v1545_v36 = vcombine.high %v1535_v61, %v1543_v8  ;;  %vm2741_vm15 = vcmask 64512  }
  0x9a   : > { %3168 = vxpose.xlu1.c.b16.start.end [1/1] (short) (narrow) %v1694_v62, 16  ;;  %v1710_v12 = vpack.i.b16 %v1709_v51, %v1708_v41  ;;  %v1717_v26 = vshrl.u32 %v1525_v21, 16  ;;  %v1714_v14 = vpack.i.b16 %v1525_v21, %v1491_v17  ;;  %v1527_v7 = vcombine.high %v1525_v21, %v19116_v47  ;;  %v13245_v41 = vld [vmem:[%s13772_s29 + $0x60] ss:$16 sps:$4 sm:$0xff]   ;;  %v13246_v17 = vld [vmem:[%s13772_s29 + $0x68] ss:$16 sps:$4 sm:$0xff]  }
  0x9b   : > { %v1560_v11 = vcombine.high %v1552_v48, %v19116_v47  ;;  %v1732_v51 = vshrl.u32 %v1552_v48, 16  ;;  %v13247_v21 = vld [vmem:[%s13772_s29 + $0x64] ss:$16 sps:$4 sm:$0xff]   ;;  %v1594_v37 = vcombine.high %v1586_v45, %v19116_v47  ;;  %v1603_v61 = vrot.slane %v13245_v41, %v13808_v29 }
  0x9c   : > { %3231 = vxpose.xlu0.c.b16.start.end [1/1] (short) (narrow) %v1698_v49, 16  ;;  %v1718_v62 = vpack.i.b16 %v1717_v26, %v1716_v15  ;;  %v1725_v18 = vshrl.u32 %v1527_v7, 16  ;;  %v1722_v49 = vpack.i.b16 %v1527_v7, %v1493_v23  ;;  %v1730_v15 = vpack.i.b16 %v1586_v45, %v1552_v48 }
  0x9d   : > { %v1740_v26 = vshrl.u32 %v1560_v11, 16  ;;  %v1611_v8 = vrot.slane %v13246_v17, %v13808_v29  ;;  %v1741_v7 = vshrl.u32 %v1594_v37, 16  ;;  %v1738_v48 = vpack.i.b16 %v1594_v37, %v1560_v11 }
  0x9e   : > { %3294 = vxpose.xlu1.c.b16.start.end [1/1] (short) (narrow) %v1702_v16, 16  ;;  %v1579_v16 = vcombine.high %v1569_v52, %v1577_v50  ;;  %v1726_v39 = vpack.i.b16 %v1725_v18, %v1724_v5  ;;  %v1637_v52 = vrot.slane %v13247_v21, %v13808_v29  ;;  %v18800_v5 = vmov 0.0  }
  0x9f   : > { %12255 = vmatprep.subr.bf16.mxu0 %v18800_v5  ;;  %12257 = vmatprep.mubr.msk.bf16.mxu0 %vm13678_vm13, %v18800_v5  ;;  %v2810_v18 = vsel %vm2745_vm12, %v13736_v1, 0  ;;  %v1742_v11 = vpack.i.b16 %v1741_v7, %v1740_v26  ;;  %v1613_v7 = vcombine.high %v1603_v61, %v1611_v8  ;;  %v4259_v4 = vsel %vm2745_vm12, %v19162_v6, 0 }
  0xa0   : > { %3357 = vxpose.xlu0.c.b16.start.end [1/1] (short) (narrow) %v1706_v55, 16  ;;  %v1733_v55 = vshrl.u32 %v1586_v45, 16  ;;  %v1593_v23 = vrot.slane %v1579_v16, %v13825_v44  ;;  %v2747_v45 = vsel %vm2745_vm12, %v13734_v0, 0  ;;  %12261 = vmatprep.subr.bf16.mxu1 %v18800_v5  ;;  %vm2212_vm0 = vcmask 15360  }
  0xa1   : > { %12256 = vmatpush3.bf16.msra.mxu0 %v2747_v45  ;;  %12262 = vmatpush3.bf16.msra.mxu1 %v2810_v18  ;;  %vm6290_vm9 = vcmask 130048  }
  0xa2   : > { %3420 = vxpose.xlu1.c.b16.start.end [1/1] (short) (narrow) %v1710_v12, 16  ;;  %v13248_v12 = vld [vmem:[%s13772_s29 + $0x6c] ss:$16 sps:$4 sm:$0xff]   ;;  %v1734_v50 = vpack.i.b16 %v1733_v55, %v1732_v51  ;;  %v1595_v16 = vcombine.high %v1593_v23, %v19116_v47  ;;  %12267 = vmatprep.subr.bf16.mxu0 %v18800_v5  ;;  %v1749_v41 = vshrl.u32 %v1593_v23, 16  ;;  %v1612_v51 = vcombine.low %v1603_v61, %v1611_v8 }
  0xa3   : > { %12263 = vmatprep.mubr.msk.bf16.mxu1 %vm13678_vm13, %v18800_v5  ;;  %12273 = vmatprep.subr.bf16.mxu1 %v18800_v5 }
  0xa4   : > { %3483 = vxpose.xlu0.c.b16.start.end [1/1] (short) (narrow) %v1714_v14, 16  ;;  %v1559_v14 = vrot.slane %v1545_v36, %v13825_v44 }
  0xa6   : > { %3546 = vxpose.xlu1.c.b16.start.end [1/1] (short) (narrow) %v1718_v62, 16  ;;  %v1645_v62 = vrot.slane %v13248_v12, %v13808_v29  ;;  %v1561_v36 = vcombine.high %v1559_v14, %v19116_v47  ;;  %v1746_v17 = vpack.i.b16 %v1593_v23, %v1559_v14  ;;  %v1620_v12 = vrot.slane %v1612_v51, %v13825_v44  ;;  %v19156_v29 = vld [vmem:[#allocation26_spill] sm:$0xff] }
  0xa7   : > { %v4007_v22 = vsel %vm2745_vm12, %v19156_v29, 0 }
  0xa8   : > { %3609 = vxpose.xlu0.c.b16.start.end [1/1] (short) (narrow) %v1722_v49, 16  ;;  %v1748_v49 = vshrl.u32 %v1559_v14, 16  ;;  %v1646_v55 = vcombine.low %v1637_v52, %v1645_v62  ;;  %v1756_v21 = vshrl.u32 %v1561_v36, 16  ;;  %v1754_v26 = vpack.i.b16 %v1595_v16, %v1561_v36 }
  0xa9   : > { %v1647_v45 = vcombine.high %v1637_v52, %v1645_v62  ;;  %v1764_v18 = vshrl.u32 %v1620_v12, 16  ;;  %v1628_v14 = vcombine.high %v1620_v12, %v19116_v47 }
  0xaa   : > { %3672 = vxpose.xlu1.c.b16.start.end [1/1] (short) (narrow) %v1726_v39, 16  ;;  %v1757_v39 = vshrl.u32 %v1595_v16, 16  ;;  %v1750_v37 = vpack.i.b16 %v1749_v41, %v1748_v49  ;;  %v1627_v49 = vrot.slane %v1613_v7, %v13825_v44  ;;  %v19123_v7 = vmov 0 }
  0xab   : > { %v1772_v51 = vshrl.u32 %v1628_v14, 16  ;;  %v1661_v36 = vrot.slane %v1647_v45, %v13825_v44 }
  0xac   : > { %3735 = vxpose.xlu0.c.b16.start.end [1/1] (short) (narrow) %v1730_v15, 16  ;;  %v1654_v15 = vrot.slane %v1646_v55, %v13825_v44  ;;  %v1780_v8 = vshrl.u32 %v1627_v49, 16  ;;  %v1629_v16 = vcombine.high %v1627_v49, %v19116_v47 }
  0xad   : > { %v1781_v62 = vshrl.u32 %v1661_v36, 16 }
  0xae   : > { %3798 = vxpose.xlu1.c.b16.start.end [1/1] (short) (narrow) %v1734_v50, 16  ;;  %v1758_v50 = vpack.i.b16 %v1757_v39, %v1756_v21  ;;  %v1662_v23 = vcombine.high %v1654_v15, %v19116_v47  ;;  %v1778_v21 = vpack.i.b16 %v1661_v36, %v1627_v49  ;;  %v1826_v39 = vstv %s1825_s21 }
  0xaf   : > { %vm14613_vm14 = vcmp.eq.s32.totalorder %v1826_v39, 1  ;;  %v11772_v39 = vcombine.low %v13960_v20, %v13960_v20  ;;  %v19149_v20 = vld [vmem:[#allocation22_spill] sm:$0xff] }
  0xb0   : > { %3861 = vxpose.xlu0.c.b16.start.end [1/1] (short) (narrow) %v1738_v48, 16  ;;  %v1765_v48 = vshrl.u32 %v1654_v15, 16  ;;  %v1773_v55 = vshrl.u32 %v1662_v23, 16  ;;  %v1770_v61 = vpack.i.b16 %v1662_v23, %v1628_v14  ;;  %v19124_v7 = vsel %vm14613_vm14, 4294967295, %v19123_v7  ;;  %v1795_v23 = vld [vmem:[#allocation4 + $0x8] sm:$0xf] }
  0xb1   : > { %19125 = vst [vmem:[#allocation138_spill] sm:$0xff] %v19124_v7  ;;  %v1830_v49 = vsel %vm14613_vm14, %v1795_v23, 0  ;;  %v11775_v23 = vcombine.low %v13958_v31, %v13958_v31 }
  0xb2   : > { %3924 = vxpose.xlu1.c.b16.start.end [1/1] (short) (narrow) %v1742_v11, 16  ;;  %v1762_v11 = vpack.i.b16 %v1654_v15, %v1620_v12  ;;  %v1766_v41 = vpack.i.b16 %v1765_v48, %v1764_v18  ;;  %v1774_v52 = vpack.i.b16 %v1773_v55, %v1772_v51  ;;  %v1788_v12 = vshrl.u32 %v1629_v16, 16  ;;  %v1793_v18 = vld [vmem:[#allocation4] sm:$0xf]  ;;  %v1796_v55 = vld [vmem:[#allocation4 + $0xc] sm:$0xf] }
  0xb3   : > { %v1828_v48 = vsel %vm14613_vm14, %v1793_v18, 0  ;;  %v11739_v51 = vcombine.low %v1830_v49, %v1830_v49  ;;  %v1800_v18 = vld [vmem:[#allocation4 + $0x1c] sm:$0xf] }
  0xb4   : > { %3987 = vxpose.xlu0.c.b16.start.end [1/1] (short) (narrow) %v1746_v17, 16  ;;  %v1663_v17 = vcombine.high %v1661_v36, %v19116_v47  ;;  %v11770_v36 = vcombine.low %v13954_v28, %v13954_v28 }
  0xb6   : > { %4050 = vxpose.xlu1.c.b16.start.end [1/1] (short) (narrow) %v1750_v37, 16  ;;  %v1782_v37 = vpack.i.b16 %v1781_v62, %v1780_v8  ;;  %v1789_v15 = vshrl.u32 %v1663_v17, 16  ;;  %v1831_v8 = vsel %vm14613_vm14, %v1796_v55, 0  ;;  %v11776_v55 = vcombine.low %v13972_v63, %v13972_v63 }
  0xb8   : > { %4113 = vxpose.xlu0.c.b16.start.end [1/1] (short) (narrow) %v1754_v26, 16  ;;  %v1786_v26 = vpack.i.b16 %v1663_v17, %v1629_v16  ;;  %v1790_v45 = vpack.i.b16 %v1789_v15, %v1788_v12  ;;  %v11740_v16 = vcombine.low %v1831_v8, %v1831_v8  ;;  %v11773_v15 = vcombine.low %v13952_v27, %v13952_v27  ;;  %v1810_v27 = vld [vmem:[#allocation4 + $0x44] sm:$0xf] }
  0xb9   : > { %v11777_v8 = vcombine.low %v13963_v30, %v13963_v30 }
  0xba   : > { %4176 = vxpose.xlu1.c.b16.start.end [1/1] (short) (narrow) %v1758_v50, 16  ;;  %v1794_v50 = vld [vmem:[#allocation4 + $0x4] sm:$0xf] }
  0xbb   : > { %v1829_v47 = vsel %vm14613_vm14, %v1794_v50, 0 }
  0xbc   : > { %4239 = vxpose.xlu0.c.b16.start.end [1/1] (short) (narrow) %v1762_v11, 16  ;;  %v11738_v14 = vcombine.low %v1829_v47, %v1829_v47  ;;  %v11737_v11 = vcombine.low %v1828_v48, %v1828_v48  ;;  %v11774_v47 = vcombine.low %v13965_v33, %v13965_v33  ;;  %v1801_v48 = vld [vmem:[#allocation4 + $0x20] sm:$0xf]  ;;  %v1811_v33 = vld [vmem:[#allocation4 + $0x48] sm:$0xf] }
  0xbe   : > { %4302 = vxpose.xlu1.c.b16.start.end [1/1] (short) (narrow) %v1766_v41, 16  ;;  %v11769_v41 = vcombine.low %v13890_v57, %v13890_v57 }
  0xc0   : > { %4365 = vxpose.xlu0.c.b16.start.end [1/1] (short) (narrow) %v1770_v61, 16  ;;  %v1797_v61 = vld [vmem:[#allocation4 + $0x10] sm:$0xf] }
  0xc1   : > { %v1832_v62 = vsel %vm14613_vm14, %v1797_v61, 0 }
  0xc2   : > { %4428 = vxpose.xlu1.c.b16.start.end [1/1] (short) (narrow) %v1774_v52, 16  ;;  %v11771_v52 = vcombine.low %v13940_v56, %v13940_v56  ;;  %v11741_v17 = vcombine.low %v1832_v62, %v1832_v62  ;;  %v3755_v56 = vsel %vm2745_vm12, %v19149_v20, 0 }
  0xc4   : > { %4491 = vxpose.xlu0.c.b16.start.end [1/1] (short) (narrow) %v1778_v21, 16  ;;  %v1798_v21 = vld [vmem:[#allocation4 + $0x14] sm:$0xf] }
  0xc5   : > { %v1833_v12 = vsel %vm14613_vm14, %v1798_v21, 0 }
  0xc6   : > { %4554 = vxpose.xlu1.c.b16.start.end [1/1] (short) (narrow) %v1782_v37, 16  ;;  %v1799_v37 = vld [vmem:[#allocation4 + $0x18] sm:$0xf]  ;;  %v11742_v50 = vcombine.low %v1833_v12, %v1833_v12 }
  0xc8   : > { %4617 = vxpose.xlu0.c.b16.start.end [1/1] (short) (narrow) %v1786_v26, 16  ;;  %v1834_v26 = vsel %vm14613_vm14, %v1799_v37, 0  ;;  %v19127_v37 = vld [vmem:[#allocation42_spill] sm:$0xff] }
  0xc9   : > { %v11778_v12 = vcombine.low %v19127_v37, %v19127_v37  ;;  %v19133_v37 = vld [vmem:[#allocation39_spill] sm:$0xff] }
  0xca   : > { %4680 = vxpose.xlu1.c.b16.start.end [1/1] (short) (narrow) %v1790_v45, 16  ;;  %v11743_v45 = vcombine.low %v1834_v26, %v1834_v26  ;;  %v19128_v26 = vld [vmem:[#allocation37_spill] sm:$0xff] }
  0xce   : > { %2022 = vrot.lane.b32.xlu1 %v11738_v14, %s13679_s12  ;;  %v1835_v14 = vsel %vm14613_vm14, %v1800_v18, 0  ;;  %v1804_v18 = vld [vmem:[#allocation4 + $0x2c] sm:$0xf] }
  0xcf   : > { %v11744_v49 = vcombine.low %v1835_v14, %v1835_v14  ;;  %v1839_v14 = vsel %vm14613_vm14, %v1804_v18, 0  ;;  %v1807_v18 = vld [vmem:[#allocation4 + $0x38] sm:$0xf] }
  0xd1   : > { %2020 = vrot.lane.b32.xlu0 %v11737_v11, %s13679_s12  ;;  %v1836_v11 = vsel %vm14613_vm14, %v1801_v48, 0 }
  0xd2   : > { %2148 = vrot.lane.b32.xlu1 %v11769_v41, %s13680_s22  ;;  %v11745_v41 = vcombine.low %v1836_v11, %v1836_v11 }
  0xd5   : > { %2024 = vrot.lane.b32.xlu0 %v11739_v51, %s13679_s12  ;;  %v1802_v51 = vld [vmem:[#allocation4 + $0x24] sm:$0xf] }
  0xd6   : > { %2150 = vrot.lane.b32.xlu1 %v11770_v36, %s13680_s22  ;;  %v1803_v36 = vld [vmem:[#allocation4 + $0x28] sm:$0xf]  ;;  %v1837_v61 = vsel %vm14613_vm14, %v1802_v51, 0 }
  0xd7   : > { %v11746_v62 = vcombine.low %v1837_v61, %v1837_v61  ;;  %v11748_v61 = vcombine.low %v1839_v14, %v1839_v14 }
  0xd9   : > { %2152 = vrot.lane.b32.xlu0 %v11771_v52, %s13680_s22  ;;  %v1838_v52 = vsel %vm14613_vm14, %v1803_v36, 0 }
  0xda   : > { %2026 = vrot.lane.b32.xlu1 %v11740_v16, %s13679_s12  ;;  %v19126_v16 = vld [vmem:[#allocation8_spill] sm:$0xff]  ;;  %v11747_v21 = vcombine.low %v1838_v52, %v1838_v52  ;;  %v19131_v52 = vld [vmem:[#allocation11_spill] sm:$0xff] }
  0xdd   : > { %2028 = vrot.lane.b32.xlu0 %v11741_v17, %s13679_s12  ;;  %v2873_v17 = vsel %vm2745_vm12, %v19126_v16, 0  ;;  %v19132_v16 = vld [vmem:[#allocation12_spill] sm:$0xff] }
  0xde   : > { %2154 = vrot.lane.b32.xlu1 %v11772_v39, %s13680_s22 }
  0xe1   : > { %2156 = vrot.lane.b32.xlu0 %v11773_v15, %s13680_s22 }
  0xe2   : > { %2030 = vrot.lane.b32.xlu1 %v11742_v50, %s13679_s12  ;;  %v11779_v50 = vcombine.low %v19128_v26, %v19128_v26  ;;  %v19134_v26 = vld [vmem:[#allocation46_spill] sm:$0xff] }
  0xe5   : > { %2032 = vrot.lane.b32.xlu0 %v11743_v45, %s13679_s12  ;;  %v1805_v45 = vld [vmem:[#allocation4 + $0x30] sm:$0xf] }
  0xe6   : > { %2158 = vrot.lane.b32.xlu1 %v11774_v47, %s13680_s22  ;;  %v1840_v48 = vsel %vm14613_vm14, %v1805_v45, 0 }
  0xe7   : > { %v11749_v36 = vcombine.low %v1840_v48, %v1840_v48  ;;  %v1806_v48 = vld [vmem:[#allocation4 + $0x34] sm:$0xf] }
  0xe9   : > { %2160 = vrot.lane.b32.xlu0 %v11775_v23, %s13680_s22  ;;  %v19129_v23 = vld [vmem:[#allocation9_spill] sm:$0xff] }
  0xea   : > { %2034 = vrot.lane.b32.xlu1 %v11744_v49, %s13679_s12  ;;  %v2936_v11 = vsel %vm2745_vm12, %v19129_v23, 0  ;;  %v19130_v49 = vld [vmem:[#allocation10_spill] sm:$0xff]  ;;  %v1842_v23 = vsel %vm14613_vm14, %v1807_v18, 0 }
  0xed   : > { %2036 = vrot.lane.b32.xlu0 %v11745_v41, %s13679_s12  ;;  %v2999_v41 = vsel %vm2745_vm12, %v19130_v49, 0  ;;  %v19135_v49 = vld [vmem:[#allocation13_spill] sm:$0xff] }
  0xee   : > { %2162 = vrot.lane.b32.xlu1 %v11776_v55, %s13680_s22 }
  0xf1   : > { %2164 = vrot.lane.b32.xlu0 %v11777_v8, %s13680_s22 }
  0xf2   : > { %v14677_v39 = vpop.trf.xlu0  ;;  %2038 = vrot.lane.b32.xlu1 %v11746_v62, %s13679_s12  ;;  %v3062_v62 = vsel %vm2745_vm12, %v19131_v52, 0 }
  0xf3   : > { %12258 = vmatmul.mubr.msk.bf16.vlgmr.msra.gmra.mrb[0].mxu0 %vm2741_vm15, %v14677_v39 }
  0xf4   : > { %12268 = vmatpush3.bf16.msra.mxu0 %v2873_v17  ;;  %12269 = vmatprep.mubr.msk.bf16.mxu0 %vm13678_vm13, %v18800_v5  ;;  %v14687_v15 = vpop.trf.xlu1  ;;  %v3125_v17 = vsel %vm2745_vm12, %v19132_v16, 0 }
  0xf5   : > { %12279 = vmatprep.subr.bf16.mxu0 %v18800_v5  ;;  %2040 = vrot.lane.b32.xlu0 %v11747_v21, %s13679_s12 }
  0xf6   : > { %v14692_v47 = vpop.trf.xlu0  ;;  %2166 = vrot.lane.b32.xlu1 %v11778_v12, %s13680_s22  ;;  %v11781_v12 = vcombine.low %v19133_v37, %v19133_v37 }
  0xf8   : > { %v14703_v51 = vpop.trf.xlu1 }
  0xf9   : > { %2168 = vrot.lane.b32.xlu0 %v11779_v50, %s13680_s22  ;;  %v11780_v50 = vcombine.low %v19134_v26, %v19134_v26 }
  0xfa   : > { %v14706_v55 = vpop.trf.xlu0  ;;  %2042 = vrot.lane.b32.xlu1 %v11748_v61, %s13679_s12 }
  0xfb   : > { %12264 = vmatmul.mubr.msk.bf16.vlgmr.msra.gmra.mrb[0].mxu1 %vm2741_vm15, %v14706_v55  ;;  %12270 = vmatmul.mubr.msk.bf16.vlgmr.msra.gmra.mrb[4].mxu0 %vm2741_vm15, %v14687_v15 }
  0xfc   : > { %12274 = vmatpush3.bf16.msra.mxu1 %v2936_v11  ;;  %12280 = vmatpush3.bf16.msra.mxu0 %v2999_v41  ;;  %v14716_v8 = vpop.trf.xlu1  ;;  %v1841_v11 = vsel %vm14613_vm14, %v1806_v48, 0  ;;  %v3188_v41 = vsel %vm2745_vm12, %v19135_v49, 0  ;;  %v19140_v49 = vld [vmem:[#allocation50_spill] sm:$0xff] }
  0xfd   : > { %12275 = vmatprep.mubr.msk.bf16.mxu1 %vm13678_vm13, %v18800_v5  ;;  %12281 = vmatprep.mubr.msk.bf16.mxu0 %vm13678_vm13, %v18800_v5  ;;  %v11750_v16 = vcombine.low %v1841_v11, %v1841_v11 }
  0xfe   : > { %12285 = vmatprep.subr.bf16.mxu1 %v18800_v5  ;;  %12291 = vmatprep.subr.bf16.mxu0 %v18800_v5  ;;  %v14746_v14 = vpop.trf.xlu0 }
  0xff   : > { %2044 = vrot.lane.b32.xlu0 %v11749_v36, %s13679_s12  ;;  %2170 = vrot.lane.b32.xlu1 %v11780_v50, %s13680_s22  ;;  %v19136_v36 = vld [vmem:[#allocation14_spill] sm:$0xff]  ;;  %v19138_v50 = vld [vmem:[#allocation16_spill] sm:$0xff] }
 0x100   : > { %v14726_v21 = vpop.trf.xlu1  ;;  %v3251_v61 = vsel %vm2745_vm12, %v19136_v36, 0  ;;  %v3377_v18 = vsel %vm2745_vm12, %v19138_v50, 0  ;;  %v19141_v50 = vld [vmem:[#allocation17_spill] sm:$0xff] }
 0x102   : > { %v14772_v37 = vpop.trf.xlu0 }
 0x103   : > { %12276 = vmatmul.mubr.msk.bf16.vlgmr.msra.gmra.mrb[4].mxu1 %vm2741_vm15, %v14716_v8  ;;  %12282 = vmatmul.mubr.msk.bf16.vlgmr.msra.gmra.mrb[8].mxu0 %vm2741_vm15, %v14692_v47 }
 0x104   : > { %12286 = vmatpush3.bf16.msra.mxu1 %v3062_v62  ;;  %12292 = vmatpush3.bf16.msra.mxu0 %v3125_v17  ;;  %v14740_v45 = vpop.trf.xlu1  ;;  %v11751_v62 = vcombine.low %v1842_v23, %v1842_v23  ;;  %v19139_v23 = vld [vmem:[#allocation43_spill] sm:$0xff] }
 0x105   : > { %12287 = vmatprep.mubr.msk.bf16.mxu1 %vm13678_vm13, %v18800_v5  ;;  %12293 = vmatprep.mubr.msk.bf16.mxu0 %vm13678_vm13, %v18800_v5  ;;  %v11783_v11 = vcombine.low %v19139_v23, %v19139_v23  ;;  %v19142_v23 = vld [vmem:[#allocation18_spill] sm:$0xff] }
 0x106   : > { %12297 = vmatprep.subr.bf16.mxu1 %v18800_v5  ;;  %12303 = vmatprep.subr.bf16.mxu0 %v18800_v5  ;;  %v14788_v36 = vpop.trf.xlu0 }
 0x107   : > { %2172 = vrot.lane.b32.xlu0 %v11781_v12, %s13680_s22  ;;  %2046 = vrot.lane.b32.xlu1 %v11750_v16, %s13679_s12  ;;  %v19137_v12 = vld [vmem:[#allocation15_spill] sm:$0xff] }
 0x108   : > { %v14756_v52 = vpop.trf.xlu1  ;;  %v3314_v26 = vsel %vm2745_vm12, %v19137_v12, 0 }
 0x10a   : > { %v14808_v30 = vpop.trf.xlu0 }
 0x10b   : > { %12288 = vmatmul.mubr.msk.bf16.vlgmr.msra.gmra.mrb[8].mxu1 %vm2741_vm15, %v14703_v51  ;;  %12294 = vmatmul.mubr.msk.bf16.vlgmr.msra.gmra.mrb[12].mxu0 %vm2741_vm15, %v14746_v14 }
 0x10c   : > { %12298 = vmatpush3.bf16.msra.mxu1 %v3188_v41  ;;  %12304 = vmatpush3.bf16.msra.mxu0 %v3251_v61  ;;  %v14766_v17 = vpop.trf.xlu1  ;;  %v11782_v41 = vcombine.low %v19140_v49, %v19140_v49  ;;  %v1809_v61 = vld [vmem:[#allocation4 + $0x40] sm:$0xf]  ;;  %v3503_v49 = vsel %vm2745_vm12, %v19142_v23, 0 }
 0x10d   : > { %12299 = vmatprep.mubr.msk.bf16.mxu1 %vm13678_vm13, %v18800_v5  ;;  %12305 = vmatprep.mubr.msk.bf16.mxu0 %vm13678_vm13, %v18800_v5  ;;  %v1844_v12 = vsel %vm14613_vm14, %v1809_v61, 0 }
 0x10e   : > { %12309 = vmatprep.subr.bf16.mxu1 %v18800_v5  ;;  %12315 = vmatprep.subr.bf16.mxu0 %v18800_v5  ;;  %v14820_v61 = vpop.trf.xlu0 }
 0x10f   : > { %2048 = vrot.lane.b32.xlu0 %v11751_v62, %s13679_s12  ;;  %v1808_v62 = vld [vmem:[#allocation4 + $0x3c] sm:$0xf]  ;;  %2174 = vrot.lane.b32.xlu1 %v11782_v41, %s13680_s22 }
 0x110   : > { %v14778_v48 = vpop.trf.xlu1 }
 0x112   : > { %v14832_v23 = vpop.trf.xlu0 }
 0x113   : > { %12300 = vmatmul.mubr.msk.bf16.vlgmr.msra.gmra.mrb[12].mxu1 %vm2741_vm15, %v14726_v21  ;;  %12306 = vmatmul.mubr.msk.bf16.vlgmr.msra.gmra.mrb[16].mxu0 %vm2741_vm15, %v14772_v37 }
 0x114   : > { %12310 = vmatpush3.bf16.msra.mxu1 %v3314_v26  ;;  %12316 = vmatpush3.bf16.msra.mxu0 %v3377_v18  ;;  %v14794_v16 = vpop.trf.xlu1  ;;  %v1843_v26 = vsel %vm14613_vm14, %v1808_v62, 0  ;;  %v3440_v18 = vsel %vm2745_vm12, %v19141_v50, 0  ;;  %v19144_v50 = vld [vmem:[#allocation20_spill] sm:$0xff] }
 0x115   : > { %12311 = vmatprep.mubr.msk.bf16.mxu1 %vm13678_vm13, %v18800_v5  ;;  %12317 = vmatprep.mubr.msk.bf16.mxu0 %vm13678_vm13, %v18800_v5  ;;  %v11752_v41 = vcombine.low %v1843_v26, %v1843_v26 }
 0x116   : > { %12321 = vmatprep.subr.bf16.mxu1 %v18800_v5  ;;  %12327 = vmatprep.subr.bf16.mxu0 %v18800_v5 }
 0x117   : > { %2176 = vrot.lane.b32.xlu0 %v11783_v11, %s13680_s22  ;;  %v11753_v11 = vcombine.low %v1844_v12, %v1844_v12  ;;  %2050 = vrot.lane.b32.xlu1 %v11752_v41, %s13679_s12  ;;  %v19143_v12 = vld [vmem:[#allocation19_spill] sm:$0xff] }
 0x118   : > { %v14810_v63 = vpop.trf.xlu1  ;;  %v3566_v26 = vsel %vm2745_vm12, %v19143_v12, 0  ;;  %v19147_v12 = vmov 0.0  }
 0x11b   : > { %12312 = vmatmul.mubr.msk.bf16.vlgmr.msra.gmra.mrb[16].mxu1 %vm2741_vm15, %v14740_v45  ;;  %12318 = vmatmul.mubr.msk.bf16.vlgmr.msra.gmra.mrb[20].mxu0 %vm2741_vm15, %v14788_v36 }
 0x11c   : > { %12322 = vmatpush3.bf16.msra.mxu1 %v3440_v18  ;;  %12328 = vmatpush3.bf16.msra.mxu0 %v3503_v49  ;;  %v14822_v62 = vpop.trf.xlu1  ;;  %v3629_v18 = vsel %vm2745_vm12, %v19144_v50, 0  ;;  %v19145_v49 = vld [vmem:[#allocation47_spill] sm:$0xff]  ;;  %v14848_v50 = vpop.trf.xlu0 }
 0x11d   : > { %12323 = vmatprep.mubr.msk.bf16.mxu1 %vm13678_vm13, %v18800_v5  ;;  %12329 = vmatprep.mubr.msk.bf16.mxu0 %vm13678_vm13, %v18800_v5 }
 0x11e   : > { %12333 = vmatprep.subr.bf16.mxu1 %v18800_v5  ;;  %12339 = vmatprep.subr.bf16.mxu0 %v18800_v5  ;;  %v11785_v5 = vcombine.low %v19145_v49, %v19145_v49  ;;  %v19148_v49 = vld [vmem:[#allocation21_spill] sm:$0xff] }
 0x11f   : > { %2052 = vrot.lane.b32.xlu0 %v11753_v11, %s13679_s12  ;;  %v19146_v11 = vld [vmem:[#allocation54_spill] sm:$0xff] }
 0x120   : > { %v11784_v41 = vcombine.low %v19146_v11, %v19146_v11  ;;  %v14842_v31 = vpop.trf.xlu1  ;;  %v3692_v11 = vsel %vm2745_vm12, %v19148_v49, 0  ;;  %v14862_v28 = vpop.trf.xlu0 }
 0x122   : > { %2178 = vrot.lane.b32.xlu1 %v11784_v41, %s13680_s22  ;;  %v19151_v41 = vld [vmem:[#allocation23_spill] sm:$0xff] }
 0x123   : > { %12324 = vmatmul.mubr.msk.bf16.vlgmr.msra.gmra.mrb[20].mxu1 %vm2741_vm15, %v14756_v52  ;;  %12330 = vmatmul.mubr.msk.bf16.vlgmr.msra.gmra.mrb[24].mxu0 %vm2741_vm15, %v14808_v30 }
 0x124   : > { %12334 = vmatpush3.bf16.msra.mxu1 %v3566_v26  ;;  %12340 = vmatpush3.bf16.msra.mxu0 %v3629_v18  ;;  %v1846_v26 = vsel %vm14613_vm14, %v1811_v33, 0  ;;  %v1845_v18 = vsel %vm14613_vm14, %v1810_v27, 0  ;;  %v14864_v57 = vpop.trf.xlu1  ;;  %v14874_v20 = vpop.trf.xlu0 }
 0x125   : > { %12335 = vmatprep.mubr.msk.bf16.mxu1 %vm13678_vm13, %v19147_v12  ;;  %12341 = vmatprep.mubr.msk.bf16.mxu0 %vm13678_vm13, %v19147_v12  ;;  %19150 = vst [vmem:[#allocation139_spill] sm:$0xff] %v14864_v57  ;;  %v11755_v33 = vcombine.low %v1846_v26, %v1846_v26  ;;  %v19152_v26 = vld [vmem:[#allocation24_spill] sm:$0xff] }
 0x126   : > { %12345 = vmatprep.subr.bf16.mxu1 %v19147_v12  ;;  %12351 = vmatprep.subr.bf16.mxu0 %v19147_v12 }
 0x127   : > { %2180 = vrot.lane.b32.xlu0 %v11785_v5, %s13680_s22  ;;  %v11754_v5 = vcombine.low %v1845_v18, %v1845_v18  ;;  %v3881_v18 = vsel %vm2745_vm12, %v19152_v26, 0  ;;  %v1812_v26 = vld [vmem:[#allocation4 + $0x4c] sm:$0xf] }
 0x128   : > { %v14880_v27 = vpop.trf.xlu1  ;;  %v14886_v49 = vpop.trf.xlu0 }
 0x129   : > { %2054 = vrot.lane.b32.xlu1 %v11754_v5, %s13679_s12  ;;  %v19154_v5 = vld [vmem:[#allocation58_spill] sm:$0xff] }
 0x12a   : > { %v11786_v1 = vcombine.low %v19154_v5, %v19154_v5 }
 0x12b   : > { %12336 = vmatmul.mubr.msk.bf16.vlgmr.msra.gmra.mrb[24].mxu1 %vm2741_vm15, %v14766_v17  ;;  %12342 = vmatmul.mubr.msk.bf16.vlgmr.msra.gmra.mrb[28].mxu0 %vm2741_vm15, %v14820_v61 }
 0x12c   : > { %12346 = vmatpush3.bf16.msra.mxu1 %v3692_v11  ;;  %12352 = vmatpush3.bf16.msra.mxu0 %v3755_v56  ;;  %v3818_v56 = vsel %vm2745_vm12, %v19151_v41, 0  ;;  %v19153_v11 = vld [vmem:[#allocation51_spill] sm:$0xff]  ;;  %v1813_v41 = vld [vmem:[#allocation4 + $0x50] sm:$0xf]  ;;  %v14900_v0 = vpop.trf.xlu1  ;;  %v14902_v44 = vpop.trf.xlu0 }
 0x12d   : > { %12347 = vmatprep.mubr.msk.bf16.mxu1 %vm13678_vm13, %v19147_v12  ;;  %12353 = vmatprep.mubr.msk.bf16.mxu0 %vm13678_vm13, %v19147_v12 }
 0x12e   : > { %12357 = vmatprep.subr.bf16.mxu1 %v19147_v12  ;;  %12363 = vmatprep.subr.bf16.mxu0 %v19147_v12 }
 0x12f   : > { %2056 = vrot.lane.b32.xlu0 %v11755_v33, %s13679_s12  ;;  %v11787_v33 = vcombine.low %v19153_v11, %v19153_v11  ;;  %2182 = vrot.lane.b32.xlu1 %v11786_v1, %s13680_s22  ;;  %v19155_v11 = vld [vmem:[#allocation25_spill] sm:$0xff] }
 0x130   : > { %v3944_v5 = vsel %vm2745_vm12, %v19155_v11, 0  ;;  %v14916_v59 = vpop.trf.xlu0 }
 0x133   : > { %12348 = vmatmul.mubr.msk.bf16.vlgmr.msra.gmra.mrb[28].mxu1 %vm2741_vm15, %v14778_v48  ;;  %12354 = vmatmul.mubr.msk.bf16.vlgmr.msra.gmra.mrb[32].mxu0 %vm2741_vm15, %v14832_v23 }
 0x134   : > { %12358 = vmatpush3.bf16.msra.mxu1 %v3818_v56  ;;  %12364 = vmatpush3.bf16.msra.mxu0 %v3881_v18  ;;  %v1848_v56 = vsel %vm14613_vm14, %v1813_v41, 0  ;;  %v1847_v18 = vsel %vm14613_vm14, %v1812_v26, 0  ;;  %v14922_v41 = vpop.trf.xlu1  ;;  %v14928_v29 = vpop.trf.xlu0  ;;  %v19157_v26 = vld [vmem:[#allocation40_spill] sm:$0xff] }
 0x135   : > { %12359 = vmatprep.mubr.msk.bf16.mxu1 %vm13678_vm13, %v19147_v12  ;;  %12365 = vmatprep.mubr.msk.bf16.mxu0 %vm13678_vm13, %v19147_v12  ;;  %v11757_v1 = vcombine.low %v1848_v56, %v1848_v56  ;;  %v4070_v56 = vsel %vm2745_vm12, %v19157_v26, 0 }
 0x136   : > { %12369 = vmatprep.subr.bf16.mxu1 %v19147_v12  ;;  %12375 = vmatprep.subr.bf16.mxu0 %v19147_v12 }
 0x137   : > { %2184 = vrot.lane.b32.xlu0 %v11787_v33, %s13680_s22  ;;  %v11756_v33 = vcombine.low %v1847_v18, %v1847_v18 }
 0x139   : > { %2058 = vrot.lane.b32.xlu1 %v11756_v33, %s13679_s12 }
 0x13b   : > { %12360 = vmatmul.mubr.msk.bf16.vlgmr.msra.gmra.mrb[32].mxu1 %vm2741_vm15, %v14794_v16  ;;  %12366 = vmatmul.mubr.msk.bf16.vlgmr.msra.gmra.mrb[36].mxu0 %vm2741_vm15, %v14848_v50 }
 0x13c   : > { %12370 = vmatpush3.bf16.msra.mxu1 %v3944_v5  ;;  %12376 = vmatpush3.bf16.msra.mxu0 %v4007_v22  ;;  %v19158_v22 = vld [vmem:[#allocation41_spill] sm:$0xff]  ;;  %v19159_v5 = vld [vmem:[#allocation55_spill] sm:$0xff] }
 0x13d   : > { %12371 = vmatprep.mubr.msk.bf16.mxu1 %vm13678_vm13, %v19147_v12  ;;  %12377 = vmatprep.mubr.msk.bf16.mxu0 %vm13678_vm13, %v19147_v12  ;;  %v4133_v18 = vsel %vm2745_vm12, %v19158_v22, 0  ;;  %v11789_v2 = vcombine.low %v19159_v5, %v19159_v5  ;;  %v1850_v22 = vsel %vm14613_vm14, %v1815_v42, 0  ;;  %v1849_v5 = vsel %vm14613_vm14, %v1814_v3, 0  ;;  %v1817_v3 = vld [vmem:[#allocation4 + $0x60] sm:$0xf] }
 0x13e   : > { %12381 = vmatprep.subr.bf16.mxu1 %v19147_v12  ;;  %12387 = vmatprep.subr.bf16.mxu0 %v19147_v12  ;;  %v11759_v58 = vcombine.low %v1850_v22, %v1850_v22  ;;  %v11758_v32 = vcombine.low %v1849_v5, %v1849_v5  ;;  %v1816_v42 = vld [vmem:[#allocation4 + $0x5c] sm:$0xf]  ;;  %v19164_v22 = vld [vmem:[#allocation66_spill] sm:$0xff] }
 0x13f   : > { %2060 = vrot.lane.b32.xlu0 %v11757_v1, %s13679_s12  ;;  %v19160_v1 = vld [vmem:[#allocation62_spill] sm:$0xff]  ;;  %v11790_v5 = vcombine.low %v19164_v22, %v19164_v22 }
 0x140   : > { %v14938_v11 = vpop.permute.xlu1 %2022  ;;  %v11788_v33 = vcombine.low %v19160_v1, %v19160_v1  ;;  %v19161_v1 = vld [vmem:[#allocation44_spill] sm:$0xff] }
 0x141   : > { %v4196_v53 = vsel %vm2745_vm12, %v19161_v1, 0 }
 0x142   : > { %2186 = vrot.lane.b32.xlu1 %v11788_v33, %s13680_s22  ;;  %v19163_v33 = vld [vmem:[#allocation59_spill] sm:$0xff] }
 0x143   : > { %12372 = vmatmul.mubr.msk.bf16.vlgmr.msra.gmra.mrb[36].mxu1 %vm2741_vm15, %v14810_v63  ;;  %12378 = vmatmul.mubr.msk.bf16.vlgmr.msra.gmra.mrb[40].mxu0 %vm2741_vm15, %v14862_v28  ;;  %v14948_v26 = vpop.permute.xlu0 %2020  ;;  %v11791_v6 = vcombine.low %v19163_v33, %v19163_v33  ;;  %v19166_v33 = vld [vmem:[#allocation49_spill] sm:$0xff] }
 0x144   : > { %12382 = vmatpush3.bf16.msra.mxu1 %v4070_v56  ;;  %12388 = vmatpush3.bf16.msra.mxu0 %v4133_v18  ;;  %v14962_v56 = vpop.permute.xlu1 %2148  ;;  %v4385_v22 = vsel %vm2745_vm12, %v19166_v33, 0 }
 0x145   : > { %12383 = vmatprep.mubr.msk.bf16.mxu1 %vm13678_vm13, %v19147_v12  ;;  %12389 = vmatprep.mubr.msk.bf16.mxu0 %vm13678_vm13, %v19147_v12 }
 0x146   : > { %12393 = vmatprep.subr.bf16.mxu1 %v19147_v12  ;;  %12399 = vmatprep.subr.bf16.mxu0 %v19147_v12 }
 0x147   : > { %2188 = vrot.lane.b32.xlu0 %v11789_v2, %s13680_s22  ;;  %v14964_v18 = vpop.permute.xlu0 %2024  ;;  %2062 = vrot.lane.b32.xlu1 %v11758_v32, %s13679_s12  ;;  %v1851_v32 = vsel %vm14613_vm14, %v1816_v42, 0  ;;  %v1819_v42 = vld [vmem:[#allocation4 + $0x68] sm:$0xf] }
 0x148   : > { %v14982_v1 = vpop.permute.xlu1 %2150  ;;  %v11760_v35 = vcombine.low %v1851_v32, %v1851_v32  ;;  %v19168_v32 = vld [vmem:[#allocation70_spill] sm:$0xff] }
 0x14b   : > { %12384 = vmatmul.mubr.msk.bf16.vlgmr.msra.gmra.mrb[40].mxu1 %vm2741_vm15, %v14822_v62  ;;  %12390 = vmatmul.mubr.msk.bf16.vlgmr.msra.gmra.mrb[44].mxu0 %vm2741_vm15, %v14874_v20  ;;  %v14974_v2 = vpop.permute.xlu0 %2152 }
 0x14c   : > { %12394 = vmatpush3.bf16.msra.mxu1 %v4196_v53  ;;  %12400 = vmatpush3.bf16.msra.mxu0 %v4259_v4  ;;  %v1852_v4 = vsel %vm14613_vm14, %v1817_v3, 0  ;;  %v15000_v3 = vpop.permute.xlu1 %2026 }
 0x14d   : > { %2064 = vrot.lane.b32.xlu0 %v11759_v58, %s13679_s12  ;;  %12395 = vmatprep.mubr.msk.bf16.mxu1 %vm13678_vm13, %v19147_v12  ;;  %v19165_v58 = vld [vmem:[#allocation48_spill] sm:$0xff]  ;;  %v11761_v38 = vcombine.low %v1852_v4, %v1852_v4 }
 0x14e   : > { %12401 = vmatprep.mubr.msk.bf16.mxu0 %vm13678_vm13, %v19147_v12  ;;  %12405 = vmatprep.subr.bf16.mxu1 %v19147_v12  ;;  %v4322_v53 = vsel %vm2745_vm12, %v19165_v58, 0  ;;  %v11792_v58 = vcombine.low %v19168_v32, %v19168_v32  ;;  %v19170_v32 = vld [vmem:[#allocation53_spill] sm:$0xff] }
 0x14f   : > { %12411 = vmatprep.subr.bf16.mxu0 %v19147_v12  ;;  %2190 = vrot.lane.b32.xlu1 %v11790_v5, %s13680_s22  ;;  %v15002_v25 = vpop.permute.xlu0 %2028  ;;  %v19167_v5 = vld [vmem:[#allocation63_spill] sm:$0xff] }
 0x150   : > { %v11793_v4 = vcombine.low %v19167_v5, %v19167_v5 }
 0x151   : > { %2192 = vrot.lane.b32.xlu0 %v11791_v6, %s13680_s22  ;;  %v1818_v6 = vld [vmem:[#allocation4 + $0x64] sm:$0xf] }
 0x153   : > { %12396 = vmatmul.mubr.msk.bf16.vlgmr.msra.gmra.mrb[44].mxu1 %vm2741_vm15, %v14842_v31  ;;  %12402 = vmatmul.mubr.msk.bf16.vlgmr.msra.gmra.mrb[48].mxu0 %vm2741_vm15, %v14886_v49  ;;  %v15026_v33 = vpop.permute.xlu0 %2156 }
 0x154   : > { %12406 = vmatpush3.bf16.msra.mxu1 %v4322_v53  ;;  %12412 = vmatpush3.bf16.msra.mxu0 %v4385_v22  ;;  %v1854_v53 = vsel %vm14613_vm14, %v1819_v42, 0  ;;  %v19169_v22 = vld [vmem:[#allocation52_spill] sm:$0xff]  ;;  %v4511_v42 = vsel %vm2745_vm12, %v19170_v32, 0 }
 0x155   : > { %2068 = vrot.lane.b32.xlu0 %v11761_v38, %s13679_s12  ;;  %2066 = vrot.lane.b32.xlu1 %v11760_v35, %s13679_s12  ;;  %v1853_v38 = vsel %vm14613_vm14, %v1818_v6, 0  ;;  %v15024_v35 = vpop.permute.xlu1 %2154  ;;  %v4448_v5 = vsel %vm2745_vm12, %v19169_v22, 0  ;;  %v11763_v9 = vcombine.low %v1854_v53, %v1854_v53  ;;  %v19172_v22 = vld [vmem:[#allocation74_spill] sm:$0xff] }
 0x156   : > { %12407 = vmatprep.mubr.msk.bf16.mxu1 %vm13678_vm13, %v19147_v12  ;;  %12413 = vmatprep.mubr.msk.bf16.mxu0 %vm13678_vm13, %v19147_v12  ;;  %v11762_v6 = vcombine.low %v1853_v38, %v1853_v38  ;;  %v11794_v53 = vcombine.low %v19172_v22, %v19172_v22 }
 0x157   : > { %12417 = vmatprep.subr.bf16.mxu1 %v19147_v12  ;;  %12423 = vmatprep.subr.bf16.mxu0 %v19147_v12  ;;  %v15044_v38 = vpop.permute.xlu0 %2032 }
 0x159   : > { %2196 = vrot.lane.b32.xlu0 %v11793_v4, %s13680_s22  ;;  %2194 = vrot.lane.b32.xlu1 %v11792_v58, %s13680_s22  ;;  %v19171_v4 = vld [vmem:[#allocation67_spill] sm:$0xff]  ;;  %v15046_v32 = vpop.permute.xlu1 %2030 }
 0x15a   : > { %v11795_v58 = vcombine.low %v19171_v4, %v19171_v4  ;;  %v19174_v4 = vld [vmem:[#allocation57_spill] sm:$0xff] }
 0x15b   : > { %12408 = vmatmul.mubr.msk.bf16.vlgmr.msra.gmra.mrb[48].mxu1 %vm2741_vm15, %v14864_v57  ;;  %12414 = vmatmul.mubr.msk.bf16.vlgmr.msra.gmra.mrb[52].mxu0 %vm2741_vm15, %v14902_v44  ;;  %v4637_v22 = vsel %vm2745_vm12, %v19174_v4, 0  ;;  %v15068_v57 = vpop.permute.xlu0 %2160  ;;  %v2215_v4 = vsel %vm2212_vm0, %v14948_v26, %v14962_v56  ;;  %v19177_v26 = vld [vmem:[#allocation60_spill] sm:$0xff] }
 0x15c   : > { %12418 = vmatpush3.bf16.msra.mxu1 %v4448_v5  ;;  %12424 = vmatpush3.bf16.msra.mxu0 %v4511_v42  ;;  %v1855_v5 = vsel %vm14613_vm14, %v1820_v24, 0  ;;  %v19173_v42 = vld [vmem:[#allocation56_spill] sm:$0xff]  ;;  %v1823_v24 = vld [vmem:[#allocation4 + $0x78] sm:$0xf]  ;;  %v4700_v56 = vsel %vm2745_vm12, %v19177_v26, 0 }
 0x15d   : > { %2072 = vrot.lane.b32.xlu0 %v11763_v9, %s13679_s12  ;;  %2070 = vrot.lane.b32.xlu1 %v11762_v6, %s13679_s12  ;;  %v1856_v9 = vsel %vm14613_vm14, %v1821_v19, 0  ;;  %v4574_v6 = vsel %vm2745_vm12, %v19173_v42, 0  ;;  %v11764_v46 = vcombine.low %v1855_v5, %v1855_v5  ;;  %v1822_v19 = vld [vmem:[#allocation4 + $0x74] sm:$0xf]  ;;  %v19176_v5 = vld [vmem:[#allocation78_spill] sm:$0xff] }
 0x15e   : > { %12419 = vmatprep.mubr.msk.bf16.mxu1 %vm13678_vm13, %v19147_v12  ;;  %12425 = vmatprep.mubr.msk.bf16.mxu0 %vm13678_vm13, %v19147_v12  ;;  %v11765_v13 = vcombine.low %v1856_v9, %v1856_v9  ;;  %v11796_v42 = vcombine.low %v19176_v5, %v19176_v5 }
 0x15f   : > { %12429 = vmatprep.subr.bf16.mxu1 %v19147_v12  ;;  %12435 = vmatprep.subr.bf16.mxu0 %v19147_v12  ;;  %v15096_v5 = vpop.permute.xlu0 %2036 }
 0x161   : > { %2200 = vrot.lane.b32.xlu0 %v11795_v58, %s13680_s22  ;;  %2198 = vrot.lane.b32.xlu1 %v11794_v53, %s13680_s22  ;;  %v15070_v58 = vpop.permute.xlu1 %2158  ;;  %v19175_v53 = vld [vmem:[#allocation71_spill] sm:$0xff] }
 0x162   : > { %v11797_v9 = vcombine.low %v19175_v53, %v19175_v53 }
 0x163   : > { %12420 = vmatmul.mubr.msk.bf16.vlgmr.msra.gmra.mrb[52].mxu1 %vm2741_vm15, %v14880_v27  ;;  %12426 = vmatmul.mubr.msk.bf16.vlgmr.msra.gmra.mrb[56].mxu0 %vm2741_vm15, %v14916_v59  ;;  %v2165_v26 = vpop.permute.xlu0 %2164 }
 0x164   : > { %12430 = vmatpush3.bf16.msra.mxu1 %v4574_v6  ;;  %12436 = vmatpush3.bf16.msra.mxu0 %v4637_v22  ;;  %v4743_v6 = vsel %vm2745_vm12, %v2215_v4, 0  ;;  %v19179_v4 = vld [vmem:[#allocation81_spill] sm:$0xff] }
 0x165   : > { %2076 = vrot.lane.b32.xlu0 %v11765_v13, %s13679_s12  ;;  %2074 = vrot.lane.b32.xlu1 %v11764_v46, %s13679_s12  ;;  %v1858_v13 = vsel %vm14613_vm14, %v1823_v24, 0  ;;  %v1857_v46 = vsel %vm14613_vm14, %v1822_v19, 0  ;;  %v15098_v24 = vpop.permute.xlu1 %2034  ;;  %v1824_v19 = vld [vmem:[#allocation4 + $0x7c] sm:$0xf] }
 0x166   : > { %12431 = vmatprep.mubr.msk.bf16.mxu1 %vm13678_vm13, %v19147_v12  ;;  %12437 = vmatprep.mubr.msk.bf16.mxu0 %vm13678_vm13, %v19147_v12  ;;  %v11767_v22 = vcombine.low %v1858_v13, %v1858_v13  ;;  %v11766_v53 = vcombine.low %v1857_v46, %v1857_v46  ;;  %v11798_v13 = vcombine.low %v19179_v4, %v19179_v4 }
 0x167   : > { %12441 = vmatprep.subr.bf16.mxu1 %v19147_v12  ;;  %12447 = vmatprep.subr.bf16.mxu0 %v19147_v12  ;;  %v2221_v46 = vsel %vm2212_vm0, %v14964_v18, %v14974_v2 }
 0x169   : > { %2204 = vrot.lane.b32.xlu0 %v11797_v9, %s13680_s22  ;;  %2202 = vrot.lane.b32.xlu1 %v11796_v42, %s13680_s22  ;;  %v19178_v9 = vld [vmem:[#allocation75_spill] sm:$0xff] }
 0x16a   : > { %v11799_v42 = vcombine.low %v19178_v9, %v19178_v9 }
 0x16b   : > { %12432 = vmatmul.mubr.msk.bf16.vlgmr.msra.gmra.mrb[56].mxu1 %vm2741_vm15, %v14900_v0  ;;  %12438 = vmatmul.mubr.msk.bf16.vlgmr.msra.gmra.mrb[60].mxu0 %vm2741_vm15, %v14928_v29 }
 0x16c   : > { %12442 = vmatpush3.bf16.msra.mxu1 %v4700_v56  ;;  %12448 = vmatpush3.bf16.msra.mxu0 %v4743_v6  ;;  %v1859_v6 = vsel %vm14613_vm14, %v1824_v19, 0  ;;  %v2163_v56 = vpop.permute.xlu1 %2162  ;;  %v2041_v19 = vpop.permute.xlu0 %2040 }
 0x16d   : > { %2080 = vrot.lane.b32.xlu0 %v11767_v22, %s13679_s12  ;;  %2078 = vrot.lane.b32.xlu1 %v11766_v53, %s13679_s12  ;;  %v2218_v22 = vsel %vm2212_vm0, %v14938_v11, %v14982_v1  ;;  %v4829_v53 = vsel %vm2745_vm12, %v2221_v46, 0  ;;  %v11768_v18 = vcombine.low %v1859_v6, %v1859_v6  ;;  %v19180_v11 = vld [vmem:[#allocation85_spill] sm:$0xff] }
 0x16e   : > { %12443 = vmatprep.mubr.msk.bf16.mxu1 %vm13678_vm13, %v19147_v12  ;;  %12449 = vmatprep.mubr.msk.bf16.mxu0 %vm13678_vm13, %v19147_v12  ;;  %v4786_v2 = vsel %vm2745_vm12, %v2218_v22, 0  ;;  %v11800_v1 = vcombine.low %v19180_v11, %v19180_v11 }
 0x16f   : > { %12453 = vmatprep.subr.bf16.mxu1 %v19147_v12  ;;  %12459 = vmatprep.subr.bf16.mxu0 %v19147_v12 }
 0x170   : > { %v2039_v9 = vpop.permute.xlu1 %2038 }
 0x171   : > { %2208 = vrot.lane.b32.xlu0 %v11799_v42, %s13680_s22  ;;  %2206 = vrot.lane.b32.xlu1 %v11798_v13, %s13680_s22  ;;  %v2224_v42 = vsel %vm2212_vm0, %v15000_v3, %v15024_v35  ;;  %v2169_v3 = vpop.permute.xlu0 %2168 }
 0x172   : > { %v4872_v4 = vsel %vm2745_vm12, %v2224_v42, 0 }
 0x173   : > { %12444 = vmatmul.mubr.msk.bf16.vlgmr.msra.gmra.mrb[60].mxu1 %vm2741_vm15, %v14922_v41  ;;  %12450 = vmatmul.mubr.msk.bf16.vlgmr.msra.gmra.mrb[64].mxu0 %vm2741_vm15, %v14677_v39  ;;  %v2227_v39 = vsel %vm2212_vm0, %v15002_v25, %v15026_v33  ;;  %v2233_v25 = vsel %vm2212_vm0, %v15044_v38, %v15068_v57  ;;  %v2239_v57 = vsel %vm2212_vm0, %v15096_v5, %v2165_v26 }
 0x174   : > { %12454 = vmatpush3.bf16.msra.mxu1 %v4786_v2  ;;  %12460 = vmatpush3.bf16.msra.mxu0 %v4829_v53  ;;  %v4915_v13 = vsel %vm2745_vm12, %v2227_v39, 0  ;;  %v2167_v35 = vpop.permute.xlu1 %2166  ;;  %v2236_v38 = vsel %vm2212_vm0, %v15098_v24, %v2163_v56  ;;  %v2245_v26 = vsel %vm2212_vm0, %v2041_v19, %v2169_v3 }
 0x175   : > { %2082 = vrot.lane.b32.xlu1 %v11768_v18, %s13679_s12  ;;  %12455 = vmatprep.mubr.msk.bf16.mxu1 %vm13678_vm13, %v19147_v12  ;;  %v2045_v46 = vpop.permute.xlu0 %2044  ;;  %v2242_v56 = vsel %vm2212_vm0, %v2039_v9, %v2167_v35 }
 0x176   : > { %12461 = vmatprep.mubr.msk.bf16.mxu0 %vm13678_vm13, %v19147_v12  ;;  %12465 = vmatprep.subr.bf16.mxu1 %v19147_v12 }
 0x177   : > { %12471 = vmatprep.subr.bf16.mxu0 %v19147_v12 }
 0x178   : > { %v2043_v6 = vpop.permute.xlu1 %2042 }
 0x179   : > { %2210 = vrot.lane.b32.xlu1 %v11800_v1, %s13680_s22 }
 0x17b   : > { %12456 = vmatmul.mubr.msk.bf16.vlgmr.msra.gmra.mrb[64].mxu1 %vm2741_vm15, %v14706_v55  ;;  %12462 = vmatmul.mubr.msk.bf16.vlgmr.msra.gmra.mrb[68].mxu0 %vm2741_vm15, %v14687_v15  ;;  %v2230_v55 = vsel %vm2212_vm0, %v15046_v32, %v15070_v58  ;;  %v5001_v15 = vsel %vm2745_vm12, %v2233_v25, 0  ;;  %v5087_v32 = vsel %vm2745_vm12, %v2239_v57, 0  ;;  %v5044_v58 = vsel %vm2745_vm12, %v2236_v38, 0 }
 0x17c   : > { %12466 = vmatpush3.bf16.msra.mxu1 %v4872_v4  ;;  %12472 = vmatpush3.bf16.msra.mxu0 %v4915_v13  ;;  %v4958_v33 = vsel %vm2745_vm12, %v2230_v55, 0 }
 0x17d   : > { %12467 = vmatprep.mubr.msk.bf16.mxu1 %vm13678_vm13, %v19147_v12  ;;  %12473 = vmatprep.mubr.msk.bf16.mxu0 %vm13678_vm13, %v19147_v12 }
 0x17e   : > { %12477 = vmatprep.subr.bf16.mxu1 %v19147_v12  ;;  %12483 = vmatprep.subr.bf16.mxu0 %v19147_v12 }
 0x183   : > { %12468 = vmatmul.mubr.msk.bf16.vlgmr.msra.gmra.mrb[68].mxu1 %vm2741_vm15, %v14716_v8  ;;  %12474 = vmatmul.mubr.msk.bf16.vlgmr.msra.gmra.mrb[72].mxu0 %vm2741_vm15, %v14692_v47  ;;  %v2173_v8 = vpop.permute.xlu0 %2172  ;;  %v2171_v47 = vpop.permute.xlu1 %2170 }
 0x184   : > { %12478 = vmatpush3.bf16.msra.mxu1 %v4958_v33  ;;  %12484 = vmatpush3.bf16.msra.mxu0 %v5001_v15  ;;  %v2251_v18 = vsel %vm2212_vm0, %v2045_v46, %v2173_v8  ;;  %v2248_v2 = vsel %vm2212_vm0, %v2043_v6, %v2171_v47 }
 0x185   : > { %12479 = vmatprep.mubr.msk.bf16.mxu1 %vm13678_vm13, %v19147_v12  ;;  %12485 = vmatprep.mubr.msk.bf16.mxu0 %vm13678_vm13, %v19147_v12 }
 0x186   : > { %12489 = vmatprep.subr.bf16.mxu1 %v19147_v12  ;;  %12495 = vmatprep.subr.bf16.mxu0 %v19147_v12 }
 0x187   : > { %v2049_v5 = vpop.permute.xlu0 %2048  ;;  %v2047_v24 = vpop.permute.xlu1 %2046 }
 0x18b   : > { %12480 = vmatmul.mubr.msk.bf16.vlgmr.msra.gmra.mrb[72].mxu1 %vm2741_vm15, %v14703_v51  ;;  %12486 = vmatmul.mubr.msk.bf16.vlgmr.msra.gmra.mrb[76].mxu0 %vm2741_vm15, %v14746_v14  ;;  %v5173_v51 = vsel %vm2745_vm12, %v2245_v26, 0  ;;  %v5130_v14 = vsel %vm2745_vm12, %v2242_v56, 0  ;;  %v2177_v22 = vpop.permute.xlu0 %2176  ;;  %v2175_v53 = vpop.permute.xlu1 %2174 }
 0x18c   : > { %12490 = vmatpush3.bf16.msra.mxu1 %v5044_v58  ;;  %12496 = vmatpush3.bf16.msra.mxu0 %v5087_v32  ;;  %v2257_v19 = vsel %vm2212_vm0, %v2049_v5, %v2177_v22  ;;  %v2254_v9 = vsel %vm2212_vm0, %v2047_v24, %v2175_v53 }
 0x18d   : > { %12491 = vmatprep.mubr.msk.bf16.mxu1 %vm13678_vm13, %v19147_v12  ;;  %12497 = vmatprep.mubr.msk.bf16.mxu0 %vm13678_vm13, %v19147_v12  ;;  %v5302_v39 = vsel %vm2745_vm12, %v2254_v9, 0 }
 0x18e   : > { %12501 = vmatprep.subr.bf16.mxu1 %v19147_v12  ;;  %12507 = vmatprep.subr.bf16.mxu0 %v19147_v12 }
 0x18f   : > { %v2051_v1 = vpop.permute.xlu1 %2050 }
 0x191   : > { %v2053_v11 = vpop.permute.xlu0 %2052 }
 0x193   : > { %12492 = vmatmul.mubr.msk.bf16.vlgmr.msra.gmra.mrb[76].mxu1 %vm2741_vm15, %v14726_v21  ;;  %12498 = vmatmul.mubr.msk.bf16.vlgmr.msra.gmra.mrb[80].mxu0 %vm2741_vm15, %v14772_v37  ;;  %v5259_v21 = vsel %vm2745_vm12, %v2251_v18, 0  ;;  %v5216_v37 = vsel %vm2745_vm12, %v2248_v2, 0 }
 0x194   : > { %12502 = vmatpush3.bf16.msra.mxu1 %v5130_v14  ;;  %12508 = vmatpush3.bf16.msra.mxu0 %v5173_v51  ;;  %v2179_v42 = vpop.permute.xlu1 %2178 }
 0x195   : > { %12503 = vmatprep.mubr.msk.bf16.mxu1 %vm13678_vm13, %v19147_v12  ;;  %12509 = vmatprep.mubr.msk.bf16.mxu0 %vm13678_vm13, %v19147_v12  ;;  %v2260_v35 = vsel %vm2212_vm0, %v2051_v1, %v2179_v42 }
 0x196   : > { %12513 = vmatprep.subr.bf16.mxu1 %v19147_v12  ;;  %12519 = vmatprep.subr.bf16.mxu0 %v19147_v12 }
 0x19b   : > { %12504 = vmatmul.mubr.msk.bf16.vlgmr.msra.gmra.mrb[80].mxu1 %vm2741_vm15, %v14740_v45  ;;  %12510 = vmatmul.mubr.msk.bf16.vlgmr.msra.gmra.mrb[84].mxu0 %vm2741_vm15, %v14788_v36  ;;  %v2181_v45 = vpop.permute.xlu0 %2180  ;;  %v5345_v36 = vsel %vm2745_vm12, %v2257_v19, 0  ;;  %v2055_v13 = vpop.permute.xlu1 %2054 }
 0x19c   : > { %12514 = vmatpush3.bf16.msra.mxu1 %v5216_v37  ;;  %12520 = vmatpush3.bf16.msra.mxu0 %v5259_v21  ;;  %v2263_v3 = vsel %vm2212_vm0, %v2053_v11, %v2181_v45 }
 0x19d   : > { %12515 = vmatprep.mubr.msk.bf16.mxu1 %vm13678_vm13, %v19147_v12  ;;  %12521 = vmatprep.mubr.msk.bf16.mxu0 %vm13678_vm13, %v19147_v12 }
 0x19e   : > { %12525 = vmatprep.subr.bf16.mxu1 %v19147_v12  ;;  %12531 = vmatprep.subr.bf16.mxu0 %v19147_v12 }
 0x1a1   : > { %v2057_v4 = vpop.permute.xlu0 %2056  ;;  %v2183_v55 = vpop.permute.xlu1 %2182 }
 0x1a2   : > { %v2266_v33 = vsel %vm2212_vm0, %v2055_v13, %v2183_v55 }
 0x1a3   : > { %12516 = vmatmul.mubr.msk.bf16.vlgmr.msra.gmra.mrb[84].mxu1 %vm2741_vm15, %v14756_v52  ;;  %12522 = vmatmul.mubr.msk.bf16.vlgmr.msra.gmra.mrb[88].mxu0 %vm2741_vm15, %v14808_v30  ;;  %v5431_v30 = vsel %vm2745_vm12, %v2263_v3, 0  ;;  %v5388_v52 = vsel %vm2745_vm12, %v2260_v35, 0 }
 0x1a4   : > { %12526 = vmatpush3.bf16.msra.mxu1 %v5302_v39  ;;  %12532 = vmatpush3.bf16.msra.mxu0 %v5345_v36 }
 0x1a5   : > { %12527 = vmatprep.mubr.msk.bf16.mxu1 %vm13678_vm13, %v19147_v12  ;;  %12533 = vmatprep.mubr.msk.bf16.mxu0 %vm13678_vm13, %v19147_v12 }
 0x1a6   : > { %12537 = vmatprep.subr.bf16.mxu1 %v19147_v12  ;;  %12543 = vmatprep.subr.bf16.mxu0 %v19147_v12 }
 0x1a9   : > { %v2185_v25 = vpop.permute.xlu0 %2184 }
 0x1aa   : > { %v2269_v15 = vsel %vm2212_vm0, %v2057_v4, %v2185_v25 }
 0x1ab   : > { %12528 = vmatmul.mubr.msk.bf16.vlgmr.msra.gmra.mrb[88].mxu1 %vm2741_vm15, %v14766_v17  ;;  %12534 = vmatmul.mubr.msk.bf16.vlgmr.msra.gmra.mrb[92].mxu0 %vm2741_vm15, %v14820_v61  ;;  %v5517_v17 = vsel %vm2745_vm12, %v2269_v15, 0  ;;  %v5474_v61 = vsel %vm2745_vm12, %v2266_v33, 0  ;;  %v2059_v6 = vpop.permute.xlu1 %2058 }
 0x1ac   : > { %12538 = vmatpush3.bf16.msra.mxu1 %v5388_v52  ;;  %12544 = vmatpush3.bf16.msra.mxu0 %v5431_v30 }
 0x1ad   : > { %12539 = vmatprep.mubr.msk.bf16.mxu1 %vm13678_vm13, %v19147_v12  ;;  %12545 = vmatprep.mubr.msk.bf16.mxu0 %vm13678_vm13, %v19147_v12 }
 0x1ae   : > { %12549 = vmatprep.subr.bf16.mxu1 %v19147_v12  ;;  %12555 = vmatprep.subr.bf16.mxu0 %v19147_v12 }
 0x1b1   : > { %v2061_v46 = vpop.permute.xlu0 %2060 }
 0x1b3   : > { %12540 = vmatmul.mubr.msk.bf16.vlgmr.msra.gmra.mrb[92].mxu1 %vm2741_vm15, %v14778_v48  ;;  %12546 = vmatmul.mubr.msk.bf16.vlgmr.msra.gmra.mrb[96].mxu0 %vm2741_vm15, %v14832_v23  ;;  %v6125_v48 = vadd.s32 %v14509_v40, %v13822_v43 }
 0x1b4   : > { %12550 = vmatpush3.bf16.msra.mxu1 %v5474_v61  ;;  %12556 = vmatpush3.bf16.msra.mxu0 %v5517_v17  ;;  %v2187_v38 = vpop.permute.xlu1 %2186 }
 0x1b5   : > { %12551 = vmatprep.mubr.msk.bf16.mxu1 %vm13678_vm13, %v19147_v12  ;;  %12557 = vmatprep.mubr.msk.bf16.mxu0 %vm13678_vm13, %v19147_v12  ;;  %v2272_v8 = vsel %vm2212_vm0, %v2059_v6, %v2187_v38  ;;  %vm6134_vm1 = vcmp.ge.s32.totalorder %v6125_v48, %v14520_v34  ;;  %vm6138_vm2 = vcmp.le.s32.totalorder %v6125_v48, %v14527_v10  ;;  %vm6142_vm6 = vcmp.lt.s32.totalorder %v6125_v48, 16 }
 0x1b6   : > { %12561 = vmatprep.subr.bf16.mxu1 %v19147_v12  ;;  %12567 = vmatprep.subr.bf16.mxu0 %v19147_v12  ;;  %v5560_v32 = vsel %vm2745_vm12, %v2272_v8, 0  ;;  %vm6135_vm3 = vcmp.ge.s32.totalorder %v6125_v48, %v14522_v60  ;;  %vm6139_vm4 = vcmp.le.s32.totalorder %v6125_v48, %v14529_v54  ;;  %vm6140_vm5 = vmand %vm6134_vm1, %vm6138_vm2 }
 0x1b7   : > { %vm6141_vm7 = vmand %vm6135_vm3, %vm6139_vm4 }
 0x1b8   : > { %vm15288_vm8 = vmand %vm6140_vm5, %vm6142_vm6 }
 0x1b9   : > { %v2189_v57 = vpop.permute.xlu0 %2188  ;;  %v2063_v40 = vpop.permute.xlu1 %2062  ;;  %vm15300_vm1 = vmand %vm6141_vm7, %vm6142_vm6 }
 0x1ba   : > { %v2275_v23 = vsel %vm2212_vm0, %v2061_v46, %v2189_v57 }
 0x1bb   : > { %12552 = vmatmul.mubr.msk.bf16.vlgmr.msra.gmra.mrb[96].mxu1 %vm2741_vm15, %v14794_v16  ;;  %12558 = vmatmul.mubr.msk.bf16.vlgmr.msra.gmra.mrb[100].mxu0 %vm2741_vm15, %v14848_v50  ;;  %v5603_v47 = vsel %vm2745_vm12, %v2275_v23, 0 }
 0x1bc   : > { %12562 = vmatpush3.bf16.msra.mxu1 %v5560_v32  ;;  %12568 = vmatpush3.bf16.msra.mxu0 %v5603_v47 }
 0x1bd   : > { %12563 = vmatprep.mubr.msk.bf16.mxu1 %vm13678_vm13, %v19147_v12  ;;  %12569 = vmatprep.mubr.msk.bf16.mxu0 %vm13678_vm13, %v19147_v12 }
 0x1be   : > { %12573 = vmatprep.subr.bf16.mxu1 %v19147_v12  ;;  %12579 = vmatprep.subr.bf16.mxu0 %v19147_v12 }
 0x1bf   : > { %v2065_v43 = vpop.permute.xlu0 %2064 }
 0x1c1   : > { %v2191_v10 = vpop.permute.xlu1 %2190 }
 0x1c2   : > { %v2278_v60 = vsel %vm2212_vm0, %v2063_v40, %v2191_v10 }
 0x1c3   : > { %12564 = vmatmul.mubr.msk.bf16.vlgmr.msra.gmra.mrb[100].mxu1 %vm2741_vm15, %v14810_v63  ;;  %12570 = vmatmul.mubr.msk.bf16.vlgmr.msra.gmra.mrb[104].mxu0 %vm2741_vm15, %v14862_v28  ;;  %v2193_v34 = vpop.permute.xlu0 %2192  ;;  %v5646_v28 = vsel %vm2745_vm12, %v2278_v60, 0 }
 0x1c4   : > { %v2281_v50 = vsel %vm2212_vm0, %v2065_v43, %v2193_v34  ;;  %12575 = vmatprep.mubr.msk.bf16.mxu1 %vm13678_vm13, %v19147_v12  ;;  %12581 = vmatprep.mubr.msk.bf16.mxu0 %vm13678_vm13, %v19147_v12 }
 0x1c5   : > { %v5689_v63 = vsel %vm2745_vm12, %v2281_v50, 0  ;;  %12574 = vmatpush3.bf16.msra.mxu1 %v5646_v28 }
 0x1c6   : > { %v2783_v58 = vpop.f32.mrb[0].mxu0  ;;  %12580 = vmatpush3.bf16.msra.mxu0 %v5689_v63  ;;  %12585 = vmatprep.subr.bf16.mxu1 %v19147_v12 }
 0x1c7   : > { %v15306_v5 = vsel %vm15288_vm8, %v2783_v58, -10000.0  ;;  %v12259_v24 = vpop.f32.mrb[1].mxu0  ;;  %v2069_v26 = vpop.permute.xlu0 %2068  ;;  %12591 = vmatprep.subr.bf16.mxu0 %v19147_v12 }
 0x1c8   : > { %v2786_v56 = vpop.f32.mrb[2].mxu0  ;;  %v2067_v51 = vpop.permute.xlu1 %2066  ;;  %v6291_v14 = vsel %vm6290_vm9, %v15306_v5, -inf  ;;  %v19185_v24 = vld [vmem:[#allocation139_spill] sm:$0xff] }
 0x1c9   : > { %v15314_v22 = vsel %vm15300_vm1, %v2786_v56, -10000.0  ;;  %v12260_v53 = vpop.f32.mrb[3].mxu0  ;;  %6292 = vmax.xlane.f32.xlu0 %v6291_v14 }
 0x1ca   : > { %v6294_v18 = vsel %vm6290_vm9, %v15314_v22, -inf }
 0x1cb   : > { %12576 = vmatmul.mubr.msk.bf16.vlgmr.msra.gmra.mrb[104].mxu1 %vm2741_vm15, %v14822_v62  ;;  %12582 = vmatmul.mubr.msk.bf16.vlgmr.msra.gmra.mrb[108].mxu0 %vm2741_vm15, %v14874_v20  ;;  %v2197_v2 = vpop.permute.xlu0 %2196 }
 0x1cc   : > { %6295 = vmax.xlane.f32.xlu1 %v6294_v18  ;;  %v2287_v21 = vsel %vm2212_vm0, %v2069_v26, %v2197_v2  ;;  %v2195_v37 = vpop.permute.xlu1 %2194  ;;  %12587 = vmatprep.mubr.msk.bf16.mxu1 %vm13678_vm13, %v19147_v12 }
 0x1cd   : > { %v5775_v11 = vsel %vm2745_vm12, %v2287_v21, 0  ;;  %v2284_v1 = vsel %vm2212_vm0, %v2067_v51, %v2195_v37  ;;  %12593 = vmatprep.mubr.msk.bf16.mxu0 %vm13678_vm13, %v19147_v12 }
 0x1ce   : > { %v5732_v62 = vsel %vm2745_vm12, %v2284_v1, 0  ;;  %v2846_v19 = vpop.f32.mrb[0].mxu1  ;;  %v2909_v9 = vpop.f32.mrb[4].mxu0  ;;  %12592 = vmatpush3.bf16.msra.mxu0 %v5775_v11 }
 0x1cf   : > { %v15332_v20 = vsel %vm15288_vm8, %v2846_v19, -10000.0  ;;  %v12265_v45 = vpop.f32.mrb[1].mxu1  ;;  %v12271_v42 = vpop.f32.mrb[5].mxu0  ;;  %12586 = vmatpush3.bf16.msra.mxu1 %v5732_v62  ;;  %12603 = vmatprep.subr.bf16.mxu0 %v19147_v12  ;;  %v15358_v33 = vsel %vm15288_vm8, %v2909_v9, -10000.0 }
 0x1d0   : > { %v2849_v36 = vpop.f32.mrb[2].mxu1  ;;  %v2912_v39 = vpop.f32.mrb[6].mxu0  ;;  %v6297_v4 = vsel %vm6290_vm9, %v15332_v20, -inf  ;;  %12597 = vmatprep.subr.bf16.mxu1 %v19147_v12  ;;  %v6303_v48 = vsel %vm6290_vm9, %v15358_v33, -inf }
 0x1d1   : > { %v15340_v13 = vsel %vm15300_vm1, %v2849_v36, -10000.0  ;;  %v15344_v3 = vsel %vm15300_vm1, %v2912_v39, -10000.0  ;;  %v12266_v35 = vpop.f32.mrb[3].mxu1  ;;  %v2073_v30 = vpop.permute.xlu0 %2072  ;;  %6298 = vmax.xlane.f32.xlu0 %v6297_v4 }
 0x1d2   : > { %v6306_v52 = vsel %vm6290_vm9, %v15344_v3, -inf  ;;  %v12272_v25 = vpop.f32.mrb[7].mxu0  ;;  %v2071_v55 = vpop.permute.xlu1 %2070  ;;  %v6300_v15 = vsel %vm6290_vm9, %v15340_v13, -inf }
 0x1d3   : > { %12588 = vmatmul.mubr.msk.bf16.vlgmr.msra.gmra.mrb[108].mxu1 %vm2741_vm15, %v14842_v31  ;;  %12594 = vmatmul.mubr.msk.bf16.vlgmr.msra.gmra.mrb[112].mxu0 %vm2741_vm15, %v14886_v49 }
 0x1d4   : > { %6307 = vmax.xlane.f32.xlu1 %v6306_v52  ;;  %12599 = vmatprep.mubr.msk.bf16.mxu1 %vm13678_vm13, %v19147_v12 }
 0x1d5   : > { %v2201_v17 = vpop.permute.xlu0 %2200  ;;  %6301 = vmax.xlane.f32.xlu0 %v6300_v15  ;;  %12605 = vmatprep.mubr.msk.bf16.mxu0 %vm13678_vm13, %v19147_v12 }
 0x1d6   : > { %v2293_v31 = vsel %vm2212_vm0, %v2073_v30, %v2201_v17  ;;  %v2199_v61 = vpop.permute.xlu1 %2198  ;;  %v2972_v49 = vpop.f32.mrb[4].mxu1 }
 0x1d7   : > { %v5861_v46 = vsel %vm2745_vm12, %v2293_v31, 0  ;;  %v2290_v6 = vsel %vm2212_vm0, %v2071_v55, %v2199_v61  ;;  %v3035_v57 = vpop.f32.mrb[8].mxu0  ;;  %v12277_v38 = vpop.f32.mrb[5].mxu1  ;;  %v15370_v32 = vsel %vm15288_vm8, %v2972_v49, -10000.0 }
 0x1d8   : > { %v5818_v23 = vsel %vm2745_vm12, %v2290_v6, 0  ;;  %v12283_v8 = vpop.f32.mrb[9].mxu0  ;;  %v2975_v47 = vpop.f32.mrb[6].mxu1  ;;  %12604 = vmatpush3.bf16.msra.mxu0 %v5861_v46  ;;  %v6309_v58 = vsel %vm6290_vm9, %v15370_v32, -inf  ;;  %v15394_v26 = vsel %vm15288_vm8, %v3035_v57, -10000.0 }
 0x1d9   : > { %v15374_v43 = vsel %vm15300_vm1, %v2975_v47, -10000.0  ;;  %v3038_v40 = vpop.f32.mrb[10].mxu0  ;;  %12598 = vmatpush3.bf16.msra.mxu1 %v5818_v23  ;;  %v2077_v34 = vpop.permute.xlu0 %2076  ;;  %6304 = vmax.xlane.f32.xlu0 %v6303_v48  ;;  %v6315_v37 = vsel %vm6290_vm9, %v15394_v26, -inf }
 0x1da   : > { %v6312_v10 = vsel %vm6290_vm9, %v15374_v43, -inf  ;;  %v12278_v50 = vpop.f32.mrb[7].mxu1  ;;  %v12284_v60 = vpop.f32.mrb[11].mxu0  ;;  %12609 = vmatprep.subr.bf16.mxu1 %v19147_v12  ;;  %12615 = vmatprep.subr.bf16.mxu0 %v19147_v12  ;;  %v15382_v63 = vsel %vm15300_vm1, %v3038_v40, -10000.0 }
 0x1db   : > { %v2075_v28 = vpop.permute.xlu1 %2074  ;;  %12606 = vmatmul.mubr.msk.bf16.vlgmr.msra.gmra.mrb[116].mxu0 %vm2741_vm15, %v14902_v44  ;;  %6313 = vmax.xlane.f32.xlu1 %v6312_v10  ;;  %v6318_v44 = vsel %vm6290_vm9, %v15382_v63, -inf }
 0x1dc   : > { %12600 = vmatmul.mubr.msk.bf16.vlgmr.msra.gmra.mrb[112].mxu1 %vm2741_vm15, %v19185_v24  ;;  %12617 = vmatprep.mubr.msk.bf16.mxu0 %vm13678_vm13, %v19147_v12 }
 0x1dd   : > { %v2205_v56 = vpop.permute.xlu0 %2204  ;;  %6310 = vmax.xlane.f32.xlu0 %v6309_v58  ;;  %12611 = vmatprep.mubr.msk.bf16.mxu1 %vm13678_vm13, %v19147_v12 }
 0x1de   : > { %v2299_v51 = vsel %vm2212_vm0, %v2077_v34, %v2205_v56  ;;  %v3098_v14 = vpop.f32.mrb[8].mxu1  ;;  %v3161_v53 = vpop.f32.mrb[12].mxu0 }
 0x1df   : > { %v5947_v18 = vsel %vm2745_vm12, %v2299_v51, 0  ;;  %v2203_v2 = vpop.permute.xlu1 %2202  ;;  %v12289_v21 = vpop.f32.mrb[9].mxu1  ;;  %6319 = vmax.xlane.f32.xlu1 %v6318_v44  ;;  %v15408_v9 = vsel %vm15288_vm8, %v3098_v14, -10000.0  ;;  %v15430_v55 = vsel %vm15288_vm8, %v3161_v53, -10000.0 }
 0x1e0   : > { %v2296_v11 = vsel %vm2212_vm0, %v2075_v28, %v2203_v2  ;;  %v12295_v1 = vpop.f32.mrb[13].mxu0  ;;  %v3101_v62 = vpop.f32.mrb[10].mxu1  ;;  %12616 = vmatpush3.bf16.msra.mxu0 %v5947_v18  ;;  %v6321_v25 = vsel %vm6290_vm9, %v15408_v9, -inf }
 0x1e1   : > { %v5904_v19 = vsel %vm2745_vm12, %v2296_v11, 0  ;;  %v15412_v45 = vsel %vm15300_vm1, %v3101_v62, -10000.0  ;;  %v3164_v42 = vpop.f32.mrb[14].mxu0  ;;  %v2081_v36 = vpop.permute.xlu0 %2080  ;;  %6316 = vmax.xlane.f32.xlu0 %v6315_v37  ;;  %12627 = vmatprep.subr.bf16.mxu0 %v19147_v12 }
 0x1e2   : > { %v6324_v39 = vsel %vm6290_vm9, %v15412_v45, -inf  ;;  %12610 = vmatpush3.bf16.msra.mxu1 %v5904_v19  ;;  %v12290_v4 = vpop.f32.mrb[11].mxu1  ;;  %v12296_v35 = vpop.f32.mrb[15].mxu0  ;;  %v15419_v30 = vsel %vm15300_vm1, %v3164_v42, -10000.0 }
 0x1e3   : > { %v2079_v52 = vpop.permute.xlu1 %2078  ;;  %12618 = vmatmul.mubr.msk.bf16.vlgmr.msra.gmra.mrb[120].mxu0 %vm2741_vm15, %v14916_v59  ;;  %6325 = vmax.xlane.f32.xlu1 %v6324_v39  ;;  %v6330_v59 = vsel %vm6290_vm9, %v15419_v30, -inf }
 0x1e4   : > { %12621 = vmatprep.subr.bf16.mxu1 %v19147_v12  ;;  %12629 = vmatprep.mubr.msk.bf16.mxu0 %vm13678_vm13, %v19147_v12 }
 0x1e5   : > { %12612 = vmatmul.mubr.msk.bf16.vlgmr.msra.gmra.mrb[116].mxu1 %vm2741_vm15, %v14880_v27  ;;  %v2209_v15 = vpop.permute.xlu0 %2208  ;;  %6322 = vmax.xlane.f32.xlu0 %v6321_v25  ;;  %v6327_v27 = vsel %vm6290_vm9, %v15430_v55, -inf }
 0x1e6   : > { %v2305_v17 = vsel %vm2212_vm0, %v2081_v36, %v2209_v15  ;;  %v3224_v31 = vpop.f32.mrb[12].mxu1  ;;  %v3287_v61 = vpop.f32.mrb[16].mxu0  ;;  %12623 = vmatprep.mubr.msk.bf16.mxu1 %vm13678_vm13, %v19147_v12 }
 0x1e7   : > { %v6033_v49 = vsel %vm2745_vm12, %v2305_v17, 0  ;;  %v2207_v46 = vpop.permute.xlu1 %2206  ;;  %v12301_v6 = vpop.f32.mrb[13].mxu1  ;;  %6331 = vmax.xlane.f32.xlu1 %v6330_v59  ;;  %v15446_v8 = vsel %vm15288_vm8, %v3224_v31, -10000.0  ;;  %v15468_v24 = vsel %vm15288_vm8, %v3287_v61, -10000.0 }
 0x1e8   : > { %v2302_v57 = vsel %vm2212_vm0, %v2079_v52, %v2207_v46  ;;  %v12307_v38 = vpop.f32.mrb[17].mxu0  ;;  %v3227_v48 = vpop.f32.mrb[14].mxu1  ;;  %12628 = vmatpush3.bf16.msra.mxu0 %v6033_v49  ;;  %19186 = vst [vmem:[#allocation139_spill] sm:$0xff] %v15446_v8  ;;  %v6333_v58 = vsel %vm6290_vm9, %v15446_v8, -inf  ;;  %19189 = vst [vmem:[#allocation142_spill] sm:$0xff] %v15468_v24  ;;  %v6339_v53 = vsel %vm6290_vm9, %v15468_v24, -inf }
 0x1e9   : > { %v5990_v23 = vsel %vm2745_vm12, %v2302_v57, 0  ;;  %v15450_v47 = vsel %vm15300_vm1, %v3227_v48, -10000.0  ;;  %v3290_v40 = vpop.f32.mrb[18].mxu0  ;;  %v12302_v34 = vpop.f32.mrb[15].mxu1  ;;  %6328 = vmax.xlane.f32.xlu0 %v6327_v27  ;;  %12639 = vmatprep.subr.bf16.mxu0 %v19147_v12 }
 0x1ea   : > { %19187 = vst [vmem:[#allocation140_spill] sm:$0xff] %v15450_v47  ;;  %v6336_v10 = vsel %vm6290_vm9, %v15450_v47, -inf  ;;  %12622 = vmatpush3.bf16.msra.mxu1 %v5990_v23  ;;  %v12308_v50 = vpop.f32.mrb[19].mxu0  ;;  %v15457_v60 = vsel %vm15300_vm1, %v3290_v40, -10000.0 }
 0x1eb   : > { %19188 = vst [vmem:[#allocation141_spill] sm:$0xff] %v15457_v60  ;;  %v2083_v28 = vpop.permute.xlu1 %2082  ;;  %12630 = vmatmul.mubr.msk.bf16.vlgmr.msra.gmra.mrb[124].mxu0 %vm2741_vm15, %v14928_v29  ;;  %6337 = vmax.xlane.f32.xlu1 %v6336_v10  ;;  %v6342_v29 = vsel %vm6290_vm9, %v15457_v60, -inf }
 0x1ec   : > { %12633 = vmatprep.subr.bf16.mxu1 %v19147_v12  ;;  %12641 = vmatprep.mubr.msk.bf16.mxu0 %vm13678_vm13, %v19147_v12 }
 0x1ed   : > { %12624 = vmatmul.mubr.msk.bf16.vlgmr.msra.gmra.mrb[120].mxu1 %vm2741_vm15, %v14900_v0  ;;  %6334 = vmax.xlane.f32.xlu0 %v6333_v58 }
 0x1ee   : > { %v3350_v56 = vpop.f32.mrb[16].mxu1  ;;  %v3413_v44 = vpop.f32.mrb[20].mxu0  ;;  %12635 = vmatprep.mubr.msk.bf16.mxu1 %vm13678_vm13, %v19147_v12 }
 0x1ef   : > { %v2211_v51 = vpop.permute.xlu1 %2210  ;;  %v12313_v14 = vpop.f32.mrb[17].mxu1  ;;  %6343 = vmax.xlane.f32.xlu1 %v6342_v29  ;;  %v15482_v37 = vsel %vm15288_vm8, %v3350_v56, -10000.0  ;;  %v15499_v4 = vsel %vm15288_vm8, %v3413_v44, -10000.0 }
 0x1f0   : > { %v2308_v18 = vsel %vm2212_vm0, %v2083_v28, %v2211_v51  ;;  %v12319_v2 = vpop.f32.mrb[21].mxu0  ;;  %v3353_v21 = vpop.f32.mrb[18].mxu1  ;;  %19190 = vst [vmem:[#allocation143_spill] sm:$0xff] %v15482_v37  ;;  %v6345_v39 = vsel %vm6290_vm9, %v15482_v37, -inf  ;;  %19193 = vst [vmem:[#allocation146_spill] sm:$0xff] %v15499_v4  ;;  %v6351_v17 = vsel %vm6290_vm9, %v15499_v4, -inf }
 0x1f1   : > { %v6076_v0 = vsel %vm2745_vm12, %v2308_v18, 0  ;;  %v15486_v11 = vsel %vm15300_vm1, %v3353_v21, -10000.0  ;;  %v3416_v1 = vpop.f32.mrb[22].mxu0  ;;  %v12314_v62 = vpop.f32.mrb[19].mxu1  ;;  %6340 = vmax.xlane.f32.xlu0 %v6339_v53 }
 0x1f2   : > { %19191 = vst [vmem:[#allocation144_spill] sm:$0xff] %v15486_v11  ;;  %v6348_v19 = vsel %vm6290_vm9, %v15486_v11, -inf  ;;  %12634 = vmatpush3.bf16.msra.mxu1 %v6076_v0  ;;  %v12320_v42 = vpop.f32.mrb[23].mxu0  ;;  %v15492_v36 = vsel %vm15300_vm1, %v3416_v1, -10000.0 }
 0x1f3   : > { %19192 = vst [vmem:[#allocation145_spill] sm:$0xff] %v15492_v36  ;;  %6349 = vmax.xlane.f32.xlu1 %v6348_v19  ;;  %12645 = vmatprep.subr.bf16.mxu1 %v19147_v12  ;;  %v6354_v35 = vsel %vm6290_vm9, %v15492_v36, -inf }
 0x1f5   : > { %12636 = vmatmul.mubr.msk.bf16.vlgmr.msra.gmra.mrb[124].mxu1 %vm2741_vm15, %v14922_v41  ;;  %6346 = vmax.xlane.f32.xlu0 %v6345_v39 }
 0x1f6   : > { %v3476_v52 = vpop.f32.mrb[20].mxu1  ;;  %v3539_v25 = vpop.f32.mrb[24].mxu0  ;;  %12647 = vmatprep.mubr.msk.bf16.mxu1 %vm13678_vm13, %v19147_v12 }
 0x1f7   : > { %v12325_v15 = vpop.f32.mrb[21].mxu1  ;;  %v12331_v59 = vpop.f32.mrb[25].mxu0  ;;  %6355 = vmax.xlane.f32.xlu1 %v6354_v35  ;;  %v15511_v41 = vsel %vm15288_vm8, %v3476_v52, -10000.0  ;;  %v15527_v48 = vsel %vm15288_vm8, %v3539_v25, -10000.0 }
 0x1f8   : > { %v3479_v31 = vpop.f32.mrb[22].mxu1  ;;  %v3542_v61 = vpop.f32.mrb[26].mxu0  ;;  %19194 = vst [vmem:[#allocation147_spill] sm:$0xff] %v15511_v41  ;;  %v6357_v38 = vsel %vm6290_vm9, %v15511_v41, -inf  ;;  %19197 = vst [vmem:[#allocation150_spill] sm:$0xff] %v15527_v48  ;;  %v6363_v28 = vsel %vm6290_vm9, %v15527_v48, -inf }
 0x1f9   : > { %v15515_v49 = vsel %vm15300_vm1, %v3479_v31, -10000.0  ;;  %v12326_v46 = vpop.f32.mrb[23].mxu1  ;;  %v12332_v6 = vpop.f32.mrb[27].mxu0  ;;  %6352 = vmax.xlane.f32.xlu0 %v6351_v17  ;;  %v15521_v57 = vsel %vm15300_vm1, %v3542_v61, -10000.0 }
 0x1fa   : > { %19195 = vst [vmem:[#allocation148_spill] sm:$0xff] %v15515_v49  ;;  %v6360_v27 = vsel %vm6290_vm9, %v15515_v49, -inf  ;;  %19196 = vst [vmem:[#allocation149_spill] sm:$0xff] %v15521_v57  ;;  %v6366_v23 = vsel %vm6290_vm9, %v15521_v57, -inf }
 0x1fb   : > { %6361 = vmax.xlane.f32.xlu1 %v6360_v27 }
 0x1fd   : > { %6358 = vmax.xlane.f32.xlu0 %v6357_v38 }
 0x1fe   : > { %v3602_v40 = vpop.f32.mrb[24].mxu1  ;;  %v3665_v34 = vpop.f32.mrb[28].mxu0 }
 0x1ff   : > { %v12337_v10 = vpop.f32.mrb[25].mxu1  ;;  %v12343_v50 = vpop.f32.mrb[29].mxu0  ;;  %6367 = vmax.xlane.f32.xlu1 %v6366_v23  ;;  %v15535_v56 = vsel %vm15288_vm8, %v3602_v40, -10000.0  ;;  %v15551_v21 = vsel %vm15288_vm8, %v3665_v34, -10000.0 }
 0x200   : > { %v3605_v58 = vpop.f32.mrb[26].mxu1  ;;  %v3668_v29 = vpop.f32.mrb[30].mxu0  ;;  %19198 = vst [vmem:[#allocation151_spill] sm:$0xff] %v15535_v56  ;;  %v6369_v2 = vsel %vm6290_vm9, %v15535_v56, -inf  ;;  %19201 = vst [vmem:[#allocation154_spill] sm:$0xff] %v15551_v21  ;;  %v6375_v39 = vsel %vm6290_vm9, %v15551_v21, -inf }
 0x201   : > { %v15539_v44 = vsel %vm15300_vm1, %v3605_v58, -10000.0  ;;  %v12338_v51 = vpop.f32.mrb[27].mxu1  ;;  %v12344_v14 = vpop.f32.mrb[31].mxu0  ;;  %6364 = vmax.xlane.f32.xlu0 %v6363_v28  ;;  %v15545_v18 = vsel %vm15300_vm1, %v3668_v29, -10000.0 }
 0x202   : > { %19199 = vst [vmem:[#allocation152_spill] sm:$0xff] %v15539_v44  ;;  %v6372_v53 = vsel %vm6290_vm9, %v15539_v44, -inf  ;;  %19200 = vst [vmem:[#allocation153_spill] sm:$0xff] %v15545_v18  ;;  %v6378_v0 = vsel %vm6290_vm9, %v15545_v18, -inf }
 0x203   : > { %6373 = vmax.xlane.f32.xlu1 %v6372_v53 }
 0x205   : > { %6370 = vmax.xlane.f32.xlu0 %v6369_v2 }
 0x206   : > { %v3728_v1 = vpop.f32.mrb[28].mxu1  ;;  %v3791_v62 = vpop.f32.mrb[32].mxu0 }
 0x207   : > { %v12349_v19 = vpop.f32.mrb[29].mxu1  ;;  %v12355_v42 = vpop.f32.mrb[33].mxu0  ;;  %6379 = vmax.xlane.f32.xlu1 %v6378_v0  ;;  %v15559_v25 = vsel %vm15288_vm8, %v3728_v1, -10000.0  ;;  %v15575_v6 = vsel %vm15288_vm8, %v3791_v62, -10000.0 }
 0x208   : > { %v3731_v35 = vpop.f32.mrb[30].mxu1  ;;  %v3794_v52 = vpop.f32.mrb[34].mxu0  ;;  %19202 = vst [vmem:[#allocation155_spill] sm:$0xff] %v15559_v25  ;;  %v6381_v46 = vsel %vm6290_vm9, %v15559_v25, -inf  ;;  %19205 = vst [vmem:[#allocation158_spill] sm:$0xff] %v15575_v6  ;;  %v6387_v10 = vsel %vm6290_vm9, %v15575_v6, -inf }
 0x209   : > { %v15563_v15 = vsel %vm15300_vm1, %v3731_v35, -10000.0  ;;  %v12350_v59 = vpop.f32.mrb[31].mxu1  ;;  %v12356_v17 = vpop.f32.mrb[35].mxu0  ;;  %6376 = vmax.xlane.f32.xlu0 %v6375_v39  ;;  %v15569_v61 = vsel %vm15300_vm1, %v3794_v52, -10000.0 }
 0x20a   : > { %19203 = vst [vmem:[#allocation156_spill] sm:$0xff] %v15563_v15  ;;  %v6384_v31 = vsel %vm6290_vm9, %v15563_v15, -inf  ;;  %19204 = vst [vmem:[#allocation157_spill] sm:$0xff] %v15569_v61  ;;  %v6390_v27 = vsel %vm6290_vm9, %v15569_v61, -inf }
 0x20b   : > { %6385 = vmax.xlane.f32.xlu1 %v6384_v31 }
 0x20d   : > { %6382 = vmax.xlane.f32.xlu0 %v6381_v46 }
 0x20e   : > { %v3854_v38 = vpop.f32.mrb[32].mxu1  ;;  %v3917_v23 = vpop.f32.mrb[36].mxu0 }
 0x20f   : > { %v12361_v40 = vpop.f32.mrb[33].mxu1  ;;  %v12367_v34 = vpop.f32.mrb[37].mxu0  ;;  %6391 = vmax.xlane.f32.xlu1 %v6390_v27  ;;  %v15583_v58 = vsel %vm15288_vm8, %v3854_v38, -10000.0  ;;  %v15599_v1 = vsel %vm15288_vm8, %v3917_v23, -10000.0 }
 0x210   : > { %v3857_v50 = vpop.f32.mrb[34].mxu1  ;;  %v3920_v28 = vpop.f32.mrb[38].mxu0  ;;  %19206 = vst [vmem:[#allocation159_spill] sm:$0xff] %v15583_v58  ;;  %v6393_v0 = vsel %vm6290_vm9, %v15583_v58, -inf  ;;  %19209 = vst [vmem:[#allocation162_spill] sm:$0xff] %v15599_v1  ;;  %v6399_v52 = vsel %vm6290_vm9, %v15599_v1, -inf }
 0x211   : > { %v15587_v29 = vsel %vm15300_vm1, %v3857_v50, -10000.0  ;;  %v12362_v51 = vpop.f32.mrb[35].mxu1  ;;  %v12368_v14 = vpop.f32.mrb[39].mxu0  ;;  %6388 = vmax.xlane.f32.xlu0 %v6387_v10  ;;  %v15593_v2 = vsel %vm15300_vm1, %v3920_v28, -10000.0 }
 0x212   : > { %19207 = vst [vmem:[#allocation160_spill] sm:$0xff] %v15587_v29  ;;  %v6396_v53 = vsel %vm6290_vm9, %v15587_v29, -inf  ;;  %19208 = vst [vmem:[#allocation161_spill] sm:$0xff] %v15593_v2  ;;  %v6402_v62 = vsel %vm6290_vm9, %v15593_v2, -inf }
 0x213   : > { %6397 = vmax.xlane.f32.xlu1 %v6396_v53 }
 0x215   : > { %6394 = vmax.xlane.f32.xlu0 %v6393_v0 }
 0x216   : > { %v3980_v19 = vpop.f32.mrb[36].mxu1  ;;  %v4043_v42 = vpop.f32.mrb[40].mxu0 }
 0x217   : > { %v12373_v39 = vpop.f32.mrb[37].mxu1  ;;  %v12379_v35 = vpop.f32.mrb[41].mxu0  ;;  %6403 = vmax.xlane.f32.xlu1 %v6402_v62  ;;  %v15607_v31 = vsel %vm15288_vm8, %v3980_v19, -10000.0  ;;  %v15623_v10 = vsel %vm15288_vm8, %v4043_v42, -10000.0 }
 0x218   : > { %v3983_v59 = vpop.f32.mrb[38].mxu1  ;;  %v4046_v17 = vpop.f32.mrb[42].mxu0  ;;  %19210 = vst [vmem:[#allocation163_spill] sm:$0xff] %v15607_v31  ;;  %v6405_v34 = vsel %vm6290_vm9, %v15607_v31, -inf  ;;  %19213 = vst [vmem:[#allocation166_spill] sm:$0xff] %v15623_v10  ;;  %v6411_v0 = vsel %vm6290_vm9, %v15623_v10, -inf }
 0x219   : > { %v15611_v46 = vsel %vm15300_vm1, %v3983_v59, -10000.0  ;;  %v12374_v27 = vpop.f32.mrb[39].mxu1  ;;  %v12380_v38 = vpop.f32.mrb[43].mxu0  ;;  %6400 = vmax.xlane.f32.xlu0 %v6399_v52  ;;  %v15617_v40 = vsel %vm15300_vm1, %v4046_v17, -10000.0 }
 0x21a   : > { %19211 = vst [vmem:[#allocation164_spill] sm:$0xff] %v15611_v46  ;;  %v6408_v23 = vsel %vm6290_vm9, %v15611_v46, -inf  ;;  %19212 = vst [vmem:[#allocation165_spill] sm:$0xff] %v15617_v40  ;;  %v6414_v50 = vsel %vm6290_vm9, %v15617_v40, -inf }
 0x21b   : > { %6409 = vmax.xlane.f32.xlu1 %v6408_v23 }
 0x21d   : > { %6406 = vmax.xlane.f32.xlu0 %v6405_v34 }
 0x21e   : > { %v4106_v28 = vpop.f32.mrb[40].mxu1  ;;  %v4169_v51 = vpop.f32.mrb[44].mxu0 }
 0x21f   : > { %v12385_v14 = vpop.f32.mrb[41].mxu1  ;;  %v12391_v53 = vpop.f32.mrb[45].mxu0  ;;  %6415 = vmax.xlane.f32.xlu1 %v6414_v50  ;;  %v15631_v39 = vsel %vm15288_vm8, %v4106_v28, -10000.0  ;;  %v15647_v38 = vsel %vm15288_vm8, %v4169_v51, -10000.0 }
 0x220   : > { %v4109_v62 = vpop.f32.mrb[42].mxu1  ;;  %v4172_v19 = vpop.f32.mrb[46].mxu0  ;;  %19214 = vst [vmem:[#allocation167_spill] sm:$0xff] %v15631_v39  ;;  %v6417_v27 = vsel %vm6290_vm9, %v15631_v39, -inf  ;;  %19217 = vst [vmem:[#allocation170_spill] sm:$0xff] %v15647_v38  ;;  %v6423_v53 = vsel %vm6290_vm9, %v15647_v38, -inf }
 0x221   : > { %v15635_v42 = vsel %vm15300_vm1, %v4109_v62, -10000.0  ;;  %v12386_v35 = vpop.f32.mrb[43].mxu1  ;;  %v12392_v52 = vpop.f32.mrb[47].mxu0  ;;  %6412 = vmax.xlane.f32.xlu0 %v6411_v0  ;;  %v15641_v17 = vsel %vm15300_vm1, %v4172_v19, -10000.0 }
 0x222   : > { %19215 = vst [vmem:[#allocation168_spill] sm:$0xff] %v15635_v42  ;;  %v6420_v59 = vsel %vm6290_vm9, %v15635_v42, -inf  ;;  %19216 = vst [vmem:[#allocation169_spill] sm:$0xff] %v15641_v17  ;;  %v6426_v23 = vsel %vm6290_vm9, %v15641_v17, -inf }
 0x223   : > { %6421 = vmax.xlane.f32.xlu1 %v6420_v59 }
 0x225   : > { %6418 = vmax.xlane.f32.xlu0 %v6417_v27 }
 0x226   : > { %v4232_v34 = vpop.f32.mrb[44].mxu1  ;;  %v4295_v50 = vpop.f32.mrb[48].mxu0 }
 0x227   : > { %v12397_v28 = vpop.f32.mrb[45].mxu1  ;;  %v12403_v14 = vpop.f32.mrb[49].mxu0  ;;  %6427 = vmax.xlane.f32.xlu1 %v6426_v23  ;;  %v15655_v19 = vsel %vm15288_vm8, %v4232_v34, -10000.0  ;;  %v15671_v34 = vsel %vm15288_vm8, %v4295_v50, -10000.0 }
 0x228   : > { %v4235_v0 = vpop.f32.mrb[46].mxu1  ;;  %v4298_v62 = vpop.f32.mrb[50].mxu0  ;;  %19218 = vst [vmem:[#allocation171_spill] sm:$0xff] %v15655_v19  ;;  %v6429_v23 = vsel %vm6290_vm9, %v15655_v19, -inf  ;;  %19221 = vst [vmem:[#allocation174_spill] sm:$0xff] %v15671_v34 }
 0x229   : > { %v15659_v51 = vsel %vm15300_vm1, %v4235_v0, -10000.0  ;;  %v12398_v35 = vpop.f32.mrb[47].mxu1  ;;  %v12404_v52 = vpop.f32.mrb[51].mxu0  ;;  %6424 = vmax.xlane.f32.xlu0 %v6423_v53  ;;  %v15665_v27 = vsel %vm15300_vm1, %v4298_v62, -10000.0  ;;  %v6435_v62 = vsel %vm6290_vm9, %v15671_v34, -inf }
 0x22a   : > { %19219 = vst [vmem:[#allocation172_spill] sm:$0xff] %v15659_v51  ;;  %v6432_v59 = vsel %vm6290_vm9, %v15659_v51, -inf  ;;  %19220 = vst [vmem:[#allocation173_spill] sm:$0xff] %v15665_v27  ;;  %v6438_v28 = vsel %vm6290_vm9, %v15665_v27, -inf }
 0x22b   : > { %6433 = vmax.xlane.f32.xlu1 %v6432_v59 }
 0x22d   : > { %6430 = vmax.xlane.f32.xlu0 %v6429_v23 }
 0x22e   : > { %v4358_v14 = vpop.f32.mrb[48].mxu1  ;;  %v4421_v53 = vpop.f32.mrb[52].mxu0 }
 0x22f   : > { %v12409_v0 = vpop.f32.mrb[49].mxu1  ;;  %v12415_v35 = vpop.f32.mrb[53].mxu0  ;;  %6439 = vmax.xlane.f32.xlu1 %v6438_v28  ;;  %v15679_v17 = vsel %vm15288_vm8, %v4358_v14, -10000.0  ;;  %v15695_v14 = vsel %vm15288_vm8, %v4421_v53, -10000.0 }
 0x230   : > { %v4361_v52 = vpop.f32.mrb[50].mxu1  ;;  %v4424_v59 = vpop.f32.mrb[54].mxu0  ;;  %19222 = vst [vmem:[#allocation175_spill] sm:$0xff] %v15679_v17  ;;  %v6441_v35 = vsel %vm6290_vm9, %v15679_v17, -inf  ;;  %19225 = vst [vmem:[#allocation178_spill] sm:$0xff] %v15695_v14 }
 0x231   : > { %v15683_v50 = vsel %vm15300_vm1, %v4361_v52, -10000.0  ;;  %v12410_v23 = vpop.f32.mrb[51].mxu1  ;;  %v12416_v27 = vpop.f32.mrb[55].mxu0  ;;  %6436 = vmax.xlane.f32.xlu0 %v6435_v62  ;;  %v15689_v28 = vsel %vm15300_vm1, %v4424_v59, -10000.0  ;;  %v6447_v59 = vsel %vm6290_vm9, %v15695_v14, -inf }
 0x232   : > { %19223 = vst [vmem:[#allocation176_spill] sm:$0xff] %v15683_v50  ;;  %v6444_v0 = vsel %vm6290_vm9, %v15683_v50, -inf  ;;  %19224 = vst [vmem:[#allocation177_spill] sm:$0xff] %v15689_v28  ;;  %v6450_v27 = vsel %vm6290_vm9, %v15689_v28, -inf }
 0x233   : > { %6445 = vmax.xlane.f32.xlu1 %v6444_v0 }
 0x235   : > { %6442 = vmax.xlane.f32.xlu0 %v6441_v35 }
 0x236   : > { %v15699_v62 = vpop.f32.mrb[52].mxu1  ;;  %v15701_v52 = vpop.f32.mrb[56].mxu0 }
 0x237   : > { %v12421_v23 = vpop.f32.mrb[53].mxu1  ;;  %v12427_v50 = vpop.f32.mrb[57].mxu0  ;;  %6451 = vmax.xlane.f32.xlu1 %v6450_v27 }
 0x238   : > { %v15705_v0 = vpop.f32.mrb[54].mxu1  ;;  %v15707_v17 = vpop.f32.mrb[58].mxu0 }
 0x239   : > { %v12422_v53 = vpop.f32.mrb[55].mxu1  ;;  %v12428_v34 = vpop.f32.mrb[59].mxu0  ;;  %6448 = vmax.xlane.f32.xlu0 %v6447_v59 }
 0x23e   : > { %v15709_v35 = vpop.f32.mrb[56].mxu1  ;;  %v15711_v28 = vpop.f32.mrb[60].mxu0 }
 0x23f   : > { %19226 = vst [vmem:[#allocation179_spill] sm:$0xff] %v15711_v28  ;;  %v12433_v51 = vpop.f32.mrb[57].mxu1  ;;  %v12439_v19 = vpop.f32.mrb[61].mxu0 }
 0x240   : > { %v15713_v38 = vpop.f32.mrb[58].mxu1  ;;  %v15715_v50 = vpop.f32.mrb[62].mxu0 }
 0x241   : > { %19227 = vst [vmem:[#allocation180_spill] sm:$0xff] %v15715_v50  ;;  %v12434_v27 = vpop.f32.mrb[59].mxu1  ;;  %v12440_v23 = vpop.f32.mrb[63].mxu0 }
 0x246   : > { %v15717_v14 = vpop.f32.mrb[60].mxu1  ;;  %v4779_v40 = vpop.f32.mrb[64].mxu0 }
 0x247   : > { %19228 = vst [vmem:[#allocation181_spill] sm:$0xff] %v15717_v14  ;;  %v15721_v53 = vsel %vm14551_vm10, %v4779_v40, -10000.0  ;;  %v12445_v34 = vpop.f32.mrb[61].mxu1  ;;  %v12451_v59 = vpop.f32.mrb[65].mxu0 }
 0x248   : > { %v6483_v39 = vsel %vm6290_vm9, %v15721_v53, -inf  ;;  %v15725_v51 = vpop.f32.mrb[62].mxu1  ;;  %v4782_v19 = vpop.f32.mrb[66].mxu0 }
 0x249   : > { %19230 = vst [vmem:[#allocation136_spill] sm:$0xff] %v15725_v51  ;;  %v15729_v2 = vsel %vm14556_vm11, %v4782_v19, -10000.0  ;;  %v12446_v27 = vpop.f32.mrb[63].mxu1  ;;  %v12452_v23 = vpop.f32.mrb[67].mxu0  ;;  %6484 = vmax.xlane.f32.xlu0 %v6483_v39 }
 0x24a   : > { %v6486_v46 = vsel %vm6290_vm9, %v15729_v2, -inf }
 0x24b   : > { %6487 = vmax.xlane.f32.xlu1 %v6486_v46 }
 0x24e   : > { %v4822_v40 = vpop.f32.mrb[64].mxu1  ;;  %v4865_v34 = vpop.f32.mrb[68].mxu0 }
 0x24f   : > { %v15735_v59 = vsel %vm14551_vm10, %v4822_v40, -10000.0  ;;  %v12457_v31 = vpop.f32.mrb[65].mxu1  ;;  %v12463_v1 = vpop.f32.mrb[69].mxu0  ;;  %v15741_v39 = vsel %vm14551_vm10, %v4865_v34, -10000.0 }
 0x250   : > { %v6489_v61 = vsel %vm6290_vm9, %v15735_v59, -inf  ;;  %v4825_v19 = vpop.f32.mrb[66].mxu1  ;;  %v4868_v29 = vpop.f32.mrb[70].mxu0  ;;  %v6495_v40 = vsel %vm6290_vm9, %v15741_v39, -inf }
 0x251   : > { %v15745_v46 = vsel %vm14556_vm11, %v4825_v19, -10000.0  ;;  %v12458_v27 = vpop.f32.mrb[67].mxu1  ;;  %v12464_v23 = vpop.f32.mrb[71].mxu0  ;;  %6490 = vmax.xlane.f32.xlu0 %v6489_v61  ;;  %v15751_v1 = vsel %vm14556_vm11, %v4868_v29, -10000.0 }
 0x252   : > { %v6492_v31 = vsel %vm6290_vm9, %v15745_v46, -inf  ;;  %v6498_v34 = vsel %vm6290_vm9, %v15751_v1, -inf }
 0x253   : > { %6493 = vmax.xlane.f32.xlu1 %v6492_v31 }
 0x255   : > { %6496 = vmax.xlane.f32.xlu0 %v6495_v40 }
 0x256   : > { %v4908_v19 = vpop.f32.mrb[68].mxu1  ;;  %v4951_v58 = vpop.f32.mrb[72].mxu0 }
 0x257   : > { %v15759_v61 = vsel %vm14551_vm10, %v4908_v19, -10000.0  ;;  %v12469_v27 = vpop.f32.mrb[69].mxu1  ;;  %6499 = vmax.xlane.f32.xlu1 %v6498_v34  ;;  %v12475_v23 = vpop.f32.mrb[73].mxu0  ;;  %v15765_v6 = vsel %vm14551_vm10, %v4951_v58, -10000.0 }
 0x258   : > { %v6501_v29 = vsel %vm6290_vm9, %v15759_v61, -inf  ;;  %v4911_v31 = vpop.f32.mrb[70].mxu1  ;;  %v4954_v18 = vpop.f32.mrb[74].mxu0  ;;  %v6507_v58 = vsel %vm6290_vm9, %v15765_v6, -inf }
 0x259   : > { %v15769_v40 = vsel %vm14556_vm11, %v4911_v31, -10000.0  ;;  %6502 = vmax.xlane.f32.xlu0 %v6501_v29  ;;  %v12470_v27 = vpop.f32.mrb[71].mxu1  ;;  %v12476_v34 = vpop.f32.mrb[75].mxu0  ;;  %v15777_v23 = vsel %vm14556_vm11, %v4954_v18, -10000.0 }
 0x25a   : > { %v6504_v19 = vsel %vm6290_vm9, %v15769_v40, -inf  ;;  %v15773_v15 = vpop.xlane.xlu0 %6292  ;;  %v6510_v31 = vsel %vm6290_vm9, %v15777_v23, -inf  ;;  %v15791_v44 = vpop.xlane.xlu1 %6295 }
 0x25b   : > { %6505 = vmax.xlane.f32.xlu1 %v6504_v19 }
 0x25d   : > { %6508 = vmax.xlane.f32.xlu0 %v6507_v58 }
 0x25e   : > { %v4994_v29 = vpop.f32.mrb[72].mxu1  ;;  %v5037_v25 = vpop.f32.mrb[76].mxu0 }
 0x25f   : > { %v15785_v27 = vsel %vm14551_vm10, %v4994_v29, -10000.0  ;;  %v15787_v34 = vpop.xlane.xlu0 %6298  ;;  %v12481_v21 = vpop.f32.mrb[73].mxu1  ;;  %6511 = vmax.xlane.f32.xlu1 %v6510_v31  ;;  %v15795_v58 = vsel %vm14551_vm10, %v5037_v25, -10000.0 }
 0x260   : > { %v6513_v18 = vsel %vm6290_vm9, %v15785_v27, -inf  ;;  %v12487_v19 = vpop.f32.mrb[77].mxu0  ;;  %v4997_v57 = vpop.f32.mrb[74].mxu1  ;;  %v6519_v25 = vsel %vm6290_vm9, %v15795_v58, -inf }
 0x261   : > { %v15799_v56 = vsel %vm14556_vm11, %v4997_v57, -10000.0  ;;  %v5040_v29 = vpop.f32.mrb[78].mxu0  ;;  %6514 = vmax.xlane.f32.xlu0 %v6513_v18  ;;  %v12482_v31 = vpop.f32.mrb[75].mxu1 }
 0x262   : > { %v6516_v21 = vsel %vm6290_vm9, %v15799_v56, -inf  ;;  %v12488_v48 = vpop.f32.mrb[79].mxu0  ;;  %v15805_v19 = vsel %vm14556_vm11, %v5040_v29, -10000.0  ;;  %v15811_v36 = vpop.xlane.xlu1 %6307 }
 0x263   : > { %19232 = vst [vmem:[#allocation137_spill] sm:$0xff] %v15805_v19  ;;  %v15807_v12 = vpop.xlane.xlu0 %6301  ;;  %6517 = vmax.xlane.f32.xlu1 %v6516_v21  ;;  %v6522_v57 = vsel %vm6290_vm9, %v15805_v19, -inf }
 0x265   : > { %6520 = vmax.xlane.f32.xlu0 %v6519_v25 }
 0x266   : > { %v5080_v18 = vpop.f32.mrb[76].mxu1  ;;  %v5123_v49 = vpop.f32.mrb[80].mxu0 }
 0x267   : > { %v15817_v48 = vsel %vm14551_vm10, %v5080_v18, -10000.0  ;;  %v15819_v29 = vpop.xlane.xlu0 %6304  ;;  %v12493_v31 = vpop.f32.mrb[77].mxu1  ;;  %6523 = vmax.xlane.f32.xlu1 %v6522_v57  ;;  %v15825_v25 = vsel %vm14551_vm10, %v5123_v49, -10000.0 }
 0x268   : > { %19233 = vst [vmem:[#allocation182_spill] sm:$0xff] %v15817_v48  ;;  %v6525_v21 = vsel %vm6290_vm9, %v15817_v48, -inf  ;;  %v12499_v41 = vpop.f32.mrb[81].mxu0  ;;  %v5083_v4 = vpop.f32.mrb[78].mxu1  ;;  %19234 = vst [vmem:[#allocation183_spill] sm:$0xff] %v15825_v25 }
 0x269   : > { %v15829_v7 = vsel %vm14556_vm11, %v5083_v4, -10000.0  ;;  %v5126_v51 = vpop.f32.mrb[82].mxu0  ;;  %v15831_v18 = vpop.xlane.xlu1 %6313  ;;  %6526 = vmax.xlane.f32.xlu0 %v6525_v21  ;;  %v6531_v4 = vsel %vm6290_vm9, %v15825_v25, -inf }
 0x26a   : > { %19235 = vst [vmem:[#allocation184_spill] sm:$0xff] %v15829_v7  ;;  %v6528_v57 = vsel %vm6290_vm9, %v15829_v7, -inf  ;;  %v12494_v31 = vpop.f32.mrb[79].mxu1  ;;  %v12500_v11 = vpop.f32.mrb[83].mxu0  ;;  %v15837_v41 = vsel %vm14556_vm11, %v5126_v51, -10000.0 }
 0x26b   : > { %19236 = vst [vmem:[#allocation185_spill] sm:$0xff] %v15837_v41  ;;  %v15839_v14 = vpop.xlane.xlu0 %6310  ;;  %6529 = vmax.xlane.f32.xlu1 %v6528_v57  ;;  %v6534_v21 = vsel %vm6290_vm9, %v15837_v41, -inf }
 0x26d   : > { %v15843_v49 = vpop.xlane.xlu1 %6319  ;;  %6532 = vmax.xlane.f32.xlu0 %v6531_v4 }
 0x26e   : > { %v5166_v50 = vpop.f32.mrb[80].mxu1  ;;  %v5209_v37 = vpop.f32.mrb[84].mxu0 }
 0x26f   : > { %v15849_v11 = vsel %vm14551_vm10, %v5166_v50, -10000.0  ;;  %v15851_v51 = vpop.xlane.xlu0 %6316  ;;  %v12505_v31 = vpop.f32.mrb[81].mxu1  ;;  %6535 = vmax.xlane.f32.xlu1 %v6534_v21  ;;  %v15857_v4 = vsel %vm14551_vm10, %v5209_v37, -10000.0 }
 0x270   : > { %19237 = vst [vmem:[#allocation186_spill] sm:$0xff] %v15849_v11  ;;  %v6537_v57 = vsel %vm6290_vm9, %v15849_v11, -inf  ;;  %v12511_v25 = vpop.f32.mrb[85].mxu0  ;;  %v5169_v60 = vpop.f32.mrb[82].mxu1  ;;  %19238 = vst [vmem:[#allocation187_spill] sm:$0xff] %v15857_v4 }
 0x271   : > { %v15861_v41 = vsel %vm14556_vm11, %v5169_v60, -10000.0  ;;  %v5212_v28 = vpop.f32.mrb[86].mxu0  ;;  %v15863_v50 = vpop.xlane.xlu1 %6325  ;;  %6538 = vmax.xlane.f32.xlu0 %v6537_v57  ;;  %v6543_v60 = vsel %vm6290_vm9, %v15857_v4, -inf }
 0x272   : > { %19239 = vst [vmem:[#allocation188_spill] sm:$0xff] %v15861_v41  ;;  %v6540_v21 = vsel %vm6290_vm9, %v15861_v41, -inf  ;;  %v12506_v31 = vpop.f32.mrb[83].mxu1  ;;  %v12512_v24 = vpop.f32.mrb[87].mxu0  ;;  %v15869_v25 = vsel %vm14556_vm11, %v5212_v28, -10000.0 }
 0x273   : > { %19240 = vst [vmem:[#allocation189_spill] sm:$0xff] %v15869_v25  ;;  %v15871_v11 = vpop.xlane.xlu0 %6322  ;;  %6541 = vmax.xlane.f32.xlu1 %v6540_v21  ;;  %v6546_v57 = vsel %vm6290_vm9, %v15869_v25, -inf }
 0x275   : > { %v15875_v37 = vpop.xlane.xlu1 %6331  ;;  %6544 = vmax.xlane.f32.xlu0 %v6543_v60 }
 0x276   : > { %v5252_v7 = vpop.f32.mrb[84].mxu1  ;;  %v5295_v41 = vpop.f32.mrb[88].mxu0 }
 0x277   : > { %v15881_v24 = vsel %vm14551_vm10, %v5252_v7, -10000.0  ;;  %v15883_v28 = vpop.xlane.xlu0 %6328  ;;  %v12517_v31 = vpop.f32.mrb[85].mxu1  ;;  %6547 = vmax.xlane.f32.xlu1 %v6546_v57  ;;  %v15889_v60 = vsel %vm14551_vm10, %v5295_v41, -10000.0 }
 0x278   : > { %19241 = vst [vmem:[#allocation190_spill] sm:$0xff] %v15881_v24  ;;  %v6549_v21 = vsel %vm6290_vm9, %v15881_v24, -inf  ;;  %v12523_v4 = vpop.f32.mrb[89].mxu0  ;;  %v5255_v47 = vpop.f32.mrb[86].mxu1  ;;  %19242 = vst [vmem:[#allocation191_spill] sm:$0xff] %v15889_v60 }
 0x279   : > { %v15893_v25 = vsel %vm14556_vm11, %v5255_v47, -10000.0  ;;  %v5298_v48 = vpop.f32.mrb[90].mxu0  ;;  %v15895_v7 = vpop.xlane.xlu1 %6337  ;;  %6550 = vmax.xlane.f32.xlu0 %v6549_v21  ;;  %v6555_v47 = vsel %vm6290_vm9, %v15889_v60, -inf }
 0x27a   : > { %19243 = vst [vmem:[#allocation192_spill] sm:$0xff] %v15893_v25  ;;  %19244 = vst [vmem:[#allocation193_spill] sm:$0xff] %v15895_v7  ;;  %v6552_v57 = vsel %vm6290_vm9, %v15893_v25, -inf  ;;  %v12518_v31 = vpop.f32.mrb[87].mxu1  ;;  %v12524_v8 = vpop.f32.mrb[91].mxu0  ;;  %v15901_v4 = vsel %vm14556_vm11, %v5298_v48, -10000.0 }
 0x27b   : > { %19245 = vst [vmem:[#allocation194_spill] sm:$0xff] %v15901_v4  ;;  %v15903_v24 = vpop.xlane.xlu0 %6334  ;;  %6553 = vmax.xlane.f32.xlu1 %v6552_v57  ;;  %v6558_v21 = vsel %vm6290_vm9, %v15901_v4, -inf }
 0x27d   : > { %v15907_v41 = vpop.xlane.xlu1 %6343  ;;  %6556 = vmax.xlane.f32.xlu0 %v6555_v47 }
 0x27e   : > { %19246 = vst [vmem:[#allocation195_spill] sm:$0xff] %v15907_v41  ;;  %v5338_v7 = vpop.f32.mrb[88].mxu1  ;;  %v5381_v25 = vpop.f32.mrb[92].mxu0 }
 0x27f   : > { %v15913_v8 = vsel %vm14551_vm10, %v5338_v7, -10000.0  ;;  %v15915_v48 = vpop.xlane.xlu0 %6340  ;;  %v12529_v31 = vpop.f32.mrb[89].mxu1  ;;  %6559 = vmax.xlane.f32.xlu1 %v6558_v21  ;;  %v15921_v47 = vsel %vm14551_vm10, %v5381_v25, -10000.0 }
 0x280   : > { %19247 = vst [vmem:[#allocation196_spill] sm:$0xff] %v15913_v8  ;;  %19248 = vst [vmem:[#allocation197_spill] sm:$0xff] %v15915_v48  ;;  %v6561_v57 = vsel %vm6290_vm9, %v15913_v8, -inf  ;;  %v12535_v60 = vpop.f32.mrb[93].mxu0  ;;  %v5341_v19 = vpop.f32.mrb[90].mxu1 }
 0x281   : > { %19249 = vst [vmem:[#allocation198_spill] sm:$0xff] %v15921_v47  ;;  %v15925_v4 = vsel %vm14556_vm11, %v5341_v19, -10000.0  ;;  %v5384_v41 = vpop.f32.mrb[94].mxu0  ;;  %v15927_v7 = vpop.xlane.xlu1 %6349  ;;  %6562 = vmax.xlane.f32.xlu0 %v6561_v57  ;;  %v6567_v19 = vsel %vm6290_vm9, %v15921_v47, -inf }
 0x282   : > { %19250 = vst [vmem:[#allocation199_spill] sm:$0xff] %v15925_v4  ;;  %19251 = vst [vmem:[#allocation200_spill] sm:$0xff] %v15927_v7  ;;  %v6564_v21 = vsel %vm6290_vm9, %v15925_v4, -inf  ;;  %v12530_v31 = vpop.f32.mrb[91].mxu1  ;;  %v12536_v48 = vpop.f32.mrb[95].mxu0  ;;  %v15933_v60 = vsel %vm14556_vm11, %v5384_v41, -10000.0 }
 0x283   : > { %19252 = vst [vmem:[#allocation201_spill] sm:$0xff] %v15933_v60  ;;  %v15935_v8 = vpop.xlane.xlu0 %6346  ;;  %6565 = vmax.xlane.f32.xlu1 %v6564_v21  ;;  %v6570_v57 = vsel %vm6290_vm9, %v15933_v60, -inf }
 0x284   : > { %19253 = vst [vmem:[#allocation202_spill] sm:$0xff] %v15935_v8 }
 0x285   : > { %v15939_v25 = vpop.xlane.xlu1 %6355  ;;  %6568 = vmax.xlane.f32.xlu0 %v6567_v19 }
 0x286   : > { %19254 = vst [vmem:[#allocation203_spill] sm:$0xff] %v15939_v25  ;;  %v5424_v7 = vpop.f32.mrb[92].mxu1  ;;  %v5467_v4 = vpop.f32.mrb[96].mxu0 }
 0x287   : > { %v15945_v48 = vsel %vm14551_vm10, %v5424_v7, -10000.0  ;;  %v15947_v41 = vpop.xlane.xlu0 %6352  ;;  %v12541_v31 = vpop.f32.mrb[93].mxu1  ;;  %6571 = vmax.xlane.f32.xlu1 %v6570_v57  ;;  %v15953_v19 = vsel %vm14551_vm10, %v5467_v4, -10000.0 }
 0x288   : > { %19255 = vst [vmem:[#allocation204_spill] sm:$0xff] %v15945_v48  ;;  %19256 = vst [vmem:[#allocation205_spill] sm:$0xff] %v15947_v41  ;;  %v6573_v21 = vsel %vm6290_vm9, %v15945_v48, -inf  ;;  %v12547_v47 = vpop.f32.mrb[97].mxu0  ;;  %v5427_v8 = vpop.f32.mrb[94].mxu1  ;;  %v6579_v4 = vsel %vm6290_vm9, %v15953_v19, -inf }
 0x289   : > { %19257 = vst [vmem:[#allocation206_spill] sm:$0xff] %v15953_v19  ;;  %v15957_v60 = vsel %vm14556_vm11, %v5427_v8, -10000.0  ;;  %v5470_v25 = vpop.f32.mrb[98].mxu0  ;;  %v15959_v7 = vpop.xlane.xlu1 %6361  ;;  %6574 = vmax.xlane.f32.xlu0 %v6573_v21 }
 0x28a   : > { %19258 = vst [vmem:[#allocation207_spill] sm:$0xff] %v15957_v60  ;;  %19259 = vst [vmem:[#allocation208_spill] sm:$0xff] %v15959_v7  ;;  %v6576_v57 = vsel %vm6290_vm9, %v15957_v60, -inf  ;;  %v12542_v31 = vpop.f32.mrb[95].mxu1  ;;  %v12548_v41 = vpop.f32.mrb[99].mxu0  ;;  %v15965_v47 = vsel %vm14556_vm11, %v5470_v25, -10000.0 }
 0x28b   : > { %19260 = vst [vmem:[#allocation209_spill] sm:$0xff] %v15965_v47  ;;  %v15967_v48 = vpop.xlane.xlu0 %6358  ;;  %6577 = vmax.xlane.f32.xlu1 %v6576_v57  ;;  %v6582_v21 = vsel %vm6290_vm9, %v15965_v47, -inf }
 0x28c   : > { %19261 = vst [vmem:[#allocation210_spill] sm:$0xff] %v15967_v48 }
 0x28d   : > { %v15971_v8 = vpop.xlane.xlu1 %6367  ;;  %6580 = vmax.xlane.f32.xlu0 %v6579_v4 }
 0x28e   : > { %19262 = vst [vmem:[#allocation211_spill] sm:$0xff] %v15971_v8  ;;  %v5510_v7 = vpop.f32.mrb[96].mxu1  ;;  %v5553_v60 = vpop.f32.mrb[100].mxu0 }
 0x28f   : > { %v15977_v41 = vsel %vm14551_vm10, %v5510_v7, -10000.0  ;;  %v15979_v25 = vpop.xlane.xlu0 %6364  ;;  %v12553_v31 = vpop.f32.mrb[97].mxu1  ;;  %6583 = vmax.xlane.f32.xlu1 %v6582_v21  ;;  %v15985_v4 = vsel %vm14551_vm10, %v5553_v60, -10000.0 }
 0x290   : > { %19263 = vst [vmem:[#allocation212_spill] sm:$0xff] %v15977_v41  ;;  %19264 = vst [vmem:[#allocation213_spill] sm:$0xff] %v15979_v25  ;;  %v6585_v57 = vsel %vm6290_vm9, %v15977_v41, -inf  ;;  %v12559_v19 = vpop.f32.mrb[101].mxu0  ;;  %v5513_v48 = vpop.f32.mrb[98].mxu1  ;;  %v6591_v60 = vsel %vm6290_vm9, %v15985_v4, -inf }
 0x291   : > { %19265 = vst [vmem:[#allocation214_spill] sm:$0xff] %v15985_v4  ;;  %v15989_v47 = vsel %vm14556_vm11, %v5513_v48, -10000.0  ;;  %v5556_v8 = vpop.f32.mrb[102].mxu0  ;;  %v15991_v7 = vpop.xlane.xlu1 %6373  ;;  %6586 = vmax.xlane.f32.xlu0 %v6585_v57 }
 0x292   : > { %19266 = vst [vmem:[#allocation215_spill] sm:$0xff] %v15989_v47  ;;  %19267 = vst [vmem:[#allocation216_spill] sm:$0xff] %v15991_v7  ;;  %v6588_v21 = vsel %vm6290_vm9, %v15989_v47, -inf  ;;  %v12554_v31 = vpop.f32.mrb[99].mxu1  ;;  %v12560_v25 = vpop.f32.mrb[103].mxu0  ;;  %v15997_v19 = vsel %vm14556_vm11, %v5556_v8, -10000.0 }
 0x293   : > { %19268 = vst [vmem:[#allocation217_spill] sm:$0xff] %v15997_v19  ;;  %v15999_v41 = vpop.xlane.xlu0 %6370  ;;  %6589 = vmax.xlane.f32.xlu1 %v6588_v21  ;;  %v6594_v57 = vsel %vm6290_vm9, %v15997_v19, -inf }
 0x294   : > { %19269 = vst [vmem:[#allocation218_spill] sm:$0xff] %v15999_v41 }
 0x295   : > { %v16003_v48 = vpop.xlane.xlu1 %6379  ;;  %6592 = vmax.xlane.f32.xlu0 %v6591_v60 }
 0x296   : > { %19270 = vst [vmem:[#allocation219_spill] sm:$0xff] %v16003_v48  ;;  %v5596_v7 = vpop.f32.mrb[100].mxu1  ;;  %v5639_v47 = vpop.f32.mrb[104].mxu0 }
 0x297   : > { %v16009_v25 = vsel %vm14551_vm10, %v5596_v7, -10000.0  ;;  %v16011_v8 = vpop.xlane.xlu0 %6376  ;;  %v12565_v31 = vpop.f32.mrb[101].mxu1  ;;  %6595 = vmax.xlane.f32.xlu1 %v6594_v57  ;;  %v16017_v60 = vsel %vm14551_vm10, %v5639_v47, -10000.0 }
 0x298   : > { %19271 = vst [vmem:[#allocation220_spill] sm:$0xff] %v16009_v25  ;;  %19272 = vst [vmem:[#allocation221_spill] sm:$0xff] %v16011_v8  ;;  %v6597_v21 = vsel %vm6290_vm9, %v16009_v25, -inf  ;;  %v12571_v4 = vpop.f32.mrb[105].mxu0  ;;  %v5599_v41 = vpop.f32.mrb[102].mxu1  ;;  %v6603_v47 = vsel %vm6290_vm9, %v16017_v60, -inf }
 0x299   : > { %19273 = vst [vmem:[#allocation222_spill] sm:$0xff] %v16017_v60  ;;  %v16021_v19 = vsel %vm14556_vm11, %v5599_v41, -10000.0  ;;  %v5642_v48 = vpop.f32.mrb[106].mxu0  ;;  %v16023_v7 = vpop.xlane.xlu1 %6385  ;;  %6598 = vmax.xlane.f32.xlu0 %v6597_v21 }
 0x29a   : > { %19274 = vst [vmem:[#allocation223_spill] sm:$0xff] %v16021_v19  ;;  %19275 = vst [vmem:[#allocation224_spill] sm:$0xff] %v16023_v7  ;;  %v6600_v57 = vsel %vm6290_vm9, %v16021_v19, -inf  ;;  %v12566_v31 = vpop.f32.mrb[103].mxu1  ;;  %v12572_v8 = vpop.f32.mrb[107].mxu0  ;;  %v16029_v4 = vsel %vm14556_vm11, %v5642_v48, -10000.0 }
 0x29b   : > { %19276 = vst [vmem:[#allocation225_spill] sm:$0xff] %v16029_v4  ;;  %v16031_v25 = vpop.xlane.xlu0 %6382  ;;  %6601 = vmax.xlane.f32.xlu1 %v6600_v57  ;;  %v6606_v21 = vsel %vm6290_vm9, %v16029_v4, -inf }
 0x29c   : > { %19277 = vst [vmem:[#allocation226_spill] sm:$0xff] %v16031_v25 }
 0x29d   : > { %v16035_v41 = vpop.xlane.xlu1 %6391  ;;  %6604 = vmax.xlane.f32.xlu0 %v6603_v47 }
 0x29e   : > { %19278 = vst [vmem:[#allocation227_spill] sm:$0xff] %v16035_v41  ;;  %v5682_v7 = vpop.f32.mrb[104].mxu1  ;;  %v5725_v19 = vpop.f32.mrb[108].mxu0 }
 0x29f   : > { %v16041_v8 = vsel %vm14551_vm10, %v5682_v7, -10000.0  ;;  %v16043_v48 = vpop.xlane.xlu0 %6388  ;;  %v12577_v31 = vpop.f32.mrb[105].mxu1  ;;  %6607 = vmax.xlane.f32.xlu1 %v6606_v21  ;;  %v16049_v47 = vsel %vm14551_vm10, %v5725_v19, -10000.0 }
 0x2a0   : > { %19279 = vst [vmem:[#allocation228_spill] sm:$0xff] %v16041_v8  ;;  %19280 = vst [vmem:[#allocation229_spill] sm:$0xff] %v16043_v48  ;;  %v6609_v57 = vsel %vm6290_vm9, %v16041_v8, -inf  ;;  %v12583_v60 = vpop.f32.mrb[109].mxu0  ;;  %v5685_v25 = vpop.f32.mrb[106].mxu1  ;;  %v6615_v19 = vsel %vm6290_vm9, %v16049_v47, -inf }
 0x2a1   : > { %19281 = vst [vmem:[#allocation230_spill] sm:$0xff] %v16049_v47  ;;  %v16053_v4 = vsel %vm14556_vm11, %v5685_v25, -10000.0  ;;  %v5728_v41 = vpop.f32.mrb[110].mxu0  ;;  %v16055_v7 = vpop.xlane.xlu1 %6397  ;;  %6610 = vmax.xlane.f32.xlu0 %v6609_v57 }
 0x2a2   : > { %19282 = vst [vmem:[#allocation231_spill] sm:$0xff] %v16053_v4  ;;  %19283 = vst [vmem:[#allocation232_spill] sm:$0xff] %v16055_v7  ;;  %v6612_v21 = vsel %vm6290_vm9, %v16053_v4, -inf  ;;  %v12578_v31 = vpop.f32.mrb[107].mxu1  ;;  %v12584_v48 = vpop.f32.mrb[111].mxu0  ;;  %v16061_v60 = vsel %vm14556_vm11, %v5728_v41, -10000.0 }
 0x2a3   : > { %19284 = vst [vmem:[#allocation233_spill] sm:$0xff] %v16061_v60  ;;  %v16063_v8 = vpop.xlane.xlu0 %6394  ;;  %6613 = vmax.xlane.f32.xlu1 %v6612_v21  ;;  %v6618_v57 = vsel %vm6290_vm9, %v16061_v60, -inf }
 0x2a4   : > { %19285 = vst [vmem:[#allocation234_spill] sm:$0xff] %v16063_v8 }
 0x2a5   : > { %v16067_v25 = vpop.xlane.xlu1 %6403  ;;  %6616 = vmax.xlane.f32.xlu0 %v6615_v19 }
 0x2a6   : > { %19286 = vst [vmem:[#allocation235_spill] sm:$0xff] %v16067_v25  ;;  %v5768_v7 = vpop.f32.mrb[108].mxu1  ;;  %v5811_v4 = vpop.f32.mrb[112].mxu0 }
 0x2a7   : > { %v16073_v48 = vsel %vm14551_vm10, %v5768_v7, -10000.0  ;;  %v16075_v41 = vpop.xlane.xlu0 %6400  ;;  %v12589_v31 = vpop.f32.mrb[109].mxu1  ;;  %6619 = vmax.xlane.f32.xlu1 %v6618_v57  ;;  %v16081_v19 = vsel %vm14551_vm10, %v5811_v4, -10000.0 }
 0x2a8   : > { %19287 = vst [vmem:[#allocation236_spill] sm:$0xff] %v16073_v48  ;;  %19288 = vst [vmem:[#allocation237_spill] sm:$0xff] %v16075_v41  ;;  %v6621_v21 = vsel %vm6290_vm9, %v16073_v48, -inf  ;;  %v12595_v47 = vpop.f32.mrb[113].mxu0  ;;  %v5771_v8 = vpop.f32.mrb[110].mxu1  ;;  %v6627_v4 = vsel %vm6290_vm9, %v16081_v19, -inf }
 0x2a9   : > { %19289 = vst [vmem:[#allocation238_spill] sm:$0xff] %v16081_v19  ;;  %v16085_v60 = vsel %vm14556_vm11, %v5771_v8, -10000.0  ;;  %v5814_v25 = vpop.f32.mrb[114].mxu0  ;;  %v16087_v7 = vpop.xlane.xlu1 %6409  ;;  %6622 = vmax.xlane.f32.xlu0 %v6621_v21 }
 0x2aa   : > { %19290 = vst [vmem:[#allocation239_spill] sm:$0xff] %v16085_v60  ;;  %19291 = vst [vmem:[#allocation240_spill] sm:$0xff] %v16087_v7  ;;  %v6624_v57 = vsel %vm6290_vm9, %v16085_v60, -inf  ;;  %v12590_v31 = vpop.f32.mrb[111].mxu1  ;;  %v12596_v41 = vpop.f32.mrb[115].mxu0  ;;  %v16093_v47 = vsel %vm14556_vm11, %v5814_v25, -10000.0 }
 0x2ab   : > { %19292 = vst [vmem:[#allocation241_spill] sm:$0xff] %v16093_v47  ;;  %v16095_v48 = vpop.xlane.xlu0 %6406  ;;  %6625 = vmax.xlane.f32.xlu1 %v6624_v57  ;;  %v6630_v8 = vsel %vm6290_vm9, %v16093_v47, -inf  ;;  %v16114_v47 = vsel %vm15288_vm8, %v15699_v62, -10000.0 }
 0x2ac   : > { %19293 = vst [vmem:[#allocation242_spill] sm:$0xff] %v16095_v48  ;;  %19297 = vst [vmem:[#allocation246_spill] sm:$0xff] %v16114_v47  ;;  %v6453_v62 = vsel %vm6290_vm9, %v16114_v47, -inf }
 0x2ad   : > { %6628 = vmax.xlane.f32.xlu0 %v6627_v4  ;;  %v16101_v21 = vpop.xlane.xlu1 %6415 }
 0x2ae   : > { %19294 = vst [vmem:[#allocation243_spill] sm:$0xff] %v16101_v21  ;;  %v5897_v7 = vpop.f32.mrb[116].mxu0 }
 0x2af   : > { %v5854_v60 = vpop.f32.mrb[112].mxu1  ;;  %v16103_v31 = vpop.xlane.xlu0 %6412  ;;  %6631 = vmax.xlane.f32.xlu1 %v6630_v8 }
 0x2b0   : > { %19295 = vst [vmem:[#allocation244_spill] sm:$0xff] %v16103_v31  ;;  %v16107_v25 = vsel %vm14551_vm10, %v5854_v60, -10000.0  ;;  %v12601_v41 = vpop.f32.mrb[113].mxu1  ;;  %v12607_v57 = vpop.f32.mrb[117].mxu0 }
 0x2b1   : > { %19296 = vst [vmem:[#allocation245_spill] sm:$0xff] %v16107_v25  ;;  %v6633_v19 = vsel %vm6290_vm9, %v16107_v25, -inf  ;;  %v5857_v4 = vpop.f32.mrb[114].mxu1  ;;  %v5900_v48 = vpop.f32.mrb[118].mxu0  ;;  %v16127_v25 = vsel %vm15300_vm1, %v15705_v0, -10000.0 }
 0x2b2   : > { %v16118_v21 = vsel %vm14556_vm11, %v5857_v4, -10000.0  ;;  %v12602_v8 = vpop.f32.mrb[115].mxu1  ;;  %6634 = vmax.xlane.f32.xlu0 %v6633_v19  ;;  %v12608_v41 = vpop.f32.mrb[119].mxu0  ;;  %19300 = vst [vmem:[#allocation249_spill] sm:$0xff] %v16127_v25  ;;  %v16133_v4 = vsel %vm14551_vm10, %v5897_v7, -10000.0  ;;  %v16143_v0 = vsel %vm14556_vm11, %v5900_v48, -10000.0 }
 0x2b3   : > { %19298 = vst [vmem:[#allocation247_spill] sm:$0xff] %v16118_v21  ;;  %v6636_v60 = vsel %vm6290_vm9, %v16118_v21, -inf  ;;  %v16122_v57 = vpop.xlane.xlu0 %6418  ;;  %19301 = vst [vmem:[#allocation250_spill] sm:$0xff] %v16133_v4  ;;  %v16135_v19 = vpop.xlane.xlu1 %6421  ;;  %v6456_v41 = vsel %vm6290_vm9, %v16127_v25, -inf  ;;  %v6639_v7 = vsel %vm6290_vm9, %v16133_v4, -inf }
 0x2b4   : > { %19299 = vst [vmem:[#allocation248_spill] sm:$0xff] %v16122_v57  ;;  %6637 = vmax.xlane.f32.xlu1 %v6636_v60  ;;  %19302 = vst [vmem:[#allocation251_spill] sm:$0xff] %v16135_v19 }
 0x2b5   : > { %19304 = vst [vmem:[#allocation253_spill] sm:$0xff] %v16143_v0 }
 0x2b6   : > { %6454 = vmax.xlane.f32.xlu0 %v6453_v62  ;;  %v5983_v8 = vpop.f32.mrb[120].mxu0 }
 0x2b7   : > { %v16139_v21 = vpop.xlane.xlu0 %6424  ;;  %v12619_v57 = vpop.f32.mrb[121].mxu0 }
 0x2b8   : > { %19303 = vst [vmem:[#allocation252_spill] sm:$0xff] %v16139_v21  ;;  %v5940_v60 = vpop.f32.mrb[116].mxu1  ;;  %6457 = vmax.xlane.f32.xlu1 %v6456_v41  ;;  %v5986_v47 = vpop.f32.mrb[122].mxu0  ;;  %v6642_v57 = vsel %vm6290_vm9, %v16143_v0, -inf }
 0x2b9   : > { %v12613_v31 = vpop.f32.mrb[117].mxu1  ;;  %v12620_v19 = vpop.f32.mrb[123].mxu0  ;;  %v16149_v62 = vsel %vm14551_vm10, %v5940_v60, -10000.0 }
 0x2ba   : > { %19305 = vst [vmem:[#allocation254_spill] sm:$0xff] %v16149_v62  ;;  %v5943_v25 = vpop.f32.mrb[118].mxu1  ;;  %6640 = vmax.xlane.f32.xlu0 %v6639_v7  ;;  %v16153_v48 = vpop.xlane.xlu1 %6427  ;;  %v6645_v31 = vsel %vm6290_vm9, %v16149_v62, -inf  ;;  %v16164_v19 = vsel %vm15288_vm8, %v15701_v52, -10000.0 }
 0x2bb   : > { %v12614_v21 = vpop.f32.mrb[119].mxu1  ;;  %19306 = vst [vmem:[#allocation255_spill] sm:$0xff] %v16153_v48  ;;  %v16157_v41 = vsel %vm14556_vm11, %v5943_v25, -10000.0  ;;  %19308 = vst [vmem:[#allocation257_spill] sm:$0xff] %v16164_v19  ;;  %v16170_v7 = vpop.xlane.xlu0 %6430  ;;  %v16175_v25 = vsel %vm15300_vm1, %v15707_v17, -10000.0  ;;  %v6459_v52 = vsel %vm6290_vm9, %v16164_v19, -inf }
 0x2bc   : > { %19307 = vst [vmem:[#allocation256_spill] sm:$0xff] %v16157_v41  ;;  %6643 = vmax.xlane.f32.xlu1 %v6642_v57  ;;  %v6648_v21 = vsel %vm6290_vm9, %v16157_v41, -inf  ;;  %19309 = vst [vmem:[#allocation258_spill] sm:$0xff] %v16170_v7  ;;  %v16184_v41 = vsel %vm15288_vm8, %v15709_v35, -10000.0  ;;  %v6462_v17 = vsel %vm6290_vm9, %v16175_v25, -inf  ;;  %v16193_v7 = vsel %vm15300_vm1, %v15713_v38, -10000.0 }
 0x2bd   : > { %19310 = vst [vmem:[#allocation259_spill] sm:$0xff] %v16175_v25  ;;  %19311 = vst [vmem:[#allocation260_spill] sm:$0xff] %v16184_v41  ;;  %v16199_v35 = vsel %vm14551_vm10, %v5983_v8, -10000.0 }
 0x2be   : > { %6646 = vmax.xlane.f32.xlu0 %v6645_v31  ;;  %v16166_v60 = vpop.f32.mrb[124].mxu0  ;;  %19313 = vst [vmem:[#allocation262_spill] sm:$0xff] %v16193_v7  ;;  %19314 = vst [vmem:[#allocation263_spill] sm:$0xff] %v16199_v35  ;;  %v6651_v25 = vsel %vm6290_vm9, %v16199_v35, -inf }
 0x2bf   : > { %v12631_v0 = vpop.f32.mrb[125].mxu0 }
 0x2c0   : > { %v6026_v57 = vpop.f32.mrb[120].mxu1  ;;  %6649 = vmax.xlane.f32.xlu1 %v6648_v21  ;;  %v16177_v62 = vpop.f32.mrb[126].mxu0 }
 0x2c1   : > { %v12625_v31 = vpop.f32.mrb[121].mxu1  ;;  %v12632_v4 = vpop.f32.mrb[127].mxu0 }
 0x2c2   : > { %v16186_v0 = vpop.xlane.xlu1 %6433  ;;  %v6029_v48 = vpop.f32.mrb[122].mxu1  ;;  %6460 = vmax.xlane.f32.xlu0 %v6459_v52  ;;  %v6465_v4 = vsel %vm6290_vm9, %v16184_v41, -inf  ;;  %v6468_v52 = vsel %vm6290_vm9, %v16193_v7, -inf  ;;  %v16217_v41 = vsel %vm14551_vm10, %v6026_v57, -10000.0 }
 0x2c3   : > { %19312 = vst [vmem:[#allocation261_spill] sm:$0xff] %v16186_v0  ;;  %v12626_v21 = vpop.f32.mrb[123].mxu1  ;;  %v16201_v31 = vpop.xlane.xlu0 %6436  ;;  %19318 = vst [vmem:[#allocation267_spill] sm:$0xff] %v16217_v41  ;;  %v16225_v19 = vsel %vm14556_vm11, %v6029_v48, -10000.0 }
 0x2c4   : > { %6463 = vmax.xlane.f32.xlu1 %v6462_v17  ;;  %19315 = vst [vmem:[#allocation264_spill] sm:$0xff] %v16201_v31  ;;  %v16207_v21 = vsel %vm14556_vm11, %v5986_v47, -10000.0  ;;  %19319 = vst [vmem:[#allocation268_spill] sm:$0xff] %v16225_v19 }
 0x2c5   : > { %19316 = vst [vmem:[#allocation265_spill] sm:$0xff] %v16207_v21  ;;  %v6654_v47 = vsel %vm6290_vm9, %v16207_v21, -inf }
 0x2c6   : > { %6466 = vmax.xlane.f32.xlu0 %v6465_v4  ;;  %v16209_v38 = vpop.xlane.xlu1 %6439 }
 0x2c7   : > { %19317 = vst [vmem:[#allocation266_spill] sm:$0xff] %v16209_v38 }
 0x2c8   : > { %v16211_v17 = vpop.f32.mrb[124].mxu1  ;;  %6469 = vmax.xlane.f32.xlu1 %v6468_v52  ;;  %v16227_v52 = vpop.xlane.xlu0 %6442 }
 0x2c9   : > { %v12637_v8 = vpop.f32.mrb[125].mxu1  ;;  %19320 = vst [vmem:[#allocation269_spill] sm:$0xff] %v16227_v52 }
 0x2ca   : > { %v16219_v4 = vpop.f32.mrb[126].mxu1  ;;  %6652 = vmax.xlane.f32.xlu0 %v6651_v25  ;;  %v6657_v8 = vsel %vm6290_vm9, %v16217_v41, -inf  ;;  %v16231_v35 = vpop.xlane.xlu1 %6445  ;;  %v6660_v25 = vsel %vm6290_vm9, %v16225_v19, -inf }
 0x2cb   : > { %v12638_v7 = vpop.f32.mrb[127].mxu1  ;;  %19321 = vst [vmem:[#allocation270_spill] sm:$0xff] %v16231_v35  ;;  %v16547_v42 = vsel %vm14556_vm11, %v16219_v4, -10000.0 }
 0x2cc   : > { %6655 = vmax.xlane.f32.xlu1 %v6654_v47  ;;  %v16235_v57 = vpop.xlane.xlu0 %6448 }
 0x2cd   : > { %19322 = vst [vmem:[#allocation271_spill] sm:$0xff] %v16235_v57 }
 0x2ce   : > { %6658 = vmax.xlane.f32.xlu0 %v6657_v8  ;;  %v16237_v7 = vpop.xlane.xlu1 %6451 }
 0x2cf   : > { %19323 = vst [vmem:[#allocation272_spill] sm:$0xff] %v16237_v7 }
 0x2d0   : > { %6661 = vmax.xlane.f32.xlu1 %v6660_v25 }
 0x2d6   : > { %v6485_v21 = vpop.xlane.xlu0 %6484 }
 0x2d7   : > { %v6675_v48 = vmax.f32 %v15773_v15, %v6485_v21 }
 0x2d8   : > { %v6488_v38 = vpop.xlane.xlu1 %6487 }
 0x2d9   : > { %v6739_v47 = vsub.f32 %v15306_v5, %v6675_v48  ;;  %v6931_v52 = vsub.f32 %v15721_v53, %v6675_v48  ;;  %v6676_v41 = vmax.f32 %v15791_v44, %v6488_v38 }
 0x2db   : > { %v6803_v35 = vmul.f32 1.442695, %v6739_v47  ;;  %v6995_v8 = vmul.f32 1.442695, %v6931_v52  ;;  %v6740_v31 = vsub.f32 %v15314_v22, %v6676_v41  ;;  %v6932_v25 = vsub.f32 %v15729_v2, %v6676_v41 }
 0x2dd   : > { %13249 = vpow2.f32 %v6803_v35  ;;  %v6805_v19 = vmul.f32 1.442695, %v6740_v31  ;;  %v6997_v57 = vmul.f32 1.442695, %v6932_v25 }
 0x2de   : > { %13251 = vpow2.f32 %v6995_v8  ;;  %v6491_v7 = vpop.xlane.xlu0 %6490 }
 0x2df   : > { %13253 = vpow2.f32 %v6805_v19  ;;  %v6677_v15 = vmax.f32 %v15787_v34, %v6491_v7 }
 0x2e0   : > { %v6494_v21 = vpop.xlane.xlu1 %6493  ;;  %13255 = vpow2.f32 %v6997_v57 }
 0x2e1   : > { %v6741_v5 = vsub.f32 %v15332_v20, %v6677_v15  ;;  %v6933_v44 = vsub.f32 %v15735_v59, %v6677_v15  ;;  %v6678_v53 = vmax.f32 %v15807_v12, %v6494_v21 }
 0x2e2   : > { %v6497_v38 = vpop.xlane.xlu0 %6496 }
 0x2e3   : > { %v6807_v22 = vmul.f32 1.442695, %v6741_v5  ;;  %v6999_v52 = vmul.f32 1.442695, %v6933_v44  ;;  %v6742_v2 = vsub.f32 %v15340_v13, %v6678_v53  ;;  %v6934_v41 = vsub.f32 %v15745_v46, %v6678_v53 }
 0x2e4   : > { %v6679_v35 = vmax.f32 %v15819_v29, %v6497_v38  ;;  %v6500_v19 = vpop.xlane.xlu1 %6499 }
 0x2e5   : > { %13257 = vpow2.f32 %v6807_v22  ;;  %v6809_v34 = vmul.f32 1.442695, %v6742_v2  ;;  %v6680_v31 = vmax.f32 %v15811_v36, %v6500_v19  ;;  %v7001_v20 = vmul.f32 1.442695, %v6934_v41 }
 0x2e6   : > { %13259 = vpow2.f32 %v6999_v52  ;;  %v6743_v59 = vsub.f32 %v15358_v33, %v6679_v35  ;;  %v6935_v12 = vsub.f32 %v15741_v39, %v6679_v35  ;;  %v6503_v57 = vpop.xlane.xlu0 %6502 }
 0x2e7   : > { %v16255_v7 = vpop.eup %13249  ;;  %13261 = vpow2.f32 %v6809_v34  ;;  %v6744_v13 = vsub.f32 %v15344_v3, %v6680_v31  ;;  %v6681_v46 = vmax.f32 %v15839_v14, %v6503_v57  ;;  %v6936_v39 = vsub.f32 %v15751_v1, %v6680_v31 }
 0x2e8   : > { %v16259_v29 = vpop.eup %13251  ;;  %v6811_v48 = vmul.f32 1.442695, %v6743_v59  ;;  %v6506_v47 = vpop.xlane.xlu1 %6505  ;;  %v7123_v36 = vsel %vm6290_vm9, %v16255_v7, 0.0  ;;  %13263 = vpow2.f32 %v7001_v20  ;;  %v7003_v33 = vmul.f32 1.442695, %v6935_v12 }
 0x2e9   : > { %v16263_v8 = vpop.eup %13253  ;;  %7124 = vadd.xlane.f32.xlu0 %v7123_v36  ;;  %v6813_v14 = vmul.f32 1.442695, %v6744_v13  ;;  %v6745_v21 = vsub.f32 %v15370_v32, %v6681_v46  ;;  %v6682_v5 = vmax.f32 %v15831_v18, %v6506_v47  ;;  %v7315_v53 = vsel %vm6290_vm9, %v16259_v29, 0.0 }
 0x2ea   : > { %v6509_v25 = vpop.xlane.xlu0 %6508  ;;  %v7126_v3 = vsel %vm6290_vm9, %v16263_v8, 0.0  ;;  %v16268_v15 = vpop.eup %13255  ;;  %13265 = vpow2.f32 %v6811_v48  ;;  %v7005_v1 = vmul.f32 1.442695, %v6936_v39  ;;  %v6937_v38 = vsub.f32 %v15759_v61, %v6681_v46 }
 0x2eb   : > { %7127 = vadd.xlane.f32.xlu1 %v7126_v3  ;;  %13267 = vpow2.f32 %v7003_v33  ;;  %v7318_v52 = vsel %vm6290_vm9, %v16268_v15, 0.0  ;;  %v6815_v32 = vmul.f32 1.442695, %v6745_v21  ;;  %v6746_v18 = vsub.f32 %v15374_v43, %v6682_v5 }
 0x2ec   : > { %v6512_v44 = vpop.xlane.xlu1 %6511  ;;  %13269 = vpow2.f32 %v6813_v14  ;;  %v6683_v41 = vmax.f32 %v15851_v51, %v6509_v25  ;;  %v7007_v31 = vmul.f32 1.442695, %v6937_v38  ;;  %v6938_v20 = vsub.f32 %v15769_v40, %v6682_v5 }
 0x2ed   : > { %7316 = vadd.xlane.f32.xlu0 %v7315_v53  ;;  %13271 = vpow2.f32 %v7005_v1  ;;  %v6817_v12 = vmul.f32 1.442695, %v6746_v18  ;;  %v6684_v51 = vmax.f32 %v15843_v49, %v6512_v44 }
 0x2ee   : > { %v6515_v22 = vpop.xlane.xlu0 %6514  ;;  %13273 = vpow2.f32 %v6815_v32  ;;  %v6747_v43 = vsub.f32 %v15394_v26, %v6683_v41  ;;  %v7009_v40 = vmul.f32 1.442695, %v6938_v20  ;;  %v6939_v36 = vsub.f32 %v15765_v6, %v6683_v41 }
 0x2ef   : > { %v16277_v2 = vpop.eup %13257  ;;  %7319 = vadd.xlane.f32.xlu1 %v7318_v52  ;;  %13275 = vpow2.f32 %v7007_v31  ;;  %v6748_v33 = vsub.f32 %v15382_v63, %v6684_v51  ;;  %v6685_v39 = vmax.f32 %v15871_v11, %v6515_v22  ;;  %v6940_v63 = vsub.f32 %v15777_v23, %v6684_v51 }
 0x2f0   : > { %v16281_v35 = vpop.eup %13259  ;;  %v6518_v19 = vpop.xlane.xlu1 %6517  ;;  %v7129_v34 = vsel %vm6290_vm9, %v16277_v2, 0.0  ;;  %13277 = vpow2.f32 %v6817_v12  ;;  %v6819_v49 = vmul.f32 1.442695, %v6747_v43  ;;  %v7011_v6 = vmul.f32 1.442695, %v6939_v36 }
 0x2f1   : > { %v16285_v61 = vpop.eup %13261  ;;  %7130 = vadd.xlane.f32.xlu0 %v7129_v34  ;;  %v7321_v48 = vsel %vm6290_vm9, %v16281_v35, 0.0  ;;  %13279 = vpow2.f32 %v7009_v40  ;;  %v6821_v11 = vmul.f32 1.442695, %v6748_v33  ;;  %v6749_v53 = vsub.f32 %v15408_v9, %v6685_v39 }
 0x2f2   : > { %v6521_v59 = vpop.xlane.xlu0 %6520  ;;  %v16290_v57 = vpop.eup %13263  ;;  %v7132_v13 = vsel %vm6290_vm9, %v16285_v61, 0.0  ;;  %13281 = vpow2.f32 %v6819_v49  ;;  %v6686_v1 = vmax.f32 %v15863_v50, %v6518_v19  ;;  %v7013_v23 = vmul.f32 1.442695, %v6940_v63 }
 0x2f3   : > { %7133 = vadd.xlane.f32.xlu1 %v7132_v13  ;;  %v7324_v3 = vsel %vm6290_vm9, %v16290_v57, 0.0  ;;  %13283 = vpow2.f32 %v7011_v6  ;;  %v6941_v9 = vsub.f32 %v15785_v27, %v6685_v39  ;;  %v6823_v50 = vmul.f32 1.442695, %v6749_v53 }
 0x2f4   : > { %v6524_v46 = vpop.xlane.xlu1 %6523  ;;  %v16296_v47 = vpop.eup %13265  ;;  %13285 = vpow2.f32 %v6821_v11  ;;  %v6750_v19 = vsub.f32 %v15412_v45, %v6686_v1  ;;  %v6687_v34 = vmax.f32 %v15883_v28, %v6521_v59  ;;  %v6942_v45 = vsub.f32 %v15799_v56, %v6686_v1 }
 0x2f5   : > { %7322 = vadd.xlane.f32.xlu0 %v7321_v48  ;;  %v16303_v25 = vpop.eup %13267  ;;  %v7135_v21 = vsel %vm6290_vm9, %v16296_v47, 0.0  ;;  %13287 = vpow2.f32 %v7013_v23  ;;  %v7015_v27 = vmul.f32 1.442695, %v6941_v9  ;;  %v6688_v48 = vmax.f32 %v15875_v37, %v6524_v46  ;;  %v19327_v9 = vld [vmem:[#allocation193_spill] sm:$0xff] }
 0x2f6   : > { %v16299_v26 = vpop.xlane.xlu0 %6526  ;;  %v16311_v5 = vpop.eup %13269  ;;  %v7327_v32 = vsel %vm6290_vm9, %v16303_v25, 0.0  ;;  %13289 = vpow2.f32 %v6823_v50  ;;  %v6825_v28 = vmul.f32 1.442695, %v6750_v19  ;;  %v6751_v59 = vsub.f32 %v15430_v55, %v6687_v34 }
 0x2f7   : > { %7325 = vadd.xlane.f32.xlu1 %v7324_v3  ;;  %v16318_v38 = vpop.eup %13271  ;;  %v7138_v22 = vsel %vm6290_vm9, %v16311_v5, 0.0  ;;  %13291 = vpow2.f32 %v7015_v27  ;;  %v7017_v56 = vmul.f32 1.442695, %v6942_v45  ;;  %v6943_v55 = vsub.f32 %v15795_v58, %v6687_v34 }
 0x2f8   : > { %v16307_v14 = vpop.xlane.xlu1 %6529  ;;  %v16326_v18 = vpop.eup %13273  ;;  %v7330_v20 = vsel %vm6290_vm9, %v16318_v38, 0.0  ;;  %13293 = vpow2.f32 %v6825_v28  ;;  %v6827_v37 = vmul.f32 1.442695, %v6751_v59  ;;  %v6752_v46 = vsub.f32 %v15419_v30, %v6688_v48  ;;  %v19325_v30 = vld [vmem:[#allocation137_spill] sm:$0xff]  ;;  %v19329_v28 = vld [vmem:[#allocation182_spill] sm:$0xff] }
 0x2f9   : > { %7136 = vadd.xlane.f32.xlu0 %v7135_v21  ;;  %v16333_v31 = vpop.eup %13275  ;;  %v7141_v43 = vsel %vm6290_vm9, %v16326_v18, 0.0  ;;  %v6689_v21 = vmax.f32 %v15903_v24, %v16299_v26  ;;  %13295 = vpow2.f32 %v7017_v56  ;;  %v7019_v1 = vmul.f32 1.442695, %v6943_v55  ;;  %v19326_v26 = vld [vmem:[#allocation139_spill] sm:$0xff] }
 0x2fa   : > { %v16314_v44 = vpop.xlane.xlu0 %6532  ;;  %v16341_v51 = vpop.eup %13277  ;;  %v7333_v33 = vsel %vm6290_vm9, %v16333_v31, 0.0  ;;  %13297 = vpow2.f32 %v6827_v37  ;;  %v6829_v24 = vmul.f32 1.442695, %v6752_v46  ;;  %v6690_v50 = vmax.f32 %v19327_v9, %v16307_v14 }
 0x2fb   : > { %7139 = vadd.xlane.f32.xlu1 %v7138_v22  ;;  %v16348_v40 = vpop.eup %13279  ;;  %v7144_v36 = vsel %vm6290_vm9, %v16341_v51, 0.0  ;;  %v6944_v22 = vsub.f32 %v19325_v30, %v6688_v48  ;;  %v6753_v23 = vsub.f32 %v19326_v26, %v6689_v21  ;;  %13299 = vpow2.f32 %v7019_v1  ;;  %v19332_v30 = vld [vmem:[#allocation184_spill] sm:$0xff] }
 0x2fc   : > { %v16322_v52 = vpop.xlane.xlu1 %6535  ;;  %v16356_v39 = vpop.eup %13281  ;;  %v7336_v63 = vsel %vm6290_vm9, %v16348_v40, 0.0  ;;  %v6945_v59 = vsub.f32 %v19329_v28, %v6689_v21  ;;  %13301 = vpow2.f32 %v6829_v24 }
 0x2fd   : > { %7328 = vadd.xlane.f32.xlu0 %v7327_v32  ;;  %v16364_v6 = vpop.eup %13283  ;;  %v7147_v53 = vsel %vm6290_vm9, %v16356_v39, 0.0  ;;  %v7021_v45 = vmul.f32 1.442695, %v6944_v22  ;;  %v6831_v14 = vmul.f32 1.442695, %v6753_v23  ;;  %v6946_v22 = vsub.f32 %v19332_v30, %v6690_v50 }
 0x2fe   : > { %v16329_v41 = vpop.xlane.xlu0 %6538  ;;  %19324 = vst [vmem:[#allocation273_spill] sm:$0xff] %v16364_v6  ;;  %v16372_v58 = vpop.eup %13285  ;;  %v7023_v21 = vmul.f32 1.442695, %v6945_v59 }
 0x2ff   : > { %7331 = vadd.xlane.f32.xlu1 %v7330_v20  ;;  %v16380_v19 = vpop.eup %13287  ;;  %v7150_v34 = vsel %vm6290_vm9, %v16372_v58, 0.0  ;;  %13303 = vpow2.f32 %v7021_v45  ;;  %v7025_v45 = vmul.f32 1.442695, %v6946_v22 }
 0x300   : > { %v16337_v12 = vpop.xlane.xlu1 %6541  ;;  %19328 = vst [vmem:[#allocation137_spill] sm:$0xff] %v16380_v19  ;;  %v16388_v27 = vpop.eup %13289  ;;  %v7342_v55 = vsel %vm6290_vm9, %v16380_v19, 0.0  ;;  %13305 = vpow2.f32 %v6831_v14 }
 0x301   : > { %7142 = vadd.xlane.f32.xlu0 %v7141_v43  ;;  %v7339_v43 = vsel %vm6290_vm9, %v16364_v6, 0.0  ;;  %v16394_v56 = vpop.eup %13291  ;;  %v7153_v46 = vsel %vm6290_vm9, %v16388_v27, 0.0  ;;  %13307 = vpow2.f32 %v7023_v21 }
 0x302   : > { %v16344_v13 = vpop.xlane.xlu0 %6544  ;;  %19331 = vst [vmem:[#allocation139_spill] sm:$0xff] %v16394_v56  ;;  %v7345_v9 = vsel %vm6290_vm9, %v16394_v56, 0.0 }
 0x303   : > { %7145 = vadd.xlane.f32.xlu1 %v7144_v36  ;;  %v19330_v36 = vld [vmem:[#allocation140_spill] sm:$0xff] }
 0x304   : > { %v16352_v49 = vpop.xlane.xlu1 %6547 }
 0x305   : > { %7334 = vadd.xlane.f32.xlu0 %v7333_v33  ;;  %v6754_v33 = vsub.f32 %v19330_v36, %v6690_v50 }
 0x306   : > { %v16359_v3 = vpop.xlane.xlu0 %6550 }
 0x307   : > { %7337 = vadd.xlane.f32.xlu1 %v7336_v63  ;;  %v16402_v63 = vpop.eup %13293  ;;  %v6833_v1 = vmul.f32 1.442695, %v6754_v33 }
 0x308   : > { %v16368_v11 = vpop.xlane.xlu1 %6553  ;;  %v16407_v24 = vpop.eup %13295  ;;  %v7156_v26 = vsel %vm6290_vm9, %v16402_v63, 0.0 }
 0x309   : > { %7148 = vadd.xlane.f32.xlu0 %v7147_v53  ;;  %19333 = vst [vmem:[#allocation193_spill] sm:$0xff] %v16407_v24  ;;  %13309 = vpow2.f32 %v6833_v1  ;;  %v7348_v28 = vsel %vm6290_vm9, %v16407_v24, 0.0 }
 0x30a   : > { %v16375_v32 = vpop.xlane.xlu0 %6556  ;;  %13311 = vpow2.f32 %v7025_v45 }
 0x30b   : > { %7151 = vadd.xlane.f32.xlu1 %v7150_v34  ;;  %v16415_v34 = vpop.eup %13297 }
 0x30c   : > { %v16384_v20 = vpop.xlane.xlu1 %6559  ;;  %v16419_v50 = vpop.eup %13299  ;;  %v7159_v14 = vsel %vm6290_vm9, %v16415_v34, 0.0 }
 0x30d   : > { %7340 = vadd.xlane.f32.xlu0 %v7339_v43  ;;  %19335 = vst [vmem:[#allocation140_spill] sm:$0xff] %v16419_v50  ;;  %v16427_v36 = vpop.eup %13301  ;;  %v7351_v1 = vsel %vm6290_vm9, %v16419_v50, 0.0 }
 0x30e   : > { %v16391_v48 = vpop.xlane.xlu0 %6562 }
 0x30f   : > { %7343 = vadd.xlane.f32.xlu1 %v7342_v55  ;;  %v16431_v55 = vpop.eup %13303 }
 0x310   : > { %v16398_v37 = vpop.xlane.xlu1 %6565  ;;  %19337 = vst [vmem:[#allocation274_spill] sm:$0xff] %v16431_v55  ;;  %v16439_v30 = vpop.eup %13305 }
 0x311   : > { %7154 = vadd.xlane.f32.xlu0 %v7153_v46  ;;  %v7162_v46 = vsel %vm6290_vm9, %v16427_v36, 0.0  ;;  %v16445_v45 = vpop.eup %13307  ;;  %v7165_v0 = vsel %vm6290_vm9, %v16439_v30, 0.0 }
 0x312   : > { %v16404_v53 = vpop.xlane.xlu0 %6568  ;;  %v7357_v56 = vsel %vm6290_vm9, %v16445_v45, 0.0 }
 0x313   : > { %7157 = vadd.xlane.f32.xlu1 %v7156_v26  ;;  %v19340_v26 = vld [vmem:[#allocation197_spill] sm:$0xff]  ;;  %v16453_v50 = vpop.eup %13309 }
 0x314   : > { %v16411_v23 = vpop.xlane.xlu1 %6571  ;;  %19341 = vst [vmem:[#allocation197_spill] sm:$0xff] %v16445_v45 }
 0x315   : > { %19334 = vst [vmem:[#allocation182_spill] sm:$0xff] %v16411_v23  ;;  %7346 = vadd.xlane.f32.xlu0 %v7345_v9  ;;  %v6691_v9 = vmax.f32 %v19340_v26, %v16314_v44  ;;  %v19345_v44 = vld [vmem:[#allocation142_spill] sm:$0xff] }
 0x316   : > { %v16417_v43 = vpop.xlane.xlu0 %6574 }
 0x317   : > { %7349 = vadd.xlane.f32.xlu1 %v7348_v28  ;;  %v7354_v28 = vsel %vm6290_vm9, %v16431_v55, 0.0  ;;  %v6755_v26 = vsub.f32 %v19345_v44, %v6691_v9  ;;  %v7168_v55 = vsel %vm6290_vm9, %v16453_v50, 0.0 }
 0x318   : > { %v16423_v59 = vpop.xlane.xlu1 %6577 }
 0x319   : > { %7160 = vadd.xlane.f32.xlu0 %v7159_v14 }
 0x31a   : > { %v16429_v33 = vpop.xlane.xlu0 %6580 }
 0x31b   : > { %19336 = vst [vmem:[#allocation184_spill] sm:$0xff] %v16429_v33  ;;  %7163 = vadd.xlane.f32.xlu1 %v7162_v46  ;;  %v19343_v46 = vld [vmem:[#allocation195_spill] sm:$0xff] }
 0x31c   : > { %v16435_v21 = vpop.xlane.xlu1 %6583 }
 0x31d   : > { %19338 = vst [vmem:[#allocation275_spill] sm:$0xff] %v16435_v21  ;;  %7352 = vadd.xlane.f32.xlu0 %v7351_v1  ;;  %v6692_v1 = vmax.f32 %v19343_v46, %v16322_v52  ;;  %v19351_v46 = vld [vmem:[#allocation141_spill] sm:$0xff] }
 0x31e   : > { %v16441_v22 = vpop.xlane.xlu0 %6586 }
 0x31f   : > { %19339 = vst [vmem:[#allocation276_spill] sm:$0xff] %v16441_v22  ;;  %7355 = vadd.xlane.f32.xlu1 %v7354_v28  ;;  %v19346_v22 = vld [vmem:[#allocation202_spill] sm:$0xff]  ;;  %v16468_v28 = vpop.eup %13311  ;;  %v6756_v44 = vsub.f32 %v19351_v46, %v6692_v1  ;;  %v19358_v46 = vld [vmem:[#allocation181_spill] sm:$0xff] }
 0x320   : > { %v16449_v14 = vpop.xlane.xlu1 %6589  ;;  %v6693_v33 = vmax.f32 %v19346_v22, %v16329_v41  ;;  %19348 = vst [vmem:[#allocation202_spill] sm:$0xff] %v16468_v28  ;;  %v6835_v22 = vmul.f32 1.442695, %v6755_v26  ;;  %v7360_v19 = vsel %vm6290_vm9, %v16468_v28, 0.0 }
 0x321   : > { %19342 = vst [vmem:[#allocation277_spill] sm:$0xff] %v16449_v14  ;;  %7166 = vadd.xlane.f32.xlu0 %v7165_v0  ;;  %v19349_v0 = vld [vmem:[#allocation179_spill] sm:$0xff]  ;;  %v6837_v26 = vmul.f32 1.442695, %v6756_v44 }
 0x322   : > { %v16457_v21 = vpop.xlane.xlu0 %6592  ;;  %v16473_v52 = vsel %vm15288_vm8, %v19349_v0, -10000.0  ;;  %13313 = vpow2.f32 %v6835_v22  ;;  %v19367_v22 = vld [vmem:[#allocation186_spill] sm:$0xff] }
 0x323   : > { %19344 = vst [vmem:[#allocation195_spill] sm:$0xff] %v16457_v21  ;;  %19350 = vst [vmem:[#allocation179_spill] sm:$0xff] %v16473_v52  ;;  %7169 = vadd.xlane.f32.xlu1 %v7168_v55  ;;  %v19353_v21 = vld [vmem:[#allocation143_spill] sm:$0xff]  ;;  %v6471_v45 = vsel %vm6290_vm9, %v16473_v52, -inf  ;;  %v19356_v55 = vld [vmem:[#allocation180_spill] sm:$0xff]  ;;  %13315 = vpow2.f32 %v6837_v26 }
 0x324   : > { %v16464_v14 = vpop.xlane.xlu1 %6595  ;;  %v6757_v24 = vsub.f32 %v19353_v21, %v6693_v33  ;;  %v16495_v21 = vsel %vm15288_vm8, %v19358_v46, -10000.0  ;;  %v19363_v46 = vld [vmem:[#allocation136_spill] sm:$0xff] }
 0x325   : > { %19347 = vst [vmem:[#allocation142_spill] sm:$0xff] %v16464_v14  ;;  %7358 = vadd.xlane.f32.xlu0 %v7357_v56  ;;  %v19354_v14 = vld [vmem:[#allocation200_spill] sm:$0xff]  ;;  %v16490_v56 = vsel %vm15300_vm1, %v19356_v55, -10000.0  ;;  %19359 = vst [vmem:[#allocation180_spill] sm:$0xff] %v16495_v21  ;;  %v6477_v23 = vsel %vm6290_vm9, %v16495_v21, -inf }
 0x326   : > { %v16476_v41 = vpop.xlane.xlu0 %6598  ;;  %v6694_v6 = vmax.f32 %v19354_v14, %v16337_v12  ;;  %19357 = vst [vmem:[#allocation200_spill] sm:$0xff] %v16490_v56  ;;  %v19360_v12 = vld [vmem:[#allocation183_spill] sm:$0xff]  ;;  %v6474_v55 = vsel %vm6290_vm9, %v16490_v56, -inf }
 0x327   : > { %19352 = vst [vmem:[#allocation141_spill] sm:$0xff] %v16476_v41  ;;  %7361 = vadd.xlane.f32.xlu1 %v7360_v19  ;;  %v6947_v14 = vsub.f32 %v19360_v12, %v6691_v9  ;;  %v6839_v41 = vmul.f32 1.442695, %v6757_v24  ;;  %v16510_v19 = vsel %vm15300_vm1, %v19363_v46, -10000.0  ;;  %v16515_v9 = vsel %vm14551_vm10, %v16166_v60, -10000.0 }
 0x328   : > { %v16485_v0 = vpop.xlane.xlu1 %6601  ;;  %19364 = vst [vmem:[#allocation183_spill] sm:$0xff] %v16510_v19  ;;  %v6480_v54 = vsel %vm6290_vm9, %v16510_v19, -inf  ;;  %v6663_v46 = vsel %vm6290_vm9, %v16515_v9, -inf  ;;  %v16528_v60 = vsel %vm14556_vm11, %v16177_v62, -10000.0 }
 0x329   : > { %19355 = vst [vmem:[#allocation143_spill] sm:$0xff] %v16485_v0  ;;  %6472 = vmax.xlane.f32.xlu0 %v6471_v45  ;;  %v19361_v0 = vld [vmem:[#allocation144_spill] sm:$0xff]  ;;  %v7027_v24 = vmul.f32 1.442695, %v6947_v14  ;;  %v19366_v45 = vld [vmem:[#allocation185_spill] sm:$0xff]  ;;  %13317 = vpow2.f32 %v6839_v41  ;;  %19368 = vst [vmem:[#allocation136_spill] sm:$0xff] %v16528_v60 }
 0x32a   : > { %v16498_v52 = vpop.xlane.xlu0 %6604  ;;  %v6758_v28 = vsub.f32 %v19361_v0, %v6694_v6  ;;  %19365 = vst [vmem:[#allocation144_spill] sm:$0xff] %v16515_v9  ;;  %v6948_v44 = vsub.f32 %v19366_v45, %v6692_v1  ;;  %v6949_v0 = vsub.f32 %v19367_v22, %v6693_v33  ;;  %v19371_v41 = vld [vmem:[#allocation188_spill] sm:$0xff]  ;;  %v6666_v26 = vsel %vm6290_vm9, %v16528_v60, -inf  ;;  %v1861_v60 = vld [vmem:[#allocation5 + $0x4] sm:$0xf] }
 0x32b   : > { %6475 = vmax.xlane.f32.xlu1 %v6474_v55  ;;  %13319 = vpow2.f32 %v7027_v24  ;;  %v6950_v14 = vsub.f32 %v19371_v41, %v6694_v6  ;;  %19372 = vst [vmem:[#allocation188_spill] sm:$0xff] %v16547_v42  ;;  %v6672_v45 = vsel %vm6290_vm9, %v16547_v42, -inf  ;;  %v1860_v9 = vld [vmem:[#allocation5] sm:$0xf]  ;;  %v1893_v21 = vsel %vm14613_vm14, %v1861_v60, 0  ;;  %v19389_v60 = vld [vmem:[#allocation105_spill] sm:$0xff] }
 0x32c   : > { %v16505_v16 = vpop.xlane.xlu1 %6607  ;;  %v6841_v12 = vmul.f32 1.442695, %v6758_v28  ;;  %v7029_v33 = vmul.f32 1.442695, %v6948_v44  ;;  %v7031_v28 = vmul.f32 1.442695, %v6949_v0  ;;  %v16542_v55 = vpop.eup %13313 }
 0x32d   : > { %19362 = vst [vmem:[#allocation181_spill] sm:$0xff] %v16505_v16  ;;  %6478 = vmax.xlane.f32.xlu0 %v6477_v23  ;;  %v16533_v23 = vsel %vm14551_vm10, %v16211_v17, -10000.0  ;;  %v7033_v6 = vmul.f32 1.442695, %v6950_v14  ;;  %v16551_v24 = vpop.eup %13315  ;;  %v7171_v22 = vsel %vm6290_vm9, %v16542_v55, 0.0  ;;  %vm11315_vm10 = vcmask 125952  }
 0x32e   : > { %v16523_v56 = vpop.xlane.xlu0 %6610  ;;  %19369 = vst [vmem:[#allocation185_spill] sm:$0xff] %v16533_v23  ;;  %13321 = vpow2.f32 %v6841_v12  ;;  %v6669_v62 = vsel %vm6290_vm9, %v16533_v23, -inf  ;;  %v7174_v12 = vsel %vm6290_vm9, %v16551_v24, 0.0 }
 0x32f   : > { %6481 = vmax.xlane.f32.xlu1 %v6480_v54  ;;  %13323 = vpow2.f32 %v7029_v33 }
 0x330   : > { %v16535_v1 = vpop.xlane.xlu1 %6613  ;;  %13325 = vpow2.f32 %v7031_v28 }
 0x331   : > { %6664 = vmax.xlane.f32.xlu0 %v6663_v46  ;;  %19370 = vst [vmem:[#allocation186_spill] sm:$0xff] %v16535_v1  ;;  %13327 = vpow2.f32 %v7033_v6 }
 0x332   : > { %v16549_v17 = vpop.xlane.xlu0 %6616 }
 0x333   : > { %6667 = vmax.xlane.f32.xlu1 %v6666_v26  ;;  %19373 = vst [vmem:[#allocation278_spill] sm:$0xff] %v16549_v17  ;;  %v16559_v10 = vpop.eup %13317 }
 0x334   : > { %v16555_v44 = vpop.xlane.xlu1 %6619  ;;  %v7177_v54 = vsel %vm6290_vm9, %v16559_v10, 0.0 }
 0x335   : > { %6670 = vmax.xlane.f32.xlu0 %v6669_v62  ;;  %19374 = vst [vmem:[#allocation279_spill] sm:$0xff] %v16555_v44  ;;  %v16561_v4 = vpop.eup %13319  ;;  %v19396_v44 = vld [vmem:[#allocation147_spill] sm:$0xff] }
 0x336   : > { %v16563_v0 = vpop.xlane.xlu0 %6622  ;;  %v7363_v14 = vsel %vm6290_vm9, %v16561_v4, 0.0 }
 0x337   : > { %6673 = vmax.xlane.f32.xlu1 %v6672_v45  ;;  %19375 = vst [vmem:[#allocation280_spill] sm:$0xff] %v16563_v0 }
 0x338   : > { %v16569_v46 = vpop.eup %13321  ;;  %v16571_v33 = vpop.xlane.xlu1 %6625 }
 0x339   : > { %7172 = vadd.xlane.f32.xlu0 %v7171_v22  ;;  %19376 = vst [vmem:[#allocation281_spill] sm:$0xff] %v16571_v33  ;;  %v16573_v28 = vpop.eup %13323  ;;  %v7180_v41 = vsel %vm6290_vm9, %v16569_v46, 0.0 }
 0x33a   : > { %v16579_v26 = vpop.eup %13325  ;;  %v16581_v62 = vpop.xlane.xlu0 %6628  ;;  %v7366_v45 = vsel %vm6290_vm9, %v16573_v28, 0.0 }
 0x33b   : > { %7175 = vadd.xlane.f32.xlu1 %v7174_v12  ;;  %19377 = vst [vmem:[#allocation282_spill] sm:$0xff] %v16581_v62  ;;  %v7369_v22 = vsel %vm6290_vm9, %v16579_v26, 0.0  ;;  %v16589_v12 = vpop.eup %13327 }
 0x33c   : > { %v16583_v6 = vpop.xlane.xlu1 %6631 }
 0x33d   : > { %7178 = vadd.xlane.f32.xlu0 %v7177_v54  ;;  %19378 = vst [vmem:[#allocation283_spill] sm:$0xff] %v16583_v6 }
 0x33f   : > { %7181 = vadd.xlane.f32.xlu1 %v7180_v41  ;;  %v16591_v54 = vpop.xlane.xlu0 %6634  ;;  %v7372_v41 = vsel %vm6290_vm9, %v16589_v12, 0.0 }
 0x340   : > { %19379 = vst [vmem:[#allocation284_spill] sm:$0xff] %v16591_v54  ;;  %v11802_v54 = vcombine.low %v1893_v21, %v1893_v21 }
 0x341   : > { %7364 = vadd.xlane.f32.xlu0 %v7363_v14  ;;  %v16595_v14 = vpop.xlane.xlu1 %6637 }
 0x342   : > { %19380 = vst [vmem:[#allocation285_spill] sm:$0xff] %v16595_v14 }
 0x343   : > { %7367 = vadd.xlane.f32.xlu1 %v7366_v45  ;;  %v16597_v42 = vpop.xlane.xlu0 %6454  ;;  %v1892_v45 = vsel %vm14613_vm14, %v1860_v9, 0  ;;  %v11834_v9 = vcombine.low %v19389_v60, %v19389_v60  ;;  %v19397_v60 = vld [vmem:[#allocation208_spill] sm:$0xff] }
 0x344   : > { %19381 = vst [vmem:[#allocation286_spill] sm:$0xff] %v16597_v42  ;;  %v19387_v42 = vld [vmem:[#allocation104_spill] sm:$0xff]  ;;  %v6698_v0 = vmax.f32 %v19397_v60, %v16368_v11 }
 0x345   : > { %7370 = vadd.xlane.f32.xlu0 %v7369_v22  ;;  %v16599_v23 = vpop.xlane.xlu1 %6457 }
 0x346   : > { %19382 = vst [vmem:[#allocation287_spill] sm:$0xff] %v16599_v23  ;;  %v11833_v23 = vcombine.low %v19387_v42, %v19387_v42 }
 0x347   : > { %7373 = vadd.xlane.f32.xlu1 %v7372_v41  ;;  %v16603_v6 = vpop.xlane.xlu0 %6640  ;;  %v11801_v41 = vcombine.low %v1892_v45, %v1892_v45 }
 0x348   : > { %19384 = vst [vmem:[#allocation138_spill] sm:$0xff] %v16603_v6 }
 0x349   : > { %v16607_v22 = vpop.xlane.xlu1 %6643 }
 0x34a   : > { %19385 = vst [vmem:[#allocation288_spill] sm:$0xff] %v16607_v22  ;;  %v19390_v22 = vld [vmem:[#allocation205_spill] sm:$0xff] }
 0x34b   : > { %v16609_v62 = vpop.xlane.xlu0 %6646  ;;  %v6695_v21 = vmax.f32 %v19390_v22, %v16344_v13  ;;  %v19399_v22 = vld [vmem:[#allocation203_spill] sm:$0xff] }
 0x34c   : > { %19386 = vst [vmem:[#allocation289_spill] sm:$0xff] %v16609_v62 }
 0x34d   : > { %v16615_v14 = vpop.xlane.xlu1 %6649 }
 0x34e   : > { %19388 = vst [vmem:[#allocation290_spill] sm:$0xff] %v16615_v14 }
 0x34f   : > { %v16622_v45 = vpop.xlane.xlu0 %6460 }
 0x350   : > { %19391 = vst [vmem:[#allocation205_spill] sm:$0xff] %v16622_v45  ;;  %v19400_v45 = vld [vmem:[#allocation148_spill] sm:$0xff] }
 0x351   : > { %v16624_v62 = vpop.xlane.xlu1 %6463 }
 0x352   : > { %19392 = vst [vmem:[#allocation291_spill] sm:$0xff] %v16624_v62  ;;  %v6696_v62 = vmax.f32 %v19399_v22, %v16352_v49  ;;  %v19407_v49 = vld [vmem:[#allocation190_spill] sm:$0xff] }
 0x353   : > { %v16630_v14 = vpop.xlane.xlu0 %6466 }
 0x355   : > { %v16635_v13 = vpop.xlane.xlu1 %6469 }
 0x357   : > { %v16640_v17 = vpop.xlane.xlu0 %6652 }
 0x358   : > { %2407 = vrot.lane.b32.xlu1 %v11802_v54, %s13679_s12  ;;  %v19393_v54 = vld [vmem:[#allocation146_spill] sm:$0xff]  ;;  %19401 = vst [vmem:[#allocation147_spill] sm:$0xff] %v16640_v17  ;;  %v1862_v17 = vld [vmem:[#allocation5 + $0x8] sm:$0xf] }
 0x359   : > { %v6759_v42 = vsub.f32 %v19393_v54, %v6695_v21  ;;  %19395 = vst [vmem:[#allocation146_spill] sm:$0xff] %v16630_v14  ;;  %v6762_v54 = vsub.f32 %v19400_v45, %v6698_v0  ;;  %v19404_v14 = vld [vmem:[#allocation145_spill] sm:$0xff] }
 0x35b   : > { %2405 = vrot.lane.b32.xlu0 %v11801_v41, %s13679_s12  ;;  %v19394_v41 = vld [vmem:[#allocation210_spill] sm:$0xff]  ;;  %v6849_v16 = vmul.f32 1.442695, %v6762_v54  ;;  %v16646_v11 = vpop.xlane.xlu0 %6658 }
 0x35c   : > { %2565 = vrot.lane.b32.xlu1 %v11833_v23, %s13680_s22  ;;  %v6697_v6 = vmax.f32 %v19394_v41, %v16359_v3  ;;  %v6843_v23 = vmul.f32 1.442695, %v6759_v42  ;;  %19398 = vst [vmem:[#allocation210_spill] sm:$0xff] %v16635_v13  ;;  %v16642_v3 = vpop.xlane.xlu1 %6655  ;;  %v19403_v41 = vld [vmem:[#allocation187_spill] sm:$0xff]  ;;  %19405 = vst [vmem:[#allocation203_spill] sm:$0xff] %v16646_v11 }
 0x35d   : > { %19402 = vst [vmem:[#allocation208_spill] sm:$0xff] %v16642_v3  ;;  %v6951_v42 = vsub.f32 %v19403_v41, %v6695_v21 }
 0x35e   : > { %v6761_v33 = vsub.f32 %v19396_v44, %v6697_v6  ;;  %13329 = vpow2.f32 %v6843_v23  ;;  %v6760_v44 = vsub.f32 %v19404_v14, %v6696_v62  ;;  %v19406_v23 = vld [vmem:[#allocation189_spill] sm:$0xff] }
 0x35f   : > { %v7035_v60 = vmul.f32 1.442695, %v6951_v42  ;;  %v6952_v13 = vsub.f32 %v19406_v23, %v6696_v62 }
 0x360   : > { %2567 = vrot.lane.b32.xlu1 %v11834_v9, %s13680_s22  ;;  %v6847_v9 = vmul.f32 1.442695, %v6761_v33  ;;  %v6845_v1 = vmul.f32 1.442695, %v6760_v44  ;;  %v6953_v33 = vsub.f32 %v19407_v49, %v6697_v6  ;;  %v16650_v45 = vpop.xlane.xlu1 %6661 }
 0x361   : > { %19408 = vst [vmem:[#allocation148_spill] sm:$0xff] %v16650_v45  ;;  %v7037_v21 = vmul.f32 1.442695, %v6952_v13 }
 0x362   : > { %13331 = vpow2.f32 %v6847_v9  ;;  %v7039_v14 = vmul.f32 1.442695, %v6953_v33  ;;  %v19409_v9 = vld [vmem:[#allocation192_spill] sm:$0xff] }
 0x363   : > { %13333 = vpow2.f32 %v6849_v16  ;;  %v6954_v54 = vsub.f32 %v19409_v9, %v6698_v0 }
 0x364   : > { %13335 = vpow2.f32 %v7035_v60 }
 0x365   : > { %13337 = vpow2.f32 %v6845_v1  ;;  %v7041_v44 = vmul.f32 1.442695, %v6954_v54 }
 0x366   : > { %13339 = vpow2.f32 %v7037_v21 }
 0x367   : > { %13341 = vpow2.f32 %v7039_v14 }
 0x368   : > { %v16652_v22 = vpop.eup %13329 }
 0x369   : > { %v7183_v42 = vsel %vm6290_vm9, %v16652_v22, 0.0 }
 0x36c   : > { %v16657_v62 = vpop.eup %13331 }
 0x36d   : > { %v7189_v1 = vsel %vm6290_vm9, %v16657_v62, 0.0  ;;  %v16661_v13 = vpop.eup %13333 }
 0x36e   : > { %v16663_v49 = vpop.eup %13335  ;;  %v7192_v33 = vsel %vm6290_vm9, %v16661_v13, 0.0 }
 0x376   : > { %v7125_v3 = vpop.xlane.xlu0 %7124 }
 0x378   : > { %v7128_v41 = vpop.xlane.xlu1 %7127 }
 0x37a   : > { %7184 = vadd.xlane.f32.xlu0 %v7183_v42  ;;  %v7317_v6 = vpop.xlane.xlu0 %7316  ;;  %v7375_v42 = vsel %vm6290_vm9, %v16663_v49, 0.0 }
 0x37b   : > { %v7507_v16 = vadd.f32 %v7317_v6, %v7125_v3  ;;  %v16667_v3 = vpop.eup %13337 }
 0x37c   : > { %v7320_v23 = vpop.xlane.xlu1 %7319  ;;  %v16669_v54 = vpop.eup %13339 }
 0x37d   : > { %13343 = vrcp.f32 %v7507_v16  ;;  %v7508_v60 = vadd.f32 %v7320_v23, %v7128_v41  ;;  %v7186_v41 = vsel %vm6290_vm9, %v16667_v3, 0.0  ;;  %v16675_v6 = vpop.eup %13341 }
 0x37e   : > { %7190 = vadd.xlane.f32.xlu0 %v7189_v1  ;;  %v7131_v0 = vpop.xlane.xlu0 %7130  ;;  %19410 = vst [vmem:[#allocation187_spill] sm:$0xff] %v16675_v6 }
 0x37f   : > { %13345 = vrcp.f32 %v7508_v60 }
 0x380   : > { %13347 = vpow2.f32 %v7041_v44  ;;  %v7134_v21 = vpop.xlane.xlu1 %7133 }
 0x382   : > { %7193 = vadd.xlane.f32.xlu0 %v7192_v33  ;;  %v7323_v14 = vpop.xlane.xlu0 %7322  ;;  %v7381_v33 = vsel %vm6290_vm9, %v16675_v6, 0.0 }
 0x383   : > { %v7509_v9 = vadd.f32 %v7323_v14, %v7131_v0  ;;  %v7378_v0 = vsel %vm6290_vm9, %v16669_v54, 0.0 }
 0x384   : > { %7187 = vadd.xlane.f32.xlu1 %v7186_v41  ;;  %v7326_v16 = vpop.xlane.xlu1 %7325 }
 0x385   : > { %13349 = vrcp.f32 %v7509_v9  ;;  %v7510_v60 = vadd.f32 %v7326_v16, %v7134_v21 }
 0x386   : > { %7376 = vadd.xlane.f32.xlu0 %v7375_v42  ;;  %v7137_v44 = vpop.xlane.xlu0 %7136 }
 0x387   : > { %v13344_v23 = vpop.eup %13343  ;;  %13351 = vrcp.f32 %v7510_v60 }
 0x388   : > { %v7731_v14 = vmul.f32 %v13344_v23, %v16259_v29  ;;  %7379 = vadd.xlane.f32.xlu1 %v7378_v0  ;;  %v7140_v41 = vpop.xlane.xlu1 %7139  ;;  %v16686_v21 = vmul.f32 %v13344_v23, %v16255_v7  ;;  %v19413_v7 = vmov 0.0  }
 0x389   : > { %v13346_v1 = vpop.eup %13345 }
 0x38a   : > { %v16682_v45 = vpop.eup %13347  ;;  %7382 = vadd.xlane.f32.xlu0 %v7381_v33  ;;  %v7329_v42 = vpop.xlane.xlu0 %7328  ;;  %v7732_v11 = vmul.f32 %v13346_v1, %v16268_v15  ;;  %19411 = vst [vmem:[#allocation145_spill] sm:$0xff] %v16686_v21  ;;  %v16689_v9 = vmul.f32 %v13346_v1, %v16263_v8  ;;  %v19431_v21 = vld [vmem:[#allocation191_spill] sm:$0xff] }
 0x38b   : > { %v7511_v16 = vadd.f32 %v7329_v42, %v7137_v44  ;;  %v7384_v29 = vsel %vm6290_vm9, %v16682_v45, 0.0 }
 0x38c   : > { %19412 = vst [vmem:[#allocation189_spill] sm:$0xff] %v16689_v9  ;;  %v7795_v60 = vpack.c.bf16 %v7732_v11, %v7731_v14  ;;  %7385 = vadd.xlane.f32.xlu1 %v7384_v29  ;;  %v7332_v0 = vpop.xlane.xlu1 %7331 }
 0x38d   : > { %13353 = vrcp.f32 %v7511_v16  ;;  %v7512_v15 = vadd.f32 %v7332_v0, %v7140_v41  ;;  %v1863_v41 = vld [vmem:[#allocation5 + $0xc] sm:$0xf] }
 0x38e   : > { %v7143_v33 = vpop.xlane.xlu0 %7142  ;;  %v7830_v6 = vsel %vm6290_vm9, %v7795_v60, 0 }
 0x38f   : > { %12640 = vmatpush3.bf16.xpose.msra.mxu0 %v7830_v6  ;;  %v13350_v8 = vpop.eup %13349  ;;  %13355 = vrcp.f32 %v7512_v15 }
 0x390   : > { %12651 = vmatprep.subr.bf16.mxu0 %v19413_v7  ;;  %v7146_v44 = vpop.xlane.xlu1 %7145  ;;  %v7733_v14 = vmul.f32 %v13350_v8, %v16281_v35  ;;  %v16700_v29 = vmul.f32 %v13350_v8, %v16277_v2 }
 0x391   : > { %v13352_v23 = vpop.eup %13351 }
 0x392   : > { %v7335_v11 = vpop.xlane.xlu0 %7334  ;;  %v7734_v42 = vmul.f32 %v13352_v23, %v16290_v57  ;;  %19414 = vst [vmem:[#allocation190_spill] sm:$0xff] %v16700_v29  ;;  %v16703_v60 = vmul.f32 %v13352_v23, %v16285_v61  ;;  %v1895_v57 = vsel %vm14613_vm14, %v1863_v41, 0  ;;  %v1894_v61 = vsel %vm14613_vm14, %v1862_v17, 0  ;;  %v19419_v17 = vld [vmem:[#allocation107_spill] sm:$0xff] }
 0x393   : > { %v7513_v1 = vadd.f32 %v7335_v11, %v7143_v33 }
 0x394   : > { %19415 = vst [vmem:[#allocation192_spill] sm:$0xff] %v16703_v60  ;;  %v7338_v6 = vpop.xlane.xlu1 %7337  ;;  %v7796_v0 = vpack.c.bf16 %v7734_v42, %v7733_v14  ;;  %v11803_v14 = vcombine.low %v1894_v61, %v1894_v61 }
 0x395   : > { %13357 = vrcp.f32 %v7513_v1  ;;  %v7514_v33 = vadd.f32 %v7338_v6, %v7146_v44  ;;  %v11804_v44 = vcombine.low %v1895_v57, %v1895_v57 }
 0x396   : > { %v7149_v16 = vpop.xlane.xlu0 %7148  ;;  %v7875_v35 = vsel %vm6290_vm9, %v7796_v0, 0 }
 0x397   : > { %v16710_v2 = vpop.eup %13353  ;;  %13359 = vrcp.f32 %v7514_v33  ;;  %12646 = vmatpush3.bf16.xpose.msra.mxu1 %v7875_v35 }
 0x398   : > { %v7152_v8 = vpop.xlane.xlu1 %7151  ;;  %12657 = vmatprep.subr.bf16.mxu1 %v19413_v7  ;;  %v16719_v42 = vmul.f32 %v16710_v2, %v16296_v47 }
 0x399   : > { %v16715_v23 = vpop.eup %13355 }
 0x39a   : > { %v7341_v11 = vpop.xlane.xlu0 %7340  ;;  %19416 = vst [vmem:[#allocation292_spill] sm:$0xff] %v16719_v42  ;;  %v16723_v41 = vmul.f32 %v16715_v23, %v16311_v5 }
 0x39b   : > { %v7515_v1 = vadd.f32 %v7341_v11, %v7149_v16  ;;  %v19418_v16 = vld [vmem:[#allocation106_spill] sm:$0xff] }
 0x39c   : > { %19417 = vst [vmem:[#allocation293_spill] sm:$0xff] %v16723_v41  ;;  %v7344_v6 = vpop.xlane.xlu1 %7343  ;;  %v11835_v35 = vcombine.low %v19418_v16, %v19418_v16 }
 0x39d   : > { %13361 = vrcp.f32 %v7515_v1  ;;  %v7516_v33 = vadd.f32 %v7344_v6, %v7152_v8  ;;  %2411 = vrot.lane.b32.xlu1 %v11804_v44, %s13679_s12  ;;  %v11836_v8 = vcombine.low %v19419_v17, %v19419_v17  ;;  %v19420_v1 = vld [vmem:[#allocation213_spill] sm:$0xff]  ;;  %v19423_v17 = vld [vmem:[#allocation150_spill] sm:$0xff] }
 0x39e   : > { %v7155_v0 = vpop.xlane.xlu0 %7154  ;;  %v6699_v44 = vmax.f32 %v19420_v1, %v16375_v32 }
 0x39f   : > { %v16731_v47 = vpop.eup %13357  ;;  %13363 = vrcp.f32 %v7516_v33 }
 0x3a0   : > { %2409 = vrot.lane.b32.xlu0 %v11803_v14, %s13679_s12  ;;  %v7158_v57 = vpop.xlane.xlu1 %7157  ;;  %v16742_v6 = vmul.f32 %v16731_v47, %v16326_v18  ;;  %v19424_v18 = vld [vmem:[#allocation218_spill] sm:$0xff]  ;;  %v6955_v9 = vsub.f32 %v19431_v21, %v6699_v44 }
 0x3a1   : > { %v16733_v61 = vpop.eup %13359  ;;  %2569 = vrot.lane.b32.xlu1 %v11835_v35, %s13680_s22  ;;  %v6701_v1 = vmax.f32 %v19424_v18, %v16391_v48  ;;  %v19425_v35 = vld [vmem:[#allocation216_spill] sm:$0xff] }
 0x3a2   : > { %v7347_v5 = vpop.xlane.xlu0 %7346  ;;  %19421 = vst [vmem:[#allocation213_spill] sm:$0xff] %v16742_v6  ;;  %v16746_v14 = vmul.f32 %v16733_v61, %v16341_v51 }
 0x3a3   : > { %v7517_v11 = vadd.f32 %v7347_v5, %v7155_v0  ;;  %v6763_v5 = vsub.f32 %v19423_v17, %v6699_v44  ;;  %v7043_v44 = vmul.f32 1.442695, %v6955_v9 }
 0x3a4   : > { %19422 = vst [vmem:[#allocation294_spill] sm:$0xff] %v16746_v14  ;;  %v7350_v33 = vpop.xlane.xlu1 %7349 }
 0x3a5   : > { %13365 = vrcp.f32 %v7517_v11  ;;  %v7518_v0 = vadd.f32 %v7350_v33, %v7158_v57  ;;  %2571 = vrot.lane.b32.xlu1 %v11836_v8, %s13680_s22  ;;  %v6851_v29 = vmul.f32 1.442695, %v6763_v5  ;;  %v6702_v11 = vmax.f32 %v19425_v35, %v16398_v37  ;;  %v19428_v33 = vld [vmem:[#allocation151_spill] sm:$0xff]  ;;  %v19429_v5 = vld [vmem:[#allocation152_spill] sm:$0xff] }
 0x3a6   : > { %v7161_v16 = vpop.xlane.xlu0 %7160  ;;  %v6765_v48 = vsub.f32 %v19428_v33, %v6701_v1 }
 0x3a7   : > { %v16752_v32 = vpop.eup %13361  ;;  %13367 = vrcp.f32 %v7518_v0  ;;  %v6766_v37 = vsub.f32 %v19429_v5, %v6702_v11 }
 0x3a8   : > { %v7164_v15 = vpop.xlane.xlu1 %7163  ;;  %v16762_v57 = vmul.f32 %v16752_v32, %v16356_v39  ;;  %v19430_v39 = vld [vmem:[#allocation211_spill] sm:$0xff]  ;;  %v6855_v6 = vmul.f32 1.442695, %v6765_v48 }
 0x3a9   : > { %v16756_v42 = vpop.eup %13363  ;;  %v6857_v18 = vmul.f32 1.442695, %v6766_v37 }
 0x3aa   : > { %v7353_v51 = vpop.xlane.xlu0 %7352  ;;  %19426 = vst [vmem:[#allocation150_spill] sm:$0xff] %v16762_v57  ;;  %v16766_v8 = vmul.f32 %v16756_v42, %v16372_v58 }
 0x3ab   : > { %v7519_v41 = vadd.f32 %v7353_v51, %v7161_v16  ;;  %v6700_v51 = vmax.f32 %v19430_v39, %v16384_v20 }
 0x3ac   : > { %19427 = vst [vmem:[#allocation218_spill] sm:$0xff] %v16766_v8  ;;  %v7356_v0 = vpop.xlane.xlu1 %7355 }
 0x3ad   : > { %13369 = vrcp.f32 %v7519_v41  ;;  %v7520_v16 = vadd.f32 %v7356_v0, %v7164_v15  ;;  %v19434_v41 = vld [vmem:[#allocation149_spill] sm:$0xff] }
 0x3ae   : > { %v7167_v17 = vpop.xlane.xlu0 %7166  ;;  %13371 = vpow2.f32 %v6851_v29  ;;  %v6764_v20 = vsub.f32 %v19434_v41, %v6700_v51 }
 0x3af   : > { %v16772_v35 = vpop.eup %13365  ;;  %13373 = vrcp.f32 %v7520_v16 }
 0x3b0   : > { %v7170_v58 = vpop.xlane.xlu1 %7169  ;;  %v16781_v29 = vmul.f32 %v16772_v35, %v16388_v27  ;;  %13375 = vpow2.f32 %v6855_v6  ;;  %v6853_v5 = vmul.f32 1.442695, %v6764_v20 }
 0x3b1   : > { %v16776_v33 = vpop.eup %13367 }
 0x3b2   : > { %v7359_v14 = vpop.xlane.xlu0 %7358  ;;  %19432 = vst [vmem:[#allocation216_spill] sm:$0xff] %v16781_v29  ;;  %v16785_v15 = vmul.f32 %v16776_v33, %v16402_v63  ;;  %v19437_v63 = vld [vmem:[#allocation196_spill] sm:$0xff] }
 0x3b3   : > { %v7521_v60 = vadd.f32 %v7359_v14, %v7167_v17  ;;  %v19436_v17 = vld [vmem:[#allocation194_spill] sm:$0xff]  ;;  %v6957_v37 = vsub.f32 %v19437_v63, %v6701_v1 }
 0x3b4   : > { %19433 = vst [vmem:[#allocation151_spill] sm:$0xff] %v16785_v15  ;;  %v7362_v48 = vpop.xlane.xlu1 %7361  ;;  %v6956_v16 = vsub.f32 %v19436_v17, %v6700_v51  ;;  %v19442_v51 = vld [vmem:[#allocation199_spill] sm:$0xff] }
 0x3b5   : > { %13377 = vrcp.f32 %v7521_v60  ;;  %v7522_v21 = vadd.f32 %v7362_v48, %v7170_v58  ;;  %v7047_v1 = vmul.f32 1.442695, %v6957_v37  ;;  %v6958_v58 = vsub.f32 %v19442_v51, %v6702_v11 }
 0x3b6   : > { %v16788_v0 = vpop.xlane.xlu0 %6472  ;;  %13379 = vpow2.f32 %v6857_v18  ;;  %v7045_v60 = vmul.f32 1.442695, %v6956_v16 }
 0x3b7   : > { %19435 = vst [vmem:[#allocation152_spill] sm:$0xff] %v16788_v0  ;;  %v16793_v27 = vpop.eup %13369  ;;  %13381 = vrcp.f32 %v7522_v21  ;;  %v7049_v17 = vmul.f32 1.442695, %v6958_v58 }
 0x3b8   : > { %v16796_v39 = vpop.eup %13371  ;;  %v16798_v6 = vpop.xlane.xlu1 %6475  ;;  %13383 = vpow2.f32 %v7043_v44  ;;  %v16806_v9 = vmul.f32 %v16793_v27, %v16415_v34 }
 0x3b9   : > { %19438 = vst [vmem:[#allocation211_spill] sm:$0xff] %v16798_v6  ;;  %v16802_v57 = vpop.eup %13373  ;;  %13385 = vpow2.f32 %v6853_v5  ;;  %v7195_v21 = vsel %vm6290_vm9, %v16796_v39, 0.0 }
 0x3ba   : > { %v16800_v41 = vpop.xlane.xlu0 %6478  ;;  %19440 = vst [vmem:[#allocation149_spill] sm:$0xff] %v16806_v9  ;;  %v16810_v18 = vmul.f32 %v16802_v57, %v16427_v36  ;;  %v16821_v34 = vpop.eup %13375  ;;  %13387 = vpow2.f32 %v7045_v60 }
 0x3bb   : > { %19439 = vst [vmem:[#allocation191_spill] sm:$0xff] %v16800_v41  ;;  %13389 = vpow2.f32 %v7047_v1  ;;  %v7201_v63 = vsel %vm6290_vm9, %v16821_v34, 0.0 }
 0x3bc   : > { %19441 = vst [vmem:[#allocation194_spill] sm:$0xff] %v16810_v18  ;;  %v16813_v20 = vpop.xlane.xlu1 %6481  ;;  %13391 = vpow2.f32 %v7049_v17 }
 0x3bd   : > { %19443 = vst [vmem:[#allocation196_spill] sm:$0xff] %v16813_v20 }
 0x3be   : > { %v16815_v48 = vpop.xlane.xlu0 %6664 }
 0x3bf   : > { %19444 = vst [vmem:[#allocation199_spill] sm:$0xff] %v16815_v48  ;;  %7196 = vadd.xlane.f32.xlu0 %v7195_v21  ;;  %v16823_v36 = vpop.eup %13377 }
 0x3c0   : > { %v16825_v16 = vpop.eup %13379  ;;  %v16827_v11 = vpop.xlane.xlu1 %6667  ;;  %v16837_v51 = vmul.f32 %v16823_v36, %v16439_v30 }
 0x3c1   : > { %19445 = vst [vmem:[#allocation295_spill] sm:$0xff] %v16827_v11  ;;  %v16833_v37 = vpop.eup %13381  ;;  %v7204_v44 = vsel %vm6290_vm9, %v16825_v16, 0.0 }
 0x3c2   : > { %v16829_v5 = vpop.xlane.xlu0 %6670  ;;  %19447 = vst [vmem:[#allocation297_spill] sm:$0xff] %v16837_v51  ;;  %v16841_v60 = vmul.f32 %v16833_v37, %v16453_v50  ;;  %v16843_v1 = vpop.eup %13383 }
 0x3c3   : > { %19446 = vst [vmem:[#allocation296_spill] sm:$0xff] %v16829_v5  ;;  %7202 = vadd.xlane.f32.xlu0 %v7201_v63  ;;  %v16851_v14 = vpop.eup %13385  ;;  %v7387_v18 = vsel %vm6290_vm9, %v16843_v1, 0.0  ;;  %v7736_v5 = vmul.f32 %v16715_v23, %v16318_v38  ;;  %v7737_v38 = vmul.f32 %v16731_v47, %v16333_v31 }
 0x3c4   : > { %19448 = vst [vmem:[#allocation298_spill] sm:$0xff] %v16841_v60  ;;  %v16845_v58 = vpop.xlane.xlu1 %6673  ;;  %v16853_v30 = vpop.eup %13387  ;;  %v7198_v50 = vsel %vm6290_vm9, %v16851_v14, 0.0 }
 0x3c5   : > { %19449 = vst [vmem:[#allocation299_spill] sm:$0xff] %v16845_v58  ;;  %v16859_v29 = vpop.eup %13389  ;;  %v7390_v63 = vsel %vm6290_vm9, %v16853_v30, 0.0 }
 0x3c6   : > { %v7173_v21 = vpop.xlane.xlu0 %7172  ;;  %v16865_v60 = vpop.eup %13391 }
 0x3c7   : > { %7205 = vadd.xlane.f32.xlu0 %v7204_v44  ;;  %v7393_v44 = vsel %vm6290_vm9, %v16859_v29, 0.0  ;;  %v7396_v11 = vsel %vm6290_vm9, %v16865_v60, 0.0 }
 0x3c8   : > { %v7176_v9 = vpop.xlane.xlu1 %7175 }
 0x3c9   : > { %7199 = vadd.xlane.f32.xlu1 %v7198_v50 }
 0x3ca   : > { %v7179_v17 = vpop.xlane.xlu0 %7178 }
 0x3cb   : > { %7388 = vadd.xlane.f32.xlu0 %v7387_v18 }
 0x3cc   : > { %v7182_v15 = vpop.xlane.xlu1 %7181 }
 0x3cd   : > { %7391 = vadd.xlane.f32.xlu1 %v7390_v63  ;;  %v1865_v63 = vld [vmem:[#allocation5 + $0x14] sm:$0xf] }
 0x3ce   : > { %v7365_v51 = vpop.xlane.xlu0 %7364 }
 0x3cf   : > { %v7523_v8 = vadd.f32 %v7365_v51, %v7173_v21  ;;  %7394 = vadd.xlane.f32.xlu0 %v7393_v44  ;;  %v7735_v21 = vmul.f32 %v16710_v2, %v16303_v25  ;;  %v1864_v44 = vld [vmem:[#allocation5 + $0x10] sm:$0xf] }
 0x3d0   : > { %v7368_v6 = vpop.xlane.xlu1 %7367  ;;  %v1896_v23 = vsel %vm14613_vm14, %v1864_v44, 0  ;;  %v19455_v44 = vld [vmem:[#allocation109_spill] sm:$0xff] }
 0x3d1   : > { %13393 = vrcp.f32 %v7523_v8  ;;  %v7524_v18 = vadd.f32 %v7368_v6, %v7176_v9  ;;  %7397 = vadd.xlane.f32.xlu1 %v7396_v11  ;;  %v7797_v0 = vpack.c.bf16 %v7736_v5, %v7735_v21  ;;  %v1897_v8 = vsel %vm14613_vm14, %v1865_v63, 0 }
 0x3d2   : > { %v7371_v20 = vpop.xlane.xlu0 %7370  ;;  %v7738_v6 = vmul.f32 %v16733_v61, %v16348_v40  ;;  %v11806_v2 = vcombine.low %v1897_v8, %v1897_v8  ;;  %v11805_v5 = vcombine.low %v1896_v23, %v1896_v23  ;;  %v19456_v8 = vld [vmem:[#allocation221_spill] sm:$0xff] }
 0x3d3   : > { %v7525_v50 = vadd.f32 %v7371_v20, %v7179_v17  ;;  %13395 = vrcp.f32 %v7524_v18  ;;  %v7920_v11 = vsel %vm6290_vm9, %v7797_v0, 0  ;;  %v19452_v18 = vld [vmem:[#allocation108_spill] sm:$0xff] }
 0x3d4   : > { %v7374_v58 = vpop.xlane.xlu1 %7373  ;;  %v7798_v40 = vpack.c.bf16 %v7738_v6, %v7737_v38  ;;  %v19457_v6 = vld [vmem:[#allocation154_spill] sm:$0xff] }
 0x3d5   : > { %13397 = vrcp.f32 %v7525_v50  ;;  %v7526_v41 = vadd.f32 %v7374_v58, %v7182_v15  ;;  %v11837_v50 = vcombine.low %v19452_v18, %v19452_v18  ;;  %v19463_v18 = vld [vmem:[#allocation156_spill] sm:$0xff] }
 0x3d6   : > { %v2406_v15 = vpop.permute.xlu0 %2405 }
 0x3d7   : > { %13399 = vrcp.f32 %v7526_v41 }
 0x3d8   : > { %v2408_v51 = vpop.permute.xlu1 %2407 }
 0x3db   : > { %v16877_v9 = vpop.eup %13393 }
 0x3dc   : > { %v2566_v20 = vpop.permute.xlu1 %2565  ;;  %v16890_v61 = vmul.f32 %v16877_v9, %v16542_v55 }
 0x3dd   : > { %v16883_v41 = vpop.eup %13395  ;;  %v2631_v25 = vsel %vm2212_vm0, %v2406_v15, %v2566_v20  ;;  %v19458_v20 = vld [vmem:[#allocation226_spill] sm:$0xff] }
 0x3de   : > { %12642 = vmatmul.mubr.msk.bf16.vlgmr.msra.gmra.mrb[128].mxu0 %vm6290_vm9, %v2631_v25  ;;  %19450 = vst [vmem:[#allocation300_spill] sm:$0xff] %v16890_v61  ;;  %v16894_v31 = vmul.f32 %v16883_v41, %v16551_v24  ;;  %v7965_v24 = vsel %vm6290_vm9, %v7798_v40, 0  ;;  %v6705_v38 = vmax.f32 %v19458_v20, %v16417_v43  ;;  %v19459_v25 = vld [vmem:[#allocation155_spill] sm:$0xff] }
 0x3df   : > { %v16896_v47 = vpop.eup %13397  ;;  %12652 = vmatpush3.bf16.xpose.msra.mxu0 %v7920_v11  ;;  %12653 = vmatprep.mubr.msk.bf16.mxu0 %vm13678_vm13, %v19413_v7  ;;  %v19460_v11 = vld [vmem:[#allocation224_spill] sm:$0xff] }
 0x3e0   : > { %19451 = vst [vmem:[#allocation301_spill] sm:$0xff] %v16894_v31  ;;  %v2568_v58 = vpop.permute.xlu1 %2567  ;;  %12663 = vmatprep.subr.bf16.mxu0 %v19413_v7  ;;  %v16913_v63 = vmul.f32 %v16896_v47, %v16559_v10  ;;  %v11838_v10 = vcombine.low %v19455_v44, %v19455_v44  ;;  %v6706_v40 = vmax.f32 %v19460_v11, %v16423_v59  ;;  %v19468_v11 = vld [vmem:[#allocation207_spill] sm:$0xff] }
 0x3e1   : > { %v16903_v17 = vpop.eup %13399  ;;  %v2634_v55 = vsel %vm2212_vm0, %v2408_v51, %v2568_v58  ;;  %v19462_v58 = vld [vmem:[#allocation219_spill] sm:$0xff]  ;;  %v19467_v51 = vld [vmem:[#allocation204_spill] sm:$0xff] }
 0x3e2   : > { %2415 = vrot.lane.b32.xlu1 %v11806_v2, %s13679_s12  ;;  %12648 = vmatmul.mubr.msk.bf16.vlgmr.msra.gmra.mrb[128].mxu1 %vm6290_vm9, %v2634_v55  ;;  %19453 = vst [vmem:[#allocation302_spill] sm:$0xff] %v16913_v63  ;;  %v16917_v21 = vmul.f32 %v16903_v17, %v16569_v46  ;;  %v6703_v46 = vmax.f32 %v19456_v8, %v16404_v53 }
 0x3e3   : > { %12658 = vmatpush3.bf16.xpose.msra.mxu1 %v7965_v24  ;;  %12659 = vmatprep.mubr.msk.bf16.mxu1 %vm13678_vm13, %v19413_v7  ;;  %v6769_v2 = vsub.f32 %v19459_v25, %v6705_v38  ;;  %v6770_v53 = vsub.f32 %v19463_v18, %v6706_v40  ;;  %v6961_v0 = vsub.f32 %v19467_v51, %v6705_v38 }
 0x3e4   : > { %19454 = vst [vmem:[#allocation303_spill] sm:$0xff] %v16917_v21  ;;  %12669 = vmatprep.subr.bf16.mxu1 %v19413_v7  ;;  %v6767_v15 = vsub.f32 %v19457_v6, %v6703_v46  ;;  %v1866_v21 = vld [vmem:[#allocation5 + $0x18] sm:$0xf] }
 0x3e5   : > { %2413 = vrot.lane.b32.xlu0 %v11805_v5, %s13679_s12  ;;  %v19461_v5 = vld [vmem:[#allocation182_spill] sm:$0xff]  ;;  %v6863_v24 = vmul.f32 1.442695, %v6769_v2  ;;  %v6865_v6 = vmul.f32 1.442695, %v6770_v53 }
 0x3e6   : > { %2573 = vrot.lane.b32.xlu1 %v11837_v50, %s13680_s22  ;;  %v6859_v23 = vmul.f32 1.442695, %v6767_v15  ;;  %v6704_v55 = vmax.f32 %v19462_v58, %v19461_v5  ;;  %v19464_v50 = vld [vmem:[#allocation198_spill] sm:$0xff]  ;;  %v19466_v15 = vld [vmem:[#allocation201_spill] sm:$0xff]  ;;  %v7055_v2 = vmul.f32 1.442695, %v6961_v0  ;;  %v6962_v5 = vsub.f32 %v19468_v11, %v6706_v40 }
 0x3e7   : > { %v6959_v44 = vsub.f32 %v19464_v50, %v6703_v46 }
 0x3e8   : > { %13401 = vpow2.f32 %v6859_v23  ;;  %v6960_v20 = vsub.f32 %v19466_v15, %v6704_v55 }
 0x3e9   : > { %13403 = vpow2.f32 %v6863_v24  ;;  %v7051_v43 = vmul.f32 1.442695, %v6959_v44 }
 0x3ea   : > { %2575 = vrot.lane.b32.xlu1 %v11838_v10, %s13680_s22  ;;  %v19465_v10 = vld [vmem:[#allocation153_spill] sm:$0xff]  ;;  %13405 = vpow2.f32 %v6865_v6  ;;  %v7053_v23 = vmul.f32 1.442695, %v6960_v20 }
 0x3eb   : > { %v6768_v8 = vsub.f32 %v19465_v10, %v6704_v55  ;;  %13407 = vpow2.f32 %v7051_v43  ;;  %v7057_v55 = vmul.f32 1.442695, %v6962_v5 }
 0x3ed   : > { %v6861_v25 = vmul.f32 1.442695, %v6768_v8 }
 0x3ef   : > { %13409 = vpow2.f32 %v6861_v25 }
 0x3f0   : > { %13411 = vpow2.f32 %v7053_v23 }
 0x3f1   : > { %13413 = vpow2.f32 %v7055_v2 }
 0x3f2   : > { %v16944_v59 = vpop.eup %13401  ;;  %13415 = vpow2.f32 %v7057_v55 }
 0x3f3   : > { %v7207_v46 = vsel %vm6290_vm9, %v16944_v59, 0.0  ;;  %v16949_v58 = vpop.eup %13403 }
 0x3f4   : > { %v7213_v51 = vsel %vm6290_vm9, %v16949_v58, 0.0  ;;  %v16953_v38 = vpop.eup %13405 }
 0x3f5   : > { %v16955_v0 = vpop.eup %13407  ;;  %v7216_v18 = vsel %vm6290_vm9, %v16953_v38, 0.0 }
 0x3f6   : > { %v7399_v8 = vsel %vm6290_vm9, %v16955_v0, 0.0 }
 0x3f9   : > { %v16959_v53 = vpop.eup %13409 }
 0x3fa   : > { %v16961_v50 = vpop.eup %13411  ;;  %v7210_v44 = vsel %vm6290_vm9, %v16959_v53, 0.0 }
 0x3fb   : > { %v16967_v6 = vpop.eup %13413  ;;  %v7402_v15 = vsel %vm6290_vm9, %v16961_v50, 0.0 }
 0x3fc   : > { %v7405_v25 = vsel %vm6290_vm9, %v16967_v6, 0.0  ;;  %v16973_v23 = vpop.eup %13415 }
 0x3fd   : > { %v7408_v5 = vsel %vm6290_vm9, %v16973_v23, 0.0 }
 0x404   : > { %7208 = vadd.xlane.f32.xlu0 %v7207_v46 }
 0x407   : > { %v7185_v24 = vpop.xlane.xlu0 %7184 }
 0x408   : > { %7214 = vadd.xlane.f32.xlu0 %v7213_v51 }
 0x40b   : > { %v7191_v40 = vpop.xlane.xlu0 %7190 }
 0x40c   : > { %7217 = vadd.xlane.f32.xlu0 %v7216_v18 }
 0x40e   : > { %7211 = vadd.xlane.f32.xlu1 %v7210_v44 }
 0x40f   : > { %v7194_v10 = vpop.xlane.xlu0 %7193 }
 0x410   : > { %7400 = vadd.xlane.f32.xlu0 %v7399_v8  ;;  %v19469_v8 = vld [vmem:[#allocation137_spill] sm:$0xff] }
 0x411   : > { %v7188_v43 = vpop.xlane.xlu1 %7187  ;;  %v7740_v63 = vmul.f32 %v16756_v42, %v19469_v8 }
 0x412   : > { %7403 = vadd.xlane.f32.xlu1 %v7402_v15  ;;  %v1867_v15 = vld [vmem:[#allocation5 + $0x1c] sm:$0xf] }
 0x413   : > { %v7377_v20 = vpop.xlane.xlu0 %7376 }
 0x414   : > { %v7527_v2 = vadd.f32 %v7377_v20, %v7185_v24  ;;  %7406 = vadd.xlane.f32.xlu0 %v7405_v25  ;;  %v19470_v20 = vld [vmem:[#allocation273_spill] sm:$0xff] }
 0x415   : > { %v7380_v11 = vpop.xlane.xlu1 %7379  ;;  %v7739_v25 = vmul.f32 %v16752_v32, %v19470_v20 }
 0x416   : > { %13417 = vrcp.f32 %v7527_v2  ;;  %v7528_v55 = vadd.f32 %v7380_v11, %v7188_v43  ;;  %7409 = vadd.xlane.f32.xlu1 %v7408_v5  ;;  %v1899_v43 = vsel %vm14613_vm14, %v1867_v15, 0  ;;  %v19471_v2 = vld [vmem:[#allocation193_spill] sm:$0xff] }
 0x417   : > { %v7383_v46 = vpop.xlane.xlu0 %7382  ;;  %v7799_v61 = vpack.c.bf16 %v7740_v63, %v7739_v25  ;;  %v11808_v63 = vcombine.low %v1899_v43, %v1899_v43  ;;  %v19475_v25 = vld [vmem:[#allocation110_spill] sm:$0xff] }
 0x418   : > { %v7529_v51 = vadd.f32 %v7383_v46, %v7191_v40  ;;  %13419 = vrcp.f32 %v7528_v55  ;;  %v7742_v40 = vmul.f32 %v16776_v33, %v19471_v2  ;;  %v19472_v46 = vld [vmem:[#allocation139_spill] sm:$0xff]  ;;  %v1898_v55 = vsel %vm14613_vm14, %v1866_v21, 0 }
 0x419   : > { %v7386_v18 = vpop.xlane.xlu1 %7385  ;;  %v7741_v42 = vmul.f32 %v16772_v35, %v19472_v46  ;;  %v11807_v21 = vcombine.low %v1898_v55, %v1898_v55  ;;  %v11839_v43 = vcombine.low %v19475_v25, %v19475_v25  ;;  %v19480_v46 = vld [vmem:[#allocation229_spill] sm:$0xff] }
 0x41a   : > { %13421 = vrcp.f32 %v7529_v51  ;;  %v7530_v44 = vadd.f32 %v7386_v18, %v7194_v10  ;;  %v8010_v18 = vsel %vm6290_vm9, %v7799_v61, 0 }
 0x41b   : > { %v2410_v10 = vpop.permute.xlu0 %2409  ;;  %v7800_v33 = vpack.c.bf16 %v7742_v40, %v7741_v42  ;;  %v19481_v42 = vld [vmem:[#allocation158_spill] sm:$0xff] }
 0x41c   : > { %13423 = vrcp.f32 %v7530_v44 }
 0x41d   : > { %v2412_v24 = vpop.permute.xlu1 %2411 }
 0x420   : > { %v16985_v11 = vpop.eup %13417 }
 0x421   : > { %v2570_v5 = vpop.permute.xlu1 %2569  ;;  %v16998_v44 = vmul.f32 %v16985_v11, %v16652_v22 }
 0x422   : > { %v16991_v51 = vpop.eup %13419  ;;  %v2637_v32 = vsel %vm2212_vm0, %v2410_v10, %v2570_v5  ;;  %v19478_v10 = vld [vmem:[#allocation111_spill] sm:$0xff]  ;;  %v19479_v5 = vld [vmem:[#allocation184_spill] sm:$0xff] }
 0x423   : > { %12654 = vmatmul.mubr.msk.bf16.vlgmr.msra.gmra.mrb[132].mxu0 %vm6290_vm9, %v2637_v32  ;;  %19473 = vst [vmem:[#allocation221_spill] sm:$0xff] %v16998_v44  ;;  %v17002_v35 = vmul.f32 %v16991_v51, %v16667_v3  ;;  %v8055_v3 = vsel %vm6290_vm9, %v7800_v33, 0  ;;  %v19482_v32 = vld [vmem:[#allocation276_spill] sm:$0xff] }
 0x424   : > { %v17004_v8 = vpop.eup %13421  ;;  %12664 = vmatpush3.bf16.xpose.msra.mxu0 %v8010_v18  ;;  %12665 = vmatprep.mubr.msk.bf16.mxu0 %vm13678_vm13, %v19413_v7 }
 0x425   : > { %19474 = vst [vmem:[#allocation154_spill] sm:$0xff] %v17002_v35  ;;  %v2572_v15 = vpop.permute.xlu1 %2571  ;;  %12675 = vmatprep.subr.bf16.mxu0 %v19413_v7  ;;  %v17021_v2 = vmul.f32 %v17004_v8, %v16657_v62  ;;  %v11840_v62 = vcombine.low %v19478_v10, %v19478_v10  ;;  %v19493_v35 = vld [vmem:[#allocation212_spill] sm:$0xff] }
 0x426   : > { %v17011_v20 = vpop.eup %13423  ;;  %v2640_v22 = vsel %vm2212_vm0, %v2412_v24, %v2572_v15  ;;  %v19488_v24 = vld [vmem:[#allocation227_spill] sm:$0xff] }
 0x427   : > { %2419 = vrot.lane.b32.xlu1 %v11808_v63, %s13679_s12  ;;  %12660 = vmatmul.mubr.msk.bf16.vlgmr.msra.gmra.mrb[132].mxu1 %vm6290_vm9, %v2640_v22  ;;  %19476 = vst [vmem:[#allocation226_spill] sm:$0xff] %v17021_v2  ;;  %v17025_v40 = vmul.f32 %v17011_v20, %v16661_v13  ;;  %v6707_v13 = vmax.f32 %v19480_v46, %v19479_v5  ;;  %v19483_v63 = vld [vmem:[#allocation234_spill] sm:$0xff]  ;;  %v19485_v22 = vld [vmem:[#allocation277_spill] sm:$0xff]  ;;  %v19489_v2 = vld [vmem:[#allocation160_spill] sm:$0xff] }
 0x428   : > { %12670 = vmatpush3.bf16.xpose.msra.mxu1 %v8055_v3  ;;  %12671 = vmatprep.mubr.msk.bf16.mxu1 %vm13678_vm13, %v19413_v7  ;;  %v6709_v18 = vmax.f32 %v19483_v63, %v19482_v32  ;;  %v19486_v3 = vld [vmem:[#allocation232_spill] sm:$0xff]  ;;  %v19490_v46 = vld [vmem:[#allocation206_spill] sm:$0xff] }
 0x429   : > { %19477 = vst [vmem:[#allocation155_spill] sm:$0xff] %v17025_v40  ;;  %12681 = vmatprep.subr.bf16.mxu1 %v19413_v7  ;;  %v6771_v55 = vsub.f32 %v19481_v42, %v6707_v13  ;;  %v6710_v25 = vmax.f32 %v19486_v3, %v19485_v22  ;;  %v19491_v40 = vld [vmem:[#allocation157_spill] sm:$0xff] }
 0x42a   : > { %2417 = vrot.lane.b32.xlu0 %v11807_v21, %s13679_s12  ;;  %v19484_v21 = vld [vmem:[#allocation159_spill] sm:$0xff]  ;;  %v6965_v31 = vsub.f32 %v19493_v35, %v6709_v18 }
 0x42b   : > { %2577 = vrot.lane.b32.xlu1 %v11839_v43, %s13680_s22  ;;  %v6867_v33 = vmul.f32 1.442695, %v6771_v55  ;;  %v6773_v15 = vsub.f32 %v19484_v21, %v6709_v18  ;;  %v19487_v43 = vld [vmem:[#allocation275_spill] sm:$0xff]  ;;  %v6774_v5 = vsub.f32 %v19489_v2, %v6710_v25  ;;  %v19492_v55 = vld [vmem:[#allocation209_spill] sm:$0xff] }
 0x42c   : > { %v6708_v10 = vmax.f32 %v19488_v24, %v19487_v43  ;;  %v19494_v2 = vld [vmem:[#allocation215_spill] sm:$0xff] }
 0x42d   : > { %13425 = vpow2.f32 %v6867_v33  ;;  %v6871_v61 = vmul.f32 1.442695, %v6773_v15  ;;  %v6873_v44 = vmul.f32 1.442695, %v6774_v5  ;;  %v7063_v15 = vmul.f32 1.442695, %v6965_v31 }
 0x42e   : > { %v6772_v42 = vsub.f32 %v19491_v40, %v6708_v10  ;;  %v6964_v63 = vsub.f32 %v19492_v55, %v6708_v10  ;;  %v6966_v22 = vsub.f32 %v19494_v2, %v6710_v25 }
 0x42f   : > { %2579 = vrot.lane.b32.xlu1 %v11840_v62, %s13680_s22  ;;  %v6963_v62 = vsub.f32 %v19490_v46, %v6707_v13  ;;  %13427 = vpow2.f32 %v6871_v61 }
 0x430   : > { %v6869_v21 = vmul.f32 1.442695, %v6772_v42  ;;  %13429 = vpow2.f32 %v6873_v44  ;;  %v7061_v24 = vmul.f32 1.442695, %v6964_v63  ;;  %v7065_v13 = vmul.f32 1.442695, %v6966_v22 }
 0x431   : > { %v7059_v32 = vmul.f32 1.442695, %v6963_v62 }
 0x433   : > { %13431 = vpow2.f32 %v7059_v32 }
 0x434   : > { %13433 = vpow2.f32 %v6869_v21 }
 0x435   : > { %13435 = vpow2.f32 %v7061_v24 }
 0x436   : > { %13437 = vpow2.f32 %v7063_v15 }
 0x437   : > { %v17052_v33 = vpop.eup %13425  ;;  %13439 = vpow2.f32 %v7065_v13 }
 0x438   : > { %v7219_v40 = vsel %vm6290_vm9, %v17052_v33, 0.0 }
 0x439   : > { %v17057_v61 = vpop.eup %13427 }
 0x43a   : > { %v7225_v44 = vsel %vm6290_vm9, %v17057_v61, 0.0  ;;  %v17061_v35 = vpop.eup %13429 }
 0x43b   : > { %v7228_v25 = vsel %vm6290_vm9, %v17061_v35, 0.0 }
 0x43d   : > { %v17063_v31 = vpop.eup %13431 }
 0x43e   : > { %19495 = vst [vmem:[#allocation224_spill] sm:$0xff] %v17063_v31  ;;  %v17067_v43 = vpop.eup %13433  ;;  %v7411_v62 = vsel %vm6290_vm9, %v17063_v31, 0.0  ;;  %v19501_v31 = vld [vmem:[#allocation202_spill] sm:$0xff] }
 0x43f   : > { %v17069_v10 = vpop.eup %13435  ;;  %v7222_v5 = vsel %vm6290_vm9, %v17067_v43, 0.0 }
 0x440   : > { %19496 = vst [vmem:[#allocation182_spill] sm:$0xff] %v17069_v10  ;;  %v17075_v42 = vpop.eup %13437  ;;  %v7414_v55 = vsel %vm6290_vm9, %v17069_v10, 0.0  ;;  %v1870_v10 = vld [vmem:[#allocation5 + $0x28] sm:$0xf] }
 0x441   : > { %19497 = vst [vmem:[#allocation219_spill] sm:$0xff] %v17075_v42  ;;  %v7417_v21 = vsel %vm6290_vm9, %v17075_v42, 0.0  ;;  %v17081_v24 = vpop.eup %13439 }
 0x442   : > { %19498 = vst [vmem:[#allocation156_spill] sm:$0xff] %v17081_v24  ;;  %v7420_v22 = vsel %vm6290_vm9, %v17081_v24, 0.0  ;;  %v1868_v24 = vld [vmem:[#allocation5 + $0x20] sm:$0xf] }
 0x449   : > { %7220 = vadd.xlane.f32.xlu0 %v7219_v40 }
 0x44c   : > { %v7197_v3 = vpop.xlane.xlu0 %7196 }
 0x44d   : > { %7226 = vadd.xlane.f32.xlu0 %v7225_v44 }
 0x450   : > { %v7203_v18 = vpop.xlane.xlu0 %7202 }
 0x451   : > { %7229 = vadd.xlane.f32.xlu0 %v7228_v25 }
 0x453   : > { %7223 = vadd.xlane.f32.xlu1 %v7222_v5 }
 0x454   : > { %v7206_v46 = vpop.xlane.xlu0 %7205 }
 0x455   : > { %7412 = vadd.xlane.f32.xlu0 %v7411_v62  ;;  %v19499_v62 = vld [vmem:[#allocation274_spill] sm:$0xff] }
 0x456   : > { %v7200_v32 = vpop.xlane.xlu1 %7199  ;;  %v7744_v48 = vmul.f32 %v16802_v57, %v19499_v62 }
 0x457   : > { %7415 = vadd.xlane.f32.xlu1 %v7414_v55  ;;  %v19500_v55 = vld [vmem:[#allocation140_spill] sm:$0xff] }
 0x458   : > { %v7389_v63 = vpop.xlane.xlu0 %7388 }
 0x459   : > { %v7531_v15 = vadd.f32 %v7389_v63, %v7197_v3  ;;  %7418 = vadd.xlane.f32.xlu0 %v7417_v21  ;;  %v7743_v3 = vmul.f32 %v16793_v27, %v19500_v55  ;;  %v1869_v21 = vld [vmem:[#allocation5 + $0x24] sm:$0xf]  ;;  %v1900_v27 = vsel %vm14613_vm14, %v1868_v24, 0  ;;  %v19505_v55 = vld [vmem:[#allocation112_spill] sm:$0xff] }
 0x45a   : > { %v7392_v2 = vpop.xlane.xlu1 %7391  ;;  %v11809_v24 = vcombine.low %v1900_v27, %v1900_v27  ;;  %v19512_v27 = vld [vmem:[#allocation141_spill] sm:$0xff] }
 0x45b   : > { %13441 = vrcp.f32 %v7531_v15  ;;  %v7532_v13 = vadd.f32 %v7392_v2, %v7200_v32  ;;  %7421 = vadd.xlane.f32.xlu1 %v7420_v22  ;;  %v7801_v42 = vpack.c.bf16 %v7744_v48, %v7743_v3  ;;  %v7746_v32 = vmul.f32 %v16833_v37, %v19501_v31  ;;  %v19502_v22 = vld [vmem:[#allocation197_spill] sm:$0xff] }
 0x45c   : > { %v7395_v40 = vpop.xlane.xlu0 %7394  ;;  %v7745_v57 = vmul.f32 %v16823_v36, %v19502_v22  ;;  %v11841_v3 = vcombine.low %v19505_v55, %v19505_v55  ;;  %v19511_v22 = vld [vmem:[#allocation162_spill] sm:$0xff] }
 0x45d   : > { %v7533_v44 = vadd.f32 %v7395_v40, %v7203_v18  ;;  %13443 = vrcp.f32 %v7532_v13  ;;  %v1901_v18 = vsel %vm14613_vm14, %v1869_v21, 0  ;;  %v8100_v13 = vsel %vm6290_vm9, %v7801_v42, 0  ;;  %v19517_v55 = vld [vmem:[#allocation142_spill] sm:$0xff] }
 0x45e   : > { %v7398_v25 = vpop.xlane.xlu1 %7397  ;;  %v11810_v37 = vcombine.low %v1901_v18, %v1901_v18  ;;  %v7802_v31 = vpack.c.bf16 %v7746_v32, %v7745_v57  ;;  %v19508_v18 = vld [vmem:[#allocation113_spill] sm:$0xff] }
 0x45f   : > { %13445 = vrcp.f32 %v7533_v44  ;;  %v7534_v5 = vadd.f32 %v7398_v25, %v7206_v46 }
 0x460   : > { %v2414_v46 = vpop.permute.xlu0 %2413 }
 0x461   : > { %13447 = vrcp.f32 %v7534_v5  ;;  %v19519_v5 = vld [vmem:[#allocation164_spill] sm:$0xff] }
 0x462   : > { %v2416_v63 = vpop.permute.xlu1 %2415 }
 0x465   : > { %v17091_v15 = vpop.eup %13441 }
 0x466   : > { %v2574_v2 = vpop.permute.xlu1 %2573  ;;  %v17106_v44 = vmul.f32 %v17091_v15, %v16796_v39 }
 0x467   : > { %v17099_v40 = vpop.eup %13443  ;;  %v2643_v48 = vsel %vm2212_vm0, %v2414_v46, %v2574_v2  ;;  %v19509_v46 = vld [vmem:[#allocation195_spill] sm:$0xff]  ;;  %v19510_v2 = vld [vmem:[#allocation237_spill] sm:$0xff] }
 0x468   : > { %12666 = vmatmul.mubr.msk.bf16.vlgmr.msra.gmra.mrb[136].mxu0 %vm6290_vm9, %v2643_v48  ;;  %19503 = vst [vmem:[#allocation198_spill] sm:$0xff] %v17106_v44  ;;  %v17110_v36 = vmul.f32 %v17099_v40, %v16851_v14  ;;  %v8145_v14 = vsel %vm6290_vm9, %v7802_v31, 0  ;;  %v19513_v48 = vld [vmem:[#allocation242_spill] sm:$0xff]  ;;  %v19514_v31 = vld [vmem:[#allocation163_spill] sm:$0xff]  ;;  %v19523_v44 = vld [vmem:[#allocation220_spill] sm:$0xff] }
 0x469   : > { %v17112_v25 = vpop.eup %13445  ;;  %12676 = vmatpush3.bf16.xpose.msra.mxu0 %v8100_v13  ;;  %12677 = vmatprep.mubr.msk.bf16.mxu0 %vm13678_vm13, %v19413_v7  ;;  %v6713_v13 = vmax.f32 %v19513_v48, %v19512_v27 }
 0x46a   : > { %19504 = vst [vmem:[#allocation153_spill] sm:$0xff] %v17110_v36  ;;  %v2576_v42 = vpop.permute.xlu1 %2575  ;;  %12687 = vmatprep.subr.bf16.mxu0 %v19413_v7  ;;  %v17129_v21 = vmul.f32 %v17112_v25, %v16821_v34  ;;  %v11842_v34 = vcombine.low %v19508_v18, %v19508_v18 }
 0x46b   : > { %v17119_v62 = vpop.eup %13447  ;;  %v2646_v39 = vsel %vm2212_vm0, %v2416_v63, %v2576_v42  ;;  %v19515_v42 = vld [vmem:[#allocation143_spill] sm:$0xff]  ;;  %v6969_v36 = vsub.f32 %v19523_v44, %v6713_v13 }
 0x46c   : > { %2423 = vrot.lane.b32.xlu1 %v11810_v37, %s13679_s12  ;;  %12672 = vmatmul.mubr.msk.bf16.vlgmr.msra.gmra.mrb[136].mxu1 %vm6290_vm9, %v2646_v39  ;;  %19506 = vst [vmem:[#allocation201_spill] sm:$0xff] %v17129_v21  ;;  %v17133_v32 = vmul.f32 %v17119_v62, %v16825_v16  ;;  %v6711_v16 = vmax.f32 %v19510_v2, %v19509_v46  ;;  %v19516_v39 = vld [vmem:[#allocation240_spill] sm:$0xff]  ;;  %v19520_v2 = vld [vmem:[#allocation214_spill] sm:$0xff]  ;;  %v19521_v21 = vld [vmem:[#allocation161_spill] sm:$0xff] }
 0x46d   : > { %12682 = vmatpush3.bf16.xpose.msra.mxu1 %v8145_v14  ;;  %12683 = vmatprep.mubr.msk.bf16.mxu1 %vm13678_vm13, %v19413_v7  ;;  %v6714_v14 = vmax.f32 %v19516_v39, %v19515_v42 }
 0x46e   : > { %19507 = vst [vmem:[#allocation204_spill] sm:$0xff] %v17133_v32  ;;  %12693 = vmatprep.subr.bf16.mxu1 %v19413_v7  ;;  %v6775_v57 = vsub.f32 %v19511_v22, %v6711_v16 }
 0x46f   : > { %2421 = vrot.lane.b32.xlu0 %v11809_v24, %s13679_s12  ;;  %v6777_v24 = vsub.f32 %v19514_v31, %v6713_v13  ;;  %v6778_v46 = vsub.f32 %v19519_v5, %v6714_v14  ;;  %v19524_v5 = vld [vmem:[#allocation223_spill] sm:$0xff] }
 0x470   : > { %2581 = vrot.lane.b32.xlu1 %v11841_v3, %s13680_s22  ;;  %v6875_v37 = vmul.f32 1.442695, %v6775_v57  ;;  %v19518_v3 = vld [vmem:[#allocation235_spill] sm:$0xff]  ;;  %v19522_v57 = vld [vmem:[#allocation217_spill] sm:$0xff]  ;;  %v6970_v39 = vsub.f32 %v19524_v5, %v6714_v14 }
 0x471   : > { %v6712_v18 = vmax.f32 %v19518_v3, %v19517_v55  ;;  %v6879_v63 = vmul.f32 1.442695, %v6777_v24  ;;  %v6881_v32 = vmul.f32 1.442695, %v6778_v46  ;;  %v7071_v24 = vmul.f32 1.442695, %v6969_v36 }
 0x472   : > { %13449 = vpow2.f32 %v6875_v37 }
 0x473   : > { %v6776_v22 = vsub.f32 %v19521_v21, %v6712_v18  ;;  %13451 = vpow2.f32 %v6879_v63  ;;  %v6968_v48 = vsub.f32 %v19522_v57, %v6712_v18 }
 0x474   : > { %2583 = vrot.lane.b32.xlu1 %v11842_v34, %s13680_s22  ;;  %v6967_v34 = vsub.f32 %v19520_v2, %v6711_v16  ;;  %13453 = vpow2.f32 %v6881_v32  ;;  %v7073_v16 = vmul.f32 1.442695, %v6970_v39 }
 0x475   : > { %v6877_v31 = vmul.f32 1.442695, %v6776_v22  ;;  %v7069_v42 = vmul.f32 1.442695, %v6968_v48 }
 0x476   : > { %v7067_v27 = vmul.f32 1.442695, %v6967_v34 }
 0x478   : > { %13455 = vpow2.f32 %v7067_v27 }
 0x479   : > { %13457 = vpow2.f32 %v6877_v31 }
 0x47a   : > { %13459 = vpow2.f32 %v7069_v42 }
 0x47b   : > { %13461 = vpow2.f32 %v7071_v24 }
 0x47c   : > { %v17160_v37 = vpop.eup %13449  ;;  %13463 = vpow2.f32 %v7073_v16 }
 0x47d   : > { %v7231_v21 = vsel %vm6290_vm9, %v17160_v37, 0.0  ;;  %v17165_v63 = vpop.eup %13451 }
 0x47e   : > { %v7237_v44 = vsel %vm6290_vm9, %v17165_v63, 0.0  ;;  %v17169_v32 = vpop.eup %13453 }
 0x47f   : > { %v7240_v14 = vsel %vm6290_vm9, %v17169_v32, 0.0 }
 0x482   : > { %v17171_v36 = vpop.eup %13455 }
 0x483   : > { %v17175_v3 = vpop.eup %13457  ;;  %v7423_v34 = vsel %vm6290_vm9, %v17171_v36, 0.0 }
 0x484   : > { %v17177_v18 = vpop.eup %13459  ;;  %v7234_v46 = vsel %vm6290_vm9, %v17175_v3, 0.0 }
 0x485   : > { %v17183_v22 = vpop.eup %13461  ;;  %v7426_v57 = vsel %vm6290_vm9, %v17177_v18, 0.0 }
 0x486   : > { %v7429_v31 = vsel %vm6290_vm9, %v17183_v22, 0.0  ;;  %v17189_v42 = vpop.eup %13463 }
 0x487   : > { %v7432_v39 = vsel %vm6290_vm9, %v17189_v42, 0.0 }
 0x48e   : > { %7232 = vadd.xlane.f32.xlu0 %v7231_v21 }
 0x491   : > { %v7209_v55 = vpop.xlane.xlu0 %7208 }
 0x492   : > { %7238 = vadd.xlane.f32.xlu0 %v7237_v44 }
 0x495   : > { %v7215_v13 = vpop.xlane.xlu0 %7214 }
 0x496   : > { %7241 = vadd.xlane.f32.xlu0 %v7240_v14 }
 0x498   : > { %7235 = vadd.xlane.f32.xlu1 %v7234_v46 }
 0x499   : > { %v7218_v2 = vpop.xlane.xlu0 %7217 }
 0x49a   : > { %7424 = vadd.xlane.f32.xlu0 %v7423_v34  ;;  %v7748_v34 = vmul.f32 %v16883_v41, %v16573_v28  ;;  %v7749_v28 = vmul.f32 %v16896_v47, %v16579_v26 }
 0x49b   : > { %v7212_v27 = vpop.xlane.xlu1 %7211 }
 0x49c   : > { %7427 = vadd.xlane.f32.xlu1 %v7426_v57 }
 0x49d   : > { %v7401_v48 = vpop.xlane.xlu0 %7400 }
 0x49e   : > { %v7535_v24 = vadd.f32 %v7401_v48, %v7209_v55  ;;  %7430 = vadd.xlane.f32.xlu0 %v7429_v31  ;;  %v7747_v55 = vmul.f32 %v16877_v9, %v16561_v4  ;;  %v1871_v48 = vld [vmem:[#allocation5 + $0x2c] sm:$0xf]  ;;  %v1902_v4 = vsel %vm14613_vm14, %v1870_v10, 0 }
 0x49f   : > { %v7404_v5 = vpop.xlane.xlu1 %7403  ;;  %v11811_v10 = vcombine.low %v1902_v4, %v1902_v4 }
 0x4a0   : > { %13465 = vrcp.f32 %v7535_v24  ;;  %v7536_v16 = vadd.f32 %v7404_v5, %v7212_v27  ;;  %7433 = vadd.xlane.f32.xlu1 %v7432_v39  ;;  %v7803_v31 = vpack.c.bf16 %v7748_v34, %v7747_v55  ;;  %v7750_v27 = vmul.f32 %v16903_v17, %v16589_v12 }
 0x4a1   : > { %v7407_v21 = vpop.xlane.xlu0 %7406 }
 0x4a2   : > { %v7537_v44 = vadd.f32 %v7407_v21, %v7215_v13  ;;  %13467 = vrcp.f32 %v7536_v16  ;;  %v1903_v13 = vsel %vm14613_vm14, %v1871_v48, 0  ;;  %v8190_v39 = vsel %vm6290_vm9, %v7803_v31, 0  ;;  %v19528_v31 = vld [vmem:[#allocation115_spill] sm:$0xff] }
 0x4a3   : > { %v7410_v14 = vpop.xlane.xlu1 %7409  ;;  %v11812_v12 = vcombine.low %v1903_v13, %v1903_v13  ;;  %v7804_v17 = vpack.c.bf16 %v7750_v27, %v7749_v28  ;;  %v19529_v27 = vld [vmem:[#allocation244_spill] sm:$0xff]  ;;  %v19530_v13 = vld [vmem:[#allocation166_spill] sm:$0xff] }
 0x4a4   : > { %13469 = vrcp.f32 %v7537_v44  ;;  %v7538_v46 = vadd.f32 %v7410_v14, %v7218_v2  ;;  %v19541_v44 = vld [vmem:[#allocation228_spill] sm:$0xff] }
 0x4a5   : > { %v2418_v2 = vpop.permute.xlu0 %2417 }
 0x4a6   : > { %13471 = vrcp.f32 %v7538_v46  ;;  %v19525_v46 = vld [vmem:[#allocation114_spill] sm:$0xff] }
 0x4a7   : > { %v2420_v57 = vpop.permute.xlu1 %2419  ;;  %v11843_v34 = vcombine.low %v19525_v46, %v19525_v46 }
 0x4aa   : > { %v17199_v24 = vpop.eup %13465 }
 0x4ab   : > { %v2578_v5 = vpop.permute.xlu1 %2577  ;;  %v17214_v21 = vmul.f32 %v17199_v24, %v16944_v59 }
 0x4ac   : > { %v17207_v9 = vpop.eup %13467  ;;  %v2649_v41 = vsel %vm2212_vm0, %v2418_v2, %v2578_v5  ;;  %v19531_v5 = vld [vmem:[#allocation248_spill] sm:$0xff] }
 0x4ad   : > { %12678 = vmatmul.mubr.msk.bf16.vlgmr.msra.gmra.mrb[140].mxu0 %vm6290_vm9, %v2649_v41  ;;  %v17218_v26 = vmul.f32 %v17207_v9, %v16959_v53  ;;  %v8235_v53 = vsel %vm6290_vm9, %v7804_v17, 0  ;;  %v6717_v28 = vmax.f32 %v19531_v5, %v16523_v56  ;;  %v19532_v41 = vld [vmem:[#allocation167_spill] sm:$0xff] }
 0x4ae   : > { %v17220_v47 = vpop.eup %13469  ;;  %12688 = vmatpush3.bf16.xpose.msra.mxu0 %v8190_v39  ;;  %12689 = vmatprep.mubr.msk.bf16.mxu0 %vm13678_vm13, %v19413_v7  ;;  %v19534_v17 = vld [vmem:[#allocation251_spill] sm:$0xff] }
 0x4af   : > { %v2580_v16 = vpop.permute.xlu1 %2579  ;;  %12699 = vmatprep.subr.bf16.mxu0 %v19413_v7  ;;  %v17237_v55 = vmul.f32 %v17220_v47, %v16949_v58  ;;  %v11844_v58 = vcombine.low %v19528_v31, %v19528_v31  ;;  %v6781_v39 = vsub.f32 %v19532_v41, %v6717_v28  ;;  %v19538_v31 = vld [vmem:[#allocation222_spill] sm:$0xff] }
 0x4b0   : > { %v17227_v14 = vpop.eup %13471  ;;  %v2652_v59 = vsel %vm2212_vm0, %v2420_v57, %v2580_v16  ;;  %v19535_v16 = vld [vmem:[#allocation181_spill] sm:$0xff] }
 0x4b1   : > { %2427 = vrot.lane.b32.xlu1 %v11812_v12, %s13679_s12  ;;  %12684 = vmatmul.mubr.msk.bf16.vlgmr.msra.gmra.mrb[140].mxu1 %vm6290_vm9, %v2652_v59  ;;  %19526 = vst [vmem:[#allocation207_spill] sm:$0xff] %v17237_v55  ;;  %v17241_v48 = vmul.f32 %v17227_v14, %v16953_v38  ;;  %v6715_v38 = vmax.f32 %v19529_v27, %v16498_v52  ;;  %v19533_v12 = vld [vmem:[#allocation186_spill] sm:$0xff]  ;;  %v19536_v59 = vld [vmem:[#allocation243_spill] sm:$0xff]  ;;  %v6887_v46 = vmul.f32 1.442695, %v6781_v39  ;;  %v19539_v27 = vld [vmem:[#allocation165_spill] sm:$0xff] }
 0x4b2   : > { %12694 = vmatpush3.bf16.xpose.msra.mxu1 %v8235_v53  ;;  %12695 = vmatprep.mubr.msk.bf16.mxu1 %vm13678_vm13, %v19413_v7  ;;  %v6716_v53 = vmax.f32 %v19536_v59, %v19535_v16  ;;  %v6973_v55 = vsub.f32 %v19541_v44, %v6717_v28 }
 0x4b3   : > { %19527 = vst [vmem:[#allocation137_spill] sm:$0xff] %v17241_v48  ;;  %12705 = vmatprep.subr.bf16.mxu1 %v19413_v7  ;;  %v6779_v2 = vsub.f32 %v19530_v13, %v6715_v38  ;;  %v1872_v48 = vld [vmem:[#allocation5 + $0x30] sm:$0xf] }
 0x4b4   : > { %2425 = vrot.lane.b32.xlu0 %v11811_v10, %s13679_s12  ;;  %v6718_v10 = vmax.f32 %v19534_v17, %v19533_v12  ;;  %v6780_v13 = vsub.f32 %v19539_v27, %v6716_v53  ;;  %v7079_v39 = vmul.f32 1.442695, %v6973_v55  ;;  %v19542_v17 = vld [vmem:[#allocation231_spill] sm:$0xff] }
 0x4b5   : > { %2585 = vrot.lane.b32.xlu1 %v11843_v34, %s13680_s22  ;;  %v6883_v4 = vmul.f32 1.442695, %v6779_v2  ;;  %v19537_v34 = vld [vmem:[#allocation168_spill] sm:$0xff]  ;;  %v19540_v2 = vld [vmem:[#allocation225_spill] sm:$0xff] }
 0x4b6   : > { %v6782_v52 = vsub.f32 %v19537_v34, %v6718_v10  ;;  %v6972_v5 = vsub.f32 %v19540_v2, %v6716_v53  ;;  %v6885_v41 = vmul.f32 1.442695, %v6780_v13  ;;  %v6974_v16 = vsub.f32 %v19542_v17, %v6718_v10 }
 0x4b7   : > { %13473 = vpow2.f32 %v6883_v4 }
 0x4b8   : > { %13475 = vpow2.f32 %v6887_v46  ;;  %v6889_v57 = vmul.f32 1.442695, %v6782_v52  ;;  %v7077_v12 = vmul.f32 1.442695, %v6972_v5  ;;  %v7081_v53 = vmul.f32 1.442695, %v6974_v16 }
 0x4b9   : > { %2587 = vrot.lane.b32.xlu1 %v11844_v58, %s13680_s22  ;;  %v6971_v58 = vsub.f32 %v19538_v31, %v6715_v38 }
 0x4ba   : > { %13477 = vpow2.f32 %v6889_v57 }
 0x4bb   : > { %v7075_v56 = vmul.f32 1.442695, %v6971_v58 }
 0x4bd   : > { %13479 = vpow2.f32 %v7075_v56 }
 0x4be   : > { %13481 = vpow2.f32 %v6885_v41 }
 0x4bf   : > { %13483 = vpow2.f32 %v7077_v12 }
 0x4c0   : > { %13485 = vpow2.f32 %v7079_v39 }
 0x4c1   : > { %v17268_v4 = vpop.eup %13473  ;;  %13487 = vpow2.f32 %v7081_v53 }
 0x4c2   : > { %v7243_v38 = vsel %vm6290_vm9, %v17268_v4, 0.0  ;;  %v17273_v59 = vpop.eup %13475 }
 0x4c3   : > { %v7249_v44 = vsel %vm6290_vm9, %v17273_v59, 0.0 }
 0x4c4   : > { %v17277_v57 = vpop.eup %13477 }
 0x4c5   : > { %v7252_v10 = vsel %vm6290_vm9, %v17277_v57, 0.0 }
 0x4c7   : > { %v17279_v55 = vpop.eup %13479 }
 0x4c8   : > { %v17283_v34 = vpop.eup %13481  ;;  %v7435_v27 = vsel %vm6290_vm9, %v17279_v55, 0.0 }
 0x4c9   : > { %v17285_v52 = vpop.eup %13483  ;;  %v7246_v31 = vsel %vm6290_vm9, %v17283_v34, 0.0 }
 0x4ca   : > { %v17291_v13 = vpop.eup %13485  ;;  %v7438_v2 = vsel %vm6290_vm9, %v17285_v52, 0.0 }
 0x4cb   : > { %v7441_v41 = vsel %vm6290_vm9, %v17291_v13, 0.0  ;;  %v17297_v12 = vpop.eup %13487 }
 0x4cc   : > { %v7444_v16 = vsel %vm6290_vm9, %v17297_v12, 0.0 }
 0x4d3   : > { %7244 = vadd.xlane.f32.xlu0 %v7243_v38 }
 0x4d6   : > { %v7221_v46 = vpop.xlane.xlu0 %7220 }
 0x4d7   : > { %7250 = vadd.xlane.f32.xlu0 %v7249_v44 }
 0x4da   : > { %v7227_v28 = vpop.xlane.xlu0 %7226 }
 0x4db   : > { %7253 = vadd.xlane.f32.xlu0 %v7252_v10 }
 0x4dd   : > { %7247 = vadd.xlane.f32.xlu1 %v7246_v31 }
 0x4de   : > { %v7230_v58 = vpop.xlane.xlu0 %7229 }
 0x4df   : > { %7436 = vadd.xlane.f32.xlu0 %v7435_v27  ;;  %v7752_v27 = vmul.f32 %v16991_v51, %v16669_v54 }
 0x4e0   : > { %v7224_v56 = vpop.xlane.xlu1 %7223 }
 0x4e1   : > { %7439 = vadd.xlane.f32.xlu1 %v7438_v2 }
 0x4e2   : > { %v7413_v5 = vpop.xlane.xlu0 %7412 }
 0x4e3   : > { %v7539_v39 = vadd.f32 %v7413_v5, %v7221_v46  ;;  %7442 = vadd.xlane.f32.xlu0 %v7441_v41  ;;  %v7751_v46 = vmul.f32 %v16985_v11, %v16663_v49  ;;  %v1873_v5 = vld [vmem:[#allocation5 + $0x34] sm:$0xf]  ;;  %v1904_v49 = vsel %vm14613_vm14, %v1872_v48, 0 }
 0x4e4   : > { %v7416_v17 = vpop.xlane.xlu1 %7415  ;;  %v11813_v48 = vcombine.low %v1904_v49, %v1904_v49  ;;  %v19553_v49 = vld [vmem:[#allocation280_spill] sm:$0xff] }
 0x4e5   : > { %13489 = vrcp.f32 %v7539_v39  ;;  %v7540_v53 = vadd.f32 %v7416_v17, %v7224_v56  ;;  %7445 = vadd.xlane.f32.xlu1 %v7444_v16  ;;  %v7805_v41 = vpack.c.bf16 %v7752_v27, %v7751_v46  ;;  %v7754_v56 = vmul.f32 %v17011_v20, %v16682_v45  ;;  %v19543_v16 = vld [vmem:[#allocation187_spill] sm:$0xff]  ;;  %v19546_v46 = vld [vmem:[#allocation116_spill] sm:$0xff] }
 0x4e6   : > { %v7419_v38 = vpop.xlane.xlu0 %7418  ;;  %v7753_v54 = vmul.f32 %v17004_v8, %v19543_v16  ;;  %v19552_v16 = vld [vmem:[#allocation170_spill] sm:$0xff] }
 0x4e7   : > { %v7541_v44 = vadd.f32 %v7419_v38, %v7227_v28  ;;  %13491 = vrcp.f32 %v7540_v53  ;;  %v1905_v28 = vsel %vm14613_vm14, %v1873_v5, 0  ;;  %v8280_v38 = vsel %vm6290_vm9, %v7805_v41, 0 }
 0x4e8   : > { %v7422_v10 = vpop.xlane.xlu1 %7421  ;;  %v11814_v45 = vcombine.low %v1905_v28, %v1905_v28  ;;  %v7806_v20 = vpack.c.bf16 %v7754_v56, %v7753_v54  ;;  %v11845_v5 = vcombine.low %v19546_v46, %v19546_v46  ;;  %v19549_v28 = vld [vmem:[#allocation117_spill] sm:$0xff]  ;;  %v19558_v46 = vld [vmem:[#allocation279_spill] sm:$0xff] }
 0x4e9   : > { %13493 = vrcp.f32 %v7541_v44  ;;  %v7542_v31 = vadd.f32 %v7422_v10, %v7230_v58 }
 0x4ea   : > { %v2422_v58 = vpop.permute.xlu0 %2421 }
 0x4eb   : > { %13495 = vrcp.f32 %v7542_v31  ;;  %v19560_v31 = vld [vmem:[#allocation172_spill] sm:$0xff] }
 0x4ec   : > { %v2424_v2 = vpop.permute.xlu1 %2423 }
 0x4ef   : > { %v17307_v39 = vpop.eup %13489 }
 0x4f0   : > { %v2582_v17 = vpop.permute.xlu1 %2581  ;;  %v17322_v53 = vmul.f32 %v17307_v39, %v17052_v33 }
 0x4f1   : > { %v17315_v11 = vpop.eup %13491  ;;  %v2655_v51 = vsel %vm2212_vm0, %v2422_v58, %v2582_v17  ;;  %v19550_v58 = vld [vmem:[#allocation278_spill] sm:$0xff]  ;;  %v19551_v17 = vld [vmem:[#allocation252_spill] sm:$0xff] }
 0x4f2   : > { %12690 = vmatmul.mubr.msk.bf16.vlgmr.msra.gmra.mrb[144].mxu0 %vm6290_vm9, %v2655_v51  ;;  %19544 = vst [vmem:[#allocation273_spill] sm:$0xff] %v17322_v53  ;;  %v17326_v8 = vmul.f32 %v17315_v11, %v17067_v43  ;;  %v8325_v43 = vsel %vm6290_vm9, %v7806_v20, 0  ;;  %v19554_v51 = vld [vmem:[#allocation258_spill] sm:$0xff]  ;;  %v19555_v20 = vld [vmem:[#allocation171_spill] sm:$0xff]  ;;  %v19564_v53 = vld [vmem:[#allocation236_spill] sm:$0xff] }
 0x4f3   : > { %v17328_v44 = vpop.eup %13493  ;;  %12700 = vmatpush3.bf16.xpose.msra.mxu0 %v8280_v38  ;;  %12701 = vmatprep.mubr.msk.bf16.mxu0 %vm13678_vm13, %v19413_v7  ;;  %v6721_v38 = vmax.f32 %v19554_v51, %v19553_v49 }
 0x4f4   : > { %19545 = vst [vmem:[#allocation193_spill] sm:$0xff] %v17326_v8  ;;  %v2584_v10 = vpop.permute.xlu1 %2583  ;;  %12711 = vmatprep.subr.bf16.mxu0 %v19413_v7  ;;  %v17345_v41 = vmul.f32 %v17328_v44, %v17057_v61  ;;  %v11846_v61 = vcombine.low %v19549_v28, %v19549_v28 }
 0x4f5   : > { %v17335_v27 = vpop.eup %13495  ;;  %v2658_v33 = vsel %vm2212_vm0, %v2424_v2, %v2584_v10  ;;  %v19556_v10 = vld [vmem:[#allocation281_spill] sm:$0xff]  ;;  %v6977_v8 = vsub.f32 %v19564_v53, %v6721_v38 }
 0x4f6   : > { %2431 = vrot.lane.b32.xlu1 %v11814_v45, %s13679_s12  ;;  %12696 = vmatmul.mubr.msk.bf16.vlgmr.msra.gmra.mrb[144].mxu1 %vm6290_vm9, %v2658_v33  ;;  %19547 = vst [vmem:[#allocation139_spill] sm:$0xff] %v17345_v41  ;;  %v17349_v56 = vmul.f32 %v17335_v27, %v17061_v35  ;;  %v6719_v35 = vmax.f32 %v19551_v17, %v19550_v58  ;;  %v19557_v33 = vld [vmem:[#allocation261_spill] sm:$0xff]  ;;  %v19561_v17 = vld [vmem:[#allocation230_spill] sm:$0xff] }
 0x4f7   : > { %12706 = vmatpush3.bf16.xpose.msra.mxu1 %v8325_v43  ;;  %12707 = vmatprep.mubr.msk.bf16.mxu1 %vm13678_vm13, %v19413_v7  ;;  %v6722_v43 = vmax.f32 %v19557_v33, %v19556_v10  ;;  %v19562_v41 = vld [vmem:[#allocation169_spill] sm:$0xff] }
 0x4f8   : > { %19548 = vst [vmem:[#allocation184_spill] sm:$0xff] %v17349_v56  ;;  %12717 = vmatprep.subr.bf16.mxu1 %v19413_v7  ;;  %v6783_v54 = vsub.f32 %v19552_v16, %v6719_v35 }
 0x4f9   : > { %2429 = vrot.lane.b32.xlu0 %v11813_v48, %s13679_s12  ;;  %v6785_v48 = vsub.f32 %v19555_v20, %v6721_v38  ;;  %v6786_v58 = vsub.f32 %v19560_v31, %v6722_v43  ;;  %v19565_v31 = vld [vmem:[#allocation239_spill] sm:$0xff] }
 0x4fa   : > { %2589 = vrot.lane.b32.xlu1 %v11845_v5, %s13680_s22  ;;  %v6891_v45 = vmul.f32 1.442695, %v6783_v54  ;;  %v19559_v5 = vld [vmem:[#allocation255_spill] sm:$0xff]  ;;  %v19563_v54 = vld [vmem:[#allocation233_spill] sm:$0xff]  ;;  %v6978_v33 = vsub.f32 %v19565_v31, %v6722_v43 }
 0x4fb   : > { %v6720_v28 = vmax.f32 %v19559_v5, %v19558_v46  ;;  %v6895_v2 = vmul.f32 1.442695, %v6785_v48  ;;  %v6897_v56 = vmul.f32 1.442695, %v6786_v58  ;;  %v7087_v48 = vmul.f32 1.442695, %v6977_v8 }
 0x4fc   : > { %13497 = vpow2.f32 %v6891_v45 }
 0x4fd   : > { %v6784_v16 = vsub.f32 %v19562_v41, %v6720_v28  ;;  %13499 = vpow2.f32 %v6895_v2  ;;  %v6976_v51 = vsub.f32 %v19563_v54, %v6720_v28 }
 0x4fe   : > { %2591 = vrot.lane.b32.xlu1 %v11846_v61, %s13680_s22  ;;  %v6975_v61 = vsub.f32 %v19561_v17, %v6719_v35  ;;  %13501 = vpow2.f32 %v6897_v56  ;;  %v7089_v35 = vmul.f32 1.442695, %v6978_v33 }
 0x4ff   : > { %v6893_v20 = vmul.f32 1.442695, %v6784_v16  ;;  %v7085_v10 = vmul.f32 1.442695, %v6976_v51 }
 0x500   : > { %v7083_v49 = vmul.f32 1.442695, %v6975_v61 }
 0x502   : > { %13503 = vpow2.f32 %v7083_v49 }
 0x503   : > { %13505 = vpow2.f32 %v6893_v20 }
 0x504   : > { %13507 = vpow2.f32 %v7085_v10 }
 0x505   : > { %13509 = vpow2.f32 %v7087_v48 }
 0x506   : > { %v17376_v45 = vpop.eup %13497  ;;  %13511 = vpow2.f32 %v7089_v35 }
 0x507   : > { %v7255_v41 = vsel %vm6290_vm9, %v17376_v45, 0.0  ;;  %v17381_v2 = vpop.eup %13499 }
 0x508   : > { %v7261_v53 = vsel %vm6290_vm9, %v17381_v2, 0.0  ;;  %v17385_v56 = vpop.eup %13501 }
 0x509   : > { %v7264_v43 = vsel %vm6290_vm9, %v17385_v56, 0.0 }
 0x50c   : > { %v17387_v8 = vpop.eup %13503 }
 0x50d   : > { %v17391_v5 = vpop.eup %13505  ;;  %v7447_v61 = vsel %vm6290_vm9, %v17387_v8, 0.0 }
 0x50e   : > { %v17393_v28 = vpop.eup %13507  ;;  %v7258_v58 = vsel %vm6290_vm9, %v17391_v5, 0.0 }
 0x50f   : > { %v17399_v16 = vpop.eup %13509  ;;  %v7450_v54 = vsel %vm6290_vm9, %v17393_v28, 0.0 }
 0x510   : > { %v7453_v20 = vsel %vm6290_vm9, %v17399_v16, 0.0  ;;  %v17405_v10 = vpop.eup %13511 }
 0x511   : > { %v7456_v33 = vsel %vm6290_vm9, %v17405_v10, 0.0 }
 0x518   : > { %7256 = vadd.xlane.f32.xlu0 %v7255_v41 }
 0x51b   : > { %v7233_v46 = vpop.xlane.xlu0 %7232 }
 0x51c   : > { %7262 = vadd.xlane.f32.xlu0 %v7261_v53 }
 0x51f   : > { %v7239_v38 = vpop.xlane.xlu0 %7238 }
 0x520   : > { %7265 = vadd.xlane.f32.xlu0 %v7264_v43 }
 0x522   : > { %7259 = vadd.xlane.f32.xlu1 %v7258_v58 }
 0x523   : > { %v7242_v17 = vpop.xlane.xlu0 %7241 }
 0x524   : > { %7448 = vadd.xlane.f32.xlu0 %v7447_v61  ;;  %v7756_v61 = vmul.f32 %v17099_v40, %v16853_v30 }
 0x525   : > { %v7236_v49 = vpop.xlane.xlu1 %7235 }
 0x526   : > { %7451 = vadd.xlane.f32.xlu1 %v7450_v54  ;;  %v1875_v54 = vld [vmem:[#allocation5 + $0x3c] sm:$0xf] }
 0x527   : > { %v7425_v51 = vpop.xlane.xlu0 %7424 }
 0x528   : > { %v7543_v48 = vadd.f32 %v7425_v51, %v7233_v46  ;;  %7454 = vadd.xlane.f32.xlu0 %v7453_v20  ;;  %v7755_v46 = vmul.f32 %v17091_v15, %v16843_v1 }
 0x529   : > { %v7428_v31 = vpop.xlane.xlu1 %7427 }
 0x52a   : > { %13513 = vrcp.f32 %v7543_v48  ;;  %v7544_v35 = vadd.f32 %v7428_v31, %v7236_v49  ;;  %7457 = vadd.xlane.f32.xlu1 %v7456_v33  ;;  %v7807_v20 = vpack.c.bf16 %v7756_v61, %v7755_v46  ;;  %v7758_v48 = vmul.f32 %v17119_v62, %v16865_v60  ;;  %v1874_v49 = vld [vmem:[#allocation5 + $0x38] sm:$0xf] }
 0x52b   : > { %v7431_v41 = vpop.xlane.xlu0 %7430  ;;  %v1906_v40 = vsel %vm14613_vm14, %v1874_v49, 0 }
 0x52c   : > { %v7545_v53 = vadd.f32 %v7431_v41, %v7239_v38  ;;  %13515 = vrcp.f32 %v7544_v35  ;;  %v1907_v38 = vsel %vm14613_vm14, %v1875_v54, 0  ;;  %v8370_v41 = vsel %vm6290_vm9, %v7807_v20, 0  ;;  %v19566_v54 = vld [vmem:[#allocation118_spill] sm:$0xff] }
 0x52d   : > { %v7434_v43 = vpop.xlane.xlu1 %7433  ;;  %v11816_v35 = vcombine.low %v1907_v38, %v1907_v38 }
 0x52e   : > { %13517 = vrcp.f32 %v7545_v53  ;;  %v7546_v58 = vadd.f32 %v7434_v43, %v7242_v17  ;;  %v7757_v17 = vmul.f32 %v17112_v25, %v16859_v29 }
 0x52f   : > { %v2426_v33 = vpop.permute.xlu0 %2425 }
 0x530   : > { %13519 = vrcp.f32 %v7546_v58  ;;  %v7808_v60 = vpack.c.bf16 %v7758_v48, %v7757_v17  ;;  %v11815_v58 = vcombine.low %v1906_v40, %v1906_v40  ;;  %v19569_v17 = vld [vmem:[#allocation264_spill] sm:$0xff] }
 0x531   : > { %v2428_v51 = vpop.permute.xlu1 %2427 }
 0x532   : > { %v8415_v48 = vsel %vm6290_vm9, %v7808_v60, 0  ;;  %v19573_v60 = vld [vmem:[#allocation175_spill] sm:$0xff] }
 0x534   : > { %v13514_v31 = vpop.eup %13513 }
 0x535   : > { %v2586_v30 = vpop.permute.xlu1 %2585  ;;  %v17425_v53 = vmul.f32 %v13514_v31, %v17171_v36  ;;  %v17431_v25 = vmul.f32 %v13514_v31, %v17160_v37  ;;  %v19568_v31 = vld [vmem:[#allocation282_spill] sm:$0xff] }
 0x536   : > { %v13516_v1 = vpop.eup %13515  ;;  %v2661_v15 = vsel %vm2212_vm0, %v2426_v33, %v2586_v30  ;;  %v6723_v33 = vmax.f32 %v19569_v17, %v19568_v31  ;;  %v19570_v30 = vld [vmem:[#allocation174_spill] sm:$0xff] }
 0x537   : > { %12702 = vmatmul.mubr.msk.bf16.vlgmr.msra.gmra.mrb[148].mxu0 %vm6290_vm9, %v2661_v15  ;;  %v17428_v29 = vmul.f32 %v13516_v1, %v17177_v18  ;;  %v17434_v43 = vmul.f32 %v13516_v1, %v17175_v3  ;;  %v11847_v3 = vcombine.low %v19566_v54, %v19566_v54  ;;  %v19571_v1 = vld [vmem:[#allocation284_spill] sm:$0xff]  ;;  %v19572_v15 = vld [vmem:[#allocation269_spill] sm:$0xff]  ;;  %v19577_v54 = vld [vmem:[#allocation266_spill] sm:$0xff] }
 0x538   : > { %v13518_v62 = vpop.eup %13517  ;;  %12712 = vmatpush3.bf16.xpose.msra.mxu0 %v8370_v41  ;;  %12713 = vmatprep.mubr.msk.bf16.mxu0 %vm13678_vm13, %v19413_v7  ;;  %v6787_v40 = vsub.f32 %v19570_v30, %v6723_v33  ;;  %v6725_v41 = vmax.f32 %v19572_v15, %v19571_v1  ;;  %v19579_v17 = vld [vmem:[#allocation238_spill] sm:$0xff] }
 0x539   : > { %v2588_v61 = vpop.permute.xlu1 %2587  ;;  %12723 = vmatprep.subr.bf16.mxu0 %v19413_v7  ;;  %v17447_v20 = vmul.f32 %v13518_v62, %v17183_v22  ;;  %v17456_v38 = vmul.f32 %v13518_v62, %v17165_v63  ;;  %v19567_v63 = vld [vmem:[#allocation119_spill] sm:$0xff]  ;;  %v19582_v22 = vld [vmem:[#allocation245_spill] sm:$0xff] }
 0x53a   : > { %v13520_v46 = vpop.eup %13519  ;;  %v2664_v37 = vsel %vm2212_vm0, %v2428_v51, %v2588_v61  ;;  %v6789_v62 = vsub.f32 %v19573_v60, %v6725_v41  ;;  %v19575_v61 = vld [vmem:[#allocation270_spill] sm:$0xff]  ;;  %v6981_v36 = vsub.f32 %v19582_v22, %v6725_v41 }
 0x53b   : > { %2435 = vrot.lane.b32.xlu1 %v11816_v35, %s13679_s12  ;;  %12708 = vmatmul.mubr.msk.bf16.vlgmr.msra.gmra.mrb[148].mxu1 %vm6290_vm9, %v2664_v37  ;;  %v17453_v49 = vmul.f32 %v13520_v46, %v17189_v42  ;;  %v17459_v51 = vmul.f32 %v13520_v46, %v17169_v32  ;;  %v11848_v32 = vcombine.low %v19567_v63, %v19567_v63  ;;  %v6899_v35 = vmul.f32 1.442695, %v6787_v40  ;;  %v19576_v37 = vld [vmem:[#allocation283_spill] sm:$0xff]  ;;  %v19578_v63 = vld [vmem:[#allocation176_spill] sm:$0xff]  ;;  %v19580_v42 = vld [vmem:[#allocation173_spill] sm:$0xff] }
 0x53c   : > { %12718 = vmatpush3.bf16.xpose.msra.mxu1 %v8415_v48  ;;  %12719 = vmatprep.mubr.msk.bf16.mxu1 %vm13678_vm13, %v19413_v7  ;;  %v6903_v48 = vmul.f32 1.442695, %v6789_v62  ;;  %v19581_v40 = vld [vmem:[#allocation241_spill] sm:$0xff]  ;;  %v7095_v62 = vmul.f32 1.442695, %v6981_v36 }
 0x53d   : > { %12729 = vmatprep.subr.bf16.mxu1 %v19413_v7  ;;  %13521 = vpow2.f32 %v6899_v35 }
 0x53e   : > { %2433 = vrot.lane.b32.xlu0 %v11815_v58, %s13679_s12  ;;  %v19574_v58 = vld [vmem:[#allocation285_spill] sm:$0xff]  ;;  %13523 = vpow2.f32 %v6903_v48 }
 0x53f   : > { %2593 = vrot.lane.b32.xlu1 %v11847_v3, %s13680_s22  ;;  %v6726_v46 = vmax.f32 %v19575_v61, %v19574_v58  ;;  %v6724_v3 = vmax.f32 %v19577_v54, %v19576_v37  ;;  %v19583_v61 = vld [vmem:[#allocation247_spill] sm:$0xff] }
 0x541   : > { %v6790_v31 = vsub.f32 %v19578_v63, %v6726_v46  ;;  %v6788_v30 = vsub.f32 %v19580_v42, %v6724_v3  ;;  %v6980_v15 = vsub.f32 %v19581_v40, %v6724_v3  ;;  %v6982_v37 = vsub.f32 %v19583_v61, %v6726_v46 }
 0x543   : > { %2595 = vrot.lane.b32.xlu1 %v11848_v32, %s13680_s22  ;;  %v6979_v32 = vsub.f32 %v19579_v17, %v6723_v33  ;;  %v6905_v18 = vmul.f32 1.442695, %v6790_v31  ;;  %v6901_v60 = vmul.f32 1.442695, %v6788_v30  ;;  %v7093_v58 = vmul.f32 1.442695, %v6980_v15 }
 0x544   : > { %v7097_v54 = vmul.f32 1.442695, %v6982_v37 }
 0x545   : > { %v7091_v1 = vmul.f32 1.442695, %v6979_v32  ;;  %13525 = vpow2.f32 %v6905_v18 }
 0x547   : > { %v17488_v35 = vpop.eup %13521  ;;  %13527 = vpow2.f32 %v7091_v1 }
 0x548   : > { %13529 = vpow2.f32 %v6901_v60  ;;  %v7267_v42 = vsel %vm6290_vm9, %v17488_v35, 0.0  ;;  %v17493_v33 = vpop.eup %13523 }
 0x549   : > { %13531 = vpow2.f32 %v7093_v58  ;;  %v7273_v18 = vsel %vm6290_vm9, %v17493_v33, 0.0 }
 0x54a   : > { %13533 = vpow2.f32 %v7095_v62 }
 0x54b   : > { %13535 = vpow2.f32 %v7097_v54 }
 0x54f   : > { %v17497_v22 = vpop.eup %13525 }
 0x550   : > { %v7276_v46 = vsel %vm6290_vm9, %v17497_v22, 0.0 }
 0x551   : > { %v17499_v36 = vpop.eup %13527 }
 0x552   : > { %v17503_v48 = vpop.eup %13529  ;;  %v7459_v32 = vsel %vm6290_vm9, %v17499_v36, 0.0 }
 0x553   : > { %v17505_v63 = vpop.eup %13531  ;;  %v7270_v31 = vsel %vm6290_vm9, %v17503_v48, 0.0 }
 0x554   : > { %v17511_v30 = vpop.eup %13533  ;;  %v7462_v40 = vsel %vm6290_vm9, %v17505_v63, 0.0 }
 0x555   : > { %v7465_v60 = vsel %vm6290_vm9, %v17511_v30, 0.0  ;;  %v17517_v58 = vpop.eup %13535 }
 0x556   : > { %v7468_v37 = vsel %vm6290_vm9, %v17517_v58, 0.0 }
 0x55d   : > { %7268 = vadd.xlane.f32.xlu0 %v7267_v42 }
 0x560   : > { %v7245_v3 = vpop.xlane.xlu0 %7244 }
 0x561   : > { %7274 = vadd.xlane.f32.xlu0 %v7273_v18 }
 0x564   : > { %v7251_v41 = vpop.xlane.xlu0 %7250 }
 0x565   : > { %7277 = vadd.xlane.f32.xlu0 %v7276_v46 }
 0x567   : > { %7271 = vadd.xlane.f32.xlu1 %v7270_v31 }
 0x568   : > { %v7254_v17 = vpop.xlane.xlu0 %7253 }
 0x569   : > { %7460 = vadd.xlane.f32.xlu0 %v7459_v32  ;;  %v7760_v32 = vmul.f32 %v17207_v9, %v16961_v50 }
 0x56a   : > { %v7248_v1 = vpop.xlane.xlu1 %7247 }
 0x56b   : > { %7463 = vadd.xlane.f32.xlu1 %v7462_v40  ;;  %v1877_v40 = vld [vmem:[#allocation5 + $0x44] sm:$0xf] }
 0x56c   : > { %v7437_v15 = vpop.xlane.xlu0 %7436 }
 0x56d   : > { %v7547_v62 = vadd.f32 %v7437_v15, %v7245_v3  ;;  %7466 = vadd.xlane.f32.xlu0 %v7465_v60  ;;  %v7759_v3 = vmul.f32 %v17199_v24, %v16955_v0 }
 0x56e   : > { %v7440_v61 = vpop.xlane.xlu1 %7439 }
 0x56f   : > { %13537 = vrcp.f32 %v7547_v62  ;;  %v7548_v54 = vadd.f32 %v7440_v61, %v7248_v1  ;;  %7469 = vadd.xlane.f32.xlu1 %v7468_v37  ;;  %v7809_v60 = vpack.c.bf16 %v7760_v32, %v7759_v3  ;;  %v7762_v62 = vmul.f32 %v17227_v14, %v16973_v23  ;;  %v1876_v1 = vld [vmem:[#allocation5 + $0x40] sm:$0xf] }
 0x570   : > { %v7443_v42 = vpop.xlane.xlu0 %7442  ;;  %v1908_v9 = vsel %vm14613_vm14, %v1876_v1, 0 }
 0x571   : > { %v7549_v18 = vadd.f32 %v7443_v42, %v7251_v41  ;;  %13539 = vrcp.f32 %v7548_v54  ;;  %v1909_v41 = vsel %vm14613_vm14, %v1877_v40, 0  ;;  %v8460_v42 = vsel %vm6290_vm9, %v7809_v60, 0  ;;  %v19585_v40 = vld [vmem:[#allocation120_spill] sm:$0xff] }
 0x572   : > { %v7446_v46 = vpop.xlane.xlu1 %7445  ;;  %v11818_v54 = vcombine.low %v1909_v41, %v1909_v41 }
 0x573   : > { %13541 = vrcp.f32 %v7549_v18  ;;  %v7550_v31 = vadd.f32 %v7446_v46, %v7254_v17  ;;  %v7761_v17 = vmul.f32 %v17220_v47, %v16967_v6 }
 0x574   : > { %v2430_v37 = vpop.permute.xlu0 %2429 }
 0x575   : > { %13543 = vrcp.f32 %v7550_v31  ;;  %v7810_v23 = vpack.c.bf16 %v7762_v62, %v7761_v17  ;;  %v11817_v31 = vcombine.low %v1908_v9, %v1908_v9  ;;  %v19590_v17 = vld [vmem:[#allocation271_spill] sm:$0xff] }
 0x576   : > { %v2432_v15 = vpop.permute.xlu1 %2431 }
 0x577   : > { %v8505_v62 = vsel %vm6290_vm9, %v7810_v23, 0  ;;  %v19594_v23 = vld [vmem:[#allocation246_spill] sm:$0xff] }
 0x579   : > { %v13538_v61 = vpop.eup %13537 }
 0x57a   : > { %v2590_v50 = vpop.permute.xlu1 %2589  ;;  %v17537_v18 = vmul.f32 %v13538_v61, %v17279_v55  ;;  %v17543_v47 = vmul.f32 %v13538_v61, %v17268_v4  ;;  %v19589_v61 = vld [vmem:[#allocation138_spill] sm:$0xff] }
 0x57b   : > { %v13540_v0 = vpop.eup %13539  ;;  %v2667_v24 = vsel %vm2212_vm0, %v2430_v37, %v2590_v50  ;;  %v6727_v37 = vmax.f32 %v19590_v17, %v19589_v61  ;;  %v19591_v50 = vld [vmem:[#allocation178_spill] sm:$0xff] }
 0x57c   : > { %12714 = vmatmul.mubr.msk.bf16.vlgmr.msra.gmra.mrb[152].mxu0 %vm6290_vm9, %v2667_v24  ;;  %v17540_v6 = vmul.f32 %v13540_v0, %v17285_v52  ;;  %19584 = vst [vmem:[#allocation229_spill] sm:$0xff] %v17543_v47  ;;  %v17546_v46 = vmul.f32 %v13540_v0, %v17283_v34  ;;  %v11849_v34 = vcombine.low %v19585_v40, %v19585_v40  ;;  %v19592_v0 = vld [vmem:[#allocation289_spill] sm:$0xff]  ;;  %v19593_v24 = vld [vmem:[#allocation286_spill] sm:$0xff]  ;;  %v19598_v40 = vld [vmem:[#allocation272_spill] sm:$0xff] }
 0x57d   : > { %v13542_v14 = vpop.eup %13541  ;;  %12724 = vmatpush3.bf16.xpose.msra.mxu0 %v8460_v42  ;;  %12725 = vmatprep.mubr.msk.bf16.mxu0 %vm13678_vm13, %v19413_v7  ;;  %v6791_v9 = vsub.f32 %v19591_v50, %v6727_v37  ;;  %v6729_v42 = vmax.f32 %v19593_v24, %v19592_v0  ;;  %v19600_v17 = vld [vmem:[#allocation250_spill] sm:$0xff]  ;;  %v19607_v47 = vld [vmem:[#allocation156_spill] sm:$0xff] }
 0x57e   : > { %v2592_v32 = vpop.permute.xlu1 %2591  ;;  %12735 = vmatprep.subr.bf16.mxu0 %v19413_v7  ;;  %v17559_v60 = vmul.f32 %v13542_v14, %v17291_v13  ;;  %v17568_v41 = vmul.f32 %v13542_v14, %v17273_v59  ;;  %v19588_v59 = vld [vmem:[#allocation121_spill] sm:$0xff]  ;;  %v19603_v13 = vld [vmem:[#allocation254_spill] sm:$0xff] }
 0x57f   : > { %v13544_v3 = vpop.eup %13543  ;;  %v2670_v4 = vsel %vm2212_vm0, %v2432_v15, %v2592_v32  ;;  %v6793_v14 = vsub.f32 %v19594_v23, %v6729_v42  ;;  %v19596_v32 = vld [vmem:[#allocation287_spill] sm:$0xff]  ;;  %v6985_v55 = vsub.f32 %v19603_v13, %v6729_v42 }
 0x580   : > { %2439 = vrot.lane.b32.xlu1 %v11818_v54, %s13679_s12  ;;  %12720 = vmatmul.mubr.msk.bf16.vlgmr.msra.gmra.mrb[152].mxu1 %vm6290_vm9, %v2670_v4  ;;  %v17565_v1 = vmul.f32 %v13544_v3, %v17297_v12  ;;  %19586 = vst [vmem:[#allocation158_spill] sm:$0xff] %v17568_v41  ;;  %v17571_v15 = vmul.f32 %v13544_v3, %v17277_v57  ;;  %v6907_v54 = vmul.f32 1.442695, %v6791_v9  ;;  %v19597_v4 = vld [vmem:[#allocation288_spill] sm:$0xff]  ;;  %v19601_v12 = vld [vmem:[#allocation177_spill] sm:$0xff] }
 0x581   : > { %12730 = vmatpush3.bf16.xpose.msra.mxu1 %v8505_v62  ;;  %12731 = vmatprep.mubr.msk.bf16.mxu1 %vm13678_vm13, %v19413_v7  ;;  %v11850_v57 = vcombine.low %v19588_v59, %v19588_v59  ;;  %v6911_v62 = vmul.f32 1.442695, %v6793_v14  ;;  %v19599_v59 = vld [vmem:[#allocation249_spill] sm:$0xff]  ;;  %v7103_v14 = vmul.f32 1.442695, %v6985_v55 }
 0x582   : > { %19587 = vst [vmem:[#allocation276_spill] sm:$0xff] %v17571_v15  ;;  %12741 = vmatprep.subr.bf16.mxu1 %v19413_v7  ;;  %13545 = vpow2.f32 %v6907_v54  ;;  %v19602_v9 = vld [vmem:[#allocation253_spill] sm:$0xff] }
 0x583   : > { %2437 = vrot.lane.b32.xlu0 %v11817_v31, %s13679_s12  ;;  %v19595_v31 = vld [vmem:[#allocation290_spill] sm:$0xff]  ;;  %13547 = vpow2.f32 %v6911_v62 }
 0x584   : > { %2597 = vrot.lane.b32.xlu1 %v11849_v34, %s13680_s22  ;;  %v6730_v3 = vmax.f32 %v19596_v32, %v19595_v31  ;;  %v6728_v34 = vmax.f32 %v19598_v40, %v19597_v4  ;;  %v19604_v32 = vld [vmem:[#allocation256_spill] sm:$0xff] }
 0x586   : > { %v6794_v61 = vsub.f32 %v19599_v59, %v6730_v3  ;;  %v6792_v50 = vsub.f32 %v19601_v12, %v6728_v34  ;;  %v6984_v24 = vsub.f32 %v19602_v9, %v6728_v34  ;;  %v6986_v4 = vsub.f32 %v19604_v32, %v6730_v3 }
 0x588   : > { %2599 = vrot.lane.b32.xlu1 %v11850_v57, %s13680_s22  ;;  %v6983_v57 = vsub.f32 %v19600_v17, %v6727_v37  ;;  %v6913_v52 = vmul.f32 1.442695, %v6794_v61  ;;  %v6909_v23 = vmul.f32 1.442695, %v6792_v50  ;;  %v7101_v31 = vmul.f32 1.442695, %v6984_v24 }
 0x589   : > { %v7105_v40 = vmul.f32 1.442695, %v6986_v4 }
 0x58a   : > { %v7099_v0 = vmul.f32 1.442695, %v6983_v57  ;;  %13549 = vpow2.f32 %v6913_v52 }
 0x58c   : > { %v17600_v54 = vpop.eup %13545  ;;  %13551 = vpow2.f32 %v7099_v0 }
 0x58d   : > { %13553 = vpow2.f32 %v6909_v23  ;;  %v7279_v12 = vsel %vm6290_vm9, %v17600_v54, 0.0  ;;  %v17605_v37 = vpop.eup %13547 }
 0x58e   : > { %13555 = vpow2.f32 %v7101_v31  ;;  %v7285_v52 = vsel %vm6290_vm9, %v17605_v37, 0.0 }
 0x58f   : > { %13557 = vpow2.f32 %v7103_v14 }
 0x590   : > { %13559 = vpow2.f32 %v7105_v40 }
 0x594   : > { %v17609_v13 = vpop.eup %13549 }
 0x595   : > { %v7288_v3 = vsel %vm6290_vm9, %v17609_v13, 0.0 }
 0x596   : > { %v17611_v55 = vpop.eup %13551 }
 0x597   : > { %v17615_v62 = vpop.eup %13553  ;;  %v7471_v57 = vsel %vm6290_vm9, %v17611_v55, 0.0 }
 0x598   : > { %v17617_v59 = vpop.eup %13555  ;;  %v7282_v61 = vsel %vm6290_vm9, %v17615_v62, 0.0 }
 0x599   : > { %v17623_v50 = vpop.eup %13557  ;;  %v7474_v9 = vsel %vm6290_vm9, %v17617_v59, 0.0 }
 0x59a   : > { %v7477_v23 = vsel %vm6290_vm9, %v17623_v50, 0.0  ;;  %v17629_v31 = vpop.eup %13559 }
 0x59b   : > { %v7480_v4 = vsel %vm6290_vm9, %v17629_v31, 0.0 }
 0x5a2   : > { %7280 = vadd.xlane.f32.xlu0 %v7279_v12 }
 0x5a5   : > { %v7257_v34 = vpop.xlane.xlu0 %7256 }
 0x5a6   : > { %7286 = vadd.xlane.f32.xlu0 %v7285_v52 }
 0x5a9   : > { %v7263_v42 = vpop.xlane.xlu0 %7262 }
 0x5aa   : > { %7289 = vadd.xlane.f32.xlu0 %v7288_v3 }
 0x5ac   : > { %7283 = vadd.xlane.f32.xlu1 %v7282_v61 }
 0x5ad   : > { %v7266_v17 = vpop.xlane.xlu0 %7265 }
 0x5ae   : > { %7472 = vadd.xlane.f32.xlu0 %v7471_v57  ;;  %v19605_v57 = vld [vmem:[#allocation182_spill] sm:$0xff] }
 0x5af   : > { %v7260_v0 = vpop.xlane.xlu1 %7259  ;;  %v7764_v41 = vmul.f32 %v17315_v11, %v19605_v57 }
 0x5b0   : > { %7475 = vadd.xlane.f32.xlu1 %v7474_v9  ;;  %v19606_v9 = vld [vmem:[#allocation224_spill] sm:$0xff] }
 0x5b1   : > { %v7449_v24 = vpop.xlane.xlu0 %7448 }
 0x5b2   : > { %v7551_v14 = vadd.f32 %v7449_v24, %v7257_v34  ;;  %7478 = vadd.xlane.f32.xlu0 %v7477_v23  ;;  %v7763_v34 = vmul.f32 %v17307_v39, %v19606_v9  ;;  %v1879_v24 = vld [vmem:[#allocation5 + $0x4c] sm:$0xf] }
 0x5b3   : > { %v7452_v32 = vpop.xlane.xlu1 %7451 }
 0x5b4   : > { %13561 = vrcp.f32 %v7551_v14  ;;  %v7552_v40 = vadd.f32 %v7452_v32, %v7260_v0  ;;  %7481 = vadd.xlane.f32.xlu1 %v7480_v4  ;;  %v7811_v15 = vpack.c.bf16 %v7764_v41, %v7763_v34  ;;  %v7766_v14 = vmul.f32 %v17335_v27, %v19607_v47  ;;  %v1878_v0 = vld [vmem:[#allocation5 + $0x48] sm:$0xf] }
 0x5b5   : > { %v7455_v12 = vpop.xlane.xlu0 %7454  ;;  %v19608_v4 = vld [vmem:[#allocation219_spill] sm:$0xff] }
 0x5b6   : > { %v7553_v52 = vadd.f32 %v7455_v12, %v7263_v42  ;;  %13563 = vrcp.f32 %v7552_v40  ;;  %v1911_v42 = vsel %vm14613_vm14, %v1879_v24, 0  ;;  %v1910_v40 = vsel %vm14613_vm14, %v1878_v0, 0 }
 0x5b7   : > { %v7458_v3 = vpop.xlane.xlu1 %7457  ;;  %v8550_v41 = vsel %vm6290_vm9, %v7811_v15, 0  ;;  %v11819_v34 = vcombine.low %v1910_v40, %v1910_v40  ;;  %v19616_v40 = vld [vmem:[#allocation257_spill] sm:$0xff] }
 0x5b8   : > { %13565 = vrcp.f32 %v7553_v52  ;;  %v7554_v61 = vadd.f32 %v7458_v3, %v7266_v17  ;;  %v7765_v17 = vmul.f32 %v17328_v44, %v19608_v4  ;;  %v11820_v3 = vcombine.low %v1911_v42, %v1911_v42 }
 0x5b9   : > { %v2434_v12 = vpop.permute.xlu0 %2433 }
 0x5ba   : > { %13567 = vrcp.f32 %v7554_v61  ;;  %v7812_v27 = vpack.c.bf16 %v7766_v14, %v7765_v17  ;;  %v19610_v14 = vld [vmem:[#allocation122_spill] sm:$0xff]  ;;  %v19614_v17 = vld [vmem:[#allocation147_spill] sm:$0xff] }
 0x5bb   : > { %v2436_v23 = vpop.permute.xlu1 %2435 }
 0x5bc   : > { %v8595_v42 = vsel %vm6290_vm9, %v7812_v27, 0 }
 0x5be   : > { %v13562_v32 = vpop.eup %13561 }
 0x5bf   : > { %v2594_v11 = vpop.permute.xlu1 %2593  ;;  %v17649_v61 = vmul.f32 %v13562_v32, %v17387_v8  ;;  %v17655_v57 = vmul.f32 %v13562_v32, %v17376_v45  ;;  %v19628_v8 = vld [vmem:[#allocation267_spill] sm:$0xff] }
 0x5c0   : > { %v13564_v39 = vpop.eup %13563  ;;  %v2673_v52 = vsel %vm2212_vm0, %v2434_v12, %v2594_v11  ;;  %v19615_v12 = vld [vmem:[#allocation205_spill] sm:$0xff] }
 0x5c1   : > { %12726 = vmatmul.mubr.msk.bf16.vlgmr.msra.gmra.mrb[156].mxu0 %vm6290_vm9, %v2673_v52  ;;  %v17652_v44 = vmul.f32 %v13564_v39, %v17393_v28  ;;  %19609 = vst [vmem:[#allocation234_spill] sm:$0xff] %v17655_v57  ;;  %v17658_v9 = vmul.f32 %v13564_v39, %v17391_v5  ;;  %v11851_v5 = vcombine.low %v19610_v14, %v19610_v14  ;;  %v19617_v52 = vld [vmem:[#allocation203_spill] sm:$0xff]  ;;  %v19622_v14 = vld [vmem:[#allocation208_spill] sm:$0xff] }
 0x5c2   : > { %v13566_v47 = vpop.eup %13565  ;;  %12736 = vmatpush3.bf16.xpose.msra.mxu0 %v8550_v41  ;;  %12737 = vmatprep.mubr.msk.bf16.mxu0 %vm13678_vm13, %v19413_v7  ;;  %v6731_v11 = vmax.f32 %v19615_v12, %v19614_v17  ;;  %v19618_v41 = vld [vmem:[#allocation146_spill] sm:$0xff]  ;;  %v19625_v12 = vld [vmem:[#allocation263_spill] sm:$0xff]  ;;  %v1880_v57 = vld [vmem:[#allocation5 + $0x50] sm:$0xf] }
 0x5c3   : > { %v2596_v15 = vpop.permute.xlu1 %2595  ;;  %12747 = vmatprep.subr.bf16.mxu0 %v19413_v7  ;;  %v17671_v0 = vmul.f32 %v13566_v47, %v17399_v16  ;;  %v17680_v4 = vmul.f32 %v13566_v47, %v17381_v2  ;;  %v19613_v2 = vld [vmem:[#allocation123_spill] sm:$0xff]  ;;  %v19619_v47 = vld [vmem:[#allocation260_spill] sm:$0xff] }
 0x5c4   : > { %v13568_v24 = vpop.eup %13567  ;;  %v2676_v45 = vsel %vm2212_vm0, %v2436_v23, %v2596_v15  ;;  %v6795_v39 = vsub.f32 %v19616_v40, %v6731_v11  ;;  %v19620_v15 = vld [vmem:[#allocation148_spill] sm:$0xff]  ;;  %v19626_v28 = vld [vmem:[#allocation259_spill] sm:$0xff] }
 0x5c5   : > { %2443 = vrot.lane.b32.xlu1 %v11820_v3, %s13679_s12  ;;  %12732 = vmatmul.mubr.msk.bf16.vlgmr.msra.gmra.mrb[156].mxu1 %vm6290_vm9, %v2676_v45  ;;  %v17677_v32 = vmul.f32 %v13568_v24, %v17405_v10  ;;  %19611 = vst [vmem:[#allocation159_spill] sm:$0xff] %v17680_v4  ;;  %v17683_v23 = vmul.f32 %v13568_v24, %v17385_v56  ;;  %v19621_v24 = vld [vmem:[#allocation210_spill] sm:$0xff] }
 0x5c6   : > { %12742 = vmatpush3.bf16.xpose.msra.mxu1 %v8595_v42  ;;  %12743 = vmatprep.mubr.msk.bf16.mxu1 %vm13678_vm13, %v19413_v7  ;;  %v11852_v56 = vcombine.low %v19613_v2, %v19613_v2  ;;  %v6733_v3 = vmax.f32 %v19618_v41, %v19617_v52  ;;  %v6915_v27 = vmul.f32 1.442695, %v6795_v39  ;;  %v6734_v45 = vmax.f32 %v19621_v24, %v19620_v15  ;;  %v19624_v10 = vld [vmem:[#allocation262_spill] sm:$0xff]  ;;  %v19627_v39 = vld [vmem:[#allocation265_spill] sm:$0xff] }
 0x5c7   : > { %19612 = vst [vmem:[#allocation277_spill] sm:$0xff] %v17683_v23  ;;  %12753 = vmatprep.subr.bf16.mxu1 %v19413_v7 }
 0x5c8   : > { %2441 = vrot.lane.b32.xlu0 %v11819_v34, %s13679_s12  ;;  %v6797_v34 = vsub.f32 %v19619_v47, %v6733_v3  ;;  %13569 = vpow2.f32 %v6915_v27  ;;  %v6798_v17 = vsub.f32 %v19624_v10, %v6734_v45  ;;  %v6989_v4 = vsub.f32 %v19628_v8, %v6733_v3  ;;  %v19629_v10 = vld [vmem:[#allocation268_spill] sm:$0xff] }
 0x5c9   : > { %2601 = vrot.lane.b32.xlu1 %v11851_v5, %s13680_s22  ;;  %v19623_v5 = vld [vmem:[#allocation291_spill] sm:$0xff]  ;;  %v6990_v24 = vsub.f32 %v19629_v10, %v6734_v45 }
 0x5ca   : > { %v6732_v42 = vmax.f32 %v19623_v5, %v19622_v14  ;;  %v6919_v2 = vmul.f32 1.442695, %v6797_v34  ;;  %v6921_v16 = vmul.f32 1.442695, %v6798_v17  ;;  %v7111_v34 = vmul.f32 1.442695, %v6989_v4 }
 0x5cb   : > { %v7113_v14 = vmul.f32 1.442695, %v6990_v24 }
 0x5cc   : > { %v6796_v40 = vsub.f32 %v19626_v28, %v6732_v42  ;;  %13571 = vpow2.f32 %v6919_v2  ;;  %v6988_v41 = vsub.f32 %v19627_v39, %v6732_v42 }
 0x5cd   : > { %2603 = vrot.lane.b32.xlu1 %v11852_v56, %s13680_s22  ;;  %v6987_v56 = vsub.f32 %v19625_v12, %v6731_v11  ;;  %13573 = vpow2.f32 %v6921_v16 }
 0x5ce   : > { %v6917_v47 = vmul.f32 1.442695, %v6796_v40  ;;  %v7109_v15 = vmul.f32 1.442695, %v6988_v41 }
 0x5cf   : > { %v7107_v52 = vmul.f32 1.442695, %v6987_v56 }
 0x5d1   : > { %13575 = vpow2.f32 %v7107_v52 }
 0x5d2   : > { %v17712_v27 = vpop.eup %13569  ;;  %13577 = vpow2.f32 %v6917_v47 }
 0x5d3   : > { %v7291_v28 = vsel %vm6290_vm9, %v17712_v27, 0.0  ;;  %13579 = vpow2.f32 %v7109_v15 }
 0x5d4   : > { %13581 = vpow2.f32 %v7111_v34 }
 0x5d5   : > { %13583 = vpow2.f32 %v7113_v14 }
 0x5d6   : > { %v17717_v11 = vpop.eup %13571 }
 0x5d7   : > { %v7297_v8 = vsel %vm6290_vm9, %v17717_v11, 0.0  ;;  %v17721_v16 = vpop.eup %13573 }
 0x5d8   : > { %v7300_v45 = vsel %vm6290_vm9, %v17721_v16, 0.0 }
 0x5db   : > { %v17723_v4 = vpop.eup %13575 }
 0x5dc   : > { %v17727_v42 = vpop.eup %13577  ;;  %v7483_v56 = vsel %vm6290_vm9, %v17723_v4, 0.0 }
 0x5dd   : > { %v17729_v2 = vpop.eup %13579  ;;  %v7294_v17 = vsel %vm6290_vm9, %v17727_v42, 0.0 }
 0x5de   : > { %v17735_v40 = vpop.eup %13581  ;;  %v7486_v39 = vsel %vm6290_vm9, %v17729_v2, 0.0 }
 0x5df   : > { %v7489_v47 = vsel %vm6290_vm9, %v17735_v40, 0.0  ;;  %v17741_v15 = vpop.eup %13583 }
 0x5e0   : > { %v7492_v24 = vsel %vm6290_vm9, %v17741_v15, 0.0 }
 0x5e7   : > { %7292 = vadd.xlane.f32.xlu0 %v7291_v28 }
 0x5ea   : > { %v7269_v5 = vpop.xlane.xlu0 %7268 }
 0x5eb   : > { %7298 = vadd.xlane.f32.xlu0 %v7297_v8 }
 0x5ee   : > { %v7275_v3 = vpop.xlane.xlu0 %7274 }
 0x5ef   : > { %7301 = vadd.xlane.f32.xlu0 %v7300_v45 }
 0x5f1   : > { %7295 = vadd.xlane.f32.xlu1 %v7294_v17 }
 0x5f2   : > { %v7278_v12 = vpop.xlane.xlu0 %7277 }
 0x5f3   : > { %7484 = vadd.xlane.f32.xlu0 %v7483_v56  ;;  %v1881_v56 = vld [vmem:[#allocation5 + $0x54] sm:$0xf] }
 0x5f4   : > { %v7272_v52 = vpop.xlane.xlu1 %7271 }
 0x5f5   : > { %7487 = vadd.xlane.f32.xlu1 %v7486_v39 }
 0x5f6   : > { %v7461_v41 = vpop.xlane.xlu0 %7460 }
 0x5f7   : > { %v7555_v34 = vadd.f32 %v7461_v41, %v7269_v5  ;;  %7490 = vadd.xlane.f32.xlu0 %v7489_v47  ;;  %v1913_v5 = vsel %vm14613_vm14, %v1881_v56, 0  ;;  %v19633_v56 = vld [vmem:[#allocation124_spill] sm:$0xff] }
 0x5f8   : > { %v7464_v10 = vpop.xlane.xlu1 %7463 }
 0x5f9   : > { %13585 = vrcp.f32 %v7555_v34  ;;  %v7556_v14 = vadd.f32 %v7464_v10, %v7272_v52  ;;  %7493 = vadd.xlane.f32.xlu1 %v7492_v24  ;;  %v1912_v34 = vsel %vm14613_vm14, %v1880_v57, 0  ;;  %v19630_v10 = vpack.c.bf16 %v17428_v29, %v17425_v53 }
 0x5fa   : > { %v7467_v28 = vpop.xlane.xlu0 %7466  ;;  %v11822_v24 = vcombine.low %v1913_v5, %v1913_v5  ;;  %v11821_v53 = vcombine.low %v1912_v34, %v1912_v34 }
 0x5fb   : > { %v7557_v8 = vadd.f32 %v7467_v28, %v7275_v3  ;;  %13587 = vrcp.f32 %v7556_v14 }
 0x5fc   : > { %v7470_v45 = vpop.xlane.xlu1 %7469 }
 0x5fd   : > { %13589 = vrcp.f32 %v7557_v8  ;;  %v7558_v17 = vadd.f32 %v7470_v45, %v7278_v12  ;;  %v8640_v12 = vsel %vm6290_vm9, %v19630_v10, 0 }
 0x5fe   : > { %v2438_v41 = vpop.permute.xlu0 %2437 }
 0x5ff   : > { %13591 = vrcp.f32 %v7558_v17 }
 0x600   : > { %v2440_v23 = vpop.permute.xlu1 %2439 }
 0x603   : > { %v13586_v39 = vpop.eup %13585 }
 0x604   : > { %v2598_v47 = vpop.permute.xlu1 %2597  ;;  %v17756_v14 = vmul.f32 %v13586_v39, %v17499_v36  ;;  %v17762_v57 = vmul.f32 %v13586_v39, %v17488_v35  ;;  %v19634_v39 = vpack.c.bf16 %v17453_v49, %v17447_v20  ;;  %v19650_v20 = vld [vmem:[#allocation200_spill] sm:$0xff] }
 0x605   : > { %v13588_v52 = vpop.eup %13587  ;;  %v2679_v3 = vsel %vm2212_vm0, %v2438_v41, %v2598_v47 }
 0x606   : > { %12738 = vmatmul.mubr.msk.bf16.vlgmr.msra.gmra.mrb[160].mxu0 %vm6290_vm9, %v2679_v3  ;;  %v17759_v8 = vmul.f32 %v13588_v52, %v17505_v63  ;;  %19631 = vst [vmem:[#allocation232_spill] sm:$0xff] %v17762_v57  ;;  %v17765_v45 = vmul.f32 %v13588_v52, %v17503_v48  ;;  %v11853_v48 = vcombine.low %v19633_v56, %v19633_v56  ;;  %v8685_v41 = vsel %vm6290_vm9, %v19634_v39, 0  ;;  %v19640_v3 = vld [vmem:[#allocation179_spill] sm:$0xff]  ;;  %v19645_v56 = vld [vmem:[#allocation196_spill] sm:$0xff] }
 0x607   : > { %v13590_v28 = vpop.eup %13589  ;;  %12748 = vmatpush3.bf16.xpose.msra.mxu0 %v8640_v12  ;;  %12749 = vmatprep.mubr.msk.bf16.mxu0 %vm13678_vm13, %v19413_v7  ;;  %v19641_v12 = vld [vmem:[#allocation296_spill] sm:$0xff]  ;;  %v19648_v63 = vld [vmem:[#allocation183_spill] sm:$0xff] }
 0x608   : > { %19632 = vst [vmem:[#allocation275_spill] sm:$0xff] %v17765_v45  ;;  %v2600_v29 = vpop.permute.xlu1 %2599  ;;  %12759 = vmatprep.subr.bf16.mxu0 %v19413_v7  ;;  %v17778_v5 = vmul.f32 %v13590_v28, %v17511_v30  ;;  %v19638_v30 = vld [vmem:[#allocation199_spill] sm:$0xff]  ;;  %v1882_v45 = vld [vmem:[#allocation5 + $0x58] sm:$0xf] }
 0x609   : > { %v13592_v17 = vpop.eup %13591  ;;  %v2682_v35 = vsel %vm2212_vm0, %v2440_v23, %v2600_v29  ;;  %v17790_v23 = vmul.f32 %v13590_v28, %v17493_v33  ;;  %v19637_v33 = vld [vmem:[#allocation125_spill] sm:$0xff]  ;;  %v19643_v29 = vld [vmem:[#allocation180_spill] sm:$0xff] }
 0x60a   : > { %2447 = vrot.lane.b32.xlu1 %v11822_v24, %s13679_s12  ;;  %12744 = vmatmul.mubr.msk.bf16.vlgmr.msra.gmra.mrb[160].mxu1 %vm6290_vm9, %v2682_v35  ;;  %v17787_v47 = vmul.f32 %v13592_v17, %v17517_v58  ;;  %v17793_v34 = vmul.f32 %v13592_v17, %v17497_v22  ;;  %v11854_v22 = vcombine.low %v19637_v33, %v19637_v33  ;;  %v19639_v58 = vld [vmem:[#allocation152_spill] sm:$0xff]  ;;  %v19642_v24 = vld [vmem:[#allocation191_spill] sm:$0xff] }
 0x60b   : > { %19635 = vst [vmem:[#allocation227_spill] sm:$0xff] %v17790_v23  ;;  %12754 = vmatpush3.bf16.xpose.msra.mxu1 %v8685_v41  ;;  %12755 = vmatprep.mubr.msk.bf16.mxu1 %vm13678_vm13, %v19413_v7  ;;  %v6735_v52 = vmax.f32 %v19639_v58, %v19638_v30  ;;  %v6737_v28 = vmax.f32 %v19642_v24, %v19641_v12  ;;  %v19644_v35 = vld [vmem:[#allocation299_spill] sm:$0xff]  ;;  %v19649_v58 = vld [vmem:[#allocation144_spill] sm:$0xff]  ;;  %v19652_v23 = vld [vmem:[#allocation185_spill] sm:$0xff] }
 0x60c   : > { %19636 = vst [vmem:[#allocation160_spill] sm:$0xff] %v17793_v34  ;;  %12765 = vmatprep.subr.bf16.mxu1 %v19413_v7  ;;  %v6738_v39 = vmax.f32 %v19645_v56, %v19644_v35  ;;  %v19647_v41 = vld [vmem:[#allocation211_spill] sm:$0xff] }
 0x60d   : > { %2445 = vrot.lane.b32.xlu0 %v11821_v53, %s13679_s12  ;;  %v6799_v10 = vsub.f32 %v19640_v3, %v6735_v52  ;;  %v6801_v17 = vsub.f32 %v19643_v29, %v6737_v28  ;;  %v6993_v34 = vsub.f32 %v19652_v23, %v6737_v28 }
 0x60e   : > { %2605 = vrot.lane.b32.xlu1 %v11853_v48, %s13680_s22  ;;  %v19646_v48 = vld [vmem:[#allocation295_spill] sm:$0xff]  ;;  %v6802_v30 = vsub.f32 %v19648_v63, %v6738_v39  ;;  %v19653_v63 = vld [vmem:[#allocation188_spill] sm:$0xff] }
 0x60f   : > { %v6923_v53 = vmul.f32 1.442695, %v6799_v10  ;;  %v6736_v33 = vmax.f32 %v19647_v41, %v19646_v48  ;;  %v6927_v49 = vmul.f32 1.442695, %v6801_v17  ;;  %v19651_v10 = vld [vmem:[#allocation136_spill] sm:$0xff]  ;;  %v6994_v56 = vsub.f32 %v19653_v63, %v6738_v39 }
 0x610   : > { %v6929_v36 = vmul.f32 1.442695, %v6802_v30  ;;  %v7119_v17 = vmul.f32 1.442695, %v6993_v34 }
 0x611   : > { %13593 = vpow2.f32 %v6923_v53  ;;  %v6800_v3 = vsub.f32 %v19650_v20, %v6736_v33  ;;  %v6992_v24 = vsub.f32 %v19651_v10, %v6736_v33 }
 0x612   : > { %2607 = vrot.lane.b32.xlu1 %v11854_v22, %s13680_s22  ;;  %v6991_v22 = vsub.f32 %v19649_v58, %v6735_v52  ;;  %13595 = vpow2.f32 %v6927_v49  ;;  %v7121_v52 = vmul.f32 1.442695, %v6994_v56 }
 0x613   : > { %v6925_v29 = vmul.f32 1.442695, %v6800_v3  ;;  %13597 = vpow2.f32 %v6929_v36  ;;  %v7117_v35 = vmul.f32 1.442695, %v6992_v24 }
 0x614   : > { %v7115_v12 = vmul.f32 1.442695, %v6991_v22 }
 0x616   : > { %13599 = vpow2.f32 %v7115_v12 }
 0x617   : > { %13601 = vpow2.f32 %v6925_v29 }
 0x618   : > { %13603 = vpow2.f32 %v7117_v35 }
 0x619   : > { %13605 = vpow2.f32 %v7119_v17 }
 0x61a   : > { %13607 = vpow2.f32 %v7121_v52 }
 0x61b   : > { %v17822_v53 = vpop.eup %13593 }
 0x61c   : > { %v7303_v20 = vsel %vm6290_vm9, %v17822_v53, 0.0  ;;  %v17827_v49 = vpop.eup %13595 }
 0x61d   : > { %v7309_v36 = vsel %vm6290_vm9, %v17827_v49, 0.0  ;;  %v17831_v23 = vpop.eup %13597 }
 0x61e   : > { %v7312_v39 = vsel %vm6290_vm9, %v17831_v23, 0.0 }
 0x620   : > { %v17833_v34 = vpop.eup %13599 }
 0x621   : > { %v17837_v41 = vpop.eup %13601  ;;  %v7495_v22 = vsel %vm6290_vm9, %v17833_v34, 0.0 }
 0x622   : > { %v17839_v33 = vpop.eup %13603  ;;  %v7306_v30 = vsel %vm6290_vm9, %v17837_v41, 0.0 }
 0x623   : > { %v17845_v3 = vpop.eup %13605  ;;  %v7498_v10 = vsel %vm6290_vm9, %v17839_v33, 0.0 }
 0x624   : > { %v7501_v29 = vsel %vm6290_vm9, %v17845_v3, 0.0  ;;  %v17851_v35 = vpop.eup %13607 }
 0x625   : > { %v7504_v56 = vsel %vm6290_vm9, %v17851_v35, 0.0 }
 0x62c   : > { %7304 = vadd.xlane.f32.xlu0 %v7303_v20 }
 0x62f   : > { %v7281_v48 = vpop.xlane.xlu0 %7280 }
 0x630   : > { %7310 = vadd.xlane.f32.xlu0 %v7309_v36 }
 0x633   : > { %v7287_v28 = vpop.xlane.xlu0 %7286 }
 0x634   : > { %7313 = vadd.xlane.f32.xlu0 %v7312_v39 }
 0x636   : > { %7307 = vadd.xlane.f32.xlu1 %v7306_v30 }
 0x637   : > { %v7290_v58 = vpop.xlane.xlu0 %7289 }
 0x638   : > { %7496 = vadd.xlane.f32.xlu0 %v7495_v22  ;;  %v1883_v22 = vld [vmem:[#allocation5 + $0x5c] sm:$0xf] }
 0x639   : > { %v7284_v12 = vpop.xlane.xlu1 %7283 }
 0x63a   : > { %7499 = vadd.xlane.f32.xlu1 %v7498_v10 }
 0x63b   : > { %v7473_v24 = vpop.xlane.xlu0 %7472 }
 0x63c   : > { %v7559_v17 = vadd.f32 %v7473_v24, %v7281_v48  ;;  %7502 = vadd.xlane.f32.xlu0 %v7501_v29  ;;  %v1915_v48 = vsel %vm14613_vm14, %v1883_v22, 0 }
 0x63d   : > { %v7476_v63 = vpop.xlane.xlu1 %7475 }
 0x63e   : > { %13609 = vrcp.f32 %v7559_v17  ;;  %v7560_v52 = vadd.f32 %v7476_v63, %v7284_v12  ;;  %7505 = vadd.xlane.f32.xlu1 %v7504_v56  ;;  %v1914_v17 = vsel %vm14613_vm14, %v1882_v45, 0  ;;  %v19654_v63 = vpack.c.bf16 %v17540_v6, %v17537_v18 }
 0x63f   : > { %v7479_v20 = vpop.xlane.xlu0 %7478  ;;  %v11824_v56 = vcombine.low %v1915_v48, %v1915_v48  ;;  %v11823_v18 = vcombine.low %v1914_v17, %v1914_v17  ;;  %v19655_v48 = vld [vmem:[#allocation126_spill] sm:$0xff] }
 0x640   : > { %v7561_v36 = vadd.f32 %v7479_v20, %v7287_v28  ;;  %13611 = vrcp.f32 %v7560_v52  ;;  %v1884_v20 = vld [vmem:[#allocation5 + $0x60] sm:$0xf] }
 0x641   : > { %v7482_v39 = vpop.xlane.xlu1 %7481  ;;  %v1916_v22 = vsel %vm14613_vm14, %v1884_v20, 0 }
 0x642   : > { %13613 = vrcp.f32 %v7561_v36  ;;  %v7562_v30 = vadd.f32 %v7482_v39, %v7290_v58  ;;  %v8730_v58 = vsel %vm6290_vm9, %v19654_v63, 0  ;;  %v1885_v63 = vld [vmem:[#allocation5 + $0x64] sm:$0xf] }
 0x643   : > { %v2442_v24 = vpop.permute.xlu0 %2441 }
 0x644   : > { %13615 = vrcp.f32 %v7562_v30 }
 0x645   : > { %v2444_v57 = vpop.permute.xlu1 %2443 }
 0x648   : > { %v13610_v10 = vpop.eup %13609 }
 0x649   : > { %v2602_v29 = vpop.permute.xlu1 %2601  ;;  %v17866_v36 = vmul.f32 %v13610_v10, %v17611_v55  ;;  %v17872_v45 = vmul.f32 %v13610_v10, %v17600_v54  ;;  %v11855_v10 = vcombine.low %v19655_v48, %v19655_v48 }
 0x64a   : > { %v13612_v12 = vpop.eup %13611  ;;  %v2685_v28 = vsel %vm2212_vm0, %v2442_v24, %v2602_v29  ;;  %v19656_v29 = vpack.c.bf16 %v17565_v1, %v17559_v60 }
 0x64b   : > { %12750 = vmatmul.mubr.msk.bf16.vlgmr.msra.gmra.mrb[164].mxu0 %vm6290_vm9, %v2685_v28  ;;  %v17869_v39 = vmul.f32 %v13612_v12, %v17617_v59  ;;  %v17875_v30 = vmul.f32 %v13612_v12, %v17615_v62 }
 0x64c   : > { %v13614_v52 = vpop.eup %13613  ;;  %12760 = vmatpush3.bf16.xpose.msra.mxu0 %v8730_v58  ;;  %12761 = vmatprep.mubr.msk.bf16.mxu0 %vm13678_vm13, %v19413_v7  ;;  %v8775_v17 = vsel %vm6290_vm9, %v19656_v29, 0  ;;  %v1917_v58 = vsel %vm14613_vm14, %v1885_v63, 0  ;;  %v19660_v29 = vld [vmem:[#allocation130_spill] sm:$0xff] }
 0x64d   : > { %v2604_v6 = vpop.permute.xlu1 %2603  ;;  %12771 = vmatprep.subr.bf16.mxu0 %v19413_v7  ;;  %v7821_v55 = vpack.c.bf16 %v17869_v39, %v17866_v36  ;;  %v7725_v54 = vpack.c.bf16 %v17875_v30, %v17872_v45  ;;  %v17890_v24 = vmul.f32 %v13614_v52, %v17623_v50  ;;  %v11825_v50 = vcombine.low %v1916_v22, %v1916_v22  ;;  %v1887_v22 = vld [vmem:[#allocation5 + $0x6c] sm:$0xf]  ;;  %v19766_v45 = vld [vmem:[#allocation98_spill] sm:$0xff] }
 0x64e   : > { %v13616_v59 = vpop.eup %13615  ;;  %v2688_v62 = vsel %vm2212_vm0, %v2444_v57, %v2604_v6  ;;  %v17902_v57 = vmul.f32 %v13614_v52, %v17605_v37  ;;  %v1886_v37 = vld [vmem:[#allocation5 + $0x68] sm:$0xf] }
 0x64f   : > { %12756 = vmatmul.mubr.msk.bf16.vlgmr.msra.gmra.mrb[164].mxu1 %vm6290_vm9, %v2688_v62  ;;  %2451 = vrot.lane.b32.xlu1 %v11824_v56, %s13679_s12  ;;  %v17899_v12 = vmul.f32 %v13616_v59, %v17629_v31  ;;  %v17905_v28 = vmul.f32 %v13616_v59, %v17609_v13  ;;  %v19657_v13 = vld [vmem:[#allocation127_spill] sm:$0xff]  ;;  %v19658_v56 = vld [vmem:[#allocation128_spill] sm:$0xff]  ;;  %v1918_v52 = vsel %vm14613_vm14, %v1886_v37, 0  ;;  %v19659_v62 = vld [vmem:[#allocation129_spill] sm:$0xff] }
 0x650   : > { %12766 = vmatpush3.bf16.xpose.msra.mxu1 %v8775_v17  ;;  %12767 = vmatprep.mubr.msk.bf16.mxu1 %vm13678_vm13, %v19413_v7  ;;  %v11856_v31 = vcombine.low %v19657_v13, %v19657_v13  ;;  %v11857_v20 = vcombine.low %v19658_v56, %v19658_v56  ;;  %v11827_v6 = vcombine.low %v1918_v52, %v1918_v52  ;;  %v1888_v59 = vld [vmem:[#allocation5 + $0x70] sm:$0xf]  ;;  %v1889_v13 = vld [vmem:[#allocation5 + $0x74] sm:$0xf] }
 0x651   : > { %12777 = vmatprep.subr.bf16.mxu1 %v19413_v7  ;;  %v7822_v60 = vpack.c.bf16 %v17899_v12, %v17890_v24  ;;  %v7726_v1 = vpack.c.bf16 %v17905_v28, %v17902_v57  ;;  %v11858_v48 = vcombine.low %v19659_v62, %v19659_v62  ;;  %v11859_v17 = vcombine.low %v19660_v29, %v19660_v29  ;;  %v19662_v52 = vld [vmem:[#allocation132_spill] sm:$0xff]  ;;  %v1891_v62 = vld [vmem:[#allocation5 + $0x7c] sm:$0xf] }
 0x652   : > { %2449 = vrot.lane.b32.xlu0 %v11823_v18, %s13679_s12  ;;  %v11826_v18 = vcombine.low %v1917_v58, %v1917_v58  ;;  %v19661_v58 = vld [vmem:[#allocation131_spill] sm:$0xff]  ;;  %v1923_v29 = vsel %vm14613_vm14, %v1891_v62, 0 }
 0x653   : > { %2609 = vrot.lane.b32.xlu1 %v11855_v10, %s13680_s22  ;;  %v1919_v10 = vsel %vm14613_vm14, %v1887_v22, 0  ;;  %v11860_v56 = vcombine.low %v19661_v58, %v19661_v58 }
 0x654   : > { %v11828_v63 = vcombine.low %v1919_v10, %v1919_v10 }
 0x656   : > { %2453 = vrot.lane.b32.xlu0 %v11825_v50, %s13679_s12  ;;  %v1920_v50 = vsel %vm14613_vm14, %v1888_v59, 0 }
 0x657   : > { %2611 = vrot.lane.b32.xlu1 %v11856_v31, %s13680_s22  ;;  %v11829_v37 = vcombine.low %v1920_v50, %v1920_v50  ;;  %v1890_v31 = vld [vmem:[#allocation5 + $0x78] sm:$0xf] }
 0x65a   : > { %2613 = vrot.lane.b32.xlu0 %v11857_v20, %s13680_s22  ;;  %v1921_v20 = vsel %vm14613_vm14, %v1889_v13, 0  ;;  %v19665_v13 = vld [vmem:[#allocation135_spill] sm:$0xff] }
 0x65b   : > { %2455 = vrot.lane.b32.xlu1 %v11826_v18, %s13679_s12  ;;  %v11861_v18 = vcombine.low %v19662_v52, %v19662_v52  ;;  %v11830_v22 = vcombine.low %v1921_v20, %v1921_v20 }
 0x65e   : > { %2457 = vrot.lane.b32.xlu0 %v11827_v6, %s13679_s12  ;;  %v1922_v6 = vsel %vm14613_vm14, %v1890_v31, 0  ;;  %v11864_v31 = vcombine.low %v19665_v13, %v19665_v13 }
 0x65f   : > { %2615 = vrot.lane.b32.xlu1 %v11858_v48, %s13680_s22  ;;  %v11831_v59 = vcombine.low %v1922_v6, %v1922_v6  ;;  %v19663_v48 = vld [vmem:[#allocation133_spill] sm:$0xff] }
 0x660   : > { %v11862_v10 = vcombine.low %v19663_v48, %v19663_v48 }
 0x662   : > { %2617 = vrot.lane.b32.xlu0 %v11859_v17, %s13680_s22  ;;  %v19664_v17 = vld [vmem:[#allocation134_spill] sm:$0xff] }
 0x663   : > { %2459 = vrot.lane.b32.xlu1 %v11828_v63, %s13679_s12  ;;  %v11863_v50 = vcombine.low %v19664_v17, %v19664_v17  ;;  %v11832_v63 = vcombine.low %v1923_v29, %v1923_v29 }
 0x666   : > { %2461 = vrot.lane.b32.xlu0 %v11829_v37, %s13679_s12 }
 0x667   : > { %2619 = vrot.lane.b32.xlu1 %v11860_v56, %s13680_s22 }
 0x66a   : > { %2621 = vrot.lane.b32.xlu0 %v11861_v18, %s13680_s22 }
 0x66b   : > { %2463 = vrot.lane.b32.xlu1 %v11830_v22, %s13679_s12 }
 0x66e   : > { %2465 = vrot.lane.b32.xlu0 %v11831_v59, %s13679_s12 }
 0x66f   : > { %2623 = vrot.lane.b32.xlu1 %v11862_v10, %s13680_s22 }
 0x672   : > { %2625 = vrot.lane.b32.xlu0 %v11863_v50, %s13680_s22 }
 0x673   : > { %2467 = vrot.lane.b32.xlu1 %v11832_v63, %s13679_s12 }
 0x674   : > { %v7293_v37 = vpop.xlane.xlu0 %7292 }
 0x677   : > { %2627 = vrot.lane.b32.xlu1 %v11864_v31, %s13680_s22 }
 0x678   : > { %v7299_v58 = vpop.xlane.xlu0 %7298 }
 0x67c   : > { %v7302_v56 = vpop.xlane.xlu0 %7301 }
 0x67e   : > { %v7296_v19 = vpop.xlane.xlu1 %7295 }
 0x680   : > { %v7485_v20 = vpop.xlane.xlu0 %7484 }
 0x681   : > { %v7563_v52 = vadd.f32 %v7485_v20, %v7293_v37  ;;  %v19666_v37 = vpack.c.bf16 %v17652_v44, %v17649_v61 }
 0x682   : > { %v7488_v18 = vpop.xlane.xlu1 %7487 }
 0x683   : > { %13617 = vrcp.f32 %v7563_v52  ;;  %v7564_v22 = vadd.f32 %v7488_v18, %v7296_v19  ;;  %v8820_v31 = vsel %vm6290_vm9, %v19666_v37, 0 }
 0x684   : > { %v7491_v6 = vpop.xlane.xlu0 %7490 }
 0x685   : > { %v7565_v59 = vadd.f32 %v7491_v6, %v7299_v58  ;;  %13619 = vrcp.f32 %v7564_v22 }
 0x686   : > { %v7494_v62 = vpop.xlane.xlu1 %7493 }
 0x687   : > { %13621 = vrcp.f32 %v7565_v59  ;;  %v7566_v48 = vadd.f32 %v7494_v62, %v7302_v56 }
 0x688   : > { %v2446_v17 = vpop.permute.xlu0 %2445 }
 0x689   : > { %13623 = vrcp.f32 %v7566_v48 }
 0x68a   : > { %v2448_v10 = vpop.permute.xlu1 %2447 }
 0x68d   : > { %v13618_v29 = vpop.eup %13617 }
 0x68e   : > { %v2606_v50 = vpop.permute.xlu1 %2605  ;;  %v17972_v58 = vmul.f32 %v13618_v29, %v17723_v4  ;;  %v17978_v19 = vmul.f32 %v13618_v29, %v17712_v27 }
 0x68f   : > { %v13620_v63 = vpop.eup %13619  ;;  %v2691_v13 = vsel %vm2212_vm0, %v2446_v17, %v2606_v50 }
 0x690   : > { %12762 = vmatmul.mubr.msk.bf16.vlgmr.msra.gmra.mrb[168].mxu0 %vm6290_vm9, %v2691_v13  ;;  %v17975_v56 = vmul.f32 %v13620_v63, %v17729_v2  ;;  %v17981_v20 = vmul.f32 %v13620_v63, %v17727_v42  ;;  %v19667_v42 = vpack.c.bf16 %v17677_v32, %v17671_v0 }
 0x691   : > { %v13622_v52 = vpop.eup %13621  ;;  %12772 = vmatpush3.bf16.xpose.msra.mxu0 %v8820_v31  ;;  %12773 = vmatprep.mubr.msk.bf16.mxu0 %vm13678_vm13, %v19413_v7 }
 0x692   : > { %v2608_v61 = vpop.permute.xlu1 %2607  ;;  %12783 = vmatprep.subr.bf16.mxu0 %v19413_v7  ;;  %v7823_v44 = vpack.c.bf16 %v17975_v56, %v17972_v58  ;;  %v7727_v4 = vpack.c.bf16 %v17981_v20, %v17978_v19  ;;  %v8865_v18 = vsel %vm6290_vm9, %v19667_v42, 0  ;;  %v17997_v6 = vmul.f32 %v13622_v52, %v17735_v40  ;;  %v19770_v20 = vld [vmem:[#allocation101_spill] sm:$0xff] }
 0x693   : > { %v13624_v2 = vpop.eup %13623  ;;  %v2694_v27 = vsel %vm2212_vm0, %v2448_v10, %v2608_v61  ;;  %v18003_v59 = vmul.f32 %v13622_v52, %v17717_v11 }
 0x694   : > { %12768 = vmatmul.mubr.msk.bf16.vlgmr.msra.gmra.mrb[168].mxu1 %vm6290_vm9, %v2694_v27  ;;  %v18000_v22 = vmul.f32 %v13624_v2, %v17741_v15  ;;  %v18006_v62 = vmul.f32 %v13624_v2, %v17721_v16  ;;  %v10559_v30 = vsel %vm6290_vm9, %v7727_v4, 0 }
 0x695   : > { %12778 = vmatpush3.bf16.xpose.msra.mxu1 %v8865_v18  ;;  %12779 = vmatprep.mubr.msk.bf16.mxu1 %vm13678_vm13, %v19413_v7 }
 0x696   : > { %12789 = vmatprep.subr.bf16.mxu1 %v19413_v7  ;;  %v7824_v0 = vpack.c.bf16 %v18000_v22, %v17997_v6  ;;  %v19768_v57 = vpack.c.bf16 %v18006_v62, %v18003_v59  ;;  %v19771_v59 = vld [vmem:[#allocation102_spill] sm:$0xff]  ;;  %v19772_v62 = vld [vmem:[#allocation103_spill] sm:$0xff] }
 0x698   : > { %v9135_v58 = vsel %vm6290_vm9, %v7824_v0, 0  ;;  %v10605_v28 = vsel %vm6290_vm9, %v19768_v57, 0 }
 0x6b9   : > { %v7305_v40 = vpop.xlane.xlu0 %7304 }
 0x6bd   : > { %v7311_v15 = vpop.xlane.xlu0 %7310 }
 0x6c1   : > { %v7314_v48 = vpop.xlane.xlu0 %7313 }
 0x6c3   : > { %v7308_v11 = vpop.xlane.xlu1 %7307 }
 0x6c5   : > { %v7497_v10 = vpop.xlane.xlu0 %7496 }
 0x6c6   : > { %v7567_v29 = vadd.f32 %v7497_v10, %v7305_v40  ;;  %v19668_v40 = vpack.c.bf16 %v17759_v8, %v17756_v14 }
 0x6c7   : > { %v7500_v16 = vpop.xlane.xlu1 %7499 }
 0x6c8   : > { %13625 = vrcp.f32 %v7567_v29  ;;  %v7568_v50 = vadd.f32 %v7500_v16, %v7308_v11 }
 0x6c9   : > { %v7503_v17 = vpop.xlane.xlu0 %7502 }
 0x6ca   : > { %v7569_v63 = vadd.f32 %v7503_v17, %v7311_v15  ;;  %13627 = vrcp.f32 %v7568_v50  ;;  %v8910_v15 = vsel %vm6290_vm9, %v19668_v40, 0 }
 0x6cb   : > { %v7506_v13 = vpop.xlane.xlu1 %7505 }
 0x6cc   : > { %13629 = vrcp.f32 %v7569_v63  ;;  %v7570_v31 = vadd.f32 %v7506_v13, %v7314_v48 }
 0x6cd   : > { %v2450_v37 = vpop.permute.xlu0 %2449 }
 0x6ce   : > { %13631 = vrcp.f32 %v7570_v31 }
 0x6cf   : > { %v2452_v52 = vpop.permute.xlu1 %2451 }
 0x6d1   : > { %v2454_v61 = vpop.permute.xlu0 %2453 }
 0x6d2   : > { %v13626_v2 = vpop.eup %13625 }
 0x6d3   : > { %v2610_v27 = vpop.permute.xlu1 %2609  ;;  %v18022_v11 = vmul.f32 %v13626_v2, %v17822_v53  ;;  %v19669_v53 = vpack.c.bf16 %v17787_v47, %v17778_v5  ;;  %v9000_v47 = vsel %vm6290_vm9, %v7821_v55, 0 }
 0x6d4   : > { %v13628_v18 = vpop.eup %13627  ;;  %v2697_v32 = vsel %vm2212_vm0, %v2450_v37, %v2610_v27 }
 0x6d5   : > { %v2614_v42 = vpop.permute.xlu0 %2613  ;;  %12774 = vmatmul.mubr.msk.bf16.vlgmr.msra.gmra.mrb[172].mxu0 %vm6290_vm9, %v2697_v32  ;;  %v18025_v48 = vmul.f32 %v13628_v18, %v17837_v41  ;;  %v8955_v41 = vsel %vm6290_vm9, %v19669_v53, 0  ;;  %v7792_v24 = vmul.f32 %v13628_v18, %v17839_v33 }
 0x6d6   : > { %v13630_v10 = vpop.eup %13629  ;;  %12784 = vmatpush3.bf16.xpose.msra.mxu0 %v8910_v15  ;;  %12785 = vmatprep.mubr.msk.bf16.mxu0 %vm13678_vm13, %v19413_v7  ;;  %v2703_v63 = vsel %vm2212_vm0, %v2454_v61, %v2614_v42  ;;  %v9090_v61 = vsel %vm6290_vm9, %v7823_v44, 0 }
 0x6d7   : > { %v2612_v29 = vpop.permute.xlu1 %2611  ;;  %12795 = vmatprep.subr.bf16.mxu0 %v19413_v7  ;;  %v7729_v14 = vpack.c.bf16 %v18025_v48, %v18022_v11  ;;  %v18039_v17 = vmul.f32 %v13630_v10, %v17827_v49 }
 0x6d8   : > { %v13632_v8 = vpop.eup %13631  ;;  %v2700_v16 = vsel %vm2212_vm0, %v2452_v52, %v2612_v29  ;;  %v9045_v52 = vsel %vm6290_vm9, %v7822_v60, 0  ;;  %v7791_v60 = vmul.f32 %v13626_v2, %v17833_v34  ;;  %v7793_v2 = vmul.f32 %v13630_v10, %v17845_v3  ;;  %v19670_v10 = vld [vmem:[#allocation189_spill] sm:$0xff] }
 0x6d9   : > { %v2458_v32 = vpop.permute.xlu0 %2457  ;;  %12780 = vmatmul.mubr.msk.bf16.vlgmr.msra.gmra.mrb[172].mxu1 %vm6290_vm9, %v2700_v16  ;;  %v18042_v50 = vmul.f32 %v13632_v8, %v17831_v23  ;;  %v7794_v44 = vmul.f32 %v13632_v8, %v17851_v35  ;;  %v19671_v29 = vld [vmem:[#allocation145_spill] sm:$0xff]  ;;  %v10651_v19 = vsel %vm6290_vm9, %v7729_v14, 0 }
 0x6da   : > { %12790 = vmatpush3.bf16.xpose.msra.mxu1 %v8955_v41  ;;  %12791 = vmatprep.mubr.msk.bf16.mxu1 %vm13678_vm13, %v19413_v7  ;;  %v7825_v56 = vpack.c.bf16 %v7792_v24, %v7791_v60  ;;  %v19673_v41 = vld [vmem:[#allocation192_spill] sm:$0xff]  ;;  %v19685_v60 = vld [vmem:[#allocation218_spill] sm:$0xff] }
 0x6db   : > { %v2456_v13 = vpop.permute.xlu1 %2455  ;;  %12801 = vmatprep.subr.bf16.mxu1 %v19413_v7  ;;  %v7730_v5 = vpack.c.bf16 %v18042_v50, %v18039_v17  ;;  %v7826_v22 = vpack.c.bf16 %v7794_v44, %v7793_v2  ;;  %v19689_v44 = vld [vmem:[#allocation151_spill] sm:$0xff] }
 0x6dc   : > { %v9180_v6 = vsel %vm6290_vm9, %v7825_v56, 0 }
 0x6dd   : > { %v2618_v37 = vpop.permute.xlu0 %2617  ;;  %12786 = vmatmul.mubr.msk.bf16.vlgmr.msra.gmra.mrb[176].mxu0 %vm6290_vm9, %v2703_v63  ;;  %v9225_v40 = vsel %vm6290_vm9, %v7826_v22, 0  ;;  %v19674_v63 = vld [vmem:[#allocation190_spill] sm:$0xff]  ;;  %v10697_v4 = vsel %vm6290_vm9, %v7730_v5, 0 }
 0x6de   : > { %12796 = vmatpush3.bf16.xpose.msra.mxu0 %v9000_v47  ;;  %12797 = vmatprep.mubr.msk.bf16.mxu0 %vm13678_vm13, %v19413_v7  ;;  %v2709_v36 = vsel %vm2212_vm0, %v2458_v32, %v2618_v37  ;;  %v19672_v32 = vpack.c.bf16 %v19670_v10, %v19671_v29  ;;  %v19676_v47 = vld [vmem:[#allocation61_spill] sm:$0xff]  ;;  %v19693_v22 = vld [vmem:[#allocation194_spill] sm:$0xff] }
 0x6df   : > { %v2616_v49 = vpop.permute.xlu1 %2615  ;;  %12807 = vmatprep.subr.bf16.mxu0 %v19413_v7 }
 0x6e0   : > { %v2706_v31 = vsel %vm2212_vm0, %v2456_v13, %v2616_v49  ;;  %v9271_v8 = vsel %vm6290_vm9, %v19672_v32, 0  ;;  %v19675_v13 = vpack.c.bf16 %v19673_v41, %v19674_v63  ;;  %v19677_v49 = vld [vmem:[#allocation293_spill] sm:$0xff]  ;;  %v19704_v63 = vld [vmem:[#allocation76_spill] sm:$0xff] }
 0x6e1   : > { %v2462_v23 = vpop.permute.xlu0 %2461  ;;  %12792 = vmatmul.mubr.msk.bf16.vlgmr.msra.gmra.mrb[176].mxu1 %vm6290_vm9, %v2706_v31  ;;  %v19700_v32 = vld [vmem:[#allocation73_spill] sm:$0xff] }
 0x6e2   : > { %12802 = vmatpush3.bf16.xpose.msra.mxu1 %v9045_v52  ;;  %12803 = vmatprep.mubr.msk.bf16.mxu1 %vm13678_vm13, %v19413_v7  ;;  %v9317_v37 = vsel %vm6290_vm9, %v19675_v13, 0  ;;  %v19705_v13 = vld [vmem:[#allocation303_spill] sm:$0xff] }
 0x6e3   : > { %v2460_v39 = vpop.permute.xlu1 %2459  ;;  %12813 = vmatprep.subr.bf16.mxu1 %v19413_v7 }
 0x6e5   : > { %v2622_v55 = vpop.permute.xlu0 %2621  ;;  %12798 = vmatmul.mubr.msk.bf16.vlgmr.msra.gmra.mrb[180].mxu0 %vm6290_vm9, %v2709_v36  ;;  %v19680_v36 = vld [vmem:[#allocation64_spill] sm:$0xff] }
 0x6e6   : > { %12808 = vmatpush3.bf16.xpose.msra.mxu0 %v9090_v61  ;;  %12809 = vmatprep.mubr.msk.bf16.mxu0 %vm13678_vm13, %v19413_v7  ;;  %v2715_v42 = vsel %vm2212_vm0, %v2462_v23, %v2622_v55  ;;  %v19678_v23 = vld [vmem:[#allocation292_spill] sm:$0xff]  ;;  %v19682_v55 = vld [vmem:[#allocation213_spill] sm:$0xff] }
 0x6e7   : > { %v2620_v12 = vpop.permute.xlu1 %2619  ;;  %12819 = vmatprep.subr.bf16.mxu0 %v19413_v7  ;;  %v19679_v31 = vpack.c.bf16 %v19677_v49, %v19678_v23  ;;  %v19708_v23 = vld [vmem:[#allocation77_spill] sm:$0xff] }
 0x6e8   : > { %v2712_v27 = vsel %vm2212_vm0, %v2460_v39, %v2620_v12  ;;  %v19681_v39 = vld [vmem:[#allocation294_spill] sm:$0xff]  ;;  %v19684_v12 = vld [vmem:[#allocation65_spill] sm:$0xff] }
 0x6e9   : > { %12804 = vmatmul.mubr.msk.bf16.vlgmr.msra.gmra.mrb[180].mxu1 %vm6290_vm9, %v2712_v27  ;;  %v2466_v33 = vpop.permute.xlu0 %2465  ;;  %v9363_v52 = vsel %vm6290_vm9, %v19679_v31, 0  ;;  %v19683_v61 = vpack.c.bf16 %v19681_v39, %v19682_v55  ;;  %v19686_v27 = vld [vmem:[#allocation150_spill] sm:$0xff]  ;;  %v19712_v55 = vld [vmem:[#allocation79_spill] sm:$0xff] }
 0x6ea   : > { %12814 = vmatpush3.bf16.xpose.msra.mxu1 %v9135_v58  ;;  %12815 = vmatprep.mubr.msk.bf16.mxu1 %vm13678_vm13, %v19413_v7  ;;  %v19687_v58 = vpack.c.bf16 %v19685_v60, %v19686_v27  ;;  %v19709_v31 = vld [vmem:[#allocation154_spill] sm:$0xff]  ;;  %v19716_v27 = vld [vmem:[#allocation80_spill] sm:$0xff] }
 0x6eb   : > { %v2464_v34 = vpop.permute.xlu1 %2463  ;;  %12825 = vmatprep.subr.bf16.mxu1 %v19413_v7  ;;  %v9409_v24 = vsel %vm6290_vm9, %v19683_v61, 0  ;;  %v19713_v61 = vld [vmem:[#allocation155_spill] sm:$0xff] }
 0x6ec   : > { %v9455_v56 = vsel %vm6290_vm9, %v19687_v58, 0  ;;  %v19717_v58 = vld [vmem:[#allocation153_spill] sm:$0xff] }
 0x6ed   : > { %12810 = vmatmul.mubr.msk.bf16.vlgmr.msra.gmra.mrb[184].mxu0 %vm6290_vm9, %v2715_v42  ;;  %v2626_v0 = vpop.permute.xlu0 %2625  ;;  %v19690_v42 = vld [vmem:[#allocation216_spill] sm:$0xff] }
 0x6ee   : > { %12820 = vmatpush3.bf16.xpose.msra.mxu0 %v9180_v6  ;;  %12821 = vmatprep.mubr.msk.bf16.mxu0 %vm13678_vm13, %v19413_v7  ;;  %v2721_v3 = vsel %vm2212_vm0, %v2466_v33, %v2626_v0  ;;  %v19688_v33 = vld [vmem:[#allocation68_spill] sm:$0xff]  ;;  %v19692_v6 = vld [vmem:[#allocation69_spill] sm:$0xff] }
 0x6ef   : > { %v2624_v35 = vpop.permute.xlu1 %2623  ;;  %12831 = vmatprep.subr.bf16.mxu0 %v19413_v7 }
 0x6f0   : > { %v2718_v18 = vsel %vm2212_vm0, %v2464_v34, %v2624_v35  ;;  %v19691_v34 = vpack.c.bf16 %v19689_v44, %v19690_v42  ;;  %v19694_v35 = vld [vmem:[#allocation149_spill] sm:$0xff]  ;;  %v19720_v42 = vld [vmem:[#allocation82_spill] sm:$0xff] }
 0x6f1   : > { %12816 = vmatmul.mubr.msk.bf16.vlgmr.msra.gmra.mrb[184].mxu1 %vm6290_vm9, %v2718_v18  ;;  %v19695_v0 = vpack.c.bf16 %v19693_v22, %v19694_v35  ;;  %v19724_v35 = vld [vmem:[#allocation83_spill] sm:$0xff] }
 0x6f2   : > { %12826 = vmatpush3.bf16.xpose.msra.mxu1 %v9225_v40  ;;  %12827 = vmatprep.mubr.msk.bf16.mxu1 %vm13678_vm13, %v19413_v7  ;;  %v9501_v2 = vsel %vm6290_vm9, %v19691_v34, 0  ;;  %v19696_v40 = vld [vmem:[#allocation72_spill] sm:$0xff] }
 0x6f3   : > { %v2468_v15 = vpop.permute.xlu1 %2467  ;;  %12837 = vmatprep.subr.bf16.mxu1 %v19413_v7  ;;  %v9547_v18 = vsel %vm6290_vm9, %v19695_v0, 0  ;;  %v19721_v34 = vld [vmem:[#allocation204_spill] sm:$0xff]  ;;  %v19725_v0 = vpack.c.bf16 %v17218_v26, %v17214_v21  ;;  %v19730_v21 = vld [vmem:[#allocation86_spill] sm:$0xff]  ;;  %v19731_v26 = vld [vmem:[#allocation193_spill] sm:$0xff] }
 0x6f5   : > { %12822 = vmatmul.mubr.msk.bf16.vlgmr.msra.gmra.mrb[188].mxu0 %vm6290_vm9, %v2721_v3  ;;  %v19697_v3 = vld [vmem:[#allocation298_spill] sm:$0xff] }
 0x6f6   : > { %12832 = vmatpush3.bf16.xpose.msra.mxu0 %v9271_v8  ;;  %12833 = vmatprep.mubr.msk.bf16.mxu0 %vm13678_vm13, %v19413_v7  ;;  %v19701_v8 = vld [vmem:[#allocation301_spill] sm:$0xff] }
 0x6f7   : > { %v2628_v16 = vpop.permute.xlu1 %2627  ;;  %12843 = vmatprep.subr.bf16.mxu0 %v19413_v7 }
 0x6f8   : > { %v2724_v53 = vsel %vm2212_vm0, %v2468_v15, %v2628_v16  ;;  %v19698_v15 = vld [vmem:[#allocation297_spill] sm:$0xff]  ;;  %v19702_v16 = vld [vmem:[#allocation300_spill] sm:$0xff] }
 0x6f9   : > { %12828 = vmatmul.mubr.msk.bf16.vlgmr.msra.gmra.mrb[188].mxu1 %vm6290_vm9, %v2724_v53  ;;  %v19699_v10 = vpack.c.bf16 %v19697_v3, %v19698_v15  ;;  %v19703_v53 = vpack.c.bf16 %v19701_v8, %v19702_v16  ;;  %v19727_v3 = vld [vmem:[#allocation137_spill] sm:$0xff]  ;;  %v19728_v15 = vld [vmem:[#allocation207_spill] sm:$0xff] }
 0x6fa   : > { %12838 = vmatpush3.bf16.xpose.msra.mxu1 %v9317_v37  ;;  %12839 = vmatprep.mubr.msk.bf16.mxu1 %vm13678_vm13, %v19413_v7  ;;  %v19706_v37 = vld [vmem:[#allocation302_spill] sm:$0xff] }
 0x6fb   : > { %12849 = vmatprep.subr.bf16.mxu1 %v19413_v7  ;;  %v9593_v29 = vsel %vm6290_vm9, %v19699_v10, 0  ;;  %v9639_v41 = vsel %vm6290_vm9, %v19703_v53, 0  ;;  %v19729_v10 = vpack.c.bf16 %v19727_v3, %v19728_v15  ;;  %v19734_v53 = vld [vmem:[#allocation87_spill] sm:$0xff] }
 0x6fd   : > { %12834 = vmatmul.mubr.msk.bf16.vlgmr.msra.gmra.mrb[128].mxu0 %vm6290_vm9, %v19676_v47  ;;  %v19707_v47 = vpack.c.bf16 %v19705_v13, %v19706_v37 }
 0x6fe   : > { %12844 = vmatpush3.bf16.xpose.msra.mxu0 %v9363_v52  ;;  %12845 = vmatprep.mubr.msk.bf16.mxu0 %vm13678_vm13, %v19413_v7  ;;  %v19710_v52 = vld [vmem:[#allocation221_spill] sm:$0xff] }
 0x6ff   : > { %12855 = vmatprep.subr.bf16.mxu0 %v19413_v7  ;;  %v9685_v49 = vsel %vm6290_vm9, %v19707_v47, 0  ;;  %v19738_v47 = vld [vmem:[#allocation88_spill] sm:$0xff] }
 0x701   : > { %12840 = vmatmul.mubr.msk.bf16.vlgmr.msra.gmra.mrb[128].mxu1 %vm6290_vm9, %v19680_v36  ;;  %v19711_v36 = vpack.c.bf16 %v19709_v31, %v19710_v52  ;;  %v19740_v31 = vld [vmem:[#allocation89_spill] sm:$0xff]  ;;  %v19741_v52 = vpack.c.bf16 %v17459_v51, %v17456_v38  ;;  %v19745_v38 = vld [vmem:[#allocation91_spill] sm:$0xff]  ;;  %v19746_v51 = vld [vmem:[#allocation276_spill] sm:$0xff] }
 0x702   : > { %12850 = vmatpush3.bf16.xpose.msra.mxu1 %v9409_v24  ;;  %12851 = vmatprep.mubr.msk.bf16.mxu1 %vm13678_vm13, %v19413_v7  ;;  %v19714_v24 = vld [vmem:[#allocation226_spill] sm:$0xff] }
 0x703   : > { %12861 = vmatprep.subr.bf16.mxu1 %v19413_v7  ;;  %v9731_v39 = vsel %vm6290_vm9, %v19711_v36, 0  ;;  %v10145_v36 = vsel %vm6290_vm9, %v19741_v52, 0  ;;  %v19773_v52 = vld [vmem:[#allocation27_spill] sm:$0xff] }
 0x705   : > { %12846 = vmatmul.mubr.msk.bf16.vlgmr.msra.gmra.mrb[132].mxu0 %vm6290_vm9, %v19684_v12  ;;  %v19715_v12 = vpack.c.bf16 %v19713_v61, %v19714_v24  ;;  %v19747_v61 = vld [vmem:[#allocation158_spill] sm:$0xff] }
 0x706   : > { %12856 = vmatpush3.bf16.xpose.msra.mxu0 %v9455_v56  ;;  %12857 = vmatprep.mubr.msk.bf16.mxu0 %vm13678_vm13, %v19413_v7  ;;  %v19718_v56 = vld [vmem:[#allocation198_spill] sm:$0xff]  ;;  %v19748_v24 = vpack.c.bf16 %v19746_v51, %v19747_v61 }
 0x707   : > { %12867 = vmatprep.subr.bf16.mxu0 %v19413_v7  ;;  %v9777_v60 = vsel %vm6290_vm9, %v19715_v12, 0 }
 0x708   : > { %v10237_v12 = vsel %vm6290_vm9, %v19748_v24, 0 }
 0x709   : > { %12852 = vmatmul.mubr.msk.bf16.vlgmr.msra.gmra.mrb[132].mxu1 %vm6290_vm9, %v19688_v33  ;;  %v19719_v33 = vpack.c.bf16 %v19717_v58, %v19718_v56  ;;  %v19752_v56 = vld [vmem:[#allocation93_spill] sm:$0xff] }
 0x70a   : > { %12862 = vmatpush3.bf16.xpose.msra.mxu1 %v9501_v2  ;;  %12863 = vmatprep.mubr.msk.bf16.mxu1 %vm13678_vm13, %v19413_v7  ;;  %v19722_v2 = vld [vmem:[#allocation201_spill] sm:$0xff] }
 0x70b   : > { %12873 = vmatprep.subr.bf16.mxu1 %v19413_v7  ;;  %v9823_v44 = vsel %vm6290_vm9, %v19719_v33, 0  ;;  %v19753_v33 = vld [vmem:[#allocation277_spill] sm:$0xff] }
 0x70d   : > { %12858 = vmatmul.mubr.msk.bf16.vlgmr.msra.gmra.mrb[136].mxu0 %vm6290_vm9, %v19692_v6  ;;  %v19723_v6 = vpack.c.bf16 %v19721_v34, %v19722_v2  ;;  %v19757_v2 = vld [vmem:[#allocation275_spill] sm:$0xff] }
 0x70e   : > { %12868 = vmatpush3.bf16.xpose.msra.mxu0 %v9547_v18  ;;  %12869 = vmatprep.mubr.msk.bf16.mxu0 %vm13678_vm13, %v19413_v7  ;;  %v9915_v18 = vsel %vm6290_vm9, %v19725_v0, 0  ;;  %v19760_v0 = vld [vmem:[#allocation95_spill] sm:$0xff] }
 0x70f   : > { %12879 = vmatprep.subr.bf16.mxu0 %v19413_v7  ;;  %v9869_v22 = vsel %vm6290_vm9, %v19723_v6, 0  ;;  %v19758_v6 = vld [vmem:[#allocation232_spill] sm:$0xff] }
 0x711   : > { %12864 = vmatmul.mubr.msk.bf16.vlgmr.msra.gmra.mrb[136].mxu1 %vm6290_vm9, %v19696_v40  ;;  %v19726_v40 = vld [vmem:[#allocation84_spill] sm:$0xff] }
 0x712   : > { %12874 = vmatpush3.bf16.xpose.msra.mxu1 %v9593_v29  ;;  %12875 = vmatprep.mubr.msk.bf16.mxu1 %vm13678_vm13, %v19413_v7  ;;  %v9961_v29 = vsel %vm6290_vm9, %v19729_v10, 0  ;;  %v19764_v10 = vld [vmem:[#allocation96_spill] sm:$0xff] }
 0x713   : > { %12885 = vmatprep.subr.bf16.mxu1 %v19413_v7 }
 0x715   : > { %12870 = vmatmul.mubr.msk.bf16.vlgmr.msra.gmra.mrb[140].mxu0 %vm6290_vm9, %v19700_v32  ;;  %v19732_v32 = vld [vmem:[#allocation273_spill] sm:$0xff] }
 0x716   : > { %12880 = vmatpush3.bf16.xpose.msra.mxu0 %v9639_v41  ;;  %12881 = vmatprep.mubr.msk.bf16.mxu0 %vm13678_vm13, %v19413_v7  ;;  %v19733_v8 = vpack.c.bf16 %v19731_v26, %v19732_v32  ;;  %v19735_v41 = vld [vmem:[#allocation184_spill] sm:$0xff]  ;;  %v10513_v26 = vsel %vm6290_vm9, %v7726_v1, 0 }
 0x717   : > { %12891 = vmatprep.subr.bf16.mxu0 %v19413_v7  ;;  %v19769_v1 = vld [vmem:[#allocation100_spill] sm:$0xff] }
 0x718   : > { %v10007_v16 = vsel %vm6290_vm9, %v19733_v8, 0 }
 0x719   : > { %12876 = vmatmul.mubr.msk.bf16.vlgmr.msra.gmra.mrb[140].mxu1 %vm6290_vm9, %v19704_v63  ;;  %v19736_v63 = vld [vmem:[#allocation139_spill] sm:$0xff] }
 0x71a   : > { %12886 = vmatpush3.bf16.xpose.msra.mxu1 %v9685_v49  ;;  %12887 = vmatprep.mubr.msk.bf16.mxu1 %vm13678_vm13, %v19413_v7  ;;  %v19737_v13 = vpack.c.bf16 %v19735_v41, %v19736_v63  ;;  %v19739_v49 = vpack.c.bf16 %v17434_v43, %v17431_v25  ;;  %v19742_v25 = vld [vmem:[#allocation90_spill] sm:$0xff]  ;;  %v19743_v43 = vld [vmem:[#allocation229_spill] sm:$0xff] }
 0x71b   : > { %12897 = vmatprep.subr.bf16.mxu1 %v19413_v7 }
 0x71c   : > { %v10053_v37 = vsel %vm6290_vm9, %v19737_v13, 0 }
 0x71d   : > { %12882 = vmatmul.mubr.msk.bf16.vlgmr.msra.gmra.mrb[144].mxu0 %vm6290_vm9, %v19708_v23  ;;  %v10099_v23 = vsel %vm6290_vm9, %v19739_v49, 0 }
 0x71e   : > { %12892 = vmatpush3.bf16.xpose.msra.mxu0 %v9731_v39  ;;  %12893 = vmatprep.mubr.msk.bf16.mxu0 %vm13678_vm13, %v19413_v7  ;;  %v19744_v39 = vpack.c.bf16 %v17546_v46, %v19743_v43  ;;  %v19749_v46 = vld [vmem:[#allocation92_spill] sm:$0xff] }
 0x71f   : > { %12903 = vmatprep.subr.bf16.mxu0 %v19413_v7 }
 0x721   : > { %12888 = vmatmul.mubr.msk.bf16.vlgmr.msra.gmra.mrb[144].mxu1 %vm6290_vm9, %v19712_v55  ;;  %v10191_v55 = vsel %vm6290_vm9, %v19744_v39, 0 }
 0x722   : > { %12898 = vmatpush3.bf16.xpose.msra.mxu1 %v9777_v60  ;;  %12899 = vmatprep.mubr.msk.bf16.mxu1 %vm13678_vm13, %v19413_v7  ;;  %v19750_v60 = vld [vmem:[#allocation234_spill] sm:$0xff] }
 0x723   : > { %12909 = vmatprep.subr.bf16.mxu1 %v19413_v7 }
 0x725   : > { %12894 = vmatmul.mubr.msk.bf16.vlgmr.msra.gmra.mrb[148].mxu0 %vm6290_vm9, %v19716_v27  ;;  %v19751_v27 = vpack.c.bf16 %v17658_v9, %v19750_v60  ;;  %v19756_v9 = vld [vmem:[#allocation94_spill] sm:$0xff] }
 0x726   : > { %12904 = vmatpush3.bf16.xpose.msra.mxu0 %v9823_v44  ;;  %12905 = vmatprep.mubr.msk.bf16.mxu0 %vm13678_vm13, %v19413_v7  ;;  %v19754_v44 = vld [vmem:[#allocation159_spill] sm:$0xff] }
 0x727   : > { %12915 = vmatprep.subr.bf16.mxu0 %v19413_v7  ;;  %v10283_v58 = vsel %vm6290_vm9, %v19751_v27, 0 }
 0x729   : > { %12900 = vmatmul.mubr.msk.bf16.vlgmr.msra.gmra.mrb[148].mxu1 %vm6290_vm9, %v19720_v42  ;;  %v19755_v42 = vpack.c.bf16 %v19753_v33, %v19754_v44 }
 0x72a   : > { %12910 = vmatpush3.bf16.xpose.msra.mxu1 %v9869_v22  ;;  %12911 = vmatprep.mubr.msk.bf16.mxu1 %vm13678_vm13, %v19413_v7  ;;  %v19759_v22 = vpack.c.bf16 %v19757_v2, %v19758_v6 }
 0x72b   : > { %12921 = vmatprep.subr.bf16.mxu1 %v19413_v7  ;;  %v10329_v34 = vsel %vm6290_vm9, %v19755_v42, 0 }
 0x72d   : > { %12906 = vmatmul.mubr.msk.bf16.vlgmr.msra.gmra.mrb[152].mxu0 %vm6290_vm9, %v19724_v35  ;;  %v10375_v35 = vsel %vm6290_vm9, %v19759_v22, 0 }
 0x72e   : > { %12916 = vmatpush3.bf16.xpose.msra.mxu0 %v9915_v18  ;;  %12917 = vmatprep.mubr.msk.bf16.mxu0 %vm13678_vm13, %v19413_v7  ;;  %v19761_v18 = vld [vmem:[#allocation160_spill] sm:$0xff] }
 0x72f   : > { %12927 = vmatprep.subr.bf16.mxu0 %v19413_v7 }
 0x731   : > { %12912 = vmatmul.mubr.msk.bf16.vlgmr.msra.gmra.mrb[152].mxu1 %vm6290_vm9, %v19726_v40  ;;  %v19762_v40 = vld [vmem:[#allocation227_spill] sm:$0xff] }
 0x732   : > { %12922 = vmatpush3.bf16.xpose.msra.mxu1 %v9961_v29  ;;  %12923 = vmatprep.mubr.msk.bf16.mxu1 %vm13678_vm13, %v19413_v7  ;;  %v19763_v3 = vpack.c.bf16 %v19761_v18, %v19762_v40  ;;  %v10467_v29 = vsel %vm6290_vm9, %v7725_v54, 0  ;;  %v19767_v54 = vld [vmem:[#allocation99_spill] sm:$0xff] }
 0x733   : > { %12933 = vmatprep.subr.bf16.mxu1 %v19413_v7 }
 0x734   : > { %v10421_v15 = vsel %vm6290_vm9, %v19763_v3, 0 }
 0x735   : > { %12918 = vmatmul.mubr.msk.bf16.vlgmr.msra.gmra.mrb[156].mxu0 %vm6290_vm9, %v19730_v21  ;;  %v19765_v21 = vld [vmem:[#allocation97_spill] sm:$0xff] }
 0x736   : > { %12928 = vmatpush3.bf16.xpose.msra.mxu0 %v10007_v16  ;;  %12929 = vmatprep.mubr.msk.bf16.mxu0 %vm13678_vm13, %v19413_v7 }
 0x737   : > { %12939 = vmatprep.subr.bf16.mxu0 %v19413_v7 }
 0x739   : > { %12924 = vmatmul.mubr.msk.bf16.vlgmr.msra.gmra.mrb[156].mxu1 %vm6290_vm9, %v19734_v53 }
 0x73a   : > { %12934 = vmatpush3.bf16.xpose.msra.mxu1 %v10053_v37  ;;  %12935 = vmatprep.mubr.msk.bf16.mxu1 %vm13678_vm13, %v19413_v7 }
 0x73b   : > { %12945 = vmatprep.subr.bf16.mxu1 %v19413_v7 }
 0x73d   : > { %12930 = vmatmul.mubr.msk.bf16.vlgmr.msra.gmra.mrb[160].mxu0 %vm6290_vm9, %v19738_v47 }
 0x73e   : > { %12940 = vmatpush3.bf16.xpose.msra.mxu0 %v10099_v23  ;;  %12941 = vmatprep.mubr.msk.bf16.mxu0 %vm13678_vm13, %v19413_v7 }
 0x73f   : > { %12951 = vmatprep.subr.bf16.mxu0 %v19413_v7 }
 0x741   : > { %12936 = vmatmul.mubr.msk.bf16.vlgmr.msra.gmra.mrb[160].mxu1 %vm6290_vm9, %v19740_v31 }
 0x742   : > { %12946 = vmatpush3.bf16.xpose.msra.mxu1 %v10145_v36  ;;  %12947 = vmatprep.mubr.msk.bf16.mxu1 %vm13678_vm13, %v19413_v7 }
 0x743   : > { %12957 = vmatprep.subr.bf16.mxu1 %v19413_v7 }
 0x745   : > { %12942 = vmatmul.mubr.msk.bf16.vlgmr.msra.gmra.mrb[164].mxu0 %vm6290_vm9, %v19742_v25 }
 0x746   : > { %12952 = vmatpush3.bf16.xpose.msra.mxu0 %v10191_v55  ;;  %12953 = vmatprep.mubr.msk.bf16.mxu0 %vm13678_vm13, %v19413_v7 }
 0x747   : > { %12963 = vmatprep.subr.bf16.mxu0 %v19413_v7 }
 0x749   : > { %12948 = vmatmul.mubr.msk.bf16.vlgmr.msra.gmra.mrb[164].mxu1 %vm6290_vm9, %v19745_v38 }
 0x74a   : > { %12958 = vmatpush3.bf16.xpose.msra.mxu1 %v10237_v12  ;;  %12959 = vmatprep.mubr.msk.bf16.mxu1 %vm13678_vm13, %v19413_v7 }
 0x74b   : > { %12969 = vmatprep.subr.bf16.mxu1 %v19413_v7 }
 0x74d   : > { %12954 = vmatmul.mubr.msk.bf16.vlgmr.msra.gmra.mrb[168].mxu0 %vm6290_vm9, %v19749_v46 }
 0x74e   : > { %12964 = vmatpush3.bf16.xpose.msra.mxu0 %v10283_v58  ;;  %12965 = vmatprep.mubr.msk.bf16.mxu0 %vm13678_vm13, %v19413_v7 }
 0x74f   : > { %12975 = vmatprep.subr.bf16.mxu0 %v19413_v7 }
 0x751   : > { %12960 = vmatmul.mubr.msk.bf16.vlgmr.msra.gmra.mrb[168].mxu1 %vm6290_vm9, %v19752_v56 }
 0x752   : > { %12970 = vmatpush3.bf16.xpose.msra.mxu1 %v10329_v34  ;;  %12971 = vmatprep.mubr.msk.bf16.mxu1 %vm13678_vm13, %v19413_v7 }
 0x753   : > { %12981 = vmatprep.subr.bf16.mxu1 %v19413_v7 }
 0x755   : > { %12966 = vmatmul.mubr.msk.bf16.vlgmr.msra.gmra.mrb[172].mxu0 %vm6290_vm9, %v19756_v9 }
 0x756   : > { %12976 = vmatpush3.bf16.xpose.msra.mxu0 %v10375_v35  ;;  %12977 = vmatprep.mubr.msk.bf16.mxu0 %vm13678_vm13, %v19413_v7 }
 0x757   : > { %12987 = vmatprep.subr.bf16.mxu0 %v19413_v7 }
 0x759   : > { %12972 = vmatmul.mubr.msk.bf16.vlgmr.msra.gmra.mrb[172].mxu1 %vm6290_vm9, %v19760_v0 }
 0x75a   : > { %12982 = vmatpush3.bf16.xpose.msra.mxu1 %v10421_v15  ;;  %12983 = vmatprep.mubr.msk.bf16.mxu1 %vm13678_vm13, %v19413_v7 }
 0x75b   : > { %12993 = vmatprep.subr.bf16.mxu1 %v19413_v7 }
 0x75d   : > { %12978 = vmatmul.mubr.msk.bf16.vlgmr.msra.gmra.mrb[176].mxu0 %vm6290_vm9, %v19764_v10 }
 0x75e   : > { %12988 = vmatpush3.bf16.xpose.msra.mxu0 %v10467_v29  ;;  %12989 = vmatprep.mubr.msk.bf16.mxu0 %vm13678_vm13, %v19413_v7 }
 0x75f   : > { %12999 = vmatprep.subr.bf16.mxu0 %v19413_v7 }
 0x761   : > { %12984 = vmatmul.mubr.msk.bf16.vlgmr.msra.gmra.mrb[176].mxu1 %vm6290_vm9, %v19765_v21 }
 0x762   : > { %12994 = vmatpush3.bf16.xpose.msra.mxu1 %v10513_v26  ;;  %12995 = vmatprep.mubr.msk.bf16.mxu1 %vm13678_vm13, %v19413_v7 }
 0x763   : > { %13005 = vmatprep.subr.bf16.mxu1 %v19413_v7 }
 0x765   : > { %12990 = vmatmul.mubr.msk.bf16.vlgmr.msra.gmra.mrb[180].mxu0 %vm6290_vm9, %v19766_v45 }
 0x766   : > { %13000 = vmatpush3.bf16.xpose.msra.mxu0 %v10559_v30  ;;  %13001 = vmatprep.mubr.msk.bf16.mxu0 %vm13678_vm13, %v19413_v7 }
 0x767   : > { %13011 = vmatprep.subr.bf16.mxu0 %v19413_v7 }
 0x769   : > { %12996 = vmatmul.mubr.msk.bf16.vlgmr.msra.gmra.mrb[180].mxu1 %vm6290_vm9, %v19767_v54 }
 0x76a   : > { %13006 = vmatpush3.bf16.xpose.msra.mxu1 %v10605_v28  ;;  %13007 = vmatprep.mubr.msk.bf16.mxu1 %vm13678_vm13, %v19413_v7 }
 0x76b   : > { %13017 = vmatprep.subr.bf16.mxu1 %v19413_v7 }
 0x76d   : > { %13002 = vmatmul.mubr.msk.bf16.vlgmr.msra.gmra.mrb[184].mxu0 %vm6290_vm9, %v19769_v1 }
 0x76e   : > { %13012 = vmatpush3.bf16.xpose.msra.mxu0 %v10651_v19  ;;  %13013 = vmatprep.mubr.msk.bf16.mxu0 %vm13678_vm13, %v19413_v7  ;;  %v19774_v19 = vld [vmem:[#allocation28_spill] sm:$0xff] }
 0x771   : > { %13008 = vmatmul.mubr.msk.bf16.vlgmr.msra.gmra.mrb[184].mxu1 %vm6290_vm9, %v19770_v20 }
 0x772   : > { %13018 = vmatpush3.bf16.xpose.msra.mxu1 %v10697_v4  ;;  %13019 = vmatprep.mubr.msk.bf16.mxu1 %vm13678_vm13, %v19413_v7 }
 0x775   : > { %13014 = vmatmul.mubr.msk.bf16.vlgmr.msra.gmra.mrb[188].mxu0 %vm6290_vm9, %v19771_v59 }
 0x779   : > { %13020 = vmatmul.mubr.msk.bf16.vlgmr.msra.gmra.mrb[188].mxu1 %vm6290_vm9, %v19772_v62 }
 0x7d0   : > { %v9307_v11 = vpop.f32.mrb[128].mxu0 }
 0x7d1   : > { %v12835_v48 = vpop.f32.mrb[129].mxu0 }
 0x7d2   : > { %v9310_v14 = vpop.f32.mrb[130].mxu0 }
 0x7d3   : > { %v12836_v32 = vpop.f32.mrb[131].mxu0 }
 0x7d4   : > { %v9353_v8 = vpop.f32.mrb[128].mxu1 }
 0x7d5   : > { %v12841_v16 = vpop.f32.mrb[129].mxu1 }
 0x7d6   : > { %v9356_v53 = vpop.f32.mrb[130].mxu1 }
 0x7d7   : > { %v12842_v17 = vpop.f32.mrb[131].mxu1 }
 0x7d8   : > { %v9399_v50 = vpop.f32.mrb[132].mxu0 }
 0x7d9   : > { %v10739_v5 = vcombine.low %v9307_v11, %v9399_v50  ;;  %v10740_v41 = vcombine.high %v9307_v11, %v9399_v50  ;;  %v12847_v63 = vpop.f32.mrb[133].mxu0 }
 0x7da   : > { %v9402_v13 = vpop.f32.mrb[134].mxu0 }
 0x7db   : > { %v12848_v7 = vpop.f32.mrb[135].mxu0  ;;  %v10747_v36 = vrot.slane %v10739_v5, %v19773_v52  ;;  %v10754_v25 = vrot.slane %v10740_v41, %v19773_v52 }
 0x7dc   : > { %v9445_v37 = vpop.f32.mrb[132].mxu1 }
 0x7dd   : > { %v10755_v47 = vcombine.low %v9353_v8, %v9445_v37  ;;  %v10756_v49 = vcombine.high %v9353_v8, %v9445_v37  ;;  %v12853_v23 = vpop.f32.mrb[133].mxu1 }
 0x7de   : > { %v9448_v31 = vpop.f32.mrb[134].mxu1 }
 0x7df   : > { %v10763_v43 = vrot.slane %v10755_v47, %v19773_v52  ;;  %v10770_v39 = vrot.slane %v10756_v49, %v19773_v52  ;;  %v12854_v55 = vpop.f32.mrb[135].mxu1 }
 0x7e0   : > { %v9491_v38 = vpop.f32.mrb[136].mxu0 }
 0x7e1   : > { %v10803_v51 = vcombine.low %v10747_v36, %v10763_v43  ;;  %v10804_v61 = vcombine.high %v10747_v36, %v10763_v43  ;;  %v10819_v24 = vcombine.low %v10754_v25, %v10770_v39  ;;  %v10820_v12 = vcombine.high %v10754_v25, %v10770_v39  ;;  %v12859_v46 = vpop.f32.mrb[137].mxu0 }
 0x7e2   : > { %v9494_v60 = vpop.f32.mrb[138].mxu0 }
 0x7e3   : > { %v12860_v27 = vpop.f32.mrb[139].mxu0  ;;  %v10811_v20 = vrot.slane %v10803_v51, %v19774_v19  ;;  %v10818_v4 = vrot.slane %v10804_v61, %v19774_v19  ;;  %v10827_v8 = vrot.slane %v10819_v24, %v19774_v19  ;;  %v10834_v16 = vrot.slane %v10820_v12, %v19774_v19 }
 0x7e4   : > { %v9537_v58 = vpop.f32.mrb[136].mxu1 }
 0x7e5   : > { %v12865_v56 = vpop.f32.mrb[137].mxu1 }
 0x7e6   : > { %v9540_v33 = vpop.f32.mrb[138].mxu1 }
 0x7e7   : > { %v12866_v44 = vpop.f32.mrb[139].mxu1 }
 0x7e8   : > { %v9583_v42 = vpop.f32.mrb[140].mxu0 }
 0x7e9   : > { %v10771_v34 = vcombine.low %v9491_v38, %v9583_v42  ;;  %v10772_v9 = vcombine.high %v9491_v38, %v9583_v42  ;;  %v12871_v2 = vpop.f32.mrb[141].mxu0 }
 0x7ea   : > { %v9586_v6 = vpop.f32.mrb[142].mxu0 }
 0x7eb   : > { %v12872_v22 = vpop.f32.mrb[143].mxu0  ;;  %v10779_v15 = vrot.slane %v10771_v34, %v19773_v52  ;;  %v10786_v10 = vrot.slane %v10772_v9, %v19773_v52 }
 0x7ec   : > { %v9629_v35 = vpop.f32.mrb[140].mxu1 }
 0x7ed   : > { %v10787_v0 = vcombine.low %v9537_v58, %v9629_v35  ;;  %v10788_v18 = vcombine.high %v9537_v58, %v9629_v35  ;;  %v12877_v40 = vpop.f32.mrb[141].mxu1 }
 0x7ee   : > { %v9632_v3 = vpop.f32.mrb[142].mxu1 }
 0x7ef   : > { %v10795_v29 = vrot.slane %v10787_v0, %v19773_v52  ;;  %v10802_v21 = vrot.slane %v10788_v18, %v19773_v52  ;;  %v12878_v26 = vpop.f32.mrb[143].mxu1 }
 0x7f0   : > { %v9675_v45 = vpop.f32.mrb[144].mxu0 }
 0x7f1   : > { %v10835_v30 = vcombine.low %v10779_v15, %v10795_v29  ;;  %v10836_v54 = vcombine.high %v10779_v15, %v10795_v29  ;;  %v10851_v57 = vcombine.low %v10786_v10, %v10802_v21  ;;  %v10852_v28 = vcombine.high %v10786_v10, %v10802_v21  ;;  %v12883_v1 = vpop.f32.mrb[145].mxu0 }
 0x7f2   : > { %v9678_v59 = vpop.f32.mrb[146].mxu0 }
 0x7f3   : > { %v10843_v62 = vrot.slane %v10835_v30, %v19774_v19  ;;  %v10850_v11 = vrot.slane %v10836_v54, %v19774_v19  ;;  %v10859_v48 = vrot.slane %v10851_v57, %v19774_v19  ;;  %v10866_v14 = vrot.slane %v10852_v28, %v19774_v19  ;;  %v12884_v32 = vpop.f32.mrb[147].mxu0 }
 0x7f4   : > { %v9721_v53 = vpop.f32.mrb[144].mxu1 }
 0x7f5   : > { %v10867_v17 = vcombine.low %v10811_v20, %v10843_v62  ;;  %v10868_v50 = vcombine.high %v10811_v20, %v10843_v62  ;;  %v10869_v5 = vcombine.low %v10818_v4, %v10850_v11  ;;  %v10870_v41 = vcombine.high %v10818_v4, %v10850_v11  ;;  %v12889_v63 = vpop.f32.mrb[145].mxu1 }
 0x7f6   : > { %v10871_v13 = vcombine.low %v10827_v8, %v10859_v48  ;;  %v10872_v7 = vcombine.high %v10827_v8, %v10859_v48  ;;  %v10873_v37 = vcombine.low %v10834_v16, %v10866_v14  ;;  %v10874_v47 = vcombine.high %v10834_v16, %v10866_v14  ;;  %v9724_v49 = vpop.f32.mrb[146].mxu1 }
 0x7f7   : > { %v11283_v23 = vpack.c.bf16 %v10867_v17, %v10867_v17  ;;  %v11284_v31 = vpack.c.bf16 %v10868_v50, %v10868_v50  ;;  %v11285_v36 = vpack.c.bf16 %v10869_v5, %v10869_v5  ;;  %v11286_v25 = vpack.c.bf16 %v10870_v41, %v10870_v41  ;;  %v12890_v43 = vpop.f32.mrb[147].mxu1 }
 0x7f8   : > { %v11287_v39 = vpack.c.bf16 %v10871_v13, %v10871_v13  ;;  %v11288_v55 = vpack.c.bf16 %v10872_v7, %v10872_v7  ;;  %v11289_v38 = vpack.c.bf16 %v10873_v37, %v10873_v37  ;;  %v11290_v51 = vpack.c.bf16 %v10874_v47, %v10874_v47  ;;  %v9767_v61 = vpop.f32.mrb[148].mxu0 }
 0x7f9   : > { %11316 = vst.msk [vmem:[%s13756_s25] sm:$0xf] %vm11315_vm10, %v11283_v23  ;;  %11317 = vst.msk [vmem:[%s13756_s25 + $0x4] sm:$0xf] %vm11315_vm10, %v11284_v31  ;;  %v10875_v24 = vcombine.low %v9675_v45, %v9767_v61  ;;  %v10876_v12 = vcombine.high %v9675_v45, %v9767_v61  ;;  %v12895_v46 = vpop.f32.mrb[149].mxu0 }
 0x7fa   : > { %11318 = vst.msk [vmem:[%s13756_s25 + $0x8] sm:$0xf] %vm11315_vm10, %v11285_v36  ;;  %11319 = vst.msk [vmem:[%s13756_s25 + $0xc] sm:$0xf] %vm11315_vm10, %v11286_v25  ;;  %v9770_v60 = vpop.f32.mrb[150].mxu0 }
 0x7fb   : > { %11320 = vst.msk [vmem:[%s13756_s25 + $0x10] sm:$0xf] %vm11315_vm10, %v11287_v39  ;;  %11321 = vst.msk [vmem:[%s13756_s25 + $0x14] sm:$0xf] %vm11315_vm10, %v11288_v55  ;;  %v12896_v27 = vpop.f32.mrb[151].mxu0  ;;  %v10883_v34 = vrot.slane %v10875_v24, %v19773_v52  ;;  %v10890_v9 = vrot.slane %v10876_v12, %v19773_v52 }
 0x7fc   : > { %11322 = vst.msk [vmem:[%s13756_s25 + $0x18] sm:$0xf] %vm11315_vm10, %v11289_v38  ;;  %11323 = vst.msk [vmem:[%s13756_s25 + $0x1c] sm:$0xf] %vm11315_vm10, %v11290_v51  ;;  %v9813_v58 = vpop.f32.mrb[148].mxu1 }
 0x7fd   : > { %v10891_v56 = vcombine.low %v9721_v53, %v9813_v58  ;;  %v10892_v33 = vcombine.high %v9721_v53, %v9813_v58  ;;  %v12901_v44 = vpop.f32.mrb[149].mxu1 }
 0x7fe   : > { %v9816_v42 = vpop.f32.mrb[150].mxu1 }
 0x7ff   : > { %v10899_v2 = vrot.slane %v10891_v56, %v19773_v52  ;;  %v10906_v6 = vrot.slane %v10892_v33, %v19773_v52  ;;  %v12902_v22 = vpop.f32.mrb[151].mxu1 }
 0x800   : > { %v9859_v35 = vpop.f32.mrb[152].mxu0 }
 0x801   : > { %v10939_v0 = vcombine.low %v10883_v34, %v10899_v2  ;;  %v10940_v18 = vcombine.high %v10883_v34, %v10899_v2  ;;  %v10955_v40 = vcombine.low %v10890_v9, %v10906_v6  ;;  %v10956_v3 = vcombine.high %v10890_v9, %v10906_v6  ;;  %v12907_v15 = vpop.f32.mrb[153].mxu0 }
 0x802   : > { %v9862_v10 = vpop.f32.mrb[154].mxu0 }
 0x803   : > { %v12908_v29 = vpop.f32.mrb[155].mxu0  ;;  %v10947_v37 = vrot.slane %v10939_v0, %v19774_v19  ;;  %v10954_v47 = vrot.slane %v10940_v18, %v19774_v19  ;;  %v10963_v39 = vrot.slane %v10955_v40, %v19774_v19  ;;  %v10970_v55 = vrot.slane %v10956_v3, %v19774_v19 }
 0x804   : > { %v9905_v21 = vpop.f32.mrb[152].mxu1 }
 0x805   : > { %v12913_v26 = vpop.f32.mrb[153].mxu1 }
 0x806   : > { %v9908_v45 = vpop.f32.mrb[154].mxu1 }
 0x807   : > { %v12914_v30 = vpop.f32.mrb[155].mxu1 }
 0x808   : > { %v9951_v54 = vpop.f32.mrb[156].mxu0 }
 0x809   : > { %v10907_v57 = vcombine.low %v9859_v35, %v9951_v54  ;;  %v10908_v28 = vcombine.high %v9859_v35, %v9951_v54  ;;  %v12919_v1 = vpop.f32.mrb[157].mxu0 }
 0x80a   : > { %v9954_v20 = vpop.f32.mrb[158].mxu0 }
 0x80b   : > { %v12920_v4 = vpop.f32.mrb[159].mxu0  ;;  %v10915_v32 = vrot.slane %v10907_v57, %v19773_v52  ;;  %v10922_v8 = vrot.slane %v10908_v28, %v19773_v52 }
 0x80c   : > { %v9997_v59 = vpop.f32.mrb[156].mxu1 }
 0x80d   : > { %v10923_v62 = vcombine.low %v9905_v21, %v9997_v59  ;;  %v10924_v11 = vcombine.high %v9905_v21, %v9997_v59  ;;  %v12925_v48 = vpop.f32.mrb[157].mxu1 }
 0x80e   : > { %v10000_v14 = vpop.f32.mrb[158].mxu1 }
 0x80f   : > { %v10931_v16 = vrot.slane %v10923_v62, %v19773_v52  ;;  %v10938_v53 = vrot.slane %v10924_v11, %v19773_v52  ;;  %v12926_v17 = vpop.f32.mrb[159].mxu1 }
 0x810   : > { %v10043_v50 = vpop.f32.mrb[160].mxu0 }
 0x811   : > { %v10971_v5 = vcombine.low %v10915_v32, %v10931_v16  ;;  %v10972_v41 = vcombine.high %v10915_v32, %v10931_v16  ;;  %v10987_v63 = vcombine.low %v10922_v8, %v10938_v53  ;;  %v10988_v13 = vcombine.high %v10922_v8, %v10938_v53  ;;  %v12931_v7 = vpop.f32.mrb[161].mxu0 }
 0x812   : > { %v10046_v49 = vpop.f32.mrb[162].mxu0 }
 0x813   : > { %v10979_v23 = vrot.slane %v10971_v5, %v19774_v19  ;;  %v10986_v31 = vrot.slane %v10972_v41, %v19774_v19  ;;  %v10995_v36 = vrot.slane %v10987_v63, %v19774_v19  ;;  %v11002_v25 = vrot.slane %v10988_v13, %v19774_v19  ;;  %v12932_v43 = vpop.f32.mrb[163].mxu0 }
 0x814   : > { %v10089_v38 = vpop.f32.mrb[160].mxu1 }
 0x815   : > { %v11003_v51 = vcombine.low %v10947_v37, %v10979_v23  ;;  %v11004_v61 = vcombine.high %v10947_v37, %v10979_v23  ;;  %v11005_v24 = vcombine.low %v10954_v47, %v10986_v31  ;;  %v11006_v12 = vcombine.high %v10954_v47, %v10986_v31  ;;  %v12937_v46 = vpop.f32.mrb[161].mxu1 }
 0x816   : > { %v11007_v60 = vcombine.low %v10963_v39, %v10995_v36  ;;  %v11008_v27 = vcombine.high %v10963_v39, %v10995_v36  ;;  %v11009_v58 = vcombine.low %v10970_v55, %v11002_v25  ;;  %v11010_v56 = vcombine.high %v10970_v55, %v11002_v25  ;;  %v10092_v33 = vpop.f32.mrb[162].mxu1 }
 0x817   : > { %v11291_v44 = vpack.c.bf16 %v11003_v51, %v11003_v51  ;;  %v11292_v42 = vpack.c.bf16 %v11004_v61, %v11004_v61  ;;  %v11293_v34 = vpack.c.bf16 %v11005_v24, %v11005_v24  ;;  %v11294_v9 = vpack.c.bf16 %v11006_v12, %v11006_v12  ;;  %v12938_v2 = vpop.f32.mrb[163].mxu1 }
 0x818   : > { %v11295_v6 = vpack.c.bf16 %v11007_v60, %v11007_v60  ;;  %v11296_v22 = vpack.c.bf16 %v11008_v27, %v11008_v27  ;;  %v11297_v35 = vpack.c.bf16 %v11009_v58, %v11009_v58  ;;  %v11298_v0 = vpack.c.bf16 %v11010_v56, %v11010_v56  ;;  %v10135_v18 = vpop.f32.mrb[164].mxu0 }
 0x819   : > { %11324 = vst.msk [vmem:[%s13756_s25 + $0x20] sm:$0xf] %vm11315_vm10, %v11291_v44  ;;  %11325 = vst.msk [vmem:[%s13756_s25 + $0x24] sm:$0xf] %vm11315_vm10, %v11292_v42  ;;  %v11011_v40 = vcombine.low %v10043_v50, %v10135_v18  ;;  %v11012_v3 = vcombine.high %v10043_v50, %v10135_v18  ;;  %v12943_v15 = vpop.f32.mrb[165].mxu0 }
 0x81a   : > { %11326 = vst.msk [vmem:[%s13756_s25 + $0x28] sm:$0xf] %vm11315_vm10, %v11293_v34  ;;  %11327 = vst.msk [vmem:[%s13756_s25 + $0x2c] sm:$0xf] %vm11315_vm10, %v11294_v9  ;;  %v10138_v10 = vpop.f32.mrb[166].mxu0 }
 0x81b   : > { %11328 = vst.msk [vmem:[%s13756_s25 + $0x30] sm:$0xf] %vm11315_vm10, %v11295_v6  ;;  %11329 = vst.msk [vmem:[%s13756_s25 + $0x34] sm:$0xf] %vm11315_vm10, %v11296_v22  ;;  %v12944_v29 = vpop.f32.mrb[167].mxu0  ;;  %v11019_v57 = vrot.slane %v11011_v40, %v19773_v52  ;;  %v11026_v28 = vrot.slane %v11012_v3, %v19773_v52 }
 0x81c   : > { %11330 = vst.msk [vmem:[%s13756_s25 + $0x38] sm:$0xf] %vm11315_vm10, %v11297_v35  ;;  %11331 = vst.msk [vmem:[%s13756_s25 + $0x3c] sm:$0xf] %vm11315_vm10, %v11298_v0  ;;  %v10181_v21 = vpop.f32.mrb[164].mxu1 }
 0x81d   : > { %v11027_v26 = vcombine.low %v10089_v38, %v10181_v21  ;;  %v11028_v45 = vcombine.high %v10089_v38, %v10181_v21  ;;  %v12949_v30 = vpop.f32.mrb[165].mxu1 }
 0x81e   : > { %v10184_v54 = vpop.f32.mrb[166].mxu1 }
 0x81f   : > { %v11035_v1 = vrot.slane %v11027_v26, %v19773_v52  ;;  %v11042_v20 = vrot.slane %v11028_v45, %v19773_v52  ;;  %v12950_v4 = vpop.f32.mrb[167].mxu1 }
 0x820   : > { %v10227_v59 = vpop.f32.mrb[168].mxu0 }
 0x821   : > { %v11075_v62 = vcombine.low %v11019_v57, %v11035_v1  ;;  %v11076_v11 = vcombine.high %v11019_v57, %v11035_v1  ;;  %v11091_v48 = vcombine.low %v11026_v28, %v11042_v20  ;;  %v11092_v14 = vcombine.high %v11026_v28, %v11042_v20  ;;  %v12955_v32 = vpop.f32.mrb[169].mxu0 }
 0x822   : > { %v10230_v8 = vpop.f32.mrb[170].mxu0 }
 0x823   : > { %v12956_v16 = vpop.f32.mrb[171].mxu0  ;;  %v11083_v58 = vrot.slane %v11075_v62, %v19774_v19  ;;  %v11090_v56 = vrot.slane %v11076_v11, %v19774_v19  ;;  %v11099_v6 = vrot.slane %v11091_v48, %v19774_v19  ;;  %v11106_v22 = vrot.slane %v11092_v14, %v19774_v19 }
 0x824   : > { %v10273_v53 = vpop.f32.mrb[168].mxu1 }
 0x825   : > { %v12961_v17 = vpop.f32.mrb[169].mxu1 }
 0x826   : > { %v10276_v50 = vpop.f32.mrb[170].mxu1 }
 0x827   : > { %v12962_v5 = vpop.f32.mrb[171].mxu1 }
 0x828   : > { %v10319_v41 = vpop.f32.mrb[172].mxu0 }
 0x829   : > { %v11043_v63 = vcombine.low %v10227_v59, %v10319_v41  ;;  %v11044_v13 = vcombine.high %v10227_v59, %v10319_v41  ;;  %v12967_v7 = vpop.f32.mrb[173].mxu0 }
 0x82a   : > { %v10322_v37 = vpop.f32.mrb[174].mxu0 }
 0x82b   : > { %v12968_v47 = vpop.f32.mrb[175].mxu0  ;;  %v11051_v43 = vrot.slane %v11043_v63, %v19773_v52  ;;  %v11058_v39 = vrot.slane %v11044_v13, %v19773_v52 }
 0x82c   : > { %v10365_v49 = vpop.f32.mrb[172].mxu1 }
 0x82d   : > { %v11059_v23 = vcombine.low %v10273_v53, %v10365_v49  ;;  %v11060_v31 = vcombine.high %v10273_v53, %v10365_v49  ;;  %v12973_v36 = vpop.f32.mrb[173].mxu1 }
 0x82e   : > { %v10368_v25 = vpop.f32.mrb[174].mxu1 }
 0x82f   : > { %v11067_v55 = vrot.slane %v11059_v23, %v19773_v52  ;;  %v11074_v38 = vrot.slane %v11060_v31, %v19773_v52  ;;  %v12974_v51 = vpop.f32.mrb[175].mxu1 }
 0x830   : > { %v10411_v61 = vpop.f32.mrb[176].mxu0 }
 0x831   : > { %v11107_v24 = vcombine.low %v11051_v43, %v11067_v55  ;;  %v11108_v12 = vcombine.high %v11051_v43, %v11067_v55  ;;  %v11123_v46 = vcombine.low %v11058_v39, %v11074_v38  ;;  %v11124_v60 = vcombine.high %v11058_v39, %v11074_v38  ;;  %v12979_v27 = vpop.f32.mrb[177].mxu0 }
 0x832   : > { %v10414_v33 = vpop.f32.mrb[178].mxu0 }
 0x833   : > { %v11115_v44 = vrot.slane %v11107_v24, %v19774_v19  ;;  %v11122_v42 = vrot.slane %v11108_v12, %v19774_v19  ;;  %v11131_v34 = vrot.slane %v11123_v46, %v19774_v19  ;;  %v11138_v9 = vrot.slane %v11124_v60, %v19774_v19  ;;  %v12980_v2 = vpop.f32.mrb[179].mxu0 }
 0x834   : > { %v10457_v35 = vpop.f32.mrb[176].mxu1 }
 0x835   : > { %v11139_v0 = vcombine.low %v11083_v58, %v11115_v44  ;;  %v11140_v18 = vcombine.high %v11083_v58, %v11115_v44  ;;  %v11141_v40 = vcombine.low %v11090_v56, %v11122_v42  ;;  %v11142_v3 = vcombine.high %v11090_v56, %v11122_v42  ;;  %v12985_v15 = vpop.f32.mrb[177].mxu1 }
 0x836   : > { %v11143_v10 = vcombine.low %v11099_v6, %v11131_v34  ;;  %v11144_v29 = vcombine.high %v11099_v6, %v11131_v34  ;;  %v11145_v21 = vcombine.low %v11106_v22, %v11138_v9  ;;  %v11146_v26 = vcombine.high %v11106_v22, %v11138_v9  ;;  %v10460_v45 = vpop.f32.mrb[178].mxu1 }
 0x837   : > { %v11299_v30 = vpack.c.bf16 %v11139_v0, %v11139_v0  ;;  %v11300_v54 = vpack.c.bf16 %v11140_v18, %v11140_v18  ;;  %v11301_v57 = vpack.c.bf16 %v11141_v40, %v11141_v40  ;;  %v11302_v28 = vpack.c.bf16 %v11142_v3, %v11142_v3  ;;  %v12986_v1 = vpop.f32.mrb[179].mxu1 }
 0x838   : > { %v11303_v20 = vpack.c.bf16 %v11143_v10, %v11143_v10  ;;  %v11304_v4 = vpack.c.bf16 %v11144_v29, %v11144_v29  ;;  %v11305_v59 = vpack.c.bf16 %v11145_v21, %v11145_v21  ;;  %v11306_v62 = vpack.c.bf16 %v11146_v26, %v11146_v26  ;;  %v10503_v11 = vpop.f32.mrb[180].mxu0 }
 0x839   : > { %11332 = vst.msk [vmem:[%s13756_s25 + $0x40] sm:$0xf] %vm11315_vm10, %v11299_v30  ;;  %11333 = vst.msk [vmem:[%s13756_s25 + $0x44] sm:$0xf] %vm11315_vm10, %v11300_v54  ;;  %v11147_v48 = vcombine.low %v10411_v61, %v10503_v11  ;;  %v11148_v14 = vcombine.high %v10411_v61, %v10503_v11  ;;  %v12991_v32 = vpop.f32.mrb[181].mxu0 }
 0x83a   : > { %11334 = vst.msk [vmem:[%s13756_s25 + $0x48] sm:$0xf] %vm11315_vm10, %v11301_v57  ;;  %11335 = vst.msk [vmem:[%s13756_s25 + $0x4c] sm:$0xf] %vm11315_vm10, %v11302_v28  ;;  %v10506_v8 = vpop.f32.mrb[182].mxu0 }
 0x83b   : > { %11336 = vst.msk [vmem:[%s13756_s25 + $0x50] sm:$0xf] %vm11315_vm10, %v11303_v20  ;;  %11337 = vst.msk [vmem:[%s13756_s25 + $0x54] sm:$0xf] %vm11315_vm10, %v11304_v4  ;;  %v12992_v16 = vpop.f32.mrb[183].mxu0  ;;  %v11155_v63 = vrot.slane %v11147_v48, %v19773_v52  ;;  %v11162_v13 = vrot.slane %v11148_v14, %v19773_v52 }
 0x83c   : > { %11338 = vst.msk [vmem:[%s13756_s25 + $0x58] sm:$0xf] %vm11315_vm10, %v11305_v59  ;;  %11339 = vst.msk [vmem:[%s13756_s25 + $0x5c] sm:$0xf] %vm11315_vm10, %v11306_v62  ;;  %v10549_v53 = vpop.f32.mrb[180].mxu1 }
 0x83d   : > { %v11163_v17 = vcombine.low %v10457_v35, %v10549_v53  ;;  %v11164_v50 = vcombine.high %v10457_v35, %v10549_v53  ;;  %v12997_v5 = vpop.f32.mrb[181].mxu1 }
 0x83e   : > { %v10552_v41 = vpop.f32.mrb[182].mxu1 }
 0x83f   : > { %v11171_v7 = vrot.slane %v11163_v17, %v19773_v52  ;;  %v11178_v37 = vrot.slane %v11164_v50, %v19773_v52  ;;  %v12998_v47 = vpop.f32.mrb[183].mxu1 }
 0x840   : > { %v10595_v49 = vpop.f32.mrb[184].mxu0 }
 0x841   : > { %v11211_v23 = vcombine.low %v11155_v63, %v11171_v7  ;;  %v11212_v31 = vcombine.high %v11155_v63, %v11171_v7  ;;  %v11227_v36 = vcombine.low %v11162_v13, %v11178_v37  ;;  %v11228_v25 = vcombine.high %v11162_v13, %v11178_v37  ;;  %v13003_v43 = vpop.f32.mrb[185].mxu0 }
 0x842   : > { %v10598_v39 = vpop.f32.mrb[186].mxu0 }
 0x843   : > { %v13004_v55 = vpop.f32.mrb[187].mxu0  ;;  %v11219_v10 = vrot.slane %v11211_v23, %v19774_v19  ;;  %v11226_v29 = vrot.slane %v11212_v31, %v19774_v19  ;;  %v11235_v54 = vrot.slane %v11227_v36, %v19774_v19 }
 0x844   : > { %v10641_v38 = vpop.f32.mrb[184].mxu1 }
 0x845   : > { %v13009_v51 = vpop.f32.mrb[185].mxu1 }
 0x846   : > { %v10644_v61 = vpop.f32.mrb[186].mxu1 }
 0x847   : > { %v13010_v24 = vpop.f32.mrb[187].mxu1 }
 0x848   : > { %v10687_v12 = vpop.f32.mrb[188].mxu0 }
 0x849   : > { %v11179_v46 = vcombine.low %v10595_v49, %v10687_v12  ;;  %v11180_v60 = vcombine.high %v10595_v49, %v10687_v12  ;;  %v13015_v27 = vpop.f32.mrb[189].mxu0 }
 0x84a   : > { %v10690_v58 = vpop.f32.mrb[190].mxu0 }
 0x84b   : > { %v13016_v56 = vpop.f32.mrb[191].mxu0  ;;  %v11187_v2 = vrot.slane %v11179_v46, %v19773_v52  ;;  %v11194_v6 = vrot.slane %v11180_v60, %v19773_v52 }
 0x84c   : > { %v10733_v33 = vpop.f32.mrb[188].mxu1 }
 0x84d   : > { %v11195_v44 = vcombine.low %v10641_v38, %v10733_v33  ;;  %v11196_v42 = vcombine.high %v10641_v38, %v10733_v33  ;;  %v13021_v34 = vpop.f32.mrb[189].mxu1 }
 0x84e   : > { %v10736_v9 = vpop.f32.mrb[190].mxu1 }
 0x84f   : > { %v11203_v22 = vrot.slane %v11195_v44, %v19773_v52  ;;  %v11210_v35 = vrot.slane %v11196_v42, %v19773_v52  ;;  %v13022_v0 = vpop.f32.mrb[191].mxu1  ;;  %v11242_v52 = vrot.slane %v11228_v25, %v19774_v19 }
 0x851   : > { %v11243_v18 = vcombine.low %v11187_v2, %v11203_v22  ;;  %v11244_v40 = vcombine.high %v11187_v2, %v11203_v22  ;;  %v11259_v3 = vcombine.low %v11194_v6, %v11210_v35  ;;  %v11260_v15 = vcombine.high %v11194_v6, %v11210_v35 }
 0x853   : > { %v11251_v21 = vrot.slane %v11243_v18, %v19774_v19  ;;  %v11258_v26 = vrot.slane %v11244_v40, %v19774_v19  ;;  %v11267_v45 = vrot.slane %v11259_v3, %v19774_v19  ;;  %v11274_v30 = vrot.slane %v11260_v15, %v19774_v19 }
 0x855   : > { %v11275_v57 = vcombine.low %v11219_v10, %v11251_v21  ;;  %v11276_v28 = vcombine.high %v11219_v10, %v11251_v21  ;;  %v11277_v1 = vcombine.low %v11226_v29, %v11258_v26  ;;  %v11278_v20 = vcombine.high %v11226_v29, %v11258_v26 }
 0x856   : > { %v11279_v4 = vcombine.low %v11235_v54, %v11267_v45  ;;  %v11280_v59 = vcombine.high %v11235_v54, %v11267_v45  ;;  %v11281_v62 = vcombine.low %v11242_v52, %v11274_v30  ;;  %v11282_v11 = vcombine.high %v11242_v52, %v11274_v30 }
 0x857   : > { %v11307_v48 = vpack.c.bf16 %v11275_v57, %v11275_v57  ;;  %v11308_v14 = vpack.c.bf16 %v11276_v28, %v11276_v28  ;;  %v11309_v32 = vpack.c.bf16 %v11277_v1, %v11277_v1  ;;  %v11310_v19 = vpack.c.bf16 %v11278_v20, %v11278_v20 }
 0x858   : > { %v11311_v8 = vpack.c.bf16 %v11279_v4, %v11279_v4  ;;  %v11312_v16 = vpack.c.bf16 %v11280_v59, %v11280_v59  ;;  %v11313_v53 = vpack.c.bf16 %v11281_v62, %v11281_v62  ;;  %v11314_v17 = vpack.c.bf16 %v11282_v11, %v11282_v11 }
 0x859   : > { %11340 = vst.msk [vmem:[%s13756_s25 + $0x60] sm:$0xf] %vm11315_vm10, %v11307_v48  ;;  %11341 = vst.msk [vmem:[%s13756_s25 + $0x64] sm:$0xf] %vm11315_vm10, %v11308_v14 }
 0x85a   : > { %11342 = vst.msk [vmem:[%s13756_s25 + $0x68] sm:$0xf] %vm11315_vm10, %v11309_v32  ;;  %11343 = vst.msk [vmem:[%s13756_s25 + $0x6c] sm:$0xf] %vm11315_vm10, %v11310_v19 }
 0x85b   : > { %11344 = vst.msk [vmem:[%s13756_s25 + $0x70] sm:$0xf] %vm11315_vm10, %v11311_v8  ;;  %11345 = vst.msk [vmem:[%s13756_s25 + $0x74] sm:$0xf] %vm11315_vm10, %v11312_v16 }
 0x85c   : > { %11346 = vst.msk [vmem:[%s13756_s25 + $0x78] sm:$0xf] %vm11315_vm10, %v11313_v53  ;;  %11347 = vst.msk [vmem:[%s13756_s25 + $0x7c] sm:$0xf] %vm11315_vm10, %v11314_v17 }
 0x85d PF: > { %vm11348_vm11 = vcmask 125952   ;;  %v19775_v50 = vld [vmem:[#allocation6_spill] sm:$0xff]  ;;  %v19776_v5 = vld [vmem:[#allocation7_spill] sm:$0xff]  ;;  %v19777_v41 = vld [vmem:[#allocation8_spill] sm:$0xff] }
 0x85e   : > { %11349 = vst.msk [vmem:[#allocation4] sm:$0xf] %vm11348_vm11, %v19775_v50  ;;  %11350 = vst.msk [vmem:[#allocation4 + $0x4] sm:$0xf] %vm11348_vm11, %v19776_v5  ;;  %v19778_v63 = vld [vmem:[#allocation9_spill] sm:$0xff]  ;;  %v19779_v13 = vld [vmem:[#allocation10_spill] sm:$0xff] }
 0x85f   : > { %11351 = vst.msk [vmem:[#allocation4 + $0x8] sm:$0xf] %vm11348_vm11, %v19777_v41  ;;  %11352 = vst.msk [vmem:[#allocation4 + $0xc] sm:$0xf] %vm11348_vm11, %v19778_v63  ;;  %v19780_v7 = vld [vmem:[#allocation11_spill] sm:$0xff]  ;;  %v19781_v37 = vld [vmem:[#allocation12_spill] sm:$0xff] }
 0x860   : > { %11353 = vst.msk [vmem:[#allocation4 + $0x10] sm:$0xf] %vm11348_vm11, %v19779_v13  ;;  %11354 = vst.msk [vmem:[#allocation4 + $0x14] sm:$0xf] %vm11348_vm11, %v19780_v7  ;;  %v19782_v47 = vld [vmem:[#allocation13_spill] sm:$0xff]  ;;  %v19783_v49 = vld [vmem:[#allocation14_spill] sm:$0xff] }
 0x861   : > { %11355 = vst.msk [vmem:[#allocation4 + $0x18] sm:$0xf] %vm11348_vm11, %v19781_v37  ;;  %11356 = vst.msk [vmem:[#allocation4 + $0x1c] sm:$0xf] %vm11348_vm11, %v19782_v47  ;;  %v19784_v23 = vld [vmem:[#allocation15_spill] sm:$0xff]  ;;  %v19785_v31 = vld [vmem:[#allocation16_spill] sm:$0xff] }
 0x862   : > { %11357 = vst.msk [vmem:[#allocation4 + $0x20] sm:$0xf] %vm11348_vm11, %v19783_v49  ;;  %11358 = vst.msk [vmem:[#allocation4 + $0x24] sm:$0xf] %vm11348_vm11, %v19784_v23  ;;  %v19786_v36 = vld [vmem:[#allocation17_spill] sm:$0xff]  ;;  %v19787_v25 = vld [vmem:[#allocation18_spill] sm:$0xff] }
 0x863   : > { %11359 = vst.msk [vmem:[#allocation4 + $0x28] sm:$0xf] %vm11348_vm11, %v19785_v31  ;;  %11360 = vst.msk [vmem:[#allocation4 + $0x2c] sm:$0xf] %vm11348_vm11, %v19786_v36  ;;  %v19788_v43 = vld [vmem:[#allocation19_spill] sm:$0xff]  ;;  %v19789_v39 = vld [vmem:[#allocation20_spill] sm:$0xff] }
 0x864   : > { %11361 = vst.msk [vmem:[#allocation4 + $0x30] sm:$0xf] %vm11348_vm11, %v19787_v25  ;;  %11362 = vst.msk [vmem:[#allocation4 + $0x34] sm:$0xf] %vm11348_vm11, %v19788_v43  ;;  %v19790_v55 = vld [vmem:[#allocation21_spill] sm:$0xff]  ;;  %v19791_v38 = vld [vmem:[#allocation22_spill] sm:$0xff] }
 0x865   : > { %11363 = vst.msk [vmem:[#allocation4 + $0x38] sm:$0xf] %vm11348_vm11, %v19789_v39  ;;  %11364 = vst.msk [vmem:[#allocation4 + $0x3c] sm:$0xf] %vm11348_vm11, %v19790_v55  ;;  %v19792_v51 = vld [vmem:[#allocation23_spill] sm:$0xff]  ;;  %v19793_v61 = vld [vmem:[#allocation24_spill] sm:$0xff] }
 0x866   : > { %11365 = vst.msk [vmem:[#allocation4 + $0x40] sm:$0xf] %vm11348_vm11, %v19791_v38  ;;  %11366 = vst.msk [vmem:[#allocation4 + $0x44] sm:$0xf] %vm11348_vm11, %v19792_v51  ;;  %v19794_v24 = vld [vmem:[#allocation25_spill] sm:$0xff]  ;;  %v19795_v12 = vld [vmem:[#allocation26_spill] sm:$0xff] }
 0x867   : > { %11367 = vst.msk [vmem:[#allocation4 + $0x48] sm:$0xf] %vm11348_vm11, %v19793_v61  ;;  %11368 = vst.msk [vmem:[#allocation4 + $0x4c] sm:$0xf] %vm11348_vm11, %v19794_v24  ;;  %v19796_v46 = vld [vmem:[#allocation40_spill] sm:$0xff]  ;;  %v19797_v60 = vld [vmem:[#allocation41_spill] sm:$0xff] }
 0x868   : > { %11369 = vst.msk [vmem:[#allocation4 + $0x50] sm:$0xf] %vm11348_vm11, %v19795_v12  ;;  %11370 = vst.msk [vmem:[#allocation4 + $0x54] sm:$0xf] %vm11348_vm11, %v19796_v46  ;;  %v19798_v27 = vld [vmem:[#allocation44_spill] sm:$0xff]  ;;  %v19799_v58 = vld [vmem:[#allocation45_spill] sm:$0xff] }
 0x869   : > { %11371 = vst.msk [vmem:[#allocation4 + $0x58] sm:$0xf] %vm11348_vm11, %v19797_v60  ;;  %11372 = vst.msk [vmem:[#allocation4 + $0x5c] sm:$0xf] %vm11348_vm11, %v19798_v27  ;;  %v19800_v56 = vld [vmem:[#allocation48_spill] sm:$0xff]  ;;  %v19801_v33 = vld [vmem:[#allocation49_spill] sm:$0xff] }
 0x86a   : > { %11373 = vst.msk [vmem:[#allocation4 + $0x60] sm:$0xf] %vm11348_vm11, %v19799_v58  ;;  %11374 = vst.msk [vmem:[#allocation4 + $0x64] sm:$0xf] %vm11348_vm11, %v19800_v56  ;;  %v19802_v44 = vld [vmem:[#allocation52_spill] sm:$0xff]  ;;  %v19803_v42 = vld [vmem:[#allocation53_spill] sm:$0xff] }
 0x86b   : > { %11375 = vst.msk [vmem:[#allocation4 + $0x68] sm:$0xf] %vm11348_vm11, %v19801_v33  ;;  %11376 = vst.msk [vmem:[#allocation4 + $0x6c] sm:$0xf] %vm11348_vm11, %v19802_v44  ;;  %v19804_v34 = vld [vmem:[#allocation56_spill] sm:$0xff]  ;;  %v19805_v9 = vld [vmem:[#allocation57_spill] sm:$0xff] }
 0x86c   : > { %11377 = vst.msk [vmem:[#allocation4 + $0x70] sm:$0xf] %vm11348_vm11, %v19803_v42  ;;  %11378 = vst.msk [vmem:[#allocation4 + $0x74] sm:$0xf] %vm11348_vm11, %v19804_v34  ;;  %v19806_v2 = vld [vmem:[#allocation60_spill] sm:$0xff]  ;;  %v19807_v6 = vld [vmem:[#allocation61_spill] sm:$0xff] }
 0x86d   : > { %11379 = vst.msk [vmem:[#allocation4 + $0x78] sm:$0xf] %vm11348_vm11, %v19805_v9  ;;  %11380 = vst.msk [vmem:[#allocation4 + $0x7c] sm:$0xf] %vm11348_vm11, %v19806_v2  ;;  %v19808_v22 = vld [vmem:[#allocation64_spill] sm:$0xff]  ;;  %v19809_v35 = vld [vmem:[#allocation65_spill] sm:$0xff] }
 0x86e   : > { %11381 = vst.msk [vmem:[#allocation5] sm:$0xf] %vm11348_vm11, %v19807_v6  ;;  %11382 = vst.msk [vmem:[#allocation5 + $0x4] sm:$0xf] %vm11348_vm11, %v19808_v22  ;;  %v19810_v0 = vld [vmem:[#allocation68_spill] sm:$0xff]  ;;  %v19811_v18 = vld [vmem:[#allocation69_spill] sm:$0xff] }
 0x86f   : > { %11383 = vst.msk [vmem:[#allocation5 + $0x8] sm:$0xf] %vm11348_vm11, %v19809_v35  ;;  %11384 = vst.msk [vmem:[#allocation5 + $0xc] sm:$0xf] %vm11348_vm11, %v19810_v0  ;;  %v19812_v40 = vld [vmem:[#allocation72_spill] sm:$0xff]  ;;  %v19813_v3 = vld [vmem:[#allocation73_spill] sm:$0xff] }
 0x870   : > { %11385 = vst.msk [vmem:[#allocation5 + $0x10] sm:$0xf] %vm11348_vm11, %v19811_v18  ;;  %11386 = vst.msk [vmem:[#allocation5 + $0x14] sm:$0xf] %vm11348_vm11, %v19812_v40  ;;  %v19814_v15 = vld [vmem:[#allocation76_spill] sm:$0xff]  ;;  %v19815_v10 = vld [vmem:[#allocation77_spill] sm:$0xff] }
 0x871   : > { %11387 = vst.msk [vmem:[#allocation5 + $0x18] sm:$0xf] %vm11348_vm11, %v19813_v3  ;;  %11388 = vst.msk [vmem:[#allocation5 + $0x1c] sm:$0xf] %vm11348_vm11, %v19814_v15  ;;  %v19816_v29 = vld [vmem:[#allocation79_spill] sm:$0xff]  ;;  %v19817_v21 = vld [vmem:[#allocation80_spill] sm:$0xff] }
 0x872   : > { %11389 = vst.msk [vmem:[#allocation5 + $0x20] sm:$0xf] %vm11348_vm11, %v19815_v10  ;;  %11390 = vst.msk [vmem:[#allocation5 + $0x24] sm:$0xf] %vm11348_vm11, %v19816_v29  ;;  %v19818_v26 = vld [vmem:[#allocation82_spill] sm:$0xff]  ;;  %v19819_v45 = vld [vmem:[#allocation83_spill] sm:$0xff] }
 0x873   : > { %11391 = vst.msk [vmem:[#allocation5 + $0x28] sm:$0xf] %vm11348_vm11, %v19817_v21  ;;  %11392 = vst.msk [vmem:[#allocation5 + $0x2c] sm:$0xf] %vm11348_vm11, %v19818_v26  ;;  %v19820_v30 = vld [vmem:[#allocation84_spill] sm:$0xff]  ;;  %v19821_v54 = vld [vmem:[#allocation86_spill] sm:$0xff] }
 0x874   : > { %11393 = vst.msk [vmem:[#allocation5 + $0x30] sm:$0xf] %vm11348_vm11, %v19819_v45  ;;  %11394 = vst.msk [vmem:[#allocation5 + $0x34] sm:$0xf] %vm11348_vm11, %v19820_v30  ;;  %v19822_v52 = vld [vmem:[#allocation87_spill] sm:$0xff]  ;;  %v19823_v57 = vld [vmem:[#allocation88_spill] sm:$0xff] }
 0x875   : > { %11395 = vst.msk [vmem:[#allocation5 + $0x38] sm:$0xf] %vm11348_vm11, %v19821_v54  ;;  %11396 = vst.msk [vmem:[#allocation5 + $0x3c] sm:$0xf] %vm11348_vm11, %v19822_v52  ;;  %v19824_v28 = vld [vmem:[#allocation89_spill] sm:$0xff]  ;;  %v19825_v1 = vld [vmem:[#allocation90_spill] sm:$0xff] }
 0x876   : > { %11397 = vst.msk [vmem:[#allocation5 + $0x40] sm:$0xf] %vm11348_vm11, %v19823_v57  ;;  %11398 = vst.msk [vmem:[#allocation5 + $0x44] sm:$0xf] %vm11348_vm11, %v19824_v28  ;;  %v19826_v20 = vld [vmem:[#allocation91_spill] sm:$0xff]  ;;  %v19827_v4 = vld [vmem:[#allocation92_spill] sm:$0xff] }
 0x877   : > { %11399 = vst.msk [vmem:[#allocation5 + $0x48] sm:$0xf] %vm11348_vm11, %v19825_v1  ;;  %11400 = vst.msk [vmem:[#allocation5 + $0x4c] sm:$0xf] %vm11348_vm11, %v19826_v20  ;;  %v19828_v59 = vld [vmem:[#allocation93_spill] sm:$0xff]  ;;  %v19829_v62 = vld [vmem:[#allocation94_spill] sm:$0xff] }
 0x878   : > { %11401 = vst.msk [vmem:[#allocation5 + $0x50] sm:$0xf] %vm11348_vm11, %v19827_v4  ;;  %11402 = vst.msk [vmem:[#allocation5 + $0x54] sm:$0xf] %vm11348_vm11, %v19828_v59  ;;  %v19830_v11 = vld [vmem:[#allocation95_spill] sm:$0xff]  ;;  %v19831_v48 = vld [vmem:[#allocation96_spill] sm:$0xff] }
 0x879   : > { %11403 = vst.msk [vmem:[#allocation5 + $0x58] sm:$0xf] %vm11348_vm11, %v19829_v62  ;;  %11404 = vst.msk [vmem:[#allocation5 + $0x5c] sm:$0xf] %vm11348_vm11, %v19830_v11  ;;  %v19832_v14 = vld [vmem:[#allocation97_spill] sm:$0xff]  ;;  %v19833_v32 = vld [vmem:[#allocation98_spill] sm:$0xff] }
 0x87a   : > { %11405 = vst.msk [vmem:[#allocation5 + $0x60] sm:$0xf] %vm11348_vm11, %v19831_v48  ;;  %11406 = vst.msk [vmem:[#allocation5 + $0x64] sm:$0xf] %vm11348_vm11, %v19832_v14  ;;  %v19834_v19 = vld [vmem:[#allocation99_spill] sm:$0xff]  ;;  %v19835_v8 = vld [vmem:[#allocation100_spill] sm:$0xff] }
 0x87b   : > { %11407 = vst.msk [vmem:[#allocation5 + $0x68] sm:$0xf] %vm11348_vm11, %v19833_v32  ;;  %11408 = vst.msk [vmem:[#allocation5 + $0x6c] sm:$0xf] %vm11348_vm11, %v19834_v19  ;;  %v19836_v16 = vld [vmem:[#allocation101_spill] sm:$0xff]  ;;  %v19837_v53 = vld [vmem:[#allocation102_spill] sm:$0xff] }
 0x87c   : > { %11409 = vst.msk [vmem:[#allocation5 + $0x70] sm:$0xf] %vm11348_vm11, %v19835_v8  ;;  %11410 = vst.msk [vmem:[#allocation5 + $0x74] sm:$0xf] %vm11348_vm11, %v19836_v16  ;;  %v19838_v17 = vld [vmem:[#allocation103_spill] sm:$0xff]  ;;  %v19839_v50 = vld [vmem:[#allocation29_spill] sm:$0xff] }
 0x87d   : > { %11411 = vst.msk [vmem:[#allocation5 + $0x78] sm:$0xf] %vm11348_vm11, %v19837_v53  ;;  %11412 = vst.msk [vmem:[#allocation5 + $0x7c] sm:$0xf] %vm11348_vm11, %v19838_v17  ;;  %v19840_v5 = vld [vmem:[#allocation32_spill] sm:$0xff]  ;;  %v19841_v41 = vld [vmem:[#allocation30_spill] sm:$0xff] }
 0x87e   : > { %11413 = vst.msk [vmem:[#allocation2] sm:$0xf] %vm11348_vm11, %v19839_v50  ;;  %11414 = vst.msk [vmem:[#allocation2 + $0x4] sm:$0xf] %vm11348_vm11, %v19840_v5  ;;  %v19842_v63 = vld [vmem:[#allocation34_spill] sm:$0xff]  ;;  %v19843_v13 = vld [vmem:[#allocation31_spill] sm:$0xff] }
 0x87f   : > { %11415 = vst.msk [vmem:[#allocation2 + $0x8] sm:$0xf] %vm11348_vm11, %v19841_v41  ;;  %11416 = vst.msk [vmem:[#allocation2 + $0xc] sm:$0xf] %vm11348_vm11, %v19842_v63  ;;  %v19844_v7 = vld [vmem:[#allocation36_spill] sm:$0xff]  ;;  %v19845_v37 = vld [vmem:[#allocation33_spill] sm:$0xff] }
 0x880   : > { %11417 = vst.msk [vmem:[#allocation2 + $0x10] sm:$0xf] %vm11348_vm11, %v19843_v13  ;;  %11418 = vst.msk [vmem:[#allocation2 + $0x14] sm:$0xf] %vm11348_vm11, %v19844_v7  ;;  %v19846_v47 = vld [vmem:[#allocation38_spill] sm:$0xff]  ;;  %v19847_v49 = vld [vmem:[#allocation35_spill] sm:$0xff] }
 0x881   : > { %11419 = vst.msk [vmem:[#allocation2 + $0x18] sm:$0xf] %vm11348_vm11, %v19845_v37  ;;  %11420 = vst.msk [vmem:[#allocation2 + $0x1c] sm:$0xf] %vm11348_vm11, %v19846_v47  ;;  %v19848_v23 = vld [vmem:[#allocation42_spill] sm:$0xff]  ;;  %v19849_v31 = vld [vmem:[#allocation37_spill] sm:$0xff] }
 0x882   : > { %11421 = vst.msk [vmem:[#allocation2 + $0x20] sm:$0xf] %vm11348_vm11, %v19847_v49  ;;  %11422 = vst.msk [vmem:[#allocation2 + $0x24] sm:$0xf] %vm11348_vm11, %v19848_v23  ;;  %v19850_v36 = vld [vmem:[#allocation46_spill] sm:$0xff]  ;;  %v19851_v25 = vld [vmem:[#allocation39_spill] sm:$0xff] }
 0x883   : > { %11423 = vst.msk [vmem:[#allocation2 + $0x28] sm:$0xf] %vm11348_vm11, %v19849_v31  ;;  %11424 = vst.msk [vmem:[#allocation2 + $0x2c] sm:$0xf] %vm11348_vm11, %v19850_v36  ;;  %v19852_v43 = vld [vmem:[#allocation50_spill] sm:$0xff]  ;;  %v19853_v39 = vld [vmem:[#allocation43_spill] sm:$0xff] }
 0x884   : > { %11425 = vst.msk [vmem:[#allocation2 + $0x30] sm:$0xf] %vm11348_vm11, %v19851_v25  ;;  %11426 = vst.msk [vmem:[#allocation2 + $0x34] sm:$0xf] %vm11348_vm11, %v19852_v43  ;;  %v19854_v55 = vld [vmem:[#allocation54_spill] sm:$0xff]  ;;  %v19855_v38 = vld [vmem:[#allocation47_spill] sm:$0xff] }
 0x885   : > { %11427 = vst.msk [vmem:[#allocation2 + $0x38] sm:$0xf] %vm11348_vm11, %v19853_v39  ;;  %11428 = vst.msk [vmem:[#allocation2 + $0x3c] sm:$0xf] %vm11348_vm11, %v19854_v55  ;;  %v19856_v51 = vld [vmem:[#allocation58_spill] sm:$0xff]  ;;  %v19857_v61 = vld [vmem:[#allocation51_spill] sm:$0xff] }
 0x886   : > { %11429 = vst.msk [vmem:[#allocation2 + $0x40] sm:$0xf] %vm11348_vm11, %v19855_v38  ;;  %11430 = vst.msk [vmem:[#allocation2 + $0x44] sm:$0xf] %vm11348_vm11, %v19856_v51  ;;  %v19858_v24 = vld [vmem:[#allocation62_spill] sm:$0xff]  ;;  %v19859_v12 = vld [vmem:[#allocation55_spill] sm:$0xff] }
 0x887   : > { %11431 = vst.msk [vmem:[#allocation2 + $0x48] sm:$0xf] %vm11348_vm11, %v19857_v61  ;;  %11432 = vst.msk [vmem:[#allocation2 + $0x4c] sm:$0xf] %vm11348_vm11, %v19858_v24  ;;  %v19860_v46 = vld [vmem:[#allocation66_spill] sm:$0xff]  ;;  %v19861_v60 = vld [vmem:[#allocation59_spill] sm:$0xff] }
 0x888   : > { %11433 = vst.msk [vmem:[#allocation2 + $0x50] sm:$0xf] %vm11348_vm11, %v19859_v12  ;;  %11434 = vst.msk [vmem:[#allocation2 + $0x54] sm:$0xf] %vm11348_vm11, %v19860_v46  ;;  %v19862_v27 = vld [vmem:[#allocation70_spill] sm:$0xff]  ;;  %v19863_v58 = vld [vmem:[#allocation63_spill] sm:$0xff] }
 0x889   : > { %11435 = vst.msk [vmem:[#allocation2 + $0x58] sm:$0xf] %vm11348_vm11, %v19861_v60  ;;  %11436 = vst.msk [vmem:[#allocation2 + $0x5c] sm:$0xf] %vm11348_vm11, %v19862_v27  ;;  %v19864_v56 = vld [vmem:[#allocation74_spill] sm:$0xff]  ;;  %v19865_v33 = vld [vmem:[#allocation67_spill] sm:$0xff] }
 0x88a   : > { %11437 = vst.msk [vmem:[#allocation2 + $0x60] sm:$0xf] %vm11348_vm11, %v19863_v58  ;;  %11438 = vst.msk [vmem:[#allocation2 + $0x64] sm:$0xf] %vm11348_vm11, %v19864_v56  ;;  %v19866_v44 = vld [vmem:[#allocation78_spill] sm:$0xff]  ;;  %v19867_v42 = vld [vmem:[#allocation71_spill] sm:$0xff] }
 0x88b   : > { %11439 = vst.msk [vmem:[#allocation2 + $0x68] sm:$0xf] %vm11348_vm11, %v19865_v33  ;;  %11440 = vst.msk [vmem:[#allocation2 + $0x6c] sm:$0xf] %vm11348_vm11, %v19866_v44  ;;  %v19868_v34 = vld [vmem:[#allocation81_spill] sm:$0xff]  ;;  %v19869_v9 = vld [vmem:[#allocation75_spill] sm:$0xff] }
 0x88c   : > { %11441 = vst.msk [vmem:[#allocation2 + $0x70] sm:$0xf] %vm11348_vm11, %v19867_v42  ;;  %11442 = vst.msk [vmem:[#allocation2 + $0x74] sm:$0xf] %vm11348_vm11, %v19868_v34  ;;  %v19870_v2 = vld [vmem:[#allocation85_spill] sm:$0xff]  ;;  %v19871_v6 = vld [vmem:[#allocation104_spill] sm:$0xff] }
 0x88d   : > { %11443 = vst.msk [vmem:[#allocation2 + $0x78] sm:$0xf] %vm11348_vm11, %v19869_v9  ;;  %11444 = vst.msk [vmem:[#allocation2 + $0x7c] sm:$0xf] %vm11348_vm11, %v19870_v2  ;;  %v19872_v22 = vld [vmem:[#allocation105_spill] sm:$0xff]  ;;  %v19873_v35 = vld [vmem:[#allocation106_spill] sm:$0xff] }
 0x88e   : > { %11445 = vst.msk [vmem:[#allocation3] sm:$0xf] %vm11348_vm11, %v19871_v6  ;;  %11446 = vst.msk [vmem:[#allocation3 + $0x4] sm:$0xf] %vm11348_vm11, %v19872_v22  ;;  %v19874_v0 = vld [vmem:[#allocation107_spill] sm:$0xff]  ;;  %v19875_v18 = vld [vmem:[#allocation108_spill] sm:$0xff] }
 0x88f   : > { %11447 = vst.msk [vmem:[#allocation3 + $0x8] sm:$0xf] %vm11348_vm11, %v19873_v35  ;;  %11448 = vst.msk [vmem:[#allocation3 + $0xc] sm:$0xf] %vm11348_vm11, %v19874_v0  ;;  %v19876_v40 = vld [vmem:[#allocation109_spill] sm:$0xff]  ;;  %v19877_v3 = vld [vmem:[#allocation110_spill] sm:$0xff] }
 0x890   : > { %11449 = vst.msk [vmem:[#allocation3 + $0x10] sm:$0xf] %vm11348_vm11, %v19875_v18  ;;  %11450 = vst.msk [vmem:[#allocation3 + $0x14] sm:$0xf] %vm11348_vm11, %v19876_v40  ;;  %v19878_v15 = vld [vmem:[#allocation111_spill] sm:$0xff]  ;;  %v19879_v10 = vld [vmem:[#allocation112_spill] sm:$0xff] }
 0x891   : > { %11451 = vst.msk [vmem:[#allocation3 + $0x18] sm:$0xf] %vm11348_vm11, %v19877_v3  ;;  %11452 = vst.msk [vmem:[#allocation3 + $0x1c] sm:$0xf] %vm11348_vm11, %v19878_v15  ;;  %v19880_v29 = vld [vmem:[#allocation113_spill] sm:$0xff]  ;;  %v19881_v21 = vld [vmem:[#allocation114_spill] sm:$0xff] }
 0x892   : > { %11453 = vst.msk [vmem:[#allocation3 + $0x20] sm:$0xf] %vm11348_vm11, %v19879_v10  ;;  %11454 = vst.msk [vmem:[#allocation3 + $0x24] sm:$0xf] %vm11348_vm11, %v19880_v29  ;;  %v19882_v26 = vld [vmem:[#allocation115_spill] sm:$0xff]  ;;  %v19883_v45 = vld [vmem:[#allocation116_spill] sm:$0xff] }
 0x893   : > { %11455 = vst.msk [vmem:[#allocation3 + $0x28] sm:$0xf] %vm11348_vm11, %v19881_v21  ;;  %11456 = vst.msk [vmem:[#allocation3 + $0x2c] sm:$0xf] %vm11348_vm11, %v19882_v26  ;;  %v19884_v30 = vld [vmem:[#allocation117_spill] sm:$0xff]  ;;  %v19885_v54 = vld [vmem:[#allocation118_spill] sm:$0xff] }
 0x894   : > { %11457 = vst.msk [vmem:[#allocation3 + $0x30] sm:$0xf] %vm11348_vm11, %v19883_v45  ;;  %11458 = vst.msk [vmem:[#allocation3 + $0x34] sm:$0xf] %vm11348_vm11, %v19884_v30  ;;  %v19886_v52 = vld [vmem:[#allocation119_spill] sm:$0xff]  ;;  %v19887_v57 = vld [vmem:[#allocation120_spill] sm:$0xff] }
 0x895   : > { %11459 = vst.msk [vmem:[#allocation3 + $0x38] sm:$0xf] %vm11348_vm11, %v19885_v54  ;;  %11460 = vst.msk [vmem:[#allocation3 + $0x3c] sm:$0xf] %vm11348_vm11, %v19886_v52  ;;  %v19888_v28 = vld [vmem:[#allocation121_spill] sm:$0xff]  ;;  %v19889_v1 = vld [vmem:[#allocation122_spill] sm:$0xff] }
 0x896   : > { %11461 = vst.msk [vmem:[#allocation3 + $0x40] sm:$0xf] %vm11348_vm11, %v19887_v57  ;;  %11462 = vst.msk [vmem:[#allocation3 + $0x44] sm:$0xf] %vm11348_vm11, %v19888_v28  ;;  %v19890_v20 = vld [vmem:[#allocation123_spill] sm:$0xff]  ;;  %v19891_v4 = vld [vmem:[#allocation124_spill] sm:$0xff] }
 0x897   : > { %11463 = vst.msk [vmem:[#allocation3 + $0x48] sm:$0xf] %vm11348_vm11, %v19889_v1  ;;  %11464 = vst.msk [vmem:[#allocation3 + $0x4c] sm:$0xf] %vm11348_vm11, %v19890_v20  ;;  %v19892_v59 = vld [vmem:[#allocation125_spill] sm:$0xff]  ;;  %v19893_v62 = vld [vmem:[#allocation126_spill] sm:$0xff] }
 0x898   : > { %11465 = vst.msk [vmem:[#allocation3 + $0x50] sm:$0xf] %vm11348_vm11, %v19891_v4  ;;  %11466 = vst.msk [vmem:[#allocation3 + $0x54] sm:$0xf] %vm11348_vm11, %v19892_v59  ;;  %v19894_v11 = vld [vmem:[#allocation127_spill] sm:$0xff]  ;;  %v19895_v48 = vld [vmem:[#allocation128_spill] sm:$0xff] }
 0x899   : > { %11467 = vst.msk [vmem:[#allocation3 + $0x58] sm:$0xf] %vm11348_vm11, %v19893_v62  ;;  %11468 = vst.msk [vmem:[#allocation3 + $0x5c] sm:$0xf] %vm11348_vm11, %v19894_v11  ;;  %v19896_v14 = vld [vmem:[#allocation129_spill] sm:$0xff]  ;;  %v19897_v32 = vld [vmem:[#allocation130_spill] sm:$0xff] }
 0x89a   : > { %11469 = vst.msk [vmem:[#allocation3 + $0x60] sm:$0xf] %vm11348_vm11, %v19895_v48  ;;  %11470 = vst.msk [vmem:[#allocation3 + $0x64] sm:$0xf] %vm11348_vm11, %v19896_v14  ;;  %v19898_v19 = vld [vmem:[#allocation131_spill] sm:$0xff]  ;;  %v19899_v8 = vld [vmem:[#allocation132_spill] sm:$0xff] }
 0x89b   : > { %11471 = vst.msk [vmem:[#allocation3 + $0x68] sm:$0xf] %vm11348_vm11, %v19897_v32  ;;  %11472 = vst.msk [vmem:[#allocation3 + $0x6c] sm:$0xf] %vm11348_vm11, %v19898_v19  ;;  %v19900_v16 = vld [vmem:[#allocation133_spill] sm:$0xff]  ;;  %v19901_v53 = vld [vmem:[#allocation134_spill] sm:$0xff] }
 0x89c   : > { %11473 = vst.msk [vmem:[#allocation3 + $0x70] sm:$0xf] %vm11348_vm11, %v19899_v8  ;;  %11474 = vst.msk [vmem:[#allocation3 + $0x74] sm:$0xf] %vm11348_vm11, %v19900_v16  ;;  %v19902_v17 = vld [vmem:[#allocation135_spill] sm:$0xff] }
 0x89d   : > { %11475 = vst.msk [vmem:[#allocation3 + $0x78] sm:$0xf] %vm11348_vm11, %v19901_v53  ;;  %11476 = vst.msk [vmem:[#allocation3 + $0x7c] sm:$0xf] %vm11348_vm11, %v19902_v17 }
 0x89e PF: > { %s13_s16 = sadd.s32 1, %s13671_s16   ;;  %s19903_s12 = smov %s13663_s14 }
 0x89f   : > { %p10_p9 = scmp.ge.s32.totalorder %s13_s16, 6   ;;  %s19904_s13 = smov %s13667_s15 }
 0x8a0   : > { %s19905_s14 = smov %s19908_s17  ;;  %s19906_s15 = smov %s19912_s18 }
 0x8a1   :  { %12 = sbr.rel (!%p10_p9) target bundleno = 3 (0x3), region = 72 }

</bundles_post_ra>
